<compile_context>
chip_gen: v5e
topology: v5e:2x2
jax: 0.10.0
libtpu: 0.0.40
codegen_flags: <defaults>
</compile_context>

<pallas_src>
import functools
import math

import jax
import jax.numpy as jnp
from jax import lax
from jax.experimental import pallas as pl
from jax.experimental.pallas import tpu as pltpu

LN_EPS = 1e-5


# --------------------------------------------------------------------------------------
# small helpers
# --------------------------------------------------------------------------------------
def _round_up(n, m):
    return (n + m - 1) // m * m


def _pad_axis(a, axis, new):
    pad = new - a.shape[axis]
    if pad <= 0:
        return a
    widths = [(0, 0)] * a.ndim
    widths[axis] = (0, pad)
    return jnp.pad(a, widths)


def _pad_last(a, new):
    return _pad_axis(a, a.ndim - 1, new)


def _vmem_limit_bytes():
    """Generation-aware scoped-VMEM limit (v5e/v6e: 128 MiB physical, v7x: 64 MiB per TC)."""
    cap = None
    try:
        cap = getattr(pltpu.get_tpu_info(), "vmem_capacity_bytes", None)
    except Exception:
        cap = None
    if cap is None:
        cap = 64 * 1024 * 1024
    if cap >= 96 * 1024 * 1024:           # v5e / v6e
        return 96 * 1024 * 1024
    return min(40 * 1024 * 1024, (cap * 5) // 8)   # v7x-sized parts


def _gelu_tanh(x):
    # tanh-approximate GELU: moves the transcendental to the otherwise-idle EUP slot instead
    # of the erf polynomial's ~12 VALU ops + exp; |err| vs exact erf-GELU ~1e-3 absolute.
    c = math.sqrt(2.0 / math.pi)
    return 0.5 * x * (1.0 + jnp.tanh(c * (x + 0.044715 * (x * x * x))))


def _layer_norm_padded(x, gamma, beta, c_real):
    # The lane-padding columns of x are exactly zero, so sums over the padded width equal
    # sums over the real width; normalize with the real channel count.  gamma/beta are
    # zero-padded, so padded lanes of the output are exactly zero.
    inv_c = 1.0 / float(c_real)
    s1 = jnp.sum(x, axis=-1, keepdims=True)
    s2 = jnp.sum(x * x, axis=-1, keepdims=True)
    mu = s1 * inv_c
    var = s2 * inv_c - mu * mu
    return (x - mu) * lax.rsqrt(var + LN_EPS) * gamma + beta


# --------------------------------------------------------------------------------------
# fused transformer-stack kernel
# --------------------------------------------------------------------------------------
def _transformer_stack_kernel(x_ref, g1_ref, b1_ref, wq_ref, wk_ref, wv_ref, wo_ref, bo_ref,
                              g2_ref, b2_ref, w1_ref, bf1_ref, w2_ref, bf2_ref,
                              o_ref, xs_ref, *, heads, dim_head, tokens, c_real, token_only):
    """One (row-tile, layer) grid step of a pre-norm ViT block stack.

    x_ref / xs_ref are channels-last 2-D (tn*tokens, C_pad) slabs.  The layer grid axis is
    the inner 'arbitrary' axis; the activation is carried across it in the VMEM scratch, so
    the whole stack costs a single HBM round trip of the activations."""
    M, Cp = x_ref.shape
    T = tokens
    tn = M // T
    layer = pl.program_id(1)

    @pl.when(layer == 0)
    def _():
        xs_ref[...] = x_ref[...].astype(jnp.float32)

    x = xs_ref[...]                                       # (M, Cp) f32 residual stream

    # ---- pre-norm multi-head self-attention ----
    xn = _layer_norm_padded(x, g1_ref[...], b1_ref[...], c_real)
    xn_b = xn.astype(jnp.bfloat16)
    # three big 2-D matmuls sharing the bf16 LHS; wq already carries the 1/sqrt(dim_head) scale
    q2 = jnp.dot(xn_b, wq_ref[...], preferred_element_type=jnp.float32)   # (M, inner)
    k2 = jnp.dot(xn_b, wk_ref[...], preferred_element_type=jnp.float32)
    v2 = jnp.dot(xn_b, wv_ref[...], preferred_element_type=jnp.float32)
    wo = wo_ref[...]                                       # (inner, Cp) bf16

    # Per-head attention (static loop, no cross-batch concats): only the (M, dim_head) lane
    # slice per head moves data; scores/probs are held one head at a time, which also keeps
    # the softmax working set at (tn, T, T) instead of (heads*tn, T, T).
    # TODO(synk): KV-block-tiled (flash) softmax for very large T (long-range stage at real
    # H*W) — the per-head (tn, T, T) score tile still scales quadratically with T.
    proj = jnp.zeros((M, Cp), jnp.float32)
    for h in range(heads):
        sl = slice(h * dim_head, (h + 1) * dim_head)
        qh = q2[:, sl].reshape(tn, T, dim_head).astype(jnp.bfloat16)
        kh = k2[:, sl].reshape(tn, T, dim_head).astype(jnp.bfloat16)
        vh = v2[:, sl].reshape(tn, T, dim_head).astype(jnp.bfloat16)
        s = jnp.einsum('bqd,bkd->bqk', qh, kh, preferred_element_type=jnp.float32)
        s = s - jnp.max(s, axis=-1, keepdims=True)
        p = jnp.exp(s)
        p = p * pl.reciprocal(jnp.sum(p, axis=-1, keepdims=True), approx=True)
        ctx = jnp.einsum('bqk,bkd->bqd', p.astype(jnp.bfloat16), vh,
                         preferred_element_type=jnp.float32)              # (tn, T, d)
        # this head's rows of the output projection (row slice of wo is sublane-aligned)
        proj = proj + jnp.dot(ctx.reshape(M, dim_head).astype(jnp.bfloat16), wo[sl, :],
                              preferred_element_type=jnp.float32)
    xr = x + proj + bo_ref[...]

    # ---- pre-norm MLP: Linear -> GELU(tanh) -> Linear ----
    xn2 = _layer_norm_padded(xr, g2_ref[...], b2_ref[...], c_real)
    h1 = jnp.dot(xn2.astype(jnp.bfloat16), w1_ref[...],
                 preferred_element_type=jnp.float32) + bf1_ref[...]
    h1 = _gelu_tanh(h1)
    h2 = jnp.dot(h1.astype(jnp.bfloat16), w2_ref[...],
                 preferred_element_type=jnp.float32) + bf2_ref[...]
    x_new = xr + h2

    xs_ref[...] = x_new

    @pl.when(layer == pl.num_programs(1) - 1)
    def _():
        if token_only:
            # downstream only consumes the forensics-token row -> dense (tn, Cp) output
            o_ref[...] = x_new.reshape(tn, T, Cp)[:, 0, :].astype(o_ref.dtype)
        else:
            o_ref[...] = x_new.astype(o_ref.dtype)


# --------------------------------------------------------------------------------------
# tiling / VMEM budgeting
# --------------------------------------------------------------------------------------
def _per_row_bytes(T, c_pad, heads, dim_head, mlp_pad):
    inner = heads * dim_head
    f32, bf16 = 4, 2
    return (
        2 * T * c_pad * f32                       # double-buffered input block
        + 2 * T * c_pad * f32                     # double-buffered output block (worst case)
        + T * c_pad * f32                         # resident activation scratch
        + 2 * T * c_pad * (f32 + bf16)            # LN outputs + bf16 copies
        + 3 * T * inner * (f32 + bf16)            # q / k / v (+ per-head bf16 slices)
        + 4 * T * T * f32                         # per-head scores + probs (couple live)
        + T * inner * f32                         # attention context
        + 2 * T * mlp_pad * f32 + T * mlp_pad * bf16   # MLP hidden / GELU / bf16 copy
        + 4 * T * c_pad * f32                     # proj accumulator, residuals, MLP out
    )


def _weight_block_bytes(c_pad, heads, dim_head, mlp_pad):
    inner = heads * dim_head
    return ((3 * c_pad * inner + inner * c_pad + 2 * c_pad * mlp_pad) * 2   # bf16 matmul weights
            + (6 * c_pad + mlp_pad) * 4)                                    # f32 LN params / biases


def _choose_row_tile(N, T, c_pad, heads, dim_head, mlp_pad, vmem_limit):
    per_row = _per_row_bytes(T, c_pad, heads, dim_head, mlp_pad)
    # weights are double-buffered across the layer grid axis; keep ~half the limit as
    # compiler headroom / spill slack
    avail = vmem_limit // 2 - 2 * _weight_block_bytes(c_pad, heads, dim_head, mlp_pad)
    avail = max(avail, 8 * per_row)
    tn = max(8, min(512, (avail // per_row) // 8 * 8))
    if tn >= N:
        return _round_up(N, 8)
    steps = -(-N // tn)
    if steps > 1 and steps % 2:
        steps += 1                                 # even step count keeps both v7x TCs busy
    return max(8, _round_up(-(-N // steps), 8))


# --------------------------------------------------------------------------------------
# stage wrapper: one pallas_call for a whole stack of transformer blocks
# --------------------------------------------------------------------------------------
def transformer_stack(x, params_list, *, heads, dim_head, c_real, token_only=False):
    """Apply a stack of pre-norm transformer blocks to x of shape (N, T, C_pad).

    Returns (N, C_pad) of the forensics token when token_only, else (N, T, C_pad)."""
    n_layers = len(params_list)
    assert n_layers >= 1
    N, T, c_pad = x.shape
    mlp_pad = params_list[0]["w1"].shape[-1]

    vmem_limit = _vmem_limit_bytes()
    tn = _choose_row_tile(N, T, c_pad, heads, dim_head, mlp_pad, vmem_limit)
    n_pad = _round_up(N, tn)
    steps = n_pad // tn
    if steps > 1 and steps % 2:                    # even parallel axis for v7x megacore
        n_pad += tn
        steps += 1
    if n_pad != N:
        # zero rows stay finite through LN / softmax and are sliced off below
        x = jnp.concatenate([x, jnp.zeros((n_pad - N, T, c_pad), x.dtype)], axis=0)

    names = ("g1", "b1", "wq", "wk", "wv", "wo", "bo", "g2", "b2", "w1", "bf1", "w2", "bf2")
    weights = [jnp.stack([p[n] for p in params_list], axis=0) for n in names]

    x2 = x.reshape(n_pad * T, c_pad)               # lane/sublane-dense 2-D slab

    in_specs = [pl.BlockSpec((tn * T, c_pad), lambda i, l: (i, 0))]
    for w in weights:
        r, c = w.shape[1], w.shape[2]
        in_specs.append(pl.BlockSpec((None, r, c), lambda i, l: (l, 0, 0)))

    if token_only:
        out_shape = jax.ShapeDtypeStruct((n_pad, c_pad), x.dtype)
        out_spec = pl.BlockSpec((tn, c_pad), lambda i, l: (i, 0))
    else:
        out_shape = jax.ShapeDtypeStruct((n_pad * T, c_pad), x.dtype)
        out_spec = pl.BlockSpec((tn * T, c_pad), lambda i, l: (i, 0))

    kernel = functools.partial(_transformer_stack_kernel, heads=heads, dim_head=dim_head,
                               tokens=T, c_real=c_real, token_only=token_only)
    out = pl.pallas_call(
        kernel,
        out_shape=out_shape,
        grid=(n_pad // tn, n_layers),
        in_specs=in_specs,
        out_specs=out_spec,
        scratch_shapes=[pltpu.VMEM((tn * T, c_pad), jnp.float32)],
        compiler_params=pltpu.CompilerParams(
            dimension_semantics=("parallel", "arbitrary"),
            vmem_limit_bytes=vmem_limit),
    )(x2, *weights)

    if token_only:
        return out[:N]
    return out.reshape(n_pad, T, c_pad)[:N]


# --------------------------------------------------------------------------------------
# parameters (synthetic init mirroring the PyTorch layer shapes, pre-padded / pre-cast)
# --------------------------------------------------------------------------------------
def init_block_params(key, dim, heads, dim_head, mlp_dim, c_pad, mlp_pad):
    """Per-block parameters: gamma/beta zero-padded (LN output exactly zero in padded lanes),
    matmul weights zero-padded on in/out features and cast to bf16, attention scale folded
    into wq host-side."""
    inner = heads * dim_head
    ks = jax.random.split(key, 7)

    def lin(k, fan_in, shape):
        bound = 1.0 / math.sqrt(fan_in)
        return jax.random.uniform(k, shape, jnp.float32, -bound, bound)

    wqkv = lin(ks[0], dim, (dim, 3 * inner))                  # to_qkv (bias=False)
    wq = wqkv[:, 0 * inner:1 * inner] * (dim_head ** -0.5)    # fold 1/sqrt(d) into wq
    wk = wqkv[:, 1 * inner:2 * inner]
    wv = wqkv[:, 2 * inner:3 * inner]
    wo = lin(ks[1], inner, (inner, dim))
    bo = lin(ks[2], inner, (1, dim))
    w1 = lin(ks[3], dim, (dim, mlp_dim))
    bf1 = lin(ks[4], dim, (1, mlp_dim))
    w2 = lin(ks[5], mlp_dim, (mlp_dim, dim))
    bf2 = lin(ks[6], mlp_dim, (1, dim))

    return dict(
        g1=_pad_last(jnp.ones((1, dim), jnp.float32), c_pad),
        b1=_pad_last(jnp.zeros((1, dim), jnp.float32), c_pad),
        wq=_pad_axis(wq, 0, c_pad).astype(jnp.bfloat16),
        wk=_pad_axis(wk, 0, c_pad).astype(jnp.bfloat16),
        wv=_pad_axis(wv, 0, c_pad).astype(jnp.bfloat16),
        wo=_pad_last(wo, c_pad).astype(jnp.bfloat16),
        bo=_pad_last(bo, c_pad),
        g2=_pad_last(jnp.ones((1, dim), jnp.float32), c_pad),
        b2=_pad_last(jnp.zeros((1, dim), jnp.float32), c_pad),
        w1=_pad_last(_pad_axis(w1, 0, c_pad), mlp_pad).astype(jnp.bfloat16),
        bf1=_pad_last(bf1, mlp_pad),
        w2=_pad_last(_pad_axis(w2, 0, mlp_pad), c_pad).astype(jnp.bfloat16),
        bf2=_pad_last(bf2, c_pad),
    )


# --------------------------------------------------------------------------------------
# module forward
# --------------------------------------------------------------------------------------
def positional_wise_fusion_forward(x, forensics_token, pos_params, long_params,
                                   *, heads, dim_head):
    """x: (B, S, L, C) with L = H*W; forensics_token: (1, 1, 1, C).  Returns (B, L, C).

    Default forward path (return_similarities=False)."""
    B, S, L, C = x.shape
    c_pad = _round_up(C, 128)
    x = _pad_last(x.astype(jnp.float32), c_pad)

    if len(pos_params) > 0:
        tok = jnp.broadcast_to(_pad_last(forensics_token.astype(jnp.float32), c_pad),
                               (B, 1, L, c_pad))
        x = jnp.concatenate([tok, x], axis=1)                    # (B, S+1, L, c_pad)
        # einops 'b s l c -> (b l) s c'
        x = jnp.transpose(x, (0, 2, 1, 3)).reshape(B * L, S + 1, c_pad)
        # all positional-fusion layers fused into one pallas_call; only the forensics-token
        # row of the final layer is written back
        x = transformer_stack(x, pos_params, heads=heads, dim_head=dim_head,
                              c_real=C, token_only=True)         # (B*L, c_pad)
        x = x.reshape(B, L, c_pad)                               # '(b l) c -> b l c'
    else:
        x = jnp.mean(x, axis=1)

    # TODO(synk): return_similarities=True (cosine / attention-map) branch is not part of
    # the default forward and is not implemented here.

    if len(long_params) > 0:
        x = transformer_stack(x, long_params, heads=heads, dim_head=dim_head,
                              c_real=C, token_only=False)        # (B, L, c_pad)
    return x[..., :C]


if __name__ == "__main__":
    # Small shapes consistent with the module's forward.
    B, S, H, W = 2, 4, 4, 4
    L = H * W
    dim, heads, dim_head, mlp_dim = 32, 2, 16, 64
    pos_layers, long_layers = 2, 1

    c_pad = _round_up(dim, 128)
    mlp_pad = _round_up(mlp_dim, 128)

    root = jax.random.PRNGKey(0)
    k_x, k_tok, k_p = jax.random.split(root, 3)

    x = jax.random.normal(k_x, (B, S, L, dim), jnp.float32)
    # nn.Parameter (1,1,1,dim) initialized with trunc_normal_(std=0.02)
    forensics_token = (jax.random.truncated_normal(
        k_tok, -2.0, 2.0, (1, 1, 1, dim), jnp.float32) * 0.02)

    block_keys = jax.random.split(k_p, pos_layers + long_layers)
    pos_params = [init_block_params(block_keys[i], dim, heads, dim_head, mlp_dim,
                                    c_pad, mlp_pad) for i in range(pos_layers)]
    long_params = [init_block_params(block_keys[pos_layers + i], dim, heads, dim_head,
                                     mlp_dim, c_pad, mlp_pad) for i in range(long_layers)]

    out = positional_wise_fusion_forward(x, forensics_token, pos_params, long_params,
                                         heads=heads, dim_head=dim_head)
    out = jax.block_until_ready(out)
    assert out.shape == (B, L, dim), out.shape
    assert bool(jnp.all(jnp.isfinite(out)))
    print("KERNEL_OK")
</pallas_src>

<mosaic_0001>
module attributes {stable_mosaic.version = 11 : i64} {
  func.func @_transformer_stack_kernel(%arg0: i32, %arg1: i32, %arg2: memref<160x128xf32, #tpu.memory_space<vmem>>, %arg3: memref<1x1x128xf32, #tpu.memory_space<vmem>>, %arg4: memref<1x1x128xf32, #tpu.memory_space<vmem>>, %arg5: memref<1x128x32xbf16, #tpu.memory_space<vmem>>, %arg6: memref<1x128x32xbf16, #tpu.memory_space<vmem>>, %arg7: memref<1x128x32xbf16, #tpu.memory_space<vmem>>, %arg8: memref<1x32x128xbf16, #tpu.memory_space<vmem>>, %arg9: memref<1x1x128xf32, #tpu.memory_space<vmem>>, %arg10: memref<1x1x128xf32, #tpu.memory_space<vmem>>, %arg11: memref<1x1x128xf32, #tpu.memory_space<vmem>>, %arg12: memref<1x128x128xbf16, #tpu.memory_space<vmem>>, %arg13: memref<1x1x128xf32, #tpu.memory_space<vmem>>, %arg14: memref<1x128x128xbf16, #tpu.memory_space<vmem>>, %arg15: memref<1x1x128xf32, #tpu.memory_space<vmem>>, %arg16: memref<32x128xf32, #tpu.memory_space<vmem>>, %arg17: memref<160x128xf32, #tpu.memory_space<vmem>>) attributes {dimension_semantics = [#tpu.dimension_semantics<parallel>, #tpu.dimension_semantics<arbitrary>], iteration_bounds = array<i64: 1, 2>, scalar_prefetch = 0 : i64, scratch_operands = 1 : i64, tpu.core_type = #tpu.core_type<tc>, window_params = [{transform_indices = @transform_0, window_bounds = array<i64: 160, 128>}, {transform_indices = @transform_1, window_bounds = array<i64: 1, 1, 128>}, {transform_indices = @transform_2, window_bounds = array<i64: 1, 1, 128>}, {transform_indices = @transform_3, window_bounds = array<i64: 1, 128, 32>}, {transform_indices = @transform_4, window_bounds = array<i64: 1, 128, 32>}, {transform_indices = @transform_5, window_bounds = array<i64: 1, 128, 32>}, {transform_indices = @transform_6, window_bounds = array<i64: 1, 32, 128>}, {transform_indices = @transform_7, window_bounds = array<i64: 1, 1, 128>}, {transform_indices = @transform_8, window_bounds = array<i64: 1, 1, 128>}, {transform_indices = @transform_9, window_bounds = array<i64: 1, 1, 128>}, {transform_indices = @transform_10, window_bounds = array<i64: 1, 128, 128>}, {transform_indices = @transform_11, window_bounds = array<i64: 1, 1, 128>}, {transform_indices = @transform_12, window_bounds = array<i64: 1, 128, 128>}, {transform_indices = @transform_13, window_bounds = array<i64: 1, 1, 128>}, {transform_indices = @transform_14, window_bounds = array<i64: 32, 128>}]} {
    %c0_i32 = arith.constant 0 : i32
    %0 = arith.cmpi eq, %arg1, %c0_i32 : i32
    %1 = arith.extui %0 : i1 to i32
    %c0_i32_0 = arith.constant 0 : i32
    %2 = arith.cmpi ne, %1, %c0_i32_0 : i32
    scf.if %2 {
      %c0_73 = arith.constant 0 : index
      %c0_74 = arith.constant 0 : index
      %162 = vector.load %arg2[%c0_73, %c0_74] : memref<160x128xf32, #tpu.memory_space<vmem>>, vector<160x128xf32>
      %c0_75 = arith.constant 0 : index
      %c0_76 = arith.constant 0 : index
      %163 = vector.load %arg17[%c0_75, %c0_76] : memref<160x128xf32, #tpu.memory_space<vmem>>, vector<160x128xf32>
      tpu.vector_store %arg17[%c0_75, %c0_76], %162 {strides = array<i32>} : memref<160x128xf32, #tpu.memory_space<vmem>>, vector<160x128xf32>,
    } else {
    }
    %c0 = arith.constant 0 : index
    %c0_1 = arith.constant 0 : index
    %3 = vector.load %arg17[%c0, %c0_1] : memref<160x128xf32, #tpu.memory_space<vmem>>, vector<160x128xf32>
    %c0_2 = arith.constant 0 : index
    %c0_3 = arith.constant 0 : index
    %c0_4 = arith.constant 0 : index
    %4 = vector.load %arg3[%c0_2, %c0_3, %c0_4] : memref<1x1x128xf32, #tpu.memory_space<vmem>>, vector<1x1x128xf32>
    %5 = vector.shape_cast %4 : vector<1x1x128xf32> to vector<1x128xf32>
    %c0_5 = arith.constant 0 : index
    %c0_6 = arith.constant 0 : index
    %c0_7 = arith.constant 0 : index
    %6 = vector.load %arg4[%c0_5, %c0_6, %c0_7] : memref<1x1x128xf32, #tpu.memory_space<vmem>>, vector<1x1x128xf32>
    %7 = vector.shape_cast %6 : vector<1x1x128xf32> to vector<1x128xf32>
    %cst = arith.constant dense<0.000000e+00> : vector<160xf32>
    %8 = vector.multi_reduction <add>, %3, %cst [1] : vector<160x128xf32> to vector<160xf32>
    %9 = vector.shape_cast %8 : vector<160xf32> to vector<160x1xf32>
    %10 = arith.mulf %3, %3 : vector<160x128xf32>
    %cst_8 = arith.constant dense<0.000000e+00> : vector<160xf32>
    %11 = vector.multi_reduction <add>, %10, %cst_8 [1] : vector<160x128xf32> to vector<160xf32>
    %12 = vector.shape_cast %11 : vector<160xf32> to vector<160x1xf32>
    %cst_9 = arith.constant 3.125000e-02 : f32
    %13 = vector.broadcast %cst_9 : f32 to vector<160x1xf32>
    %14 = arith.mulf %9, %13 : vector<160x1xf32>
    %cst_10 = arith.constant 3.125000e-02 : f32
    %15 = vector.broadcast %cst_10 : f32 to vector<160x1xf32>
    %16 = arith.mulf %12, %15 : vector<160x1xf32>
    %17 = arith.mulf %14, %14 : vector<160x1xf32>
    %18 = arith.subf %16, %17 : vector<160x1xf32>
    %19 = vector.broadcast %14 : vector<160x1xf32> to vector<160x128xf32>
    %20 = arith.subf %3, %19 : vector<160x128xf32>
    %cst_11 = arith.constant 9.99999974E-6 : f32
    %21 = vector.broadcast %cst_11 : f32 to vector<160x1xf32>
    %22 = arith.addf %18, %21 : vector<160x1xf32>
    %23 = math.rsqrt %22 : vector<160x1xf32>
    %24 = vector.broadcast %23 : vector<160x1xf32> to vector<160x128xf32>
    %25 = arith.mulf %20, %24 : vector<160x128xf32>
    %26 = vector.broadcast %5 : vector<1x128xf32> to vector<160x128xf32>
    %27 = arith.mulf %25, %26 : vector<160x128xf32>
    %28 = vector.broadcast %7 : vector<1x128xf32> to vector<160x128xf32>
    %29 = arith.addf %27, %28 : vector<160x128xf32>
    %30 = arith.truncf %29 : vector<160x128xf32> to vector<160x128xbf16>
    %c0_12 = arith.constant 0 : index
    %c0_13 = arith.constant 0 : index
    %c0_14 = arith.constant 0 : index
    %31 = vector.load %arg5[%c0_12, %c0_13, %c0_14] : memref<1x128x32xbf16, #tpu.memory_space<vmem>>, vector<1x128x32xbf16>
    %32 = vector.shape_cast %31 : vector<1x128x32xbf16> to vector<128x32xbf16>
    %cst_15 = arith.constant dense<0.000000e+00> : vector<160x32xf32>
    %33 = tpu.matmul %30, %32, %cst_15 {dimension_numbers = #tpu.dot_dimension_numbers<[1], [0], [0], [1], [0, 0, 1, 1], [], []>} : vector<160x128xbf16>, vector<128x32xbf16>, vector<160x32xf32> -> vector<160x32xf32>
    %c0_16 = arith.constant 0 : index
    %c0_17 = arith.constant 0 : index
    %c0_18 = arith.constant 0 : index
    %34 = vector.load %arg6[%c0_16, %c0_17, %c0_18] : memref<1x128x32xbf16, #tpu.memory_space<vmem>>, vector<1x128x32xbf16>
    %35 = vector.shape_cast %34 : vector<1x128x32xbf16> to vector<128x32xbf16>
    %cst_19 = arith.constant dense<0.000000e+00> : vector<160x32xf32>
    %36 = tpu.matmul %30, %35, %cst_19 {dimension_numbers = #tpu.dot_dimension_numbers<[1], [0], [0], [1], [0, 0, 1, 1], [], []>} : vector<160x128xbf16>, vector<128x32xbf16>, vector<160x32xf32> -> vector<160x32xf32>
    %c0_20 = arith.constant 0 : index
    %c0_21 = arith.constant 0 : index
    %c0_22 = arith.constant 0 : index
    %37 = vector.load %arg7[%c0_20, %c0_21, %c0_22] : memref<1x128x32xbf16, #tpu.memory_space<vmem>>, vector<1x128x32xbf16>
    %38 = vector.shape_cast %37 : vector<1x128x32xbf16> to vector<128x32xbf16>
    %cst_23 = arith.constant dense<0.000000e+00> : vector<160x32xf32>
    %39 = tpu.matmul %30, %38, %cst_23 {dimension_numbers = #tpu.dot_dimension_numbers<[1], [0], [0], [1], [0, 0, 1, 1], [], []>} : vector<160x128xbf16>, vector<128x32xbf16>, vector<160x32xf32> -> vector<160x32xf32>
    %c0_24 = arith.constant 0 : index
    %c0_25 = arith.constant 0 : index
    %c0_26 = arith.constant 0 : index
    %40 = vector.load %arg8[%c0_24, %c0_25, %c0_26] : memref<1x32x128xbf16, #tpu.memory_space<vmem>>, vector<1x32x128xbf16>
    %41 = vector.shape_cast %40 : vector<1x32x128xbf16> to vector<32x128xbf16>
    %cst_27 = arith.constant 0.000000e+00 : f32
    %42 = vector.broadcast %cst_27 : f32 to vector<160x128xf32>
    %43 = vector.extract_strided_slice %33 {offsets = [0, 0], sizes = [160, 16], strides = [1, 1]} : vector<160x32xf32> to vector<160x16xf32>
    %44 = vector.shape_cast %43 : vector<160x16xf32> to vector<32x5x16xf32>
    %45 = arith.truncf %44 : vector<32x5x16xf32> to vector<32x5x16xbf16>
    %46 = vector.extract_strided_slice %36 {offsets = [0, 0], sizes = [160, 16], strides = [1, 1]} : vector<160x32xf32> to vector<160x16xf32>
    %47 = vector.shape_cast %46 : vector<160x16xf32> to vector<32x5x16xf32>
    %48 = arith.truncf %47 : vector<32x5x16xf32> to vector<32x5x16xbf16>
    %49 = vector.extract_strided_slice %39 {offsets = [0, 0], sizes = [160, 16], strides = [1, 1]} : vector<160x32xf32> to vector<160x16xf32>
    %50 = vector.shape_cast %49 : vector<160x16xf32> to vector<32x5x16xf32>
    %51 = arith.truncf %50 : vector<32x5x16xf32> to vector<32x5x16xbf16>
    "tpu.trace_start"() <{level = 10 : i32, message = "bqd,bkd->bqk"}> : () -> ()
    %cst_28 = arith.constant dense<0.000000e+00> : vector<32x5x5xf32>
    %52 = tpu.matmul %45, %48, %cst_28 {dimension_numbers = #tpu.dot_dimension_numbers<[2], [2], [1], [1], [0, 0, 0, 1, 1, 1], [0], [0]>} : vector<32x5x16xbf16>, vector<32x5x16xbf16>, vector<32x5x5xf32> -> vector<32x5x5xf32>
    "tpu.trace_stop"() : () -> ()
    %cst_29 = arith.constant dense<0xFF800000> : vector<32x5xf32>
    %53 = vector.multi_reduction <maximumf>, %52, %cst_29 [2] : vector<32x5x5xf32> to vector<32x5xf32>
    %54 = vector.shape_cast %53 : vector<32x5xf32> to vector<32x5x1xf32>
    %55 = vector.broadcast %54 : vector<32x5x1xf32> to vector<32x5x5xf32>
    %56 = arith.subf %52, %55 : vector<32x5x5xf32>
    %57 = math.exp %56 : vector<32x5x5xf32>
    %cst_30 = arith.constant dense<0.000000e+00> : vector<32x5xf32>
    %58 = vector.multi_reduction <add>, %57, %cst_30 [2] : vector<32x5x5xf32> to vector<32x5xf32>
    %59 = vector.shape_cast %58 : vector<32x5xf32> to vector<32x5x1xf32>
    %60 = tpu.reciprocal %59 {approx = true} : vector<32x5x1xf32> -> vector<32x5x1xf32>
    %61 = vector.broadcast %60 : vector<32x5x1xf32> to vector<32x5x5xf32>
    %62 = arith.mulf %57, %61 : vector<32x5x5xf32>
    %63 = arith.truncf %62 : vector<32x5x5xf32> to vector<32x5x5xbf16>
    "tpu.trace_start"() <{level = 10 : i32, message = "bqk,bkd->bqd"}> : () -> ()
    %cst_31 = arith.constant dense<0.000000e+00> : vector<32x5x16xf32>
    %64 = tpu.matmul %63, %51, %cst_31 {dimension_numbers = #tpu.dot_dimension_numbers<[2], [1], [1], [2], [0, 0, 0, 1, 1, 2], [0], [0]>} : vector<32x5x5xbf16>, vector<32x5x16xbf16>, vector<32x5x16xf32> -> vector<32x5x16xf32>
    "tpu.trace_stop"() : () -> ()
    %65 = vector.shape_cast %64 : vector<32x5x16xf32> to vector<160x16xf32>
    %66 = arith.truncf %65 : vector<160x16xf32> to vector<160x16xbf16>
    %67 = vector.extract_strided_slice %41 {offsets = [0, 0], sizes = [16, 128], strides = [1, 1]} : vector<32x128xbf16> to vector<16x128xbf16>
    %cst_32 = arith.constant dense<0.000000e+00> : vector<160x128xf32>
    %68 = tpu.matmul %66, %67, %cst_32 {dimension_numbers = #tpu.dot_dimension_numbers<[1], [0], [0], [1], [0, 0, 1, 1], [], []>} : vector<160x16xbf16>, vector<16x128xbf16>, vector<160x128xf32> -> vector<160x128xf32>
    %69 = arith.addf %42, %68 : vector<160x128xf32>
    %70 = vector.extract_strided_slice %33 {offsets = [0, 16], sizes = [160, 16], strides = [1, 1]} : vector<160x32xf32> to vector<160x16xf32>
    %71 = vector.shape_cast %70 : vector<160x16xf32> to vector<32x5x16xf32>
    %72 = arith.truncf %71 : vector<32x5x16xf32> to vector<32x5x16xbf16>
    %73 = vector.extract_strided_slice %36 {offsets = [0, 16], sizes = [160, 16], strides = [1, 1]} : vector<160x32xf32> to vector<160x16xf32>
    %74 = vector.shape_cast %73 : vector<160x16xf32> to vector<32x5x16xf32>
    %75 = arith.truncf %74 : vector<32x5x16xf32> to vector<32x5x16xbf16>
    %76 = vector.extract_strided_slice %39 {offsets = [0, 16], sizes = [160, 16], strides = [1, 1]} : vector<160x32xf32> to vector<160x16xf32>
    %77 = vector.shape_cast %76 : vector<160x16xf32> to vector<32x5x16xf32>
    %78 = arith.truncf %77 : vector<32x5x16xf32> to vector<32x5x16xbf16>
    "tpu.trace_start"() <{level = 10 : i32, message = "bqd,bkd->bqk"}> : () -> ()
    %cst_33 = arith.constant dense<0.000000e+00> : vector<32x5x5xf32>
    %79 = tpu.matmul %72, %75, %cst_33 {dimension_numbers = #tpu.dot_dimension_numbers<[2], [2], [1], [1], [0, 0, 0, 1, 1, 1], [0], [0]>} : vector<32x5x16xbf16>, vector<32x5x16xbf16>, vector<32x5x5xf32> -> vector<32x5x5xf32>
    "tpu.trace_stop"() : () -> ()
    %cst_34 = arith.constant dense<0xFF800000> : vector<32x5xf32>
    %80 = vector.multi_reduction <maximumf>, %79, %cst_34 [2] : vector<32x5x5xf32> to vector<32x5xf32>
    %81 = vector.shape_cast %80 : vector<32x5xf32> to vector<32x5x1xf32>
    %82 = vector.broadcast %81 : vector<32x5x1xf32> to vector<32x5x5xf32>
    %83 = arith.subf %79, %82 : vector<32x5x5xf32>
    %84 = math.exp %83 : vector<32x5x5xf32>
    %cst_35 = arith.constant dense<0.000000e+00> : vector<32x5xf32>
    %85 = vector.multi_reduction <add>, %84, %cst_35 [2] : vector<32x5x5xf32> to vector<32x5xf32>
    %86 = vector.shape_cast %85 : vector<32x5xf32> to vector<32x5x1xf32>
    %87 = tpu.reciprocal %86 {approx = true} : vector<32x5x1xf32> -> vector<32x5x1xf32>
    %88 = vector.broadcast %87 : vector<32x5x1xf32> to vector<32x5x5xf32>
    %89 = arith.mulf %84, %88 : vector<32x5x5xf32>
    %90 = arith.truncf %89 : vector<32x5x5xf32> to vector<32x5x5xbf16>
    "tpu.trace_start"() <{level = 10 : i32, message = "bqk,bkd->bqd"}> : () -> ()
    %cst_36 = arith.constant dense<0.000000e+00> : vector<32x5x16xf32>
    %91 = tpu.matmul %90, %78, %cst_36 {dimension_numbers = #tpu.dot_dimension_numbers<[2], [1], [1], [2], [0, 0, 0, 1, 1, 2], [0], [0]>} : vector<32x5x5xbf16>, vector<32x5x16xbf16>, vector<32x5x16xf32> -> vector<32x5x16xf32>
    "tpu.trace_stop"() : () -> ()
    %92 = vector.shape_cast %91 : vector<32x5x16xf32> to vector<160x16xf32>
    %93 = arith.truncf %92 : vector<160x16xf32> to vector<160x16xbf16>
    %94 = vector.extract_strided_slice %41 {offsets = [16, 0], sizes = [16, 128], strides = [1, 1]} : vector<32x128xbf16> to vector<16x128xbf16>
    %cst_37 = arith.constant dense<0.000000e+00> : vector<160x128xf32>
    %95 = tpu.matmul %93, %94, %cst_37 {dimension_numbers = #tpu.dot_dimension_numbers<[1], [0], [0], [1], [0, 0, 1, 1], [], []>} : vector<160x16xbf16>, vector<16x128xbf16>, vector<160x128xf32> -> vector<160x128xf32>
    %96 = arith.addf %69, %95 : vector<160x128xf32>
    %97 = arith.addf %3, %96 : vector<160x128xf32>
    %c0_38 = arith.constant 0 : index
    %c0_39 = arith.constant 0 : index
    %c0_40 = arith.constant 0 : index
    %98 = vector.load %arg9[%c0_38, %c0_39, %c0_40] : memref<1x1x128xf32, #tpu.memory_space<vmem>>, vector<1x1x128xf32>
    %99 = vector.shape_cast %98 : vector<1x1x128xf32> to vector<1x128xf32>
    %100 = vector.broadcast %99 : vector<1x128xf32> to vector<160x128xf32>
    %101 = arith.addf %97, %100 : vector<160x128xf32>
    %c0_41 = arith.constant 0 : index
    %c0_42 = arith.constant 0 : index
    %c0_43 = arith.constant 0 : index
    %102 = vector.load %arg10[%c0_41, %c0_42, %c0_43] : memref<1x1x128xf32, #tpu.memory_space<vmem>>, vector<1x1x128xf32>
    %103 = vector.shape_cast %102 : vector<1x1x128xf32> to vector<1x128xf32>
    %c0_44 = arith.constant 0 : index
    %c0_45 = arith.constant 0 : index
    %c0_46 = arith.constant 0 : index
    %104 = vector.load %arg11[%c0_44, %c0_45, %c0_46] : memref<1x1x128xf32, #tpu.memory_space<vmem>>, vector<1x1x128xf32>
    %105 = vector.shape_cast %104 : vector<1x1x128xf32> to vector<1x128xf32>
    %cst_47 = arith.constant dense<0.000000e+00> : vector<160xf32>
    %106 = vector.multi_reduction <add>, %101, %cst_47 [1] : vector<160x128xf32> to vector<160xf32>
    %107 = vector.shape_cast %106 : vector<160xf32> to vector<160x1xf32>
    %108 = arith.mulf %101, %101 : vector<160x128xf32>
    %cst_48 = arith.constant dense<0.000000e+00> : vector<160xf32>
    %109 = vector.multi_reduction <add>, %108, %cst_48 [1] : vector<160x128xf32> to vector<160xf32>
    %110 = vector.shape_cast %109 : vector<160xf32> to vector<160x1xf32>
    %cst_49 = arith.constant 3.125000e-02 : f32
    %111 = vector.broadcast %cst_49 : f32 to vector<160x1xf32>
    %112 = arith.mulf %107, %111 : vector<160x1xf32>
    %cst_50 = arith.constant 3.125000e-02 : f32
    %113 = vector.broadcast %cst_50 : f32 to vector<160x1xf32>
    %114 = arith.mulf %110, %113 : vector<160x1xf32>
    %115 = arith.mulf %112, %112 : vector<160x1xf32>
    %116 = arith.subf %114, %115 : vector<160x1xf32>
    %117 = vector.broadcast %112 : vector<160x1xf32> to vector<160x128xf32>
    %118 = arith.subf %101, %117 : vector<160x128xf32>
    %cst_51 = arith.constant 9.99999974E-6 : f32
    %119 = vector.broadcast %cst_51 : f32 to vector<160x1xf32>
    %120 = arith.addf %116, %119 : vector<160x1xf32>
    %121 = math.rsqrt %120 : vector<160x1xf32>
    %122 = vector.broadcast %121 : vector<160x1xf32> to vector<160x128xf32>
    %123 = arith.mulf %118, %122 : vector<160x128xf32>
    %124 = vector.broadcast %103 : vector<1x128xf32> to vector<160x128xf32>
    %125 = arith.mulf %123, %124 : vector<160x128xf32>
    %126 = vector.broadcast %105 : vector<1x128xf32> to vector<160x128xf32>
    %127 = arith.addf %125, %126 : vector<160x128xf32>
    %128 = arith.truncf %127 : vector<160x128xf32> to vector<160x128xbf16>
    %c0_52 = arith.constant 0 : index
    %c0_53 = arith.constant 0 : index
    %c0_54 = arith.constant 0 : index
    %129 = vector.load %arg12[%c0_52, %c0_53, %c0_54] : memref<1x128x128xbf16, #tpu.memory_space<vmem>>, vector<1x128x128xbf16>
    %130 = vector.shape_cast %129 : vector<1x128x128xbf16> to vector<128x128xbf16>
    %cst_55 = arith.constant dense<0.000000e+00> : vector<160x128xf32>
    %131 = tpu.matmul %128, %130, %cst_55 {dimension_numbers = #tpu.dot_dimension_numbers<[1], [0], [0], [1], [0, 0, 1, 1], [], []>} : vector<160x128xbf16>, vector<128x128xbf16>, vector<160x128xf32> -> vector<160x128xf32>
    %c0_56 = arith.constant 0 : index
    %c0_57 = arith.constant 0 : index
    %c0_58 = arith.constant 0 : index
    %132 = vector.load %arg13[%c0_56, %c0_57, %c0_58] : memref<1x1x128xf32, #tpu.memory_space<vmem>>, vector<1x1x128xf32>
    %133 = vector.shape_cast %132 : vector<1x1x128xf32> to vector<1x128xf32>
    %134 = vector.broadcast %133 : vector<1x128xf32> to vector<160x128xf32>
    %135 = arith.addf %131, %134 : vector<160x128xf32>
    %cst_59 = arith.constant 5.000000e-01 : f32
    %136 = vector.broadcast %cst_59 : f32 to vector<160x128xf32>
    %137 = arith.mulf %136, %135 : vector<160x128xf32>
    %138 = arith.mulf %135, %135 : vector<160x128xf32>
    %139 = arith.mulf %138, %135 : vector<160x128xf32>
    %cst_60 = arith.constant 4.471500e-02 : f32
    %140 = vector.broadcast %cst_60 : f32 to vector<160x128xf32>
    %141 = arith.mulf %140, %139 : vector<160x128xf32>
    %142 = arith.addf %135, %141 : vector<160x128xf32>
    %cst_61 = arith.constant 0.797884583 : f32
    %143 = vector.broadcast %cst_61 : f32 to vector<160x128xf32>
    %144 = arith.mulf %143, %142 : vector<160x128xf32>
    %145 = math.tanh %144 : vector<160x128xf32>
    %cst_62 = arith.constant 1.000000e+00 : f32
    %146 = vector.broadcast %cst_62 : f32 to vector<160x128xf32>
    %147 = arith.addf %146, %145 : vector<160x128xf32>
    %148 = arith.mulf %137, %147 : vector<160x128xf32>
    %149 = arith.truncf %148 : vector<160x128xf32> to vector<160x128xbf16>
    %c0_63 = arith.constant 0 : index
    %c0_64 = arith.constant 0 : index
    %c0_65 = arith.constant 0 : index
    %150 = vector.load %arg14[%c0_63, %c0_64, %c0_65] : memref<1x128x128xbf16, #tpu.memory_space<vmem>>, vector<1x128x128xbf16>
    %151 = vector.shape_cast %150 : vector<1x128x128xbf16> to vector<128x128xbf16>
    %cst_66 = arith.constant dense<0.000000e+00> : vector<160x128xf32>
    %152 = tpu.matmul %149, %151, %cst_66 {dimension_numbers = #tpu.dot_dimension_numbers<[1], [0], [0], [1], [0, 0, 1, 1], [], []>} : vector<160x128xbf16>, vector<128x128xbf16>, vector<160x128xf32> -> vector<160x128xf32>
    %c0_67 = arith.constant 0 : index
    %c0_68 = arith.constant 0 : index
    %c0_69 = arith.constant 0 : index
    %153 = vector.load %arg15[%c0_67, %c0_68, %c0_69] : memref<1x1x128xf32, #tpu.memory_space<vmem>>, vector<1x1x128xf32>
    %154 = vector.shape_cast %153 : vector<1x1x128xf32> to vector<1x128xf32>
    %155 = vector.broadcast %154 : vector<1x128xf32> to vector<160x128xf32>
    %156 = arith.addf %152, %155 : vector<160x128xf32>
    %157 = arith.addf %101, %156 : vector<160x128xf32>
    %c0_70 = arith.constant 0 : index
    %c0_71 = arith.constant 0 : index
    %158 = vector.load %arg17[%c0_70, %c0_71] : memref<160x128xf32, #tpu.memory_space<vmem>>, vector<160x128xf32>
    tpu.vector_store %arg17[%c0_70, %c0_71], %157 {strides = array<i32>} : memref<160x128xf32, #tpu.memory_space<vmem>>, vector<160x128xf32>,
    %c1_i32 = arith.constant 1 : i32
    %159 = arith.cmpi eq, %arg1, %c1_i32 : i32
    %160 = arith.extui %159 : i1 to i32
    %c0_i32_72 = arith.constant 0 : i32
    %161 = arith.cmpi ne, %160, %c0_i32_72 : i32
    scf.if %161 {
      %162 = vector.shape_cast %157 : vector<160x128xf32> to vector<32x5x128xf32>
      %163 = vector.extract_strided_slice %162 {offsets = [0, 0, 0], sizes = [32, 1, 128], strides = [1, 1, 1]} : vector<32x5x128xf32> to vector<32x1x128xf32>
      %164 = vector.shape_cast %163 : vector<32x1x128xf32> to vector<32x128xf32>
      %c0_73 = arith.constant 0 : index
      %c0_74 = arith.constant 0 : index
      %165 = vector.load %arg16[%c0_73, %c0_74] : memref<32x128xf32, #tpu.memory_space<vmem>>, vector<32x128xf32>
      tpu.vector_store %arg16[%c0_73, %c0_74], %164 {strides = array<i32>} : memref<32x128xf32, #tpu.memory_space<vmem>>, vector<32x128xf32>,
    } else {
    }
    return
  }
  func.func @transform_0(%arg0: i32, %arg1: i32) -> (i32, i32) {
    %c0_i32 = arith.constant 0 : i32
    %c0_i32_0 = arith.constant 0 : i32
    return %arg0, %c0_i32 : i32, i32
  }
  func.func @transform_1(%arg0: i32, %arg1: i32) -> (i32, i32, i32) {
    %c0_i32 = arith.constant 0 : i32
    %c0_i32_0 = arith.constant 0 : i32
    %c0_i32_1 = arith.constant 0 : i32
    return %arg1, %c0_i32, %c0_i32_0 : i32, i32, i32
  }
  func.func @transform_2(%arg0: i32, %arg1: i32) -> (i32, i32, i32) {
    %c0_i32 = arith.constant 0 : i32
    %c0_i32_0 = arith.constant 0 : i32
    %c0_i32_1 = arith.constant 0 : i32
    return %arg1, %c0_i32, %c0_i32_0 : i32, i32, i32
  }
  func.func @transform_3(%arg0: i32, %arg1: i32) -> (i32, i32, i32) {
    %c0_i32 = arith.constant 0 : i32
    %c0_i32_0 = arith.constant 0 : i32
    %c0_i32_1 = arith.constant 0 : i32
    return %arg1, %c0_i32, %c0_i32_0 : i32, i32, i32
  }
  func.func @transform_4(%arg0: i32, %arg1: i32) -> (i32, i32, i32) {
    %c0_i32 = arith.constant 0 : i32
    %c0_i32_0 = arith.constant 0 : i32
    %c0_i32_1 = arith.constant 0 : i32
    return %arg1, %c0_i32, %c0_i32_0 : i32, i32, i32
  }
  func.func @transform_5(%arg0: i32, %arg1: i32) -> (i32, i32, i32) {
    %c0_i32 = arith.constant 0 : i32
    %c0_i32_0 = arith.constant 0 : i32
    %c0_i32_1 = arith.constant 0 : i32
    return %arg1, %c0_i32, %c0_i32_0 : i32, i32, i32
  }
  func.func @transform_6(%arg0: i32, %arg1: i32) -> (i32, i32, i32) {
    %c0_i32 = arith.constant 0 : i32
    %c0_i32_0 = arith.constant 0 : i32
    %c0_i32_1 = arith.constant 0 : i32
    return %arg1, %c0_i32, %c0_i32_0 : i32, i32, i32
  }
  func.func @transform_7(%arg0: i32, %arg1: i32) -> (i32, i32, i32) {
    %c0_i32 = arith.constant 0 : i32
    %c0_i32_0 = arith.constant 0 : i32
    %c0_i32_1 = arith.constant 0 : i32
    return %arg1, %c0_i32, %c0_i32_0 : i32, i32, i32
  }
  func.func @transform_8(%arg0: i32, %arg1: i32) -> (i32, i32, i32) {
    %c0_i32 = arith.constant 0 : i32
    %c0_i32_0 = arith.constant 0 : i32
    %c0_i32_1 = arith.constant 0 : i32
    return %arg1, %c0_i32, %c0_i32_0 : i32, i32, i32
  }
  func.func @transform_9(%arg0: i32, %arg1: i32) -> (i32, i32, i32) {
    %c0_i32 = arith.constant 0 : i32
    %c0_i32_0 = arith.constant 0 : i32
    %c0_i32_1 = arith.constant 0 : i32
    return %arg1, %c0_i32, %c0_i32_0 : i32, i32, i32
  }
  func.func @transform_10(%arg0: i32, %arg1: i32) -> (i32, i32, i32) {
    %c0_i32 = arith.constant 0 : i32
    %c0_i32_0 = arith.constant 0 : i32
    %c0_i32_1 = arith.constant 0 : i32
    return %arg1, %c0_i32, %c0_i32_0 : i32, i32, i32
  }
  func.func @transform_11(%arg0: i32, %arg1: i32) -> (i32, i32, i32) {
    %c0_i32 = arith.constant 0 : i32
    %c0_i32_0 = arith.constant 0 : i32
    %c0_i32_1 = arith.constant 0 : i32
    return %arg1, %c0_i32, %c0_i32_0 : i32, i32, i32
  }
  func.func @transform_12(%arg0: i32, %arg1: i32) -> (i32, i32, i32) {
    %c0_i32 = arith.constant 0 : i32
    %c0_i32_0 = arith.constant 0 : i32
    %c0_i32_1 = arith.constant 0 : i32
    return %arg1, %c0_i32, %c0_i32_0 : i32, i32, i32
  }
  func.func @transform_13(%arg0: i32, %arg1: i32) -> (i32, i32, i32) {
    %c0_i32 = arith.constant 0 : i32
    %c0_i32_0 = arith.constant 0 : i32
    %c0_i32_1 = arith.constant 0 : i32
    return %arg1, %c0_i32, %c0_i32_0 : i32, i32, i32
  }
  func.func @transform_14(%arg0: i32, %arg1: i32) -> (i32, i32) {
    %c0_i32 = arith.constant 0 : i32
    %c0_i32_0 = arith.constant 0 : i32
    return %arg0, %c0_i32 : i32, i32
  }
}

</mosaic_0001>

<bundles_post_ra>
// kernel: tpu_custom_call.1
= control target key start
LH: loop header
LB: loop body
LE: loop exit
PB: predicated region body
PF: predicated region fallthrough
CT: control target
= control target key end

     0   :  { %s16688_s0 = inlined_call_operand.vmem [shape: f32[160,128], index: 0, kind: input, shape index: {}]   ;;  %s16689_s1 = inlined_call_operand.hbm [shape: f32[2,1,128], index: 1, kind: input, shape index: {}]   ;;  %s16690_s2 = inlined_call_operand.hbm [shape: f32[2,1,128], index: 2, kind: input, shape index: {}]   ;;  %s16691_s3 = inlined_call_operand.vmem [shape: bf16[2,128,32], index: 3, kind: input, shape index: {}]   ;;  %s16692_s4 = inlined_call_operand.vmem [shape: bf16[2,128,32], index: 4, kind: input, shape index: {}]   ;;  %s16693_s5 = inlined_call_operand.vmem [shape: bf16[2,128,32], index: 5, kind: input, shape index: {}]   ;;  %s16694_s6 = inlined_call_operand.hbm [shape: bf16[2,32,128], index: 6, kind: input, shape index: {}]   ;;  %s16695_s7 = inlined_call_operand.vmem [shape: f32[2,1,128], index: 7, kind: input, shape index: {}]   ;;  %s16696_s8 = inlined_call_operand.vmem [shape: f32[2,1,128], index: 8, kind: input, shape index: {}]   ;;  %s16697_s9 = inlined_call_operand.hbm [shape: f32[2,1,128], index: 9, kind: input, shape index: {}]   ;;  %s16698_s10 = inlined_call_operand.vmem [shape: bf16[2,128,128], index: 10, kind: input, shape index: {}]   ;;  %s16699_s11 = inlined_call_operand.hbm [shape: f32[2,1,128], index: 11, kind: input, shape index: {}]   ;;  %s16700_s12 = inlined_call_operand.vmem [shape: bf16[2,128,128], index: 12, kind: input, shape index: {}]   ;;  %s16701_s13 = inlined_call_operand.vmem [shape: f32[2,1,128], index: 13, kind: input, shape index: {}]   ;;  %s16702_s14 = inlined_call_operand.hbm [shape: f32[32,128], index: 14, kind: output, shape index: {}]  }
   0x1   :  { %17231 = sst [smem:[#allocation92_spill]] %s16688_s0 }
   0x2   :  { %17232 = sst [smem:[#allocation93_spill]] %s16689_s1 }
   0x3   :  { %17233 = sst [smem:[#allocation94_spill]] %s16690_s2 }
   0x4   :  { %17234 = sst [smem:[#allocation95_spill]] %s16691_s3 }
   0x5   :  { %17235 = sst [smem:[#allocation96_spill]] %s16692_s4 }
   0x6   :  { %17236 = sst [smem:[#allocation97_spill]] %s16693_s5 }
   0x7   :  { %17237 = sst [smem:[#allocation98_spill]] %s16696_s8 }
   0x8   :  { %17238 = sst [smem:[#allocation99_spill]] %s16697_s9 }
   0x9   :  { %17239 = sst [smem:[#allocation100_spill]] %s16698_s10 }
   0xa   :  { %17240 = sst [smem:[#allocation101_spill]] %s16700_s12 }
   0xb   :  { %17241 = sst [smem:[#allocation102_spill]] %s16701_s13 }
   0xc   :  { %17242 = sst [smem:[#allocation103_spill]] %s16702_s14 }
   0xd   :  { %19 = vsyncpa [#allocation4], 0 }
   0xe   :  { %21 = vsyncpa [#allocation4 + $0x1], 0 }
   0xf   :  { %22 = vsyncpa [#allocation7], 0 }
  0x10   :  { %24 = vsyncpa [#allocation7 + $0x1], 0 }
  0x11   :  { %25 = vsyncpa [#allocation10], 0 }
  0x12   :  { %27 = vsyncpa [#allocation10 + $0x1], 0 }
  0x13   :  { %28 = vsyncpa [#allocation5], 0  ;;  %s10980_s29 = smov 0   ;;  %s10982_s30 = smov 0  }
  0x14   :  { %s10984_s15 = smov 0   ;;  %s10986_s16 = smov 0  }
  0x15   :  { %s10988_s17 = smov 0   ;;  %s10990_s18 = smov 0  }
  0x16 LB: > { %17243 = sst [smem:[#allocation17_spill]] %s10884_s15  ;;  %s11009_s19 = sadd.s32 4294967295, %s10896_s18   ;;  %s10896_s18 = sphi %s10990_s18, %s34_s18   ;;  %s10892_s17 = sphi %s10988_s17, %s17876_s17   ;;  %s10888_s16 = sphi %s10986_s16, %s17875_s16   ;;  %s10884_s15 = sphi %s10984_s15, %s17871_s15   ;;  %s10880_s30 = sphi %s10982_s30, %s17874_s30   ;;  %s10876_s29 = sphi %s10980_s29, %s17873_s29  }
  0x17   : > { %17244 = sst [smem:[#allocation18_spill]] %s10896_s18  ;;  %s43_s20 = sadd.s32 1, %s10892_s17 }
  0x18   : > { %p44_p0 = scmp.ge.s32.totalorder %s43_s20, 2  ;;  %s79_s21 = sadd.s32 1, %s10884_s15 }
  0x19   : > { %p86_p1 = scmp.ne.s32.totalorder %s10884_s15, %s10880_s30  ;;  %p87_p2 = scmp.eq.s32.totalorder %s10896_s18, 0 }
  0x1a   : > { %s17878_s20 = smov (%p44_p0, %s43_s20), 0  ;;  %p92_p4 = scmp.ne.s32.totalorder %s10880_s30, %s10876_s29 }
  0x1b   : > { %17245 = sst [smem:[#allocation19_spill]] %s17878_s20  ;;  %p88_p3 = por %p87_p2, %p86_p1 }
  0x1c   : > { %s76_s22 = ssub.s32 %s10892_s17, %s17878_s20  ;;  %p93_p5 = scmp.eq.s32.totalorder %s11009_s19, 0 }
  0x1d   : > { %p77_p6 = scmp.eq.s32.totalorder %s76_s22, 0  ;;  %p10194_p8 = scmp.lt.s32.totalorder %s10896_s18, 2 }
  0x1e   : > { %p11022_p7 = por %p93_p5, %p92_p4  ;;  %s11031_s25 = sand.u32 1, %s10884_s15  }
  0x1f   : > { %s11028_s24 = scalar_select %p77_p6, %s10884_s15, %s79_s21  }
  0x20   : > { %p11033_p9 = pnand %p10194_p8, %p88_p3  ;;  %s480_s27 = sand.u32 1, %s10896_s18  }
  0x21   : > { %17247 = sst [smem:[#allocation20_spill]] %s11028_s24  ;;  %s483_s20 = scalar_lea.vmem [#allocation6], %s11031_s25 }
  0x22   : > { %s17249_s2 = sld [smem:[#allocation94_spill]]  ;;  %s490_s14 = sshll.u32 %s483_s20, 4  ;;  %s491_s14 = int_to_ptr.vmem [resolvable:$true] %s490_s14 }
  0x23   : > { %p9782_p10 = scmp.ge.s32.totalorder %s10896_s18, 1  ;;  %s11044_s21 = scalar_lea.sflag [#allocation7], %s480_s27 }
  0x24   : > { %p609_p11 = scmp.lt.s32.totalorder %s10896_s18, 3  ;;  %s17250_s9 = sld [smem:[#allocation99_spill]] }
  0x25   : > { %s556_s13 = scalar_lea.sflag [#allocation10], %s480_s27  ;;  %s17252_s1 = sld [smem:[#allocation93_spill]] }
  0x26   : > { %p11054_p12 = pnand %p9782_p10, %p609_p11  ;;  %s10116_s27 = sshll.u32 %s10892_s17, 4 }
  0x28   : > { %s486_s22 = scalar_lea.hbm %s17249_s2, %s10892_s17 }
  0x29   : > { %s488_s0 = sshll.u32 %s486_s22, 4  ;;  %s558_s22 = scalar_lea.vmem [#allocation9], %s11031_s25  ;;  %s489_s0 = int_to_ptr.hbm [resolvable:$true] %s488_s0 }
  0x2a   : > { %10184 = dma.hbm_to_vmem [thread:$0]  (!%p11033_p9), %s489_s0, 16, %s491_s14, %s11044_s21  }
  0x2b   : > { %s561_s28 = scalar_lea.hbm %s17250_s9, %s10892_s17  ;;  %s565_s2 = sshll.u32 %s558_s22, 4  ;;  %s566_s2 = int_to_ptr.vmem [resolvable:$true] %s565_s2 }
  0x2c   : > { %s563_s29 = sshll.u32 %s561_s28, 4  ;;  %s469_s15 = scalar_lea.hbm %s17252_s1, %s10892_s17  ;;  %s564_s29 = int_to_ptr.hbm [resolvable:$true] %s563_s29 }
  0x2d   : > { %10190 = dma.hbm_to_vmem [thread:$0]  (!%p11033_p9), %s564_s29, 16, %s566_s2, %s556_s13  }
  0x2e   : > { %s471_s24 = sshll.u32 %s469_s15, 4  ;;  %s466_s9 = scalar_lea.vmem [#allocation3], %s11031_s25  ;;  %s472_s24 = int_to_ptr.hbm [resolvable:$true] %s471_s24 }
  0x2f   : > { %s473_s18 = sshll.u32 %s466_s9, 4  ;;  %s464_s28 = scalar_lea.sflag [#allocation4], %s11031_s25  ;;  %s474_s18 = int_to_ptr.vmem [resolvable:$true] %s473_s18 }
  0x30   : > { %10181 = dma.hbm_to_vmem [thread:$0]  (!%p11033_p9), %s472_s24, 16, %s474_s18, %s464_s28  }
  0x31   : > { %s9779_s22 = sshll.u32 %s11031_s25, 4  ;;  %s530_s29 = scalar_lea.hbm %s16694_s6, %s10116_s27 }
  0x32   : > { %s531_s0 = sshll.u32 %s530_s29, 4  ;;  %s525_s14 = scalar_lea.vmem [#allocation8], %s9779_s22  ;;  %s532_s0 = int_to_ptr.hbm [resolvable:$true] %s531_s0 }
  0x33   : > { %s533_s15 = sshll.u32 %s525_s14, 4  ;;  %s10898_s9 = smov 64   ;;  %s534_s15 = int_to_ptr.vmem [resolvable:$true] %s533_s15 }
  0x34   : > { %s10899_s1 = smov 4   ;;  %s586_s18 = scalar_lea.hbm %s16699_s11, %s10892_s17 }
  0x35   : > { %10187 = dma.hbm_to_vmem [thread:$0]  (!%p11033_p9), %s532_s0, 256, %s534_s15, %s11044_s21, %s10898_s9, %s10898_s9, %s10899_s1  }
  0x36   : > { %s588_s24 = sshll.u32 %s586_s18, 4  ;;  %s583_s28 = scalar_lea.vmem [#allocation11], %s11031_s25  ;;  %s589_s24 = int_to_ptr.hbm [resolvable:$true] %s588_s24 }
  0x37   : > { %s590_s5 = sshll.u32 %s583_s28, 4  ;;  %613 = sbr.rel (%p11054_p12) target bundleno = 4457 (0x1169), region = 76  ;;  %s591_s5 = int_to_ptr.vmem [resolvable:$true] %s590_s5 }
  0x38   : > { %10193 = dma.hbm_to_vmem [thread:$0]  (!%p11033_p9), %s589_s24, 16, %s591_s5, %s556_s13  }
  0x3c   : > { %s11087_s12 = sand.u32 1, %s10880_s30  }
  0x3d   : > { %s616_s1 = scalar_lea.sflag [#allocation4], %s11087_s12 }
  0x3e   : > { %10859 = dma.done.wait (%p11022_p7), %s616_s1, 16  }
  0x3f   : > { %10861 = vsyncadd (%p11022_p7), %s616_s1, 4294967280  ;;  %s624_s5 = sand.u32 1, %s11009_s19  }
  0x40   : > { %s625_s8 = scalar_lea.sflag [#allocation7], %s624_s5 }
  0x41   : > { %10863 = dma.done.wait (%p11022_p7), %s625_s8, 272  }
  0x42   : > { %10865 = vsyncadd (%p11022_p7), %s625_s8, 4294967024  ;;  %s9783_s13 = sshll.u32 %s11087_s12, 4  ;;  %s644_s26 = scalar_lea.sflag [#allocation10], %s624_s5 }
  0x43   : > { %s11102_s25 = scalar_lea.vmem [#allocation8], %s9783_s13 }
  0x44   : > { %10867 = dma.done.wait (%p11022_p7), %s644_s26, 32  }
  0x45   : > { %10869 = vsyncadd (%p11022_p7), %s644_s26, 4294967264  ;;  %p757_p13 = scmp.lt.s32.totalorder %s10888_s16, 1  ;;  %s17253_s3 = sld [smem:[#allocation95_spill]] }
  0x46   : > { %s17254_s4 = sld [smem:[#allocation96_spill]]  ;;  %p9794_p0 = scmp.ne.s32.totalorder %s10888_s16, 0 }
  0x47   : > { %s11111_s22 = scalar_select %p757_p13, %s10888_s16, 1 }
  0x48   : > { %s17255_s5 = sld [smem:[#allocation97_spill]] }
  0x49   : > { %s10117_s27 = sshll.u32 %s11111_s22, 6  ;;  %s17256_s20 = sld [smem:[#allocation98_spill]] }
  0x4a   : > { %s17257_s14 = sld [smem:[#allocation100_spill]] }
  0x4b   : > { %s11121_s23 = scalar_lea.vmem %s17253_s3, %s10117_s27  ;;  %s17258_s9 = sld [smem:[#allocation101_spill]] }
  0x4c   : > { %s11126_s24 = scalar_lea.vmem %s17254_s4, %s10117_s27  ;;  %s17259_s28 = sld [smem:[#allocation102_spill]] }
  0x4d   : > { %s17260_s26 = sld [smem:[#allocation92_spill]] (!%p9794_p0) }
  0x4e   : > { %s11131_s8 = scalar_lea.vmem %s17255_s5, %s10117_s27  ;;  %s655_s5 = scalar_lea.vmem [#allocation11], %s11087_s12 }
  0x4f   : > { %s11137_s2 = scalar_lea.vmem %s17256_s20, %s11111_s22  ;;  %796 = sbr.rel (%p9794_p0) target bundleno = 105 (0x69), region = 100 }
  0x50   : > { %s11142_s15 = scalar_lea.vmem %s17257_s14, %s10117_s27 }
  0x51   : > { %s11147_s18 = scalar_lea.vmem %s17258_s9, %s10117_s27 }
  0x52   : > { %s790_s1 = scalar_lea.vmem %s17259_s28, %s11111_s22 }
  0x54   : > { %v797_v0 = vld [vmem:[%s17260_s26] sm:$0xff]  ;;  %v798_v1 = vld [vmem:[%s17260_s26 + $0x8] sm:$0xff]  ;;  %v799_v2 = vld [vmem:[%s17260_s26 + $0x10] sm:$0xff] }
  0x55   : > { %817 = vst [vmem:[#allocation2] sm:$0xff] %v797_v0  ;;  %v800_v3 = vld [vmem:[%s17260_s26 + $0x18] sm:$0xff]  ;;  %v801_v4 = vld [vmem:[%s17260_s26 + $0x20] sm:$0xff]  ;;  %v802_v5 = vld [vmem:[%s17260_s26 + $0x28] sm:$0xff] }
  0x56   : > { %818 = vst [vmem:[#allocation2 + $0x38] sm:$0xff] %v798_v1  ;;  %v803_v6 = vld [vmem:[%s17260_s26 + $0x30] sm:$0xff]  ;;  %v804_v7 = vld [vmem:[%s17260_s26 + $0x38] sm:$0xff]  ;;  %v805_v8 = vld [vmem:[%s17260_s26 + $0x40] sm:$0xff] }
  0x57   : > { %819 = vst [vmem:[#allocation2 + $0x50] sm:$0xff] %v799_v2  ;;  %v806_v9 = vld [vmem:[%s17260_s26 + $0x48] sm:$0xff]  ;;  %v807_v10 = vld [vmem:[%s17260_s26 + $0x50] sm:$0xff]  ;;  %v808_v11 = vld [vmem:[%s17260_s26 + $0x58] sm:$0xff] }
  0x58   : > { %820 = vst [vmem:[#allocation2 + $0x18] sm:$0xff] %v800_v3  ;;  %v809_v12 = vld [vmem:[%s17260_s26 + $0x60] sm:$0xff]  ;;  %v810_v13 = vld [vmem:[%s17260_s26 + $0x68] sm:$0xff]  ;;  %v811_v14 = vld [vmem:[%s17260_s26 + $0x70] sm:$0xff] }
  0x59   : > { %821 = vst [vmem:[#allocation2 + $0x30] sm:$0xff] %v801_v4  ;;  %v812_v15 = vld [vmem:[%s17260_s26 + $0x78] sm:$0xff]  ;;  %v813_v16 = vld [vmem:[%s17260_s26 + $0x80] sm:$0xff]  ;;  %v814_v17 = vld [vmem:[%s17260_s26 + $0x88] sm:$0xff] }
  0x5a   : > { %822 = vst [vmem:[#allocation2 + $0x68] sm:$0xff] %v802_v5  ;;  %v815_v18 = vld [vmem:[%s17260_s26 + $0x90] sm:$0xff]  ;;  %v816_v19 = vld [vmem:[%s17260_s26 + $0x98] sm:$0xff] }
  0x5b   : > { %823 = vst [vmem:[#allocation2 + $0x78] sm:$0xff] %v803_v6 }
  0x5c   : > { %824 = vst [vmem:[#allocation2 + $0x80] sm:$0xff] %v804_v7 }
  0x5d   : > { %825 = vst [vmem:[#allocation2 + $0x8] sm:$0xff] %v805_v8 }
  0x5e   : > { %826 = vst [vmem:[#allocation2 + $0x88] sm:$0xff] %v806_v9 }
  0x5f   : > { %827 = vst [vmem:[#allocation2 + $0x28] sm:$0xff] %v807_v10 }
  0x60   : > { %828 = vst [vmem:[#allocation2 + $0x40] sm:$0xff] %v808_v11 }
  0x61   : > { %829 = vst [vmem:[#allocation2 + $0x58] sm:$0xff] %v809_v12 }
  0x62   : > { %830 = vst [vmem:[#allocation2 + $0x10] sm:$0xff] %v810_v13 }
  0x63   : > { %831 = vst [vmem:[#allocation2 + $0x98] sm:$0xff] %v811_v14 }
  0x64   : > { %832 = vst [vmem:[#allocation2 + $0x60] sm:$0xff] %v812_v15 }
  0x65   : > { %833 = vst [vmem:[#allocation2 + $0x20] sm:$0xff] %v813_v16 }
  0x66   : > { %834 = vst [vmem:[#allocation2 + $0x48] sm:$0xff] %v814_v17 }
  0x67   : > { %835 = vst [vmem:[#allocation2 + $0x70] sm:$0xff] %v815_v18 }
  0x68   : > { %836 = vst [vmem:[#allocation2 + $0x90] sm:$0xff] %v816_v19 }
  0x69 PF: > { %v11215_v20 = vld [vmem:[#allocation2] sm:$0xff]  ;;  %v11217_v21 = vld [vmem:[#allocation2 + $0x50] sm:$0xff]  ;;  %v11223_v23 = vld [vmem:[#allocation2 + $0x38] sm:$0xff]  ;;  %s17853_s21 = scalar_lea.vmem %s16695_s7, %s11111_s22  ;;  %s17856_s10 = scalar_lea.vmem [#allocation9], %s11087_s12 }
  0x6a   : > { %859 = vadd.xlane.f32.xlu0 %v11215_v20  ;;  %v899_v22 = vmul.f32 %v11215_v20, %v11215_v20  ;;  %863 = vadd.xlane.f32.xlu2 %v11217_v21  ;;  %v11225_v24 = vld [vmem:[#allocation2 + $0x18] sm:$0xff]  ;;  %v900_v25 = vmul.f32 %v11223_v23, %v11223_v23  ;;  %v901_v26 = vmul.f32 %v11217_v21, %v11217_v21  ;;  %v11233_v27 = vld [vmem:[#allocation2 + $0x30] sm:$0xff]  ;;  %v11238_v29 = vld [vmem:[#allocation2 + $0x68] sm:$0xff]  ;;  %p10111_p1 = scmp.ne.s32.totalorder %s10888_s16, 1 }
  0x6b   : > { %v902_v28 = vmul.f32 %v11225_v24, %v11225_v24  ;;  %v904_v30 = vmul.f32 %v11238_v29, %v11238_v29  ;;  %v903_v31 = vmul.f32 %v11233_v27, %v11233_v27  ;;  %v11245_v32 = vld [vmem:[#allocation2 + $0x78] sm:$0xff]  ;;  %v11249_v34 = vld [vmem:[#allocation2 + $0x80] sm:$0xff]  ;;  %v11255_v36 = vld [vmem:[#allocation2 + $0x88] sm:$0xff] }
  0x6c   : > { %919 = vadd.xlane.f32.xlu1 %v899_v22  ;;  %v905_v33 = vmul.f32 %v11245_v32, %v11245_v32  ;;  %v906_v35 = vmul.f32 %v11249_v34, %v11249_v34  ;;  %v11257_v37 = vld [vmem:[#allocation2 + $0x8] sm:$0xff]  ;;  %v908_v40 = vmul.f32 %v11255_v36, %v11255_v36  ;;  %v11268_v41 = vld [vmem:[#allocation2 + $0x40] sm:$0xff]  ;;  %v11275_v44 = vld [vmem:[#allocation2 + $0x58] sm:$0xff] }
  0x6d   : > { %v907_v38 = vmul.f32 %v11257_v37, %v11257_v37  ;;  %v11263_v39 = vld [vmem:[#allocation2 + $0x28] sm:$0xff]  ;;  %v910_v42 = vmul.f32 %v11268_v41, %v11268_v41  ;;  %v11278_v45 = vld [vmem:[#allocation2 + $0x10] sm:$0xff]  ;;  %v911_v46 = vmul.f32 %v11275_v44, %v11275_v44  ;;  %v10127_v54 = vld [vmem:[%s11121_s23 + $0x28] sm:$0xff] }
  0x6e   : > { %v909_v43 = vmul.f32 %v11263_v39, %v11263_v39  ;;  %v912_v47 = vmul.f32 %v11278_v45, %v11278_v45  ;;  %v10129_v48 = vld [vmem:[%s11121_s23 + $0x38] sm:$0xff]  ;;  %v10128_v51 = vld [vmem:[%s11121_s23 + $0x30] sm:$0xff]  ;;  %v10135_v55 = vld [vmem:[%s11126_s24 + $0x28] sm:$0xff] }
  0x6f   : > { %v10137_v49 = vld [vmem:[%s11126_s24 + $0x38] sm:$0xff]  ;;  %1419 = vmatpush.bf16.msra.mxu0 %v10129_v48  ;;  %v10136_v52 = vld [vmem:[%s11126_s24 + $0x30] sm:$0xff]  ;;  %v10143_v56 = vld [vmem:[%s11131_s8 + $0x28] sm:$0xff] }
  0x70   : > { %v10145_v50 = vld [vmem:[%s11131_s8 + $0x38] sm:$0xff]  ;;  %1542 = vmatpush.bf16.msra.mxu1 %v10137_v49  ;;  %v10144_v53 = vld [vmem:[%s11131_s8 + $0x30] sm:$0xff]  ;;  %v10126_v57 = vld [vmem:[%s11121_s23 + $0x20] sm:$0xff] }
  0x71   : > { %1665 = vmatpush.bf16.msra.mxu2 %v10145_v50  ;;  %v10134_v58 = vld [vmem:[%s11126_s24 + $0x20] sm:$0xff]  ;;  %v10125_v61 = vld [vmem:[%s11121_s23 + $0x18] sm:$0xff]  ;;  %v10124_v0 = vld [vmem:[%s11121_s23 + $0x10] sm:$0xff] }
  0x72   : > { %861 = vadd.xlane.f32.xlu0 %v11223_v23  ;;  %865 = vadd.xlane.f32.xlu2 %v11225_v24  ;;  %v10142_v59 = vld [vmem:[%s11131_s8 + $0x20] sm:$0xff]  ;;  %v10133_v62 = vld [vmem:[%s11126_s24 + $0x18] sm:$0xff]  ;;  %v10132_v1 = vld [vmem:[%s11126_s24 + $0x10] sm:$0xff] }
  0x73   : > { %1420 = vmatpush.bf16.msra.mxu0 %v10128_v51  ;;  %v11297_v60 = vld [vmem:[#allocation2 + $0x98] sm:$0xff]  ;;  %v10141_v63 = vld [vmem:[%s11131_s8 + $0x18] sm:$0xff]  ;;  %v10140_v2 = vld [vmem:[%s11131_s8 + $0x10] sm:$0xff] }
  0x74   : > { %921 = vadd.xlane.f32.xlu1 %v900_v25  ;;  %1543 = vmatpush.bf16.msra.mxu1 %v10136_v52  ;;  %v11306_v5 = vld [vmem:[#allocation2 + $0x60] sm:$0xff]  ;;  %v913_v7 = vmul.f32 %v11297_v60, %v11297_v60  ;;  %v10122_v16 = vld [vmem:[%s11121_s23] sm:$0xff] }
  0x75   : > { %1666 = vmatpush.bf16.msra.mxu2 %v10144_v53  ;;  %v914_v8 = vmul.f32 %v11306_v5, %v11306_v5  ;;  %v10123_v10 = vld [vmem:[%s11121_s23 + $0x8] sm:$0xff]  ;;  %v10130_v17 = vld [vmem:[%s11126_s24] sm:$0xff]  ;;  %s17263_s23 = scalar_lea.vmem [#allocation3], %s11087_s12 }
  0x76   : > { %v10131_v11 = vld [vmem:[%s11126_s24 + $0x8] sm:$0xff]  ;;  %v10138_v18 = vld [vmem:[%s11131_s8] sm:$0xff]  ;;  %s17264_s24 = scalar_lea.vmem [#allocation6], %s11087_s12 }
  0x77   : > { %1421 = vmatpush.bf16.msra.mxu0 %v10127_v54  ;;  %v10139_v12 = vld [vmem:[%s11131_s8 + $0x8] sm:$0xff]  ;;  %s10901_s8 = smov 112  }
  0x78   : > { %1544 = vmatpush.bf16.msra.mxu1 %v10135_v55  ;;  %v11335_v51 = vld [vmem:[#allocation2 + $0x20] sm:$0xff] }
  0x79   : > { %1667 = vmatpush.bf16.msra.mxu2 %v10143_v56 }
  0x7a   : > { %923 = vadd.xlane.f32.xlu0 %v901_v26  ;;  %867 = vadd.xlane.f32.xlu2 %v11233_v27 }
  0x7b   : > { %1422 = vmatpush.bf16.msra.mxu0 %v10126_v57 }
  0x7c   : > { %925 = vadd.xlane.f32.xlu1 %v902_v28  ;;  %1545 = vmatpush.bf16.msra.mxu1 %v10134_v58 }
  0x7d   : > { %1668 = vmatpush.bf16.msra.mxu2 %v10142_v59 }
  0x7f   : > { %1423 = vmatpush.bf16.msra.mxu0 %v10125_v61 }
  0x80   : > { %1546 = vmatpush.bf16.msra.mxu1 %v10133_v62 }
  0x81   : > { %1669 = vmatpush.bf16.msra.mxu2 %v10141_v63 }
  0x82   : > { %869 = vadd.xlane.f32.xlu0 %v11238_v29  ;;  %929 = vadd.xlane.f32.xlu2 %v904_v30 }
  0x83   : > { %1424 = vmatpush.bf16.msra.mxu0 %v10124_v0 }
  0x84   : > { %927 = vadd.xlane.f32.xlu1 %v903_v31  ;;  %1547 = vmatpush.bf16.msra.mxu1 %v10132_v1 }
  0x85   : > { %1670 = vmatpush.bf16.msra.mxu2 %v10140_v2 }
  0x87   : > { %1425 = vmatpush.bf16.msra.mxu0 %v10123_v10 }
  0x88   : > { %1548 = vmatpush.bf16.msra.mxu1 %v10131_v11 }
  0x89   : > { %1671 = vmatpush.bf16.msra.mxu2 %v10139_v12 }
  0x8a   : > { %871 = vadd.xlane.f32.xlu0 %v11245_v32  ;;  %931 = vadd.xlane.f32.xlu2 %v905_v33 }
  0x8b   : > { %1426 = vmatpush.bf16.msra.mxu0 %v10122_v16 }
  0x8c   : > { %873 = vadd.xlane.f32.xlu1 %v11249_v34  ;;  %1549 = vmatpush.bf16.msra.mxu1 %v10130_v17 }
  0x8d   : > { %1672 = vmatpush.bf16.msra.mxu2 %v10138_v18 }
  0x92   : > { %933 = vadd.xlane.f32.xlu0 %v906_v35  ;;  %877 = vadd.xlane.f32.xlu2 %v11255_v36 }
  0x94   : > { %875 = vadd.xlane.f32.xlu1 %v11257_v37 }
  0x9a   : > { %935 = vadd.xlane.f32.xlu0 %v907_v38  ;;  %879 = vadd.xlane.f32.xlu2 %v11263_v39 }
  0x9c   : > { %937 = vadd.xlane.f32.xlu1 %v908_v40 }
  0xa2   : > { %881 = vadd.xlane.f32.xlu0 %v11268_v41  ;;  %941 = vadd.xlane.f32.xlu2 %v910_v42 }
  0xa4   : > { %939 = vadd.xlane.f32.xlu1 %v909_v43 }
  0xaa   : > { %883 = vadd.xlane.f32.xlu0 %v11275_v44  ;;  %943 = vadd.xlane.f32.xlu2 %v911_v46 }
  0xac   : > { %885 = vadd.xlane.f32.xlu1 %v11278_v45 }
  0xb2   : > { %945 = vadd.xlane.f32.xlu0 %v912_v47  ;;  %889 = vadd.xlane.f32.xlu2 %v11306_v5 }
  0xb4   : > { %887 = vadd.xlane.f32.xlu1 %v11297_v60 }
  0xba   : > { %947 = vadd.xlane.f32.xlu0 %v913_v7  ;;  %891 = vadd.xlane.f32.xlu2 %v11335_v51 }
  0xbc   : > { %949 = vadd.xlane.f32.xlu1 %v914_v8 }
  0xdd   : > { %v860_v3 = vpop.xlane.xlu0 %859  ;;  %v864_v4 = vpop.xlane.xlu2 %863 }
  0xde   : > { %v11308_v6 = vmul.f32 0.03125, %v860_v3  ;;  %v11325_v30 = vmul.f32 0.03125, %v864_v4 }
  0xdf   : > { %v920_v9 = vpop.xlane.xlu1 %919 }
  0xe0   : > { %v999_v13 = vmul.f32 %v11308_v6, %v11308_v6  ;;  %v979_v14 = vmul.f32 0.03125, %v920_v9  ;;  %v1001_v42 = vmul.f32 %v11325_v30, %v11325_v30  ;;  %v11350_v9 = vld [vmem:[#allocation2 + $0x48] sm:$0xff] }
  0xe1   : > { %893 = vadd.xlane.f32.xlu0 %v11350_v9  ;;  %v916_v12 = vmul.f32 %v11350_v9, %v11350_v9 }
  0xe2   : > { %v1019_v15 = vsub.f32 %v979_v14, %v999_v13  ;;  %v915_v13 = vmul.f32 %v11335_v51, %v11335_v51 }
  0xe3   : > { %953 = vadd.xlane.f32.xlu2 %v916_v12 }
  0xe4   : > { %v1059_v19 = vadd.f32 1e-05, %v1019_v15  ;;  %951 = vadd.xlane.f32.xlu1 %v915_v13 }
  0xe5   : > { %v862_v22 = vpop.xlane.xlu0 %861  ;;  %v866_v25 = vpop.xlane.xlu2 %865 }
  0xe6   : > { %10259 = vrsqrt.f32 %v1059_v19  ;;  %v11323_v26 = vmul.f32 0.03125, %v862_v22  ;;  %v11329_v38 = vmul.f32 0.03125, %v866_v25  ;;  %vm1085_vm1 = vweird.f32 %v1059_v19 }
  0xe7   : > { %v922_v28 = vpop.xlane.xlu1 %921  ;;  %v1039_v22 = vsub.f32 %v11215_v20, %v11308_v6 }
  0xe8   : > { %v1000_v31 = vmul.f32 %v11323_v26, %v11323_v26  ;;  %v980_v33 = vmul.f32 0.03125, %v922_v28  ;;  %v1002_v49 = vmul.f32 %v11329_v38, %v11329_v38 }
  0xea   : > { %v1020_v35 = vsub.f32 %v980_v33, %v1000_v31 }
  0xec   : > { %v10260_v40 = vpop.eup %10259  ;;  %v1060_v43 = vadd.f32 1e-05, %v1020_v35 }
  0xed   : > { %v1080_v46 = vmul.f32 %v10260_v40, %v1059_v19  ;;  %v924_v47 = vpop.xlane.xlu0 %923  ;;  %v868_v48 = vpop.xlane.xlu2 %867  ;;  %vm1086_vm0 = vweird.f32 %v10260_v40 }
  0xee   : > { %10261 = vrsqrt.f32 %v1060_v43  ;;  %v981_v50 = vmul.f32 0.03125, %v924_v47  ;;  %v11340_v59 = vmul.f32 0.03125, %v868_v48  ;;  %vm11358_vm2 = vmor %vm1085_vm1, %vm1086_vm0  ;;  %v11380_v47 = vld [vmem:[%s17263_s23] ss:$0 sm:$0xff]  ;;  %vm1095_vm4 = vweird.f32 %v1060_v43 }
  0xef   : > { %v1081_v52 = vmul.f32 %v10260_v40, %v1080_v46  ;;  %v926_v53 = vpop.xlane.xlu1 %925 }
  0xf0   : > { %v1021_v54 = vsub.f32 %v981_v50, %v1001_v42  ;;  %v982_v55 = vmul.f32 0.03125, %v926_v53  ;;  %v1003_v4 = vmul.f32 %v11340_v59, %v11340_v59  ;;  %v1040_v50 = vsub.f32 %v11223_v23, %v11323_v26 }
  0xf1   : > { %v1082_v56 = vmul.f32 0.5, %v1081_v52 }
  0xf2   : > { %v11338_v57 = vadd.f32 1e-05, %v1021_v54  ;;  %v1022_v58 = vsub.f32 %v982_v55, %v1002_v49 }
  0xf3   : > { %v1083_v61 = vsub.f32 1.5, %v1082_v56 }
  0xf4   : > { %v10262_v62 = vpop.eup %10261  ;;  %10263 = vrsqrt.f32 %v11338_v57  ;;  %v11343_v63 = vadd.f32 1e-05, %v1022_v58  ;;  %vm1105_vm8 = vweird.f32 %v11338_v57 }
  0xf5   : > { %v1084_v0 = vmul.f32 %v10260_v40, %v1083_v61  ;;  %v1090_v1 = vmul.f32 %v10262_v62, %v1060_v43  ;;  %v870_v2 = vpop.xlane.xlu0 %869  ;;  %v930_v3 = vpop.xlane.xlu2 %929  ;;  %vm1096_vm3 = vweird.f32 %v10262_v62 }
  0xf6   : > { %10265 = vrsqrt.f32 %v11343_v63  ;;  %v11348_v7 = vmul.f32 0.03125, %v870_v2  ;;  %v984_v8 = vmul.f32 0.03125, %v930_v3  ;;  %vm1097_vm5 = vmor %vm1095_vm4, %vm1096_vm3  ;;  %vm1115_vm6 = vweird.f32 %v11343_v63 }
  0xf7   : > { %v1091_v10 = vmul.f32 %v10262_v62, %v1090_v1  ;;  %v928_v11 = vpop.xlane.xlu1 %927  ;;  %v1088_v18 = vsel %vm11358_vm2, %v10260_v40, %v1084_v0  ;;  %v11395_v0 = vld [vmem:[%s17264_s24] ss:$0 sm:$0xff] }
  0xf8   : > { %v1004_v15 = vmul.f32 %v11348_v7, %v11348_v7  ;;  %v983_v16 = vmul.f32 0.03125, %v928_v11  ;;  %v1279_v40 = vmul.f32 %v1088_v18, %v1039_v22 }
  0xf9   : > { %v1092_v17 = vmul.f32 0.5, %v1091_v10 }
  0xfa   : > { %v11366_v19 = vpop.eup %10263  ;;  %v1024_v25 = vsub.f32 %v984_v8, %v1004_v15  ;;  %v1023_v28 = vsub.f32 %v983_v16, %v1003_v4  ;;  %v1302_v61 = vmul.f32 %v11380_v47, %v1279_v40 }
  0xfb   : > { %v1093_v31 = vsub.f32 1.5, %v1092_v17  ;;  %v1100_v33 = vmul.f32 %v11366_v19, %v11338_v57  ;;  %vm1106_vm9 = vweird.f32 %v11366_v19 }
  0xfc   : > { %v11372_v35 = vpop.eup %10265  ;;  %v11374_v42 = vadd.f32 1e-05, %v1024_v25  ;;  %v11376_v46 = vadd.f32 1e-05, %v1023_v28  ;;  %v1325_v11 = vadd.f32 %v11395_v0, %v1302_v61  ;;  %vm11433_vm11 = vmor %vm1105_vm8, %vm1106_vm9 }
  0xfd   : > { %v1094_v48 = vmul.f32 %v10262_v62, %v1093_v31  ;;  %v1101_v20 = vmul.f32 %v11366_v19, %v1100_v33  ;;  %v1110_v6 = vmul.f32 %v11372_v35, %v11343_v63  ;;  %v872_v49 = vpop.xlane.xlu0 %871  ;;  %v932_v53 = vpop.xlane.xlu2 %931  ;;  %vm1116_vm7 = vweird.f32 %v11372_v35 }
  0xfe   : > { %10267 = vrsqrt.f32 %v11374_v42  ;;  %v11388_v52 = vmul.f32 0.03125, %v872_v49  ;;  %v985_v3 = vmul.f32 0.03125, %v932_v53  ;;  %vm11416_vm10 = vmor %vm1115_vm6, %vm1116_vm7  ;;  %v1042_v33 = vsub.f32 %v11225_v24, %v11329_v38 }
  0xff   : > { %v1102_v54 = vmul.f32 0.5, %v1101_v20  ;;  %v1111_v55 = vmul.f32 %v11372_v35, %v1110_v6  ;;  %10269 = vrsqrt.f32 %v11376_v46  ;;  %v1098_v43 = vsel %vm1097_vm5, %v10262_v62, %v1094_v48  ;;  %v874_v56 = vpop.xlane.xlu1 %873 }
 0x100   : > { %v1280_v58 = vmul.f32 %v1098_v43, %v1040_v50  ;;  %v1005_v23 = vmul.f32 %v11388_v52, %v11388_v52  ;;  %v11399_v26 = vmul.f32 0.03125, %v874_v56  ;;  %v1041_v53 = vsub.f32 %v11217_v21, %v11325_v30 }
 0x101   : > { %v1103_v1 = vsub.f32 1.5, %v1102_v54  ;;  %v1112_v2 = vmul.f32 0.5, %v1111_v55  ;;  %v11449_v54 = vld [vmem:[#allocation2 + $0x70] sm:$0xff]  ;;  %vm1135_vm12 = vweird.f32 %v11374_v42  ;;  %vm1125_vm14 = vweird.f32 %v11376_v46 }
 0x102   : > { %v1303_v62 = vmul.f32 %v11380_v47, %v1280_v58  ;;  %v1025_v8 = vsub.f32 %v985_v3, %v1005_v23  ;;  %v1006_v13 = vmul.f32 %v11399_v26, %v11399_v26  ;;  %v11451_v55 = vld [vmem:[#allocation2 + $0x90] sm:$0xff]  ;;  %895 = vadd.xlane.f32.xlu0 %v11449_v54  ;;  %v917_v23 = vmul.f32 %v11449_v54, %v11449_v54 }
 0x103   : > { %v1113_v4 = vsub.f32 1.5, %v1112_v2  ;;  %v1104_v14 = vmul.f32 %v11366_v19, %v1103_v1  ;;  %897 = vadd.xlane.f32.xlu1 %v11451_v55  ;;  %v1043_v6 = vsub.f32 %v11233_v27, %v11340_v59 }
 0x104   : > { %v11405_v10 = vpop.eup %10267  ;;  %v1326_v12 = vadd.f32 %v11395_v0, %v1303_v62  ;;  %v11422_v18 = vadd.f32 1e-05, %v1025_v8  ;;  %955 = vadd.xlane.f32.xlu2 %v917_v23 }
 0x105   : > { %v11412_v63 = vpop.eup %10269  ;;  %v1114_v15 = vmul.f32 %v11372_v35, %v1113_v4  ;;  %v1130_v17 = vmul.f32 %v11405_v10, %v11374_v42  ;;  %v934_v22 = vpop.xlane.xlu0 %933  ;;  %v1108_v57 = vsel %vm11433_vm11, %v11366_v19, %v1104_v14  ;;  %vm1136_vm13 = vweird.f32 %v11405_v10 }
 0x106   : > { %v1120_v25 = vmul.f32 %v11412_v63, %v11376_v46  ;;  %v1345_v28 = vpack.c.bf16 %v1326_v12, %v1325_v11  ;;  %v986_v31 = vmul.f32 0.03125, %v934_v22  ;;  %v878_v20 = vpop.xlane.xlu2 %877  ;;  %10271 = vrsqrt.f32 %v11422_v18  ;;  %vm11482_vm0 = vmor %vm1135_vm12, %vm1136_vm13 }
 0x107   : > { %v1131_v40 = vmul.f32 %v11405_v10, %v1130_v17  ;;  %v876_v48 = vpop.xlane.xlu1 %875  ;;  %v1118_v24 = vsel %vm11416_vm10, %v11372_v35, %v1114_v15  ;;  %v11455_v58 = vmul.f32 0.03125, %v878_v20  ;;  %v1281_v30 = vmul.f32 %v1108_v57, %v1041_v53 }
 0x108   : > { %v1121_v49 = vmul.f32 %v11412_v63, %v1120_v25  ;;  %1427 = vmatmul.bf16.vlgmr.msra.gmra.mxu0 %v1345_v28  ;;  %1550 = vmatmul.bf16.vlgmr.msra.gmra.mxu1 %v1345_v28  ;;  %v1026_v50 = vsub.f32 %v986_v31, %v1006_v13  ;;  %v11441_v38 = vmul.f32 0.03125, %v876_v48  ;;  %v1282_v35 = vmul.f32 %v1118_v24, %v1042_v33 }
 0x109   : > { %1673 = vmatmul.bf16.vlgmr.msra.gmra.mxu2 %v1345_v28  ;;  %v1132_v43 = vmul.f32 0.5, %v1131_v40  ;;  %v1008_v3 = vmul.f32 %v11455_v58, %v11455_v58  ;;  %v918_v12 = vmul.f32 %v11451_v55, %v11451_v55  ;;  %v1304_v13 = vmul.f32 %v11380_v47, %v1281_v30 }
 0x10a   : > { %v11453_v56 = vadd.f32 1e-05, %v1026_v50  ;;  %v1122_v21 = vmul.f32 0.5, %v1121_v49  ;;  %v1007_v19 = vmul.f32 %v11441_v38, %v11441_v38  ;;  %v1305_v2 = vmul.f32 %v11380_v47, %v1282_v35 }
 0x10b   : > { %v1133_v1 = vsub.f32 1.5, %v1132_v43  ;;  %vm1126_vm15 = vweird.f32 %v11412_v63  ;;  %957 = vadd.xlane.f32.xlu0 %v918_v12  ;;  %v1327_v42 = vadd.f32 %v11395_v0, %v1304_v13  ;;  %v1044_v49 = vsub.f32 %v11238_v29, %v11348_v7 }
 0x10c   : > { %10273 = vrsqrt.f32 %v11453_v56  ;;  %v11467_v4 = vpop.eup %10271  ;;  %v1123_v8 = vsub.f32 1.5, %v1122_v21  ;;  %v1328_v22 = vadd.f32 %v11395_v0, %v1305_v2  ;;  %vm11493_vm1 = vmor %vm1125_vm14, %vm1126_vm15  ;;  %vm1145_vm2 = vweird.f32 %v11422_v18 }
 0x10d   : > { %v936_v61 = vpop.xlane.xlu0 %935  ;;  %v1134_v17 = vmul.f32 %v11405_v10, %v1133_v1  ;;  %v1140_v46 = vmul.f32 %v11467_v4, %v11422_v18  ;;  %vm1146_vm3 = vweird.f32 %v11467_v4  ;;  %vm1155_vm4 = vweird.f32 %v11453_v56 }
 0x10e   : > { %v987_v62 = vmul.f32 0.03125, %v936_v61  ;;  %v1124_v31 = vmul.f32 %v11412_v63, %v1123_v8  ;;  %v1346_v50 = vpack.c.bf16 %v1328_v22, %v1327_v42  ;;  %v880_v27 = vpop.xlane.xlu2 %879  ;;  %vm11539_vm6 = vmor %vm1145_vm2, %vm1146_vm3 }
 0x10f   : > { %v938_v11 = vpop.xlane.xlu1 %937  ;;  %v1138_v24 = vsel %vm11482_vm0, %v11405_v10, %v1134_v17  ;;  %v1141_v53 = vmul.f32 %v11467_v4, %v1140_v46  ;;  %v11514_v10 = vmul.f32 0.03125, %v880_v27 }
 0x110   : > { %v1027_v14 = vsub.f32 %v987_v62, %v1007_v19  ;;  %v988_v15 = vmul.f32 0.03125, %v938_v11  ;;  %v1128_v43 = vsel %vm11493_vm1, %v11412_v63, %v1124_v31  ;;  %v1284_v7 = vmul.f32 %v1138_v24, %v1044_v49 }
 0x111   : > { %v1283_v59 = vmul.f32 %v1128_v43, %v1043_v6  ;;  %v1142_v35 = vmul.f32 0.5, %v1141_v53  ;;  %v1009_v19 = vmul.f32 %v11514_v10, %v11514_v10  ;;  %v1045_v6 = vsub.f32 %v11245_v32, %v11388_v52 }
 0x112   : > { %v11476_v16 = vpop.eup %10273  ;;  %v1028_v25 = vsub.f32 %v988_v15, %v1008_v3  ;;  %v11491_v40 = vadd.f32 1e-05, %v1027_v14  ;;  %v1307_v2 = vmul.f32 %v11380_v47, %v1284_v7  ;;  %v1046_v49 = vsub.f32 %v11249_v34, %v11399_v26 }
 0x113   : > { %v1150_v33 = vmul.f32 %v11476_v16, %v11453_v56  ;;  %v1306_v1 = vmul.f32 %v11380_v47, %v1283_v59  ;;  %v1143_v62 = vsub.f32 1.5, %v1142_v35  ;;  %vm1156_vm5 = vweird.f32 %v11476_v16 }
 0x114   : > { %v11498_v20 = vadd.f32 1e-05, %v1028_v25  ;;  %10275 = vrsqrt.f32 %v11491_v40  ;;  %v1330_v17 = vadd.f32 %v11395_v0, %v1307_v2  ;;  %vm11546_vm7 = vmor %vm1155_vm4, %vm1156_vm5  ;;  %vm1165_vm8 = vweird.f32 %v11491_v40 }
 0x115   : > { %v1151_v57 = vmul.f32 %v11476_v16, %v1150_v33  ;;  %v882_v29 = vpop.xlane.xlu0 %881  ;;  %v1329_v18 = vadd.f32 %v11395_v0, %v1306_v1  ;;  %v1144_v25 = vmul.f32 %v11467_v4, %v1143_v62  ;;  %v1047_v1 = vsub.f32 %v11257_v37, %v11441_v38 }
 0x116   : > { %10277 = vrsqrt.f32 %v11498_v20  ;;  %v11518_v61 = vmul.f32 0.03125, %v882_v29  ;;  %v942_v15 = vpop.xlane.xlu2 %941  ;;  %vm1175_vm10 = vweird.f32 %v11498_v20 }
 0x117   : > { %v1152_v21 = vmul.f32 0.5, %v1151_v57  ;;  %v940_v30 = vpop.xlane.xlu1 %939  ;;  %v990_v22 = vmul.f32 0.03125, %v942_v15  ;;  %v1148_v53 = vsel %vm11539_vm6, %v11467_v4, %v1144_v25 }
 0x118   : > { %1432 = vmatmul.bf16.gmra.mxu0 %v1346_v50  ;;  %1555 = vmatmul.bf16.gmra.mxu1 %v1346_v50  ;;  %v989_v3 = vmul.f32 0.03125, %v940_v30  ;;  %v1010_v12 = vmul.f32 %v11518_v61, %v11518_v61  ;;  %v1285_v34 = vmul.f32 %v1148_v53, %v1045_v6 }
 0x119   : > { %1678 = vmatmul.bf16.gmra.mxu2 %v1346_v50  ;;  %v1153_v8 = vsub.f32 1.5, %v1152_v21  ;;  %v1347_v50 = vpack.c.bf16 %v1330_v17, %v1329_v18 }
 0x11a   : > { %v11520_v63 = vpop.eup %10275  ;;  %v1029_v13 = vsub.f32 %v989_v3, %v1009_v19  ;;  %v1030_v48 = vsub.f32 %v990_v22, %v1010_v12  ;;  %v1048_v3 = vsub.f32 %v11255_v36, %v11455_v58 }
 0x11b   : > { %v1160_v11 = vmul.f32 %v11520_v63, %v11491_v40  ;;  %v1154_v31 = vmul.f32 %v11476_v16, %v1153_v8  ;;  %vm1166_vm9 = vweird.f32 %v11520_v63 }
 0x11c   : > { %v11522_v23 = vpop.eup %10277  ;;  %v11544_v56 = vadd.f32 1e-05, %v1029_v13  ;;  %v11556_v24 = vadd.f32 1e-05, %v1030_v48  ;;  %vm11577_vm12 = vmor %vm1165_vm8, %vm1166_vm9 }
 0x11d   : > { %v1170_v14 = vmul.f32 %v11522_v23, %v11498_v20  ;;  %v1161_v33 = vmul.f32 %v11520_v63, %v1160_v11  ;;  %v1158_v57 = vsel %vm11546_vm7, %v11476_v16, %v1154_v31  ;;  %v1308_v16 = vmul.f32 %v11380_v47, %v1285_v34  ;;  %v884_v2 = vpop.xlane.xlu0 %883 }
 0x11e   : > { %10279 = vrsqrt.f32 %v11544_v56  ;;  %v1286_v52 = vmul.f32 %v1158_v57, %v1046_v49  ;;  %vm1176_vm11 = vweird.f32 %v11522_v23  ;;  %v944_v22 = vpop.xlane.xlu2 %943  ;;  %vm1185_vm14 = vweird.f32 %v11544_v56 }
 0x11f   : > { %v1171_v42 = vmul.f32 %v11522_v23, %v1170_v14  ;;  %v1162_v43 = vmul.f32 0.5, %v1161_v33  ;;  %10281 = vrsqrt.f32 %v11556_v24  ;;  %vm1177_vm13 = vmor %vm1175_vm10, %vm1176_vm11  ;;  %v1331_v19 = vadd.f32 %v11395_v0, %v1308_v16  ;;  %v886_v58 = vpop.xlane.xlu1 %885 }
 0x120   : > { %v1309_v59 = vmul.f32 %v11380_v47, %v1286_v52  ;;  %v11598_v14 = vmul.f32 0.03125, %v884_v2  ;;  %v11602_v18 = vmul.f32 0.03125, %v886_v58  ;;  %v991_v31 = vmul.f32 0.03125, %v944_v22 }
 0x121   : > { %v1172_v32 = vmul.f32 0.5, %v1171_v42  ;;  %v1163_v26 = vsub.f32 1.5, %v1162_v43  ;;  %vm1195_vm0 = vweird.f32 %v11556_v24 }
 0x122   : > { %v1332_v20 = vadd.f32 %v11395_v0, %v1309_v59  ;;  %v1012_v28 = vmul.f32 %v11602_v18, %v11602_v18 }
 0x123   : > { %v1173_v29 = vsub.f32 1.5, %v1172_v32  ;;  %v1164_v7 = vmul.f32 %v11520_v63, %v1163_v26 }
 0x124   : > { %v11566_v27 = vpop.eup %10279  ;;  %v1348_v13 = vpack.c.bf16 %v1332_v20, %v1331_v19 }
 0x125   : > { %v11568_v4 = vpop.eup %10281  ;;  %v1174_v21 = vmul.f32 %v11522_v23, %v1173_v29  ;;  %v1180_v30 = vmul.f32 %v11566_v27, %v11544_v56  ;;  %v1168_v62 = vsel %vm11577_vm12, %v11520_v63, %v1164_v7  ;;  %v1011_v63 = vmul.f32 %v11598_v14, %v11598_v14 }
 0x126   : > { %v1190_v40 = vmul.f32 %v11568_v4, %v11556_v24  ;;  %v1287_v15 = vmul.f32 %v1168_v62, %v1047_v1  ;;  %vm1186_vm15 = vweird.f32 %v11566_v27  ;;  %vm1196_vm1 = vweird.f32 %v11568_v4 }
 0x127   : > { %v1181_v11 = vmul.f32 %v11566_v27, %v1180_v30  ;;  %v1178_v12 = vsel %vm1177_vm13, %v11522_v23, %v1174_v21  ;;  %v946_v23 = vpop.xlane.xlu0 %945  ;;  %v1031_v42 = vsub.f32 %v991_v31, %v1011_v63  ;;  %vm1187_vm2 = vmor %vm1185_vm14, %vm1186_vm15  ;;  %v1049_v56 = vsub.f32 %v11263_v39, %v11514_v10  ;;  %v888_v30 = vpop.xlane.xlu1 %887 }
 0x128   : > { %1437 = vmatmul.bf16.gmra.mxu0 %v1347_v50  ;;  %1560 = vmatmul.bf16.gmra.mxu1 %v1347_v50  ;;  %v1191_v8 = vmul.f32 %v11568_v4, %v1190_v40  ;;  %v1288_v37 = vmul.f32 %v1178_v12, %v1048_v3  ;;  %v1310_v17 = vmul.f32 %v11380_v47, %v1287_v15  ;;  %v992_v46 = vmul.f32 0.03125, %v946_v23  ;;  %vm1197_vm3 = vmor %vm1195_vm0, %vm1196_vm1 }
 0x129   : > { %1683 = vmatmul.bf16.gmra.mxu2 %v1347_v50  ;;  %v1182_v36 = vmul.f32 0.5, %v1181_v11  ;;  %v1071_v53 = vadd.f32 1e-05, %v1031_v42  ;;  %v1050_v24 = vsub.f32 %v11268_v41, %v11518_v61 }
 0x12a   : > { %v1192_v38 = vmul.f32 0.5, %v1191_v8  ;;  %v1311_v25 = vmul.f32 %v11380_v47, %v1288_v37  ;;  %v1032_v6 = vsub.f32 %v992_v46, %v1012_v28  ;;  %v1333_v49 = vadd.f32 %v11395_v0, %v1310_v17  ;;  %v890_v8 = vpop.xlane.xlu2 %889 }
 0x12b   : > { %v1183_v48 = vsub.f32 1.5, %v1182_v36  ;;  %10283 = vrsqrt.f32 %v1071_v53  ;;  %vm1205_vm4 = vweird.f32 %v1071_v53  ;;  %v974_v15 = vmul.f32 0.03125, %v890_v8 }
 0x12c   : > { %v1193_v33 = vsub.f32 1.5, %v1192_v38  ;;  %v1334_v50 = vadd.f32 %v11395_v0, %v1311_v25  ;;  %v1072_v57 = vadd.f32 1e-05, %v1032_v6  ;;  %v1051_v37 = vsub.f32 %v11275_v44, %v11598_v14 }
 0x12d   : > { %v1184_v32 = vmul.f32 %v11566_v27, %v1183_v48  ;;  %v1052_v38 = vsub.f32 %v11278_v45, %v11602_v18  ;;  %v1014_v17 = vmul.f32 %v974_v15, %v974_v15 }
 0x12e   : > { %v1194_v43 = vmul.f32 %v11568_v4, %v1193_v33  ;;  %10285 = vrsqrt.f32 %v1072_v57  ;;  %v1349_v34 = vpack.c.bf16 %v1334_v50, %v1333_v49  ;;  %vm1215_vm6 = vweird.f32 %v1072_v57 }
 0x12f   : > { %v1188_v52 = vsel %vm1187_vm2, %v11566_v27, %v1184_v32  ;;  %v948_v36 = vpop.xlane.xlu0 %947  ;;  %v950_v58 = vpop.xlane.xlu1 %949 }
 0x130   : > { %v1198_v26 = vsel %vm1197_vm3, %v11568_v4, %v1194_v43  ;;  %v1289_v16 = vmul.f32 %v1188_v52, %v1049_v56  ;;  %v11624_v4 = vmul.f32 0.03125, %v888_v30  ;;  %v993_v22 = vmul.f32 0.03125, %v948_v36 }
 0x131   : > { %v10284_v29 = vpop.eup %10283  ;;  %v1290_v59 = vmul.f32 %v1198_v26, %v1050_v24  ;;  %v994_v23 = vmul.f32 0.03125, %v950_v58 }
 0x132   : > { %v1200_v35 = vmul.f32 %v10284_v29, %v1071_v53  ;;  %v1312_v10 = vmul.f32 %v11380_v47, %v1289_v16  ;;  %vm1206_vm5 = vweird.f32 %v10284_v29  ;;  %v892_v52 = vpop.xlane.xlu2 %891 }
 0x133   : > { %v1313_v41 = vmul.f32 %v11380_v47, %v1290_v59  ;;  %vm11628_vm8 = vmor %vm1205_vm4, %vm1206_vm5  ;;  %v1034_v46 = vsub.f32 %v994_v23, %v1014_v17 }
 0x134   : > { %v10286_v7 = vpop.eup %10285  ;;  %v1201_v40 = vmul.f32 %v10284_v29, %v1200_v35  ;;  %v1335_v1 = vadd.f32 %v11395_v0, %v1312_v10  ;;  %v11655_v10 = vmul.f32 0.03125, %v892_v52 }
 0x135   : > { %v1210_v21 = vmul.f32 %v10286_v7, %v1072_v57  ;;  %vm1216_vm7 = vweird.f32 %v10286_v7  ;;  %v1336_v2 = vadd.f32 %v11395_v0, %v1313_v41  ;;  %v1074_v14 = vadd.f32 1e-05, %v1034_v46 }
 0x136   : > { %v1202_v61 = vmul.f32 0.5, %v1201_v40  ;;  %vm11632_vm9 = vmor %vm1215_vm6, %vm1216_vm7 }
 0x137   : > { %v1211_v39 = vmul.f32 %v10286_v7, %v1210_v21  ;;  %v1350_v63 = vpack.c.bf16 %v1336_v2, %v1335_v1  ;;  %vm1235_vm12 = vweird.f32 %v1074_v14  ;;  %v1054_v21 = vsub.f32 %v11306_v5, %v974_v15 }
 0x138   : > { %1442 = vmatmul.bf16.gmra.mxu0 %v1348_v13  ;;  %1565 = vmatmul.bf16.gmra.mxu1 %v1348_v13  ;;  %v1203_v19 = vsub.f32 1.5, %v1202_v61  ;;  %v1015_v5 = vmul.f32 %v11655_v10, %v11655_v10 }
 0x139   : > { %1688 = vmatmul.bf16.gmra.mxu2 %v1348_v13  ;;  %v1212_v27 = vmul.f32 0.5, %v1211_v39  ;;  %v1013_v13 = vmul.f32 %v11624_v4, %v11624_v4 }
 0x13a   : > { %v1204_v3 = vmul.f32 %v10284_v29, %v1203_v19 }
 0x13b   : > { %v1213_v20 = vsub.f32 1.5, %v1212_v27  ;;  %v1033_v31 = vsub.f32 %v993_v22, %v1013_v13 }
 0x13c   : > { %v1208_v25 = vsel %vm11628_vm8, %v10284_v29, %v1204_v3 }
 0x13d   : > { %v1214_v11 = vmul.f32 %v10286_v7, %v1213_v20  ;;  %v1073_v44 = vadd.f32 1e-05, %v1033_v31  ;;  %v1291_v33 = vmul.f32 %v1208_v25, %v1051_v37 }
 0x13f   : > { %v1218_v28 = vsel %vm11632_vm9, %v10286_v7, %v1214_v11  ;;  %10287 = vrsqrt.f32 %v1073_v44  ;;  %v1314_v18 = vmul.f32 %v11380_v47, %v1291_v33  ;;  %vm1225_vm10 = vweird.f32 %v1073_v44 }
 0x140   : > { %v1292_v45 = vmul.f32 %v1218_v28, %v1052_v38  ;;  %10289 = vrsqrt.f32 %v1074_v14  ;;  %v1053_v7 = vsub.f32 %v11297_v60, %v11624_v4 }
 0x141   : > { %v1337_v6 = vadd.f32 %v11395_v0, %v1314_v18 }
 0x142   : > { %v1315_v48 = vmul.f32 %v11380_v47, %v1292_v45 }
 0x144   : > { %v1338_v49 = vadd.f32 %v11395_v0, %v1315_v48 }
 0x145   : > { %v10288_v42 = vpop.eup %10287 }
 0x146   : > { %v10290_v50 = vpop.eup %10289  ;;  %v1220_v53 = vmul.f32 %v10288_v42, %v1073_v44  ;;  %v1351_v43 = vpack.c.bf16 %v1338_v49, %v1337_v6  ;;  %vm1226_vm11 = vweird.f32 %v10288_v42 }
 0x147   : > { %v1230_v57 = vmul.f32 %v10290_v50, %v1074_v14  ;;  %vm1236_vm13 = vweird.f32 %v10290_v50  ;;  %vm1227_vm14 = vmor %vm1225_vm10, %vm1226_vm11 }
 0x148   : > { %1447 = vmatmul.bf16.gmra.mxu0 %v1349_v34  ;;  %1570 = vmatmul.bf16.gmra.mxu1 %v1349_v34  ;;  %v1221_v32 = vmul.f32 %v10288_v42, %v1220_v53  ;;  %vm1237_vm15 = vmor %vm1235_vm12, %vm1236_vm13  ;;  %vm2988_vm12 = vcmask 130048   ;;  %vm3597_vm13 = vcmask 36864  }
 0x149   : > { %1693 = vmatmul.bf16.gmra.mxu2 %v1349_v34  ;;  %v1231_v56 = vmul.f32 %v10290_v50, %v1230_v57 }
 0x14a   : > { %v1222_v24 = vmul.f32 0.5, %v1221_v32 }
 0x14b   : > { %v1232_v34 = vmul.f32 0.5, %v1231_v56 }
 0x14c   : > { %v1223_v26 = vsub.f32 1.5, %v1222_v24 }
 0x14d   : > { %v1233_v29 = vsub.f32 1.5, %v1232_v34 }
 0x14e   : > { %v1224_v16 = vmul.f32 %v10288_v42, %v1223_v26 }
 0x14f   : > { %v1234_v59 = vmul.f32 %v10290_v50, %v1233_v29  ;;  %v1055_v29 = vsub.f32 %v11335_v51, %v11655_v10 }
 0x150   : > { %v1228_v30 = vsel %vm1227_vm14, %v10288_v42, %v1224_v16  ;;  %vm3986_vm14 = vcmask 1041408  }
 0x151   : > { %v1238_v39 = vsel %vm1237_vm15, %v10290_v50, %v1234_v59  ;;  %v1293_v61 = vmul.f32 %v1228_v30, %v1053_v7  ;;  %vm3987_vm15 = vcmask 1042432  }
 0x152   : > { %v1294_v19 = vmul.f32 %v1238_v39, %v1054_v21 }
 0x153   : > { %v1316_v20 = vmul.f32 %v11380_v47, %v1293_v61 }
 0x154   : > { %v894_v35 = vpop.xlane.xlu0 %893  ;;  %v1317_v4 = vmul.f32 %v11380_v47, %v1294_v19 }
 0x155   : > { %v11653_v40 = vmul.f32 0.03125, %v894_v35  ;;  %v1339_v3 = vadd.f32 %v11395_v0, %v1316_v20 }
 0x156   : > { %v954_v41 = vpop.xlane.xlu2 %953  ;;  %v1340_v62 = vadd.f32 %v11395_v0, %v1317_v4 }
 0x157   : > { %v952_v27 = vpop.xlane.xlu1 %951  ;;  %v1016_v1 = vmul.f32 %v11653_v40, %v11653_v40  ;;  %v996_v60 = vmul.f32 0.03125, %v954_v41  ;;  %v1056_v16 = vsub.f32 %v11350_v9, %v11653_v40 }
 0x158   : > { %1452 = vmatmul.bf16.gmra.mxu0 %v1350_v63  ;;  %1575 = vmatmul.bf16.gmra.mxu1 %v1350_v63  ;;  %v995_v2 = vmul.f32 0.03125, %v952_v27  ;;  %v1352_v11 = vpack.c.bf16 %v1340_v62, %v1339_v3 }
 0x159   : > { %1698 = vmatmul.bf16.gmra.mxu2 %v1350_v63  ;;  %v1036_v8 = vsub.f32 %v996_v60, %v1016_v1 }
 0x15a   : > { %v1035_v12 = vsub.f32 %v995_v2, %v1015_v5 }
 0x15b   : > { %v1076_v13 = vadd.f32 1e-05, %v1036_v8 }
 0x15c   : > { %v1075_v15 = vadd.f32 1e-05, %v1035_v12 }
 0x15d   : > { %10291 = vrsqrt.f32 %v1076_v13  ;;  %vm1255_vm0 = vweird.f32 %v1076_v13 }
 0x15e   : > { %10293 = vrsqrt.f32 %v1075_v15  ;;  %vm1245_vm2 = vweird.f32 %v1075_v15 }
 0x163   : > { %v10292_v17 = vpop.eup %10291 }
 0x164   : > { %v10294_v22 = vpop.eup %10293  ;;  %v1250_v23 = vmul.f32 %v10292_v17, %v1076_v13  ;;  %vm1256_vm1 = vweird.f32 %v10292_v17 }
 0x165   : > { %v1240_v25 = vmul.f32 %v10294_v22, %v1075_v15  ;;  %vm1246_vm3 = vweird.f32 %v10294_v22  ;;  %vm11704_vm4 = vmor %vm1255_vm0, %vm1256_vm1  ;;  %vm3982_vm0 = vcmask 39936  }
 0x166   : > { %v1251_v45 = vmul.f32 %v10292_v17, %v1250_v23  ;;  %vm1247_vm5 = vmor %vm1245_vm2, %vm1246_vm3 }
 0x167   : > { %v1241_v18 = vmul.f32 %v10294_v22, %v1240_v25 }
 0x168   : > { %1457 = vmatmul.bf16.gmra.mxu0 %v1351_v43  ;;  %1580 = vmatmul.bf16.gmra.mxu1 %v1351_v43  ;;  %v1252_v48 = vmul.f32 0.5, %v1251_v45 }
 0x169   : > { %1703 = vmatmul.bf16.gmra.mxu2 %v1351_v43  ;;  %v1242_v42 = vmul.f32 0.5, %v1241_v18 }
 0x16a   : > { %v1253_v6 = vsub.f32 1.5, %v1252_v48 }
 0x16b   : > { %v1243_v49 = vsub.f32 1.5, %v1242_v42 }
 0x16c   : > { %v1254_v56 = vmul.f32 %v10292_v17, %v1253_v6 }
 0x16d   : > { %v1244_v34 = vmul.f32 %v10294_v22, %v1243_v49 }
 0x16e   : > { %v1258_v7 = vsel %vm11704_vm4, %v10292_v17, %v1254_v56 }
 0x16f   : > { %v1248_v59 = vsel %vm1247_vm5, %v10294_v22, %v1244_v34  ;;  %v1296_v41 = vmul.f32 %v1258_v7, %v1056_v16 }
 0x170   : > { %v1295_v39 = vmul.f32 %v1248_v59, %v1055_v29 }
 0x171   : > { %v1319_v60 = vmul.f32 %v11380_v47, %v1296_v41 }
 0x172   : > { %v1318_v1 = vmul.f32 %v11380_v47, %v1295_v39 }
 0x174   : > { %v1341_v62 = vadd.f32 %v11395_v0, %v1318_v1 }
 0x175   : > { %v896_v32 = vpop.xlane.xlu0 %895 }
 0x176   : > { %v898_v35 = vpop.xlane.xlu1 %897  ;;  %v11726_v30 = vmul.f32 0.03125, %v896_v32 }
 0x177   : > { %v11728_v61 = vmul.f32 0.03125, %v898_v35  ;;  %v956_v51 = vpop.xlane.xlu2 %955 }
 0x178   : > { %1462 = vmatmul.bf16.gmra.mxu0 %v1352_v11  ;;  %1585 = vmatmul.bf16.gmra.mxu1 %v1352_v11  ;;  %v1017_v19 = vmul.f32 %v11726_v30, %v11726_v30  ;;  %v997_v20 = vmul.f32 0.03125, %v956_v51 }
 0x179   : > { %1708 = vmatmul.bf16.gmra.mxu2 %v1352_v11  ;;  %v1018_v5 = vmul.f32 %v11728_v61, %v11728_v61  ;;  %v1342_v11 = vadd.f32 %v11395_v0, %v1319_v60 }
 0x17a   : > { %v1037_v8 = vsub.f32 %v997_v20, %v1017_v19 }
 0x17b   : > { %v1353_v13 = vpack.c.bf16 %v1342_v11, %v1341_v62  ;;  %v1057_v11 = vsub.f32 %v11449_v54, %v11726_v30 }
 0x17c   : > { %v1077_v15 = vadd.f32 1e-05, %v1037_v8 }
 0x17e   : > { %v958_v9 = vpop.xlane.xlu0 %957  ;;  %10295 = vrsqrt.f32 %v1077_v15  ;;  %vm1265_vm6 = vweird.f32 %v1077_v15 }
 0x17f   : > { %v998_v2 = vmul.f32 0.03125, %v958_v9 }
 0x181   : > { %v1038_v12 = vsub.f32 %v998_v2, %v1018_v5 }
 0x183   : > { %v1078_v17 = vadd.f32 1e-05, %v1038_v12  ;;  %v1058_v12 = vsub.f32 %v11451_v55, %v11728_v61 }
 0x184   : > { %v10296_v42 = vpop.eup %10295 }
 0x185   : > { %v11665_v37 = vpop.f32.mrf.mxu0  ;;  %10297 = vrsqrt.f32 %v1078_v17  ;;  %v1260_v32 = vmul.f32 %v10296_v42, %v1077_v15  ;;  %vm1266_vm7 = vweird.f32 %v10296_v42  ;;  %vm1275_vm8 = vweird.f32 %v1078_v17 }
 0x186   : > { %v16855_v38 = vrot.slane %v11665_v37, 1  ;;  %v16854_v36 = vrot.slane %v11665_v37, 2  ;;  %v16848_v58 = vrot.slane %v11665_v37, 3  ;;  %1888 = vst [vmem:[#allocation1] ss:$9 sm:$0xff] %v11665_v37  ;;  %v16843_v63 = vrot.slane %v11665_v37, 4  ;;  %vm1267_vm10 = vmor %vm1265_vm6, %vm1266_vm7 }
 0x187   : > { %v16842_v31 = vrot.slane %v11665_v37, 5  ;;  %v16837_v46 = vrot.slane %v11665_v37, 6  ;;  %v16836_v14 = vrot.slane %v11665_v37, 7  ;;  %v1261_v7 = vmul.f32 %v10296_v42, %v1260_v32 }
 0x188   : > { %1890 = vst [vmem:[#allocation1 + $0x1] ss:$9 sm:$0xff] %v16855_v38  ;;  %1467 = vmatmul.bf16.gmra.mxu0 %v1353_v13  ;;  %1590 = vmatmul.bf16.gmra.mxu1 %v1353_v13 }
 0x189   : > { %1892 = vst [vmem:[#allocation1 + $0x2] ss:$9 sm:$0xff] %v16854_v36  ;;  %1713 = vmatmul.bf16.gmra.mxu2 %v1353_v13  ;;  %v1262_v39 = vmul.f32 0.5, %v1261_v7 }
 0x18a   : > { %1894 = vst [vmem:[#allocation1 + $0x3] ss:$9 sm:$0xff] %v16848_v58 }
 0x18b   : > { %1896 = vst [vmem:[#allocation1 + $0x4] ss:$9 sm:$0xff] %v16843_v63  ;;  %v10298_v6 = vpop.eup %10297  ;;  %v1263_v9 = vsub.f32 1.5, %v1262_v39 }
 0x18c   : > { %v1270_v56 = vmul.f32 %v10298_v6, %v1078_v17  ;;  %vm1276_vm9 = vweird.f32 %v10298_v6 }
 0x18d   : > { %v11680_v28 = vpop.f32.mrf.mxu0  ;;  %v1264_v2 = vmul.f32 %v10296_v42, %v1263_v9  ;;  %vm1277_vm11 = vmor %vm1275_vm8, %vm1276_vm9 }
 0x18e   : > { %v16832_v33 = vrot.slane %v11680_v28, 1  ;;  %v16825_v50 = vrot.slane %v11680_v28, 2  ;;  %v16823_v53 = vrot.slane %v11680_v28, 3  ;;  %v16819_v43 = vrot.slane %v11680_v28, 4 }
 0x18f   : > { %v16814_v52 = vrot.slane %v11680_v28, 5  ;;  %v16813_v26 = vrot.slane %v11680_v28, 6  ;;  %v16808_v10 = vrot.slane %v11680_v28, 7  ;;  %v1271_v35 = vmul.f32 %v10298_v6, %v1270_v56 }
 0x190   : > { %v1268_v13 = vsel %vm1267_vm10, %v10296_v42, %v1264_v2 }
 0x191   : > { %v1272_v41 = vmul.f32 0.5, %v1271_v35  ;;  %v1297_v17 = vmul.f32 %v1268_v13, %v1057_v11 }
 0x192   : > { %v11684_v44 = vld [vmem:[#allocation1] sm:$0xff] }
 0x193   : > { %1898 = vst [vmem:[#allocation1] ss:$9 sm:$0xff] %v16842_v31  ;;  %v1273_v19 = vsub.f32 1.5, %v1272_v41  ;;  %v1320_v7 = vmul.f32 %v11380_v47, %v1297_v17 }
 0x194   : > { %1899 = vst [vmem:[#allocation1 + $0x1] ss:$9 sm:$0xff] %v16837_v46 }
 0x195   : > { %1900 = vst [vmem:[#allocation1 + $0x2] ss:$9 sm:$0xff] %v16836_v14  ;;  %v11724_v21 = vpop.f32.mrf.mxu0  ;;  %v1274_v62 = vmul.f32 %v10298_v6, %v1273_v19  ;;  %v1343_v55 = vadd.f32 %v11395_v0, %v1320_v7 }
 0x196   : > { %1901 = vst [vmem:[#allocation1 + $0x3] ss:$9 sm:$0xff] %v11680_v28  ;;  %v16806_v27 = vrot.slane %v11724_v21, 1  ;;  %v16803_v4 = vrot.slane %v11724_v21, 2  ;;  %v16795_v3 = vrot.slane %v11724_v21, 3  ;;  %v16794_v22 = vrot.slane %v11724_v21, 4 }
 0x197   : > { %1902 = vst [vmem:[#allocation1 + $0x4] ss:$9 sm:$0xff] %v16832_v33  ;;  %v16789_v23 = vrot.slane %v11724_v21, 5  ;;  %v16787_v45 = vrot.slane %v11724_v21, 6  ;;  %v16784_v18 = vrot.slane %v11724_v21, 7  ;;  %v1278_v15 = vsel %vm1277_vm11, %v10298_v6, %v1274_v62 }
 0x198   : > { %v1298_v32 = vmul.f32 %v1278_v15, %v1058_v12 }
 0x19a   : > { %v1321_v54 = vmul.f32 %v11380_v47, %v1298_v32 }
 0x19c   : > { %v1344_v42 = vadd.f32 %v11395_v0, %v1321_v54 }
 0x19d   : > { %v11767_v48 = vpop.f32.mrf.mxu0 }
 0x19e   : > { %v11699_v57 = vld [vmem:[#allocation1] sm:$0xff]  ;;  %17285 = vst [vmem:[#allocation21_spill] sm:$0xff] %v11767_v48  ;;  %v16782_v49 = vrot.slane %v11767_v48, 1  ;;  %v16776_v24 = vrot.slane %v11767_v48, 2  ;;  %v16771_v29 = vrot.slane %v11767_v48, 3  ;;  %v16766_v16 = vrot.slane %v11767_v48, 4 }
 0x19f   : > { %1904 = vst [vmem:[#allocation1] ss:$9 sm:$0xff] %v16825_v50  ;;  %v16765_v59 = vrot.slane %v11767_v48, 5  ;;  %v16760_v51 = vrot.slane %v11767_v48, 6  ;;  %v16757_v1 = vrot.slane %v11767_v48, 7  ;;  %v1354_v47 = vpack.c.bf16 %v1344_v42, %v1343_v55 }
 0x1a0   : > { %1905 = vst [vmem:[#allocation1 + $0x1] ss:$9 sm:$0xff] %v16823_v53 }
 0x1a1   : > { %1906 = vst [vmem:[#allocation1 + $0x2] ss:$9 sm:$0xff] %v16819_v43  ;;  %1472 = vmatmul.bf16.gmra.mxu0 %v1354_v47  ;;  %1595 = vmatmul.bf16.gmra.mxu1 %v1354_v47 }
 0x1a2   : > { %1907 = vst [vmem:[#allocation1 + $0x3] ss:$9 sm:$0xff] %v16814_v52  ;;  %1718 = vmatmul.bf16.gmra.mxu2 %v1354_v47 }
 0x1a3   : > { %1908 = vst [vmem:[#allocation1 + $0x4] ss:$9 sm:$0xff] %v16813_v26 }
 0x1a5   : > { %v11788_v20 = vpop.f32.mrf.mxu0 }
 0x1a6   : > { %17286 = vst [vmem:[#allocation22_spill] sm:$0xff] %v11788_v20  ;;  %v16752_v5 = vrot.slane %v11788_v20, 1  ;;  %v16747_v8 = vrot.slane %v11788_v20, 2  ;;  %v16741_v56 = vrot.slane %v11788_v20, 4  ;;  %v16740_v35 = vrot.slane %v11788_v20, 5 }
 0x1a7   : > { %v16736_v30 = vrot.slane %v11788_v20, 6  ;;  %v16729_v61 = vrot.slane %v11788_v20, 7  ;;  %v16746_v6 = vrot.slane %v11788_v20, 3 }
 0x1aa   : > { %v11731_v40 = vld [vmem:[#allocation1] sm:$0xff] }
 0x1ab   : > { %1910 = vst [vmem:[#allocation1] ss:$9 sm:$0xff] %v16808_v10 }
 0x1ac   : > { %1911 = vst [vmem:[#allocation1 + $0x1] ss:$9 sm:$0xff] %v11724_v21 }
 0x1ad   : > { %1912 = vst [vmem:[#allocation1 + $0x2] ss:$9 sm:$0xff] %v16806_v27  ;;  %v11829_v41 = vpop.f32.mrf.mxu0 }
 0x1ae   : > { %1913 = vst [vmem:[#allocation1 + $0x3] ss:$9 sm:$0xff] %v16803_v4  ;;  %v16727_v9 = vrot.slane %v11829_v41, 1  ;;  %v16723_v19 = vrot.slane %v11829_v41, 2  ;;  %v16718_v2 = vrot.slane %v11829_v41, 3  ;;  %v16717_v62 = vrot.slane %v11829_v41, 4 }
 0x1af   : > { %1914 = vst [vmem:[#allocation1 + $0x4] ss:$9 sm:$0xff] %v16795_v3  ;;  %v16712_v11 = vrot.slane %v11829_v41, 5  ;;  %v16710_v12 = vrot.slane %v11829_v41, 6  ;;  %v16707_v17 = vrot.slane %v11829_v41, 7 }
 0x1b0   : > { %17287 = vst [vmem:[#allocation23_spill] sm:$0xff] %v11829_v41 }
 0x1b5   : > { %v11850_v15 = vpop.f32.mrf.mxu0 }
 0x1b6   : > { %v11755_v25 = vld [vmem:[#allocation1] sm:$0xff]  ;;  %17288 = vst [vmem:[#allocation24_spill] sm:$0xff] %v11850_v15  ;;  %v16708_v32 = vrot.slane %v11850_v15, 1  ;;  %v16709_v7 = vrot.slane %v11850_v15, 2  ;;  %v16711_v54 = vrot.slane %v11850_v15, 3  ;;  %v16716_v42 = vrot.slane %v11850_v15, 4 }
 0x1b7   : > { %1916 = vst [vmem:[#allocation1] ss:$9 sm:$0xff] %v16794_v22  ;;  %v16713_v47 = vrot.slane %v11850_v15, 5 }
 0x1b8   : > { %1917 = vst [vmem:[#allocation1 + $0x1] ss:$9 sm:$0xff] %v16789_v23 }
 0x1b9   : > { %1918 = vst [vmem:[#allocation1 + $0x2] ss:$9 sm:$0xff] %v16787_v45 }
 0x1ba   : > { %1919 = vst [vmem:[#allocation1 + $0x3] ss:$9 sm:$0xff] %v16784_v18 }
 0x1bb   : > { %1920 = vst [vmem:[#allocation1 + $0x4] ss:$9 sm:$0xff] %v11767_v48 }
 0x1c2   : > { %v11772_v34 = vld [vmem:[#allocation1] sm:$0xff] }
 0x1c3   : > { %1922 = vst [vmem:[#allocation1] ss:$9 sm:$0xff] %v16782_v49 }
 0x1c4   : > { %1923 = vst [vmem:[#allocation1 + $0x1] ss:$9 sm:$0xff] %v16776_v24 }
 0x1c5   : > { %1924 = vst [vmem:[#allocation1 + $0x2] ss:$9 sm:$0xff] %v16771_v29 }
 0x1c6   : > { %1925 = vst [vmem:[#allocation1 + $0x3] ss:$9 sm:$0xff] %v16766_v16 }
 0x1c7   : > { %1926 = vst [vmem:[#allocation1 + $0x4] ss:$9 sm:$0xff] %v16765_v59 }
 0x1ce   : > { %v11791_v60 = vld [vmem:[#allocation1] sm:$0xff] }
 0x1cf   : > { %1928 = vst [vmem:[#allocation1] ss:$9 sm:$0xff] %v16760_v51 }
 0x1d0   : > { %1929 = vst [vmem:[#allocation1 + $0x1] ss:$9 sm:$0xff] %v16757_v1 }
 0x1d1   : > { %1930 = vst [vmem:[#allocation1 + $0x2] ss:$9 sm:$0xff] %v11788_v20 }
 0x1d2   : > { %1931 = vst [vmem:[#allocation1 + $0x3] ss:$9 sm:$0xff] %v16752_v5 }
 0x1d3   : > { %1932 = vst [vmem:[#allocation1 + $0x4] ss:$9 sm:$0xff] %v16747_v8 }
 0x1da   : > { %v11811_v39 = vld [vmem:[#allocation1] sm:$0xff] }
 0x1db   : > { %1935 = vst [vmem:[#allocation1 + $0x1] ss:$9 sm:$0xff] %v16741_v56 }
 0x1dc   : > { %1936 = vst [vmem:[#allocation1 + $0x2] ss:$9 sm:$0xff] %v16740_v35 }
 0x1dd   : > { %1937 = vst [vmem:[#allocation1 + $0x3] ss:$9 sm:$0xff] %v16736_v30 }
 0x1de   : > { %1938 = vst [vmem:[#allocation1 + $0x4] ss:$9 sm:$0xff] %v16729_v61 }
 0x1df   : > { %1934 = vst [vmem:[#allocation1] ss:$9 sm:$0xff] %v16746_v6 }
 0x1e6   : > { %v11832_v0 = vld [vmem:[#allocation1] sm:$0xff] }
 0x1e7   : > { %1940 = vst [vmem:[#allocation1] ss:$9 sm:$0xff] %v11829_v41 }
 0x1e8   : > { %1941 = vst [vmem:[#allocation1 + $0x1] ss:$9 sm:$0xff] %v16727_v9 }
 0x1e9   : > { %1942 = vst [vmem:[#allocation1 + $0x2] ss:$9 sm:$0xff] %v16723_v19 }
 0x1ea   : > { %1943 = vst [vmem:[#allocation1 + $0x3] ss:$9 sm:$0xff] %v16718_v2 }
 0x1eb   : > { %1944 = vst [vmem:[#allocation1 + $0x4] ss:$9 sm:$0xff] %v16717_v62 }
 0x1f2   : > { %v11848_v13 = vld [vmem:[#allocation1] sm:$0xff] }
 0x1f3   : > { %1946 = vst [vmem:[#allocation1] ss:$9 sm:$0xff] %v16712_v11 }
 0x1f4   : > { %1947 = vst [vmem:[#allocation1 + $0x1] ss:$9 sm:$0xff] %v16710_v12 }
 0x1f5   : > { %1948 = vst [vmem:[#allocation1 + $0x2] ss:$9 sm:$0xff] %v16707_v17  ;;  %v16714_v17 = vrot.slane %v11850_v15, 6 }
 0x1f6   : > { %1949 = vst [vmem:[#allocation1 + $0x3] ss:$9 sm:$0xff] %v11850_v15 }
 0x1f7   : > { %1950 = vst [vmem:[#allocation1 + $0x4] ss:$9 sm:$0xff] %v16708_v32  ;;  %v11880_v32 = vpop.f32.mrf.mxu0 }
 0x1f8   : > { %17289 = vst [vmem:[#allocation25_spill] sm:$0xff] %v11880_v32  ;;  %v16720_v11 = vrot.slane %v11880_v32, 2  ;;  %v16724_v62 = vrot.slane %v11880_v32, 6  ;;  %v16725_v2 = vrot.slane %v11880_v32, 7 }
 0x1fe   : > { %v11865_v55 = vld [vmem:[#allocation1] sm:$0xff] }
 0x1ff   : > { %1952 = vst [vmem:[#allocation1] ss:$9 sm:$0xff] %v16709_v7  ;;  %v16715_v7 = vrot.slane %v11850_v15, 7 }
 0x200   : > { %1953 = vst [vmem:[#allocation1 + $0x1] ss:$9 sm:$0xff] %v16711_v54  ;;  %v16721_v54 = vrot.slane %v11880_v32, 1 }
 0x201   : > { %1954 = vst [vmem:[#allocation1 + $0x2] ss:$9 sm:$0xff] %v16716_v42 }
 0x202   : > { %1955 = vst [vmem:[#allocation1 + $0x3] ss:$9 sm:$0xff] %v16713_v47  ;;  %v16719_v47 = vrot.slane %v11880_v32, 3 }
 0x203   : > { %1956 = vst [vmem:[#allocation1 + $0x4] ss:$9 sm:$0xff] %v16714_v17  ;;  %v16722_v17 = vrot.slane %v11880_v32, 4 }
 0x20a   : > { %v11883_v12 = vld [vmem:[#allocation1] sm:$0xff] }
 0x20b   : > { %1958 = vst [vmem:[#allocation1] ss:$9 sm:$0xff] %v16715_v7  ;;  %v16726_v7 = vrot.slane %v11880_v32, 5 }
 0x20c   : > { %1959 = vst [vmem:[#allocation1 + $0x1] ss:$9 sm:$0xff] %v11880_v32 }
 0x20d   : > { %1960 = vst [vmem:[#allocation1 + $0x2] ss:$9 sm:$0xff] %v16721_v54 }
 0x20e   : > { %1961 = vst [vmem:[#allocation1 + $0x3] ss:$9 sm:$0xff] %v16720_v11 }
 0x20f   : > { %1962 = vst [vmem:[#allocation1 + $0x4] ss:$9 sm:$0xff] %v16719_v47  ;;  %v11911_v47 = vpop.f32.mrf.mxu0 }
 0x210   : > { %17290 = vst [vmem:[#allocation26_spill] sm:$0xff] %v11911_v47  ;;  %v16728_v11 = vrot.slane %v11911_v47, 1  ;;  %v16733_v54 = vrot.slane %v11911_v47, 2  ;;  %v16730_v19 = vrot.slane %v11911_v47, 3 }
 0x216   : > { %v11899_v42 = vld [vmem:[#allocation1] sm:$0xff] }
 0x217   : > { %1964 = vst [vmem:[#allocation1] ss:$9 sm:$0xff] %v16722_v17  ;;  %v11932_v9 = vpop.f32.mrf.mxu0 }
 0x218   : > { %1965 = vst [vmem:[#allocation1 + $0x1] ss:$9 sm:$0xff] %v16726_v7  ;;  %v16734_v7 = vrot.slane %v11911_v47, 6  ;;  %v16743_v30 = vrot.slane %v11932_v9, 7 }
 0x219   : > { %1966 = vst [vmem:[#allocation1 + $0x2] ss:$9 sm:$0xff] %v16724_v62  ;;  %v16731_v62 = vrot.slane %v11911_v47, 4 }
 0x21a   : > { %1967 = vst [vmem:[#allocation1 + $0x3] ss:$9 sm:$0xff] %v16725_v2  ;;  %v16732_v2 = vrot.slane %v11911_v47, 5 }
 0x21b   : > { %1968 = vst [vmem:[#allocation1 + $0x4] ss:$9 sm:$0xff] %v11911_v47 }
 0x21c   : > { %17291 = vst [vmem:[#allocation27_spill] sm:$0xff] %v11932_v9 }
 0x222   : > { %v11916_v17 = vld [vmem:[#allocation1] sm:$0xff] }
 0x223   : > { %1970 = vst [vmem:[#allocation1] ss:$9 sm:$0xff] %v16728_v11  ;;  %v16735_v11 = vrot.slane %v11911_v47, 7 }
 0x224   : > { %1971 = vst [vmem:[#allocation1 + $0x1] ss:$9 sm:$0xff] %v16733_v54  ;;  %v16742_v54 = vrot.slane %v11932_v9, 5 }
 0x225   : > { %1972 = vst [vmem:[#allocation1 + $0x2] ss:$9 sm:$0xff] %v16730_v19  ;;  %v16737_v19 = vrot.slane %v11932_v9, 1 }
 0x226   : > { %1973 = vst [vmem:[#allocation1 + $0x3] ss:$9 sm:$0xff] %v16731_v62  ;;  %v16738_v62 = vrot.slane %v11932_v9, 2 }
 0x227   : > { %1974 = vst [vmem:[#allocation1 + $0x4] ss:$9 sm:$0xff] %v16732_v2  ;;  %v16739_v2 = vrot.slane %v11932_v9, 4 }
 0x22e   : > { %v11935_v61 = vld [vmem:[#allocation1] sm:$0xff] }
 0x22f   : > { %1976 = vst [vmem:[#allocation1] ss:$9 sm:$0xff] %v16734_v7 }
 0x230   : > { %1977 = vst [vmem:[#allocation1 + $0x1] ss:$9 sm:$0xff] %v16735_v11  ;;  %v16744_v11 = vrot.slane %v11932_v9, 6 }
 0x231   : > { %1978 = vst [vmem:[#allocation1 + $0x2] ss:$9 sm:$0xff] %v11932_v9 }
 0x232   : > { %1979 = vst [vmem:[#allocation1 + $0x3] ss:$9 sm:$0xff] %v16737_v19  ;;  %v16745_v19 = vrot.slane %v11932_v9, 3 }
 0x233   : > { %1980 = vst [vmem:[#allocation1 + $0x4] ss:$9 sm:$0xff] %v16738_v62  ;;  %v11965_v62 = vpop.f32.mrf.mxu0 }
 0x234   : > { %17292 = vst [vmem:[#allocation28_spill] sm:$0xff] %v11965_v62  ;;  %v16751_v56 = vrot.slane %v11965_v62, 2 }
 0x23a   : > { %v11950_v7 = vld [vmem:[#allocation1] sm:$0xff] }
 0x23b   : > { %1983 = vst [vmem:[#allocation1 + $0x1] ss:$9 sm:$0xff] %v16739_v2  ;;  %v16748_v2 = vrot.slane %v11965_v62, 1  ;;  %v11986_v8 = vpop.f32.mrf.mxu0 }
 0x23c   : > { %1984 = vst [vmem:[#allocation1 + $0x2] ss:$9 sm:$0xff] %v16742_v54  ;;  %v16750_v54 = vrot.slane %v11965_v62, 3 }
 0x23d   : > { %1985 = vst [vmem:[#allocation1 + $0x3] ss:$9 sm:$0xff] %v16744_v11  ;;  %v16753_v11 = vrot.slane %v11965_v62, 5 }
 0x23e   : > { %1986 = vst [vmem:[#allocation1 + $0x4] ss:$9 sm:$0xff] %v16743_v30  ;;  %v16749_v30 = vrot.slane %v11965_v62, 4 }
 0x23f   : > { %1982 = vst [vmem:[#allocation1] ss:$9 sm:$0xff] %v16745_v19  ;;  %v16755_v19 = vrot.slane %v11965_v62, 6 }
 0x240   : > { %17293 = vst [vmem:[#allocation29_spill] sm:$0xff] %v11986_v8 }
 0x246   : > { %v11968_v35 = vld [vmem:[#allocation1] sm:$0xff] }
 0x247   : > { %1988 = vst [vmem:[#allocation1] ss:$9 sm:$0xff] %v11965_v62 }
 0x248   : > { %1989 = vst [vmem:[#allocation1 + $0x1] ss:$9 sm:$0xff] %v16748_v2  ;;  %v16754_v2 = vrot.slane %v11965_v62, 7 }
 0x249   : > { %1990 = vst [vmem:[#allocation1 + $0x2] ss:$9 sm:$0xff] %v16751_v56  ;;  %v16759_v56 = vrot.slane %v11986_v8, 3 }
 0x24a   : > { %1991 = vst [vmem:[#allocation1 + $0x3] ss:$9 sm:$0xff] %v16750_v54  ;;  %v16758_v54 = vrot.slane %v11986_v8, 2 }
 0x24b   : > { %1992 = vst [vmem:[#allocation1 + $0x4] ss:$9 sm:$0xff] %v16749_v30  ;;  %v16756_v30 = vrot.slane %v11986_v8, 1 }
 0x252   : > { %v11984_v6 = vld [vmem:[#allocation1] sm:$0xff] }
 0x253   : > { %1994 = vst [vmem:[#allocation1] ss:$9 sm:$0xff] %v16753_v11  ;;  %v16764_v11 = vrot.slane %v11986_v8, 4 }
 0x254   : > { %1995 = vst [vmem:[#allocation1 + $0x1] ss:$9 sm:$0xff] %v16755_v19  ;;  %v16762_v19 = vrot.slane %v11986_v8, 6 }
 0x255   : > { %1996 = vst [vmem:[#allocation1 + $0x2] ss:$9 sm:$0xff] %v16754_v2  ;;  %v16761_v2 = vrot.slane %v11986_v8, 5 }
 0x256   : > { %1997 = vst [vmem:[#allocation1 + $0x3] ss:$9 sm:$0xff] %v11986_v8 }
 0x257   : > { %1998 = vst [vmem:[#allocation1 + $0x4] ss:$9 sm:$0xff] %v16756_v30  ;;  %v16763_v30 = vrot.slane %v11986_v8, 7 }
 0x25e   : > { %v12001_v5 = vld [vmem:[#allocation1] sm:$0xff] }
 0x25f   : > { %2000 = vst [vmem:[#allocation1] ss:$9 sm:$0xff] %v16758_v54  ;;  %v12019_v54 = vpop.f32.mrf.mxu0 }
 0x260   : > { %2001 = vst [vmem:[#allocation1 + $0x1] ss:$9 sm:$0xff] %v16759_v56  ;;  %v16769_v56 = vrot.slane %v12019_v54, 1  ;;  %v16768_v51 = vrot.slane %v12019_v54, 2  ;;  %v16772_v59 = vrot.slane %v12019_v54, 6  ;;  %v16773_v16 = vrot.slane %v12019_v54, 7 }
 0x261   : > { %2002 = vst [vmem:[#allocation1 + $0x2] ss:$9 sm:$0xff] %v16764_v11 }
 0x262   : > { %2003 = vst [vmem:[#allocation1 + $0x3] ss:$9 sm:$0xff] %v16761_v2  ;;  %v16767_v2 = vrot.slane %v12019_v54, 3 }
 0x263   : > { %2004 = vst [vmem:[#allocation1 + $0x4] ss:$9 sm:$0xff] %v16762_v19  ;;  %v16770_v19 = vrot.slane %v12019_v54, 4 }
 0x264   : > { %17294 = vst [vmem:[#allocation30_spill] sm:$0xff] %v12019_v54 }
 0x26a   : > { %v12017_v1 = vld [vmem:[#allocation1] sm:$0xff] }
 0x26b   : > { %2006 = vst [vmem:[#allocation1] ss:$9 sm:$0xff] %v16763_v30  ;;  %v16774_v30 = vrot.slane %v12019_v54, 5 }
 0x26c   : > { %2007 = vst [vmem:[#allocation1 + $0x1] ss:$9 sm:$0xff] %v12019_v54 }
 0x26d   : > { %2008 = vst [vmem:[#allocation1 + $0x2] ss:$9 sm:$0xff] %v16769_v56 }
 0x26e   : > { %2009 = vst [vmem:[#allocation1 + $0x3] ss:$9 sm:$0xff] %v16768_v51 }
 0x26f   : > { %2010 = vst [vmem:[#allocation1 + $0x4] ss:$9 sm:$0xff] %v16767_v2  ;;  %v12047_v2 = vpop.f32.mrf.mxu0 }
 0x270   : > { %17295 = vst [vmem:[#allocation31_spill] sm:$0xff] %v12047_v2  ;;  %v16775_v51 = vrot.slane %v12047_v2, 1  ;;  %v16777_v56 = vrot.slane %v12047_v2, 2  ;;  %v16778_v29 = vrot.slane %v12047_v2, 3 }
 0x276   : > { %v12035_v11 = vld [vmem:[#allocation1] sm:$0xff] }
 0x277   : > { %2012 = vst [vmem:[#allocation1] ss:$9 sm:$0xff] %v16770_v19 }
 0x278   : > { %2013 = vst [vmem:[#allocation1 + $0x1] ss:$9 sm:$0xff] %v16774_v30  ;;  %v16781_v30 = vrot.slane %v12047_v2, 6 }
 0x279   : > { %2014 = vst [vmem:[#allocation1 + $0x2] ss:$9 sm:$0xff] %v16772_v59  ;;  %v16779_v59 = vrot.slane %v12047_v2, 4 }
 0x27a   : > { %2015 = vst [vmem:[#allocation1 + $0x3] ss:$9 sm:$0xff] %v16773_v16  ;;  %v16780_v16 = vrot.slane %v12047_v2, 5 }
 0x27b   : > { %2016 = vst [vmem:[#allocation1 + $0x4] ss:$9 sm:$0xff] %v12047_v2 }
 0x282   : > { %v12052_v19 = vld [vmem:[#allocation1] sm:$0xff] }
 0x283   : > { %2018 = vst [vmem:[#allocation1] ss:$9 sm:$0xff] %v16775_v51  ;;  %v16783_v51 = vrot.slane %v12047_v2, 7 }
 0x284   : > { %2019 = vst [vmem:[#allocation1 + $0x1] ss:$9 sm:$0xff] %v16777_v56  ;;  %v12073_v56 = vpop.f32.mrf.mxu0 }
 0x285   : > { %2020 = vst [vmem:[#allocation1 + $0x2] ss:$9 sm:$0xff] %v16778_v29  ;;  %v16785_v29 = vrot.slane %v12073_v56, 1  ;;  %v16791_v18 = vrot.slane %v12073_v56, 6 }
 0x286   : > { %2021 = vst [vmem:[#allocation1 + $0x3] ss:$9 sm:$0xff] %v16779_v59  ;;  %v16786_v59 = vrot.slane %v12073_v56, 2 }
 0x287   : > { %2022 = vst [vmem:[#allocation1 + $0x4] ss:$9 sm:$0xff] %v16780_v16  ;;  %v16788_v16 = vrot.slane %v12073_v56, 3 }
 0x288   : > { %17296 = vst [vmem:[#allocation32_spill] sm:$0xff] %v12073_v56 }
 0x28e   : > { %v12069_v24 = vld [vmem:[#allocation1] sm:$0xff] }
 0x28f   : > { %2024 = vst [vmem:[#allocation1] ss:$9 sm:$0xff] %v16781_v30  ;;  %v16790_v30 = vrot.slane %v12073_v56, 4 }
 0x290   : > { %2025 = vst [vmem:[#allocation1 + $0x1] ss:$9 sm:$0xff] %v16783_v51  ;;  %v16793_v51 = vrot.slane %v12073_v56, 5 }
 0x291   : > { %2026 = vst [vmem:[#allocation1 + $0x2] ss:$9 sm:$0xff] %v12073_v56 }
 0x292   : > { %2027 = vst [vmem:[#allocation1 + $0x3] ss:$9 sm:$0xff] %v16785_v29  ;;  %v16792_v29 = vrot.slane %v12073_v56, 7 }
 0x293   : > { %2028 = vst [vmem:[#allocation1 + $0x4] ss:$9 sm:$0xff] %v16786_v59  ;;  %v12101_v59 = vpop.f32.mrf.mxu0 }
 0x294   : > { %17297 = vst [vmem:[#allocation33_spill] sm:$0xff] %v12101_v59  ;;  %v16796_v23 = vrot.slane %v12101_v59, 2  ;;  %v16802_v3 = vrot.slane %v12101_v59, 7 }
 0x29a   : > { %v12086_v49 = vld [vmem:[#allocation1] sm:$0xff] }
 0x29b   : > { %2030 = vst [vmem:[#allocation1] ss:$9 sm:$0xff] %v16788_v16  ;;  %v16799_v16 = vrot.slane %v12101_v59, 1 }
 0x29c   : > { %2031 = vst [vmem:[#allocation1 + $0x1] ss:$9 sm:$0xff] %v16790_v30  ;;  %v16798_v30 = vrot.slane %v12101_v59, 3 }
 0x29d   : > { %2032 = vst [vmem:[#allocation1 + $0x2] ss:$9 sm:$0xff] %v16793_v51  ;;  %v16801_v51 = vrot.slane %v12101_v59, 6 }
 0x29e   : > { %2033 = vst [vmem:[#allocation1 + $0x3] ss:$9 sm:$0xff] %v16791_v18  ;;  %v16797_v18 = vrot.slane %v12101_v59, 4 }
 0x29f   : > { %2034 = vst [vmem:[#allocation1 + $0x4] ss:$9 sm:$0xff] %v16792_v29  ;;  %v16800_v29 = vrot.slane %v12101_v59, 5 }
 0x2a6   : > { %v12103_v45 = vld [vmem:[#allocation1] sm:$0xff] }
 0x2a7   : > { %2036 = vst [vmem:[#allocation1] ss:$9 sm:$0xff] %v12101_v59 }
 0x2a8   : > { %2037 = vst [vmem:[#allocation1 + $0x1] ss:$9 sm:$0xff] %v16799_v16 }
 0x2a9   : > { %2038 = vst [vmem:[#allocation1 + $0x2] ss:$9 sm:$0xff] %v16796_v23  ;;  %v12127_v23 = vpop.f32.mrf.mxu0 }
 0x2aa   : > { %2039 = vst [vmem:[#allocation1 + $0x3] ss:$9 sm:$0xff] %v16798_v30  ;;  %v16805_v30 = vrot.slane %v12127_v23, 2  ;;  %v16807_v16 = vrot.slane %v12127_v23, 3  ;;  %v16810_v4 = vrot.slane %v12127_v23, 6 }
 0x2ab   : > { %2040 = vst [vmem:[#allocation1 + $0x4] ss:$9 sm:$0xff] %v16797_v18  ;;  %v16804_v18 = vrot.slane %v12127_v23, 1 }
 0x2ac   : > { %17298 = vst [vmem:[#allocation34_spill] sm:$0xff] %v12127_v23 }
 0x2b2   : > { %v12120_v22 = vld [vmem:[#allocation1] sm:$0xff] }
 0x2b3   : > { %2042 = vst [vmem:[#allocation1] ss:$9 sm:$0xff] %v16800_v29 }
 0x2b4   : > { %2043 = vst [vmem:[#allocation1 + $0x1] ss:$9 sm:$0xff] %v16801_v51  ;;  %v16812_v51 = vrot.slane %v12127_v23, 4 }
 0x2b5   : > { %2044 = vst [vmem:[#allocation1 + $0x2] ss:$9 sm:$0xff] %v16802_v3  ;;  %v16809_v3 = vrot.slane %v12127_v23, 5 }
 0x2b6   : > { %2045 = vst [vmem:[#allocation1 + $0x3] ss:$9 sm:$0xff] %v12127_v23 }
 0x2b7   : > { %2046 = vst [vmem:[#allocation1 + $0x4] ss:$9 sm:$0xff] %v16804_v18  ;;  %v12152_v18 = vpop.f32.mrf.mxu0 }
 0x2b8   : > { %17299 = vst [vmem:[#allocation35_spill] sm:$0xff] %v12152_v18  ;;  %v16816_v10 = vrot.slane %v12152_v18, 2  ;;  %v16820_v26 = vrot.slane %v12152_v18, 6  ;;  %v16821_v52 = vrot.slane %v12152_v18, 7 }
 0x2be   : > { %v12137_v29 = vld [vmem:[#allocation1] sm:$0xff] }
 0x2bf   : > { %2048 = vst [vmem:[#allocation1] ss:$9 sm:$0xff] %v16805_v30  ;;  %v16811_v30 = vrot.slane %v12127_v23, 7 }
 0x2c0   : > { %2049 = vst [vmem:[#allocation1 + $0x1] ss:$9 sm:$0xff] %v16807_v16  ;;  %v16817_v16 = vrot.slane %v12152_v18, 1 }
 0x2c1   : > { %2050 = vst [vmem:[#allocation1 + $0x2] ss:$9 sm:$0xff] %v16812_v51 }
 0x2c2   : > { %2051 = vst [vmem:[#allocation1 + $0x3] ss:$9 sm:$0xff] %v16809_v3  ;;  %v16815_v3 = vrot.slane %v12152_v18, 3 }
 0x2c3   : > { %2052 = vst [vmem:[#allocation1 + $0x4] ss:$9 sm:$0xff] %v16810_v4  ;;  %v16818_v4 = vrot.slane %v12152_v18, 4 }
 0x2ca   : > { %v12155_v27 = vld [vmem:[#allocation1] sm:$0xff] }
 0x2cb   : > { %2054 = vst [vmem:[#allocation1] ss:$9 sm:$0xff] %v16811_v30  ;;  %v16822_v30 = vrot.slane %v12152_v18, 5 }
 0x2cc   : > { %2055 = vst [vmem:[#allocation1 + $0x1] ss:$9 sm:$0xff] %v12152_v18 }
 0x2cd   : > { %2056 = vst [vmem:[#allocation1 + $0x2] ss:$9 sm:$0xff] %v16817_v16 }
 0x2ce   : > { %2057 = vst [vmem:[#allocation1 + $0x3] ss:$9 sm:$0xff] %v16816_v10 }
 0x2cf   : > { %2058 = vst [vmem:[#allocation1 + $0x4] ss:$9 sm:$0xff] %v16815_v3  ;;  %v12183_v3 = vpop.f32.mrf.mxu0 }
 0x2d0   : > { %17300 = vst [vmem:[#allocation36_spill] sm:$0xff] %v12183_v3  ;;  %v16824_v10 = vrot.slane %v12183_v3, 1  ;;  %v16829_v16 = vrot.slane %v12183_v3, 2  ;;  %v16826_v43 = vrot.slane %v12183_v3, 3 }
 0x2d6   : > { %v12171_v51 = vld [vmem:[#allocation1] sm:$0xff] }
 0x2d7   : > { %2060 = vst [vmem:[#allocation1] ss:$9 sm:$0xff] %v16818_v4  ;;  %v12204_v53 = vpop.f32.mrf.mxu0 }
 0x2d8   : > { %2061 = vst [vmem:[#allocation1 + $0x1] ss:$9 sm:$0xff] %v16822_v30  ;;  %v16830_v30 = vrot.slane %v12183_v3, 6  ;;  %v16839_v33 = vrot.slane %v12204_v53, 6 }
 0x2d9   : > { %2062 = vst [vmem:[#allocation1 + $0x2] ss:$9 sm:$0xff] %v16820_v26  ;;  %v16827_v26 = vrot.slane %v12183_v3, 4 }
 0x2da   : > { %2063 = vst [vmem:[#allocation1 + $0x3] ss:$9 sm:$0xff] %v16821_v52  ;;  %v16828_v52 = vrot.slane %v12183_v3, 5 }
 0x2db   : > { %2064 = vst [vmem:[#allocation1 + $0x4] ss:$9 sm:$0xff] %v12183_v3 }
 0x2dc   : > { %17301 = vst [vmem:[#allocation37_spill] sm:$0xff] %v12204_v53 }
 0x2e2   : > { %v12188_v4 = vld [vmem:[#allocation1] sm:$0xff] }
 0x2e3   : > { %2066 = vst [vmem:[#allocation1] ss:$9 sm:$0xff] %v16824_v10  ;;  %v16831_v10 = vrot.slane %v12183_v3, 7 }
 0x2e4   : > { %2067 = vst [vmem:[#allocation1 + $0x1] ss:$9 sm:$0xff] %v16829_v16  ;;  %v16838_v16 = vrot.slane %v12204_v53, 4 }
 0x2e5   : > { %2068 = vst [vmem:[#allocation1 + $0x2] ss:$9 sm:$0xff] %v16826_v43  ;;  %v16833_v43 = vrot.slane %v12204_v53, 1 }
 0x2e6   : > { %2069 = vst [vmem:[#allocation1 + $0x3] ss:$9 sm:$0xff] %v16827_v26  ;;  %v16834_v26 = vrot.slane %v12204_v53, 2 }
 0x2e7   : > { %2070 = vst [vmem:[#allocation1 + $0x4] ss:$9 sm:$0xff] %v16828_v52  ;;  %v16835_v52 = vrot.slane %v12204_v53, 3 }
 0x2ee   : > { %v12207_v50 = vld [vmem:[#allocation1] sm:$0xff] }
 0x2ef   : > { %2072 = vst [vmem:[#allocation1] ss:$9 sm:$0xff] %v16830_v30 }
 0x2f0   : > { %2073 = vst [vmem:[#allocation1 + $0x1] ss:$9 sm:$0xff] %v16831_v10  ;;  %v16841_v10 = vrot.slane %v12204_v53, 5 }
 0x2f1   : > { %2074 = vst [vmem:[#allocation1 + $0x2] ss:$9 sm:$0xff] %v12204_v53 }
 0x2f2   : > { %2075 = vst [vmem:[#allocation1 + $0x3] ss:$9 sm:$0xff] %v16833_v43  ;;  %v16840_v43 = vrot.slane %v12204_v53, 7 }
 0x2f3   : > { %2076 = vst [vmem:[#allocation1 + $0x4] ss:$9 sm:$0xff] %v16834_v26  ;;  %v12237_v26 = vpop.f32.mrf.mxu1 }
 0x2f4   : > { %17302 = vst [vmem:[#allocation38_spill] sm:$0xff] %v12237_v26  ;;  %v16847_v46 = vrot.slane %v12237_v26, 2 }
 0x2fa   : > { %v12222_v30 = vld [vmem:[#allocation1] sm:$0xff] }
 0x2fb   : > { %2078 = vst [vmem:[#allocation1] ss:$9 sm:$0xff] %v16835_v52  ;;  %v16844_v52 = vrot.slane %v12237_v26, 1  ;;  %v12256_v31 = vpop.f32.mrf.mxu1 }
 0x2fc   : > { %2079 = vst [vmem:[#allocation1 + $0x1] ss:$9 sm:$0xff] %v16838_v16  ;;  %v16845_v16 = vrot.slane %v12237_v26, 3 }
 0x2fd   : > { %2080 = vst [vmem:[#allocation1 + $0x2] ss:$9 sm:$0xff] %v16841_v10  ;;  %v16850_v10 = vrot.slane %v12237_v26, 6 }
 0x2fe   : > { %2081 = vst [vmem:[#allocation1 + $0x3] ss:$9 sm:$0xff] %v16839_v33  ;;  %v16846_v33 = vrot.slane %v12237_v26, 4 }
 0x2ff   : > { %2082 = vst [vmem:[#allocation1 + $0x4] ss:$9 sm:$0xff] %v16840_v43  ;;  %v16849_v43 = vrot.slane %v12237_v26, 5 }
 0x300   : > { %17303 = vst [vmem:[#allocation39_spill] sm:$0xff] %v12256_v31 }
 0x306   : > { %v12240_v14 = vld [vmem:[#allocation1] sm:$0xff] }
 0x307   : > { %2308 = vst [vmem:[#allocation1] ss:$9 sm:$0xff] %v12237_v26 }
 0x308   : > { %2310 = vst [vmem:[#allocation1 + $0x1] ss:$9 sm:$0xff] %v16844_v52  ;;  %v16851_v52 = vrot.slane %v12237_v26, 7 }
 0x309   : > { %2312 = vst [vmem:[#allocation1 + $0x2] ss:$9 sm:$0xff] %v16847_v46  ;;  %v16856_v46 = vrot.slane %v12256_v31, 3 }
 0x30a   : > { %2314 = vst [vmem:[#allocation1 + $0x3] ss:$9 sm:$0xff] %v16845_v16  ;;  %v16852_v16 = vrot.slane %v12256_v31, 1 }
 0x30b   : > { %2316 = vst [vmem:[#allocation1 + $0x4] ss:$9 sm:$0xff] %v16846_v33  ;;  %v16853_v33 = vrot.slane %v12256_v31, 2 }
 0x312   : > { %v12258_v63 = vld [vmem:[#allocation1] sm:$0xff] }
 0x313   : > { %2318 = vst [vmem:[#allocation1] ss:$9 sm:$0xff] %v16849_v43  ;;  %v16859_v43 = vrot.slane %v12256_v31, 4 }
 0x314   : > { %2319 = vst [vmem:[#allocation1 + $0x1] ss:$9 sm:$0xff] %v16850_v10  ;;  %v16857_v10 = vrot.slane %v12256_v31, 5 }
 0x315   : > { %2320 = vst [vmem:[#allocation1 + $0x2] ss:$9 sm:$0xff] %v16851_v52  ;;  %v16858_v52 = vrot.slane %v12256_v31, 6 }
 0x316   : > { %2321 = vst [vmem:[#allocation1 + $0x3] ss:$9 sm:$0xff] %v12256_v31 }
 0x317   : > { %2322 = vst [vmem:[#allocation1 + $0x4] ss:$9 sm:$0xff] %v16852_v16  ;;  %v12288_v16 = vpop.f32.mrf.mxu1 }
 0x318   : > { %17304 = vst [vmem:[#allocation40_spill] sm:$0xff] %v12288_v16  ;;  %v16867_v38 = vrot.slane %v12288_v16, 1  ;;  %v16872_v26 = vrot.slane %v12288_v16, 7 }
 0x31e   : > { %v12273_v58 = vld [vmem:[#allocation1] sm:$0xff] }
 0x31f   : > { %2324 = vst [vmem:[#allocation1] ss:$9 sm:$0xff] %v16853_v33  ;;  %v16860_v33 = vrot.slane %v12256_v31, 7  ;;  %v16871_v31 = vrot.slane %v12288_v16, 6 }
 0x320   : > { %2325 = vst [vmem:[#allocation1 + $0x1] ss:$9 sm:$0xff] %v16856_v46  ;;  %v16866_v46 = vrot.slane %v12288_v16, 2 }
 0x321   : > { %2326 = vst [vmem:[#allocation1 + $0x2] ss:$9 sm:$0xff] %v16859_v43  ;;  %v16873_v43 = vrot.slane %v12288_v16, 5 }
 0x322   : > { %2327 = vst [vmem:[#allocation1 + $0x3] ss:$9 sm:$0xff] %v16857_v10  ;;  %v16865_v10 = vrot.slane %v12288_v16, 3 }
 0x323   : > { %2328 = vst [vmem:[#allocation1 + $0x4] ss:$9 sm:$0xff] %v16858_v52  ;;  %v16868_v52 = vrot.slane %v12288_v16, 4 }
 0x32a   : > { %v12291_v36 = vld [vmem:[#allocation1] sm:$0xff] }
 0x32b   : > { %2330 = vst [vmem:[#allocation1] ss:$9 sm:$0xff] %v16860_v33 }
 0x32c   : > { %2331 = vst [vmem:[#allocation1 + $0x1] ss:$9 sm:$0xff] %v12288_v16 }
 0x32d   : > { %2332 = vst [vmem:[#allocation1 + $0x2] ss:$9 sm:$0xff] %v16867_v38 }
 0x32e   : > { %2333 = vst [vmem:[#allocation1 + $0x3] ss:$9 sm:$0xff] %v16866_v46 }
 0x32f   : > { %2334 = vst [vmem:[#allocation1 + $0x4] ss:$9 sm:$0xff] %v16865_v10  ;;  %v12317_v10 = vpop.f32.mrf.mxu1 }
 0x330   : > { %17305 = vst [vmem:[#allocation41_spill] sm:$0xff] %v12317_v10  ;;  %v16876_v46 = vrot.slane %v12317_v10, 1  ;;  %v16879_v38 = vrot.slane %v12317_v10, 2  ;;  %v16882_v53 = vrot.slane %v12317_v10, 3 }
 0x336   : > { %v12307_v33 = vld [vmem:[#allocation1] sm:$0xff] }
 0x337   : > { %2336 = vst [vmem:[#allocation1] ss:$9 sm:$0xff] %v16868_v52  ;;  %v12340_v16 = vpop.f32.mrf.mxu1 }
 0x338   : > { %2337 = vst [vmem:[#allocation1 + $0x1] ss:$9 sm:$0xff] %v16873_v43  ;;  %v16883_v43 = vrot.slane %v12317_v10, 6  ;;  %v16897_v18 = vrot.slane %v12340_v16, 5 }
 0x339   : > { %2338 = vst [vmem:[#allocation1 + $0x2] ss:$9 sm:$0xff] %v16871_v31  ;;  %v16880_v31 = vrot.slane %v12317_v10, 4 }
 0x33a   : > { %2339 = vst [vmem:[#allocation1 + $0x3] ss:$9 sm:$0xff] %v16872_v26  ;;  %v16881_v26 = vrot.slane %v12317_v10, 5 }
 0x33b   : > { %2340 = vst [vmem:[#allocation1 + $0x4] ss:$9 sm:$0xff] %v12317_v10 }
 0x33c   : > { %17306 = vst [vmem:[#allocation42_spill] sm:$0xff] %v12340_v16 }
 0x342   : > { %v12324_v52 = vld [vmem:[#allocation1] sm:$0xff] }
 0x343   : > { %2342 = vst [vmem:[#allocation1] ss:$9 sm:$0xff] %v16876_v46  ;;  %v16886_v46 = vrot.slane %v12317_v10, 7 }
 0x344   : > { %2343 = vst [vmem:[#allocation1 + $0x1] ss:$9 sm:$0xff] %v16879_v38  ;;  %v16887_v38 = vrot.slane %v12340_v16, 1 }
 0x345   : > { %2344 = vst [vmem:[#allocation1 + $0x2] ss:$9 sm:$0xff] %v16882_v53  ;;  %v16894_v53 = vrot.slane %v12340_v16, 4 }
 0x346   : > { %2345 = vst [vmem:[#allocation1 + $0x3] ss:$9 sm:$0xff] %v16880_v31  ;;  %v16888_v31 = vrot.slane %v12340_v16, 2 }
 0x347   : > { %2346 = vst [vmem:[#allocation1 + $0x4] ss:$9 sm:$0xff] %v16881_v26  ;;  %v16889_v26 = vrot.slane %v12340_v16, 3 }
 0x34e   : > { %v12343_v3 = vld [vmem:[#allocation1] sm:$0xff] }
 0x34f   : > { %2348 = vst [vmem:[#allocation1] ss:$9 sm:$0xff] %v16883_v43 }
 0x350   : > { %2349 = vst [vmem:[#allocation1 + $0x1] ss:$9 sm:$0xff] %v16886_v46  ;;  %v16895_v46 = vrot.slane %v12340_v16, 6 }
 0x351   : > { %2350 = vst [vmem:[#allocation1 + $0x2] ss:$9 sm:$0xff] %v12340_v16 }
 0x352   : > { %2351 = vst [vmem:[#allocation1 + $0x3] ss:$9 sm:$0xff] %v16887_v38  ;;  %v16896_v38 = vrot.slane %v12340_v16, 7 }
 0x353   : > { %2352 = vst [vmem:[#allocation1 + $0x4] ss:$9 sm:$0xff] %v16888_v31  ;;  %v12373_v31 = vpop.f32.mrf.mxu1 }
 0x354   : > { %17307 = vst [vmem:[#allocation43_spill] sm:$0xff] %v12373_v31  ;;  %v16905_v23 = vrot.slane %v12373_v31, 2 }
 0x35a   : > { %v12358_v43 = vld [vmem:[#allocation1] sm:$0xff] }
 0x35b   : > { %2354 = vst [vmem:[#allocation1] ss:$9 sm:$0xff] %v16889_v26  ;;  %v16902_v26 = vrot.slane %v12373_v31, 1  ;;  %v12392_v16 = vpop.f32.mrf.mxu1 }
 0x35c   : > { %2355 = vst [vmem:[#allocation1 + $0x1] ss:$9 sm:$0xff] %v16894_v53  ;;  %v16903_v53 = vrot.slane %v12373_v31, 3 }
 0x35d   : > { %2356 = vst [vmem:[#allocation1 + $0x2] ss:$9 sm:$0xff] %v16897_v18  ;;  %v16909_v18 = vrot.slane %v12373_v31, 6 }
 0x35e   : > { %2357 = vst [vmem:[#allocation1 + $0x3] ss:$9 sm:$0xff] %v16895_v46  ;;  %v16904_v46 = vrot.slane %v12373_v31, 4 }
 0x35f   : > { %2358 = vst [vmem:[#allocation1 + $0x4] ss:$9 sm:$0xff] %v16896_v38  ;;  %v16908_v38 = vrot.slane %v12373_v31, 5 }
 0x360   : > { %17308 = vst [vmem:[#allocation44_spill] sm:$0xff] %v12392_v16 }
 0x366   : > { %v12376_v10 = vld [vmem:[#allocation1] sm:$0xff] }
 0x367   : > { %2360 = vst [vmem:[#allocation1] ss:$9 sm:$0xff] %v12373_v31 }
 0x368   : > { %2361 = vst [vmem:[#allocation1 + $0x1] ss:$9 sm:$0xff] %v16902_v26  ;;  %v16910_v26 = vrot.slane %v12373_v31, 7 }
 0x369   : > { %2362 = vst [vmem:[#allocation1 + $0x2] ss:$9 sm:$0xff] %v16905_v23  ;;  %v16917_v23 = vrot.slane %v12392_v16, 3 }
 0x36a   : > { %2363 = vst [vmem:[#allocation1 + $0x3] ss:$9 sm:$0xff] %v16903_v53  ;;  %v16911_v53 = vrot.slane %v12392_v16, 1 }
 0x36b   : > { %2364 = vst [vmem:[#allocation1 + $0x4] ss:$9 sm:$0xff] %v16904_v46  ;;  %v16912_v46 = vrot.slane %v12392_v16, 2 }
 0x372   : > { %v12394_v59 = vld [vmem:[#allocation1] sm:$0xff] }
 0x373   : > { %2366 = vst [vmem:[#allocation1] ss:$9 sm:$0xff] %v16908_v38  ;;  %v16920_v38 = vrot.slane %v12392_v16, 4 }
 0x374   : > { %2367 = vst [vmem:[#allocation1 + $0x1] ss:$9 sm:$0xff] %v16909_v18  ;;  %v16918_v18 = vrot.slane %v12392_v16, 5 }
 0x375   : > { %2368 = vst [vmem:[#allocation1 + $0x2] ss:$9 sm:$0xff] %v16910_v26  ;;  %v16919_v26 = vrot.slane %v12392_v16, 6 }
 0x376   : > { %2369 = vst [vmem:[#allocation1 + $0x3] ss:$9 sm:$0xff] %v12392_v16 }
 0x377   : > { %2370 = vst [vmem:[#allocation1 + $0x4] ss:$9 sm:$0xff] %v16911_v53  ;;  %v12424_v53 = vpop.f32.mrf.mxu1 }
 0x378   : > { %17309 = vst [vmem:[#allocation45_spill] sm:$0xff] %v12424_v53  ;;  %v16928_v2 = vrot.slane %v12424_v53, 1  ;;  %v16933_v54 = vrot.slane %v12424_v53, 7 }
 0x37e   : > { %v12409_v56 = vld [vmem:[#allocation1] sm:$0xff] }
 0x37f   : > { %2372 = vst [vmem:[#allocation1] ss:$9 sm:$0xff] %v16912_v46  ;;  %v16921_v46 = vrot.slane %v12392_v16, 7  ;;  %v16932_v16 = vrot.slane %v12424_v53, 6 }
 0x380   : > { %2373 = vst [vmem:[#allocation1 + $0x1] ss:$9 sm:$0xff] %v16917_v23  ;;  %v16927_v23 = vrot.slane %v12424_v53, 2 }
 0x381   : > { %2374 = vst [vmem:[#allocation1 + $0x2] ss:$9 sm:$0xff] %v16920_v38  ;;  %v16934_v38 = vrot.slane %v12424_v53, 5 }
 0x382   : > { %2375 = vst [vmem:[#allocation1 + $0x3] ss:$9 sm:$0xff] %v16918_v18  ;;  %v16926_v18 = vrot.slane %v12424_v53, 3 }
 0x383   : > { %2376 = vst [vmem:[#allocation1 + $0x4] ss:$9 sm:$0xff] %v16919_v26  ;;  %v16929_v26 = vrot.slane %v12424_v53, 4 }
 0x38a   : > { %v12427_v31 = vld [vmem:[#allocation1] sm:$0xff] }
 0x38b   : > { %2378 = vst [vmem:[#allocation1] ss:$9 sm:$0xff] %v16921_v46 }
 0x38c   : > { %2379 = vst [vmem:[#allocation1 + $0x1] ss:$9 sm:$0xff] %v12424_v53 }
 0x38d   : > { %2380 = vst [vmem:[#allocation1 + $0x2] ss:$9 sm:$0xff] %v16928_v2 }
 0x38e   : > { %2381 = vst [vmem:[#allocation1 + $0x3] ss:$9 sm:$0xff] %v16927_v23 }
 0x38f   : > { %2382 = vst [vmem:[#allocation1 + $0x4] ss:$9 sm:$0xff] %v16926_v18  ;;  %v12453_v18 = vpop.f32.mrf.mxu1 }
 0x390   : > { %17310 = vst [vmem:[#allocation46_spill] sm:$0xff] %v12453_v18  ;;  %v16937_v23 = vrot.slane %v12453_v18, 1  ;;  %v16940_v2 = vrot.slane %v12453_v18, 2  ;;  %v16943_v8 = vrot.slane %v12453_v18, 3 }
 0x396   : > { %v12443_v46 = vld [vmem:[#allocation1] sm:$0xff] }
 0x397   : > { %2384 = vst [vmem:[#allocation1] ss:$9 sm:$0xff] %v16929_v26  ;;  %v12476_v53 = vpop.f32.mrf.mxu1 }
 0x398   : > { %2385 = vst [vmem:[#allocation1 + $0x1] ss:$9 sm:$0xff] %v16934_v38  ;;  %v16944_v38 = vrot.slane %v12453_v18, 6  ;;  %v16958_v9 = vrot.slane %v12476_v53, 5 }
 0x399   : > { %2386 = vst [vmem:[#allocation1 + $0x2] ss:$9 sm:$0xff] %v16932_v16  ;;  %v16941_v16 = vrot.slane %v12453_v18, 4 }
 0x39a   : > { %2387 = vst [vmem:[#allocation1 + $0x3] ss:$9 sm:$0xff] %v16933_v54  ;;  %v16942_v54 = vrot.slane %v12453_v18, 5 }
 0x39b   : > { %2388 = vst [vmem:[#allocation1 + $0x4] ss:$9 sm:$0xff] %v12453_v18 }
 0x39c   : > { %17311 = vst [vmem:[#allocation47_spill] sm:$0xff] %v12476_v53 }
 0x3a2   : > { %v12460_v26 = vld [vmem:[#allocation1] sm:$0xff] }
 0x3a3   : > { %2390 = vst [vmem:[#allocation1] ss:$9 sm:$0xff] %v16937_v23  ;;  %v16947_v23 = vrot.slane %v12453_v18, 7 }
 0x3a4   : > { %2391 = vst [vmem:[#allocation1 + $0x1] ss:$9 sm:$0xff] %v16940_v2  ;;  %v16948_v2 = vrot.slane %v12476_v53, 1 }
 0x3a5   : > { %2392 = vst [vmem:[#allocation1 + $0x2] ss:$9 sm:$0xff] %v16943_v8  ;;  %v16955_v8 = vrot.slane %v12476_v53, 4 }
 0x3a6   : > { %2393 = vst [vmem:[#allocation1 + $0x3] ss:$9 sm:$0xff] %v16941_v16  ;;  %v16949_v16 = vrot.slane %v12476_v53, 2 }
 0x3a7   : > { %2394 = vst [vmem:[#allocation1 + $0x4] ss:$9 sm:$0xff] %v16942_v54  ;;  %v16950_v54 = vrot.slane %v12476_v53, 3 }
 0x3ae   : > { %v12479_v62 = vld [vmem:[#allocation1] sm:$0xff] }
 0x3af   : > { %2396 = vst [vmem:[#allocation1] ss:$9 sm:$0xff] %v16944_v38 }
 0x3b0   : > { %2397 = vst [vmem:[#allocation1 + $0x1] ss:$9 sm:$0xff] %v16947_v23  ;;  %v16956_v23 = vrot.slane %v12476_v53, 6 }
 0x3b1   : > { %2398 = vst [vmem:[#allocation1 + $0x2] ss:$9 sm:$0xff] %v12476_v53 }
 0x3b2   : > { %2399 = vst [vmem:[#allocation1 + $0x3] ss:$9 sm:$0xff] %v16948_v2  ;;  %v16957_v2 = vrot.slane %v12476_v53, 7 }
 0x3b3   : > { %2400 = vst [vmem:[#allocation1 + $0x4] ss:$9 sm:$0xff] %v16949_v16  ;;  %v12509_v16 = vpop.f32.mrf.mxu1 }
 0x3b4   : > { %17312 = vst [vmem:[#allocation48_spill] sm:$0xff] %v12509_v16  ;;  %v16966_v47 = vrot.slane %v12509_v16, 2 }
 0x3ba   : > { %v12494_v38 = vld [vmem:[#allocation1] sm:$0xff] }
 0x3bb   : > { %2402 = vst [vmem:[#allocation1] ss:$9 sm:$0xff] %v16950_v54  ;;  %v16963_v54 = vrot.slane %v12509_v16, 1  ;;  %v12528_v53 = vpop.f32.mrf.mxu1 }
 0x3bc   : > { %2403 = vst [vmem:[#allocation1 + $0x1] ss:$9 sm:$0xff] %v16955_v8  ;;  %v16964_v8 = vrot.slane %v12509_v16, 3 }
 0x3bd   : > { %2404 = vst [vmem:[#allocation1 + $0x2] ss:$9 sm:$0xff] %v16958_v9  ;;  %v16970_v9 = vrot.slane %v12509_v16, 6 }
 0x3be   : > { %2405 = vst [vmem:[#allocation1 + $0x3] ss:$9 sm:$0xff] %v16956_v23  ;;  %v16965_v23 = vrot.slane %v12509_v16, 4 }
 0x3bf   : > { %2406 = vst [vmem:[#allocation1 + $0x4] ss:$9 sm:$0xff] %v16957_v2  ;;  %v16969_v2 = vrot.slane %v12509_v16, 5 }
 0x3c0   : > { %17313 = vst [vmem:[#allocation49_spill] sm:$0xff] %v12528_v53 }
 0x3c6   : > { %v12512_v18 = vld [vmem:[#allocation1] sm:$0xff] }
 0x3c7   : > { %2408 = vst [vmem:[#allocation1] ss:$9 sm:$0xff] %v12509_v16 }
 0x3c8   : > { %2409 = vst [vmem:[#allocation1 + $0x1] ss:$9 sm:$0xff] %v16963_v54  ;;  %v16971_v54 = vrot.slane %v12509_v16, 7  ;;  %v12561_v16 = vpop.f32.mrf.mxu1 }
 0x3c9   : > { %2410 = vst [vmem:[#allocation1 + $0x2] ss:$9 sm:$0xff] %v16966_v47  ;;  %v16978_v47 = vrot.slane %v12528_v53, 3  ;;  %v16987_v41 = vrot.slane %v12561_v16, 1 }
 0x3ca   : > { %2411 = vst [vmem:[#allocation1 + $0x3] ss:$9 sm:$0xff] %v16964_v8  ;;  %v16972_v8 = vrot.slane %v12528_v53, 1 }
 0x3cb   : > { %2412 = vst [vmem:[#allocation1 + $0x4] ss:$9 sm:$0xff] %v16965_v23  ;;  %v16975_v23 = vrot.slane %v12528_v53, 2 }
 0x3cc   : > { %17314 = vst [vmem:[#allocation50_spill] sm:$0xff] %v12561_v16 }
 0x3d2   : > { %v12530_v32 = vld [vmem:[#allocation1] sm:$0xff] }
 0x3d3   : > { %2414 = vst [vmem:[#allocation1] ss:$9 sm:$0xff] %v16969_v2  ;;  %v16982_v2 = vrot.slane %v12528_v53, 4 }
 0x3d4   : > { %2415 = vst [vmem:[#allocation1 + $0x1] ss:$9 sm:$0xff] %v16970_v9  ;;  %v16979_v9 = vrot.slane %v12528_v53, 5 }
 0x3d5   : > { %2416 = vst [vmem:[#allocation1 + $0x2] ss:$9 sm:$0xff] %v16971_v54  ;;  %v16980_v54 = vrot.slane %v12528_v53, 6 }
 0x3d6   : > { %2417 = vst [vmem:[#allocation1 + $0x3] ss:$9 sm:$0xff] %v12528_v53 }
 0x3d7   : > { %2418 = vst [vmem:[#allocation1 + $0x4] ss:$9 sm:$0xff] %v16972_v8  ;;  %v16981_v8 = vrot.slane %v12528_v53, 7  ;;  %v16990_v53 = vrot.slane %v12561_v16, 5 }
 0x3de   : > { %v12545_v15 = vld [vmem:[#allocation1] sm:$0xff] }
 0x3df   : > { %2420 = vst [vmem:[#allocation1] ss:$9 sm:$0xff] %v16975_v23 }
 0x3e0   : > { %2421 = vst [vmem:[#allocation1 + $0x1] ss:$9 sm:$0xff] %v16978_v47  ;;  %v17015_v47 = vrot.slane %v12561_v16, 2 }
 0x3e1   : > { %2422 = vst [vmem:[#allocation1 + $0x2] ss:$9 sm:$0xff] %v16982_v2  ;;  %v16989_v2 = vrot.slane %v12561_v16, 4 }
 0x3e2   : > { %2423 = vst [vmem:[#allocation1 + $0x3] ss:$9 sm:$0xff] %v16979_v9  ;;  %v16988_v9 = vrot.slane %v12561_v16, 3 }
 0x3e3   : > { %2424 = vst [vmem:[#allocation1 + $0x4] ss:$9 sm:$0xff] %v16980_v54  ;;  %v2536_v54 = vpack.c.bf16 %v12258_v63, %v12258_v63  ;;  %v2537_v63 = vpack.c.bf16 %v12273_v58, %v12273_v58  ;;  %v2117_v58 = vpack.c.bf16 %v11699_v57, %v11699_v57 }
 0x3ea   : > { %v12563_v23 = vld [vmem:[#allocation1] sm:$0xff] }
 0x3eb   : > { %2426 = vst [vmem:[#allocation1] ss:$9 sm:$0xff] %v16981_v8  ;;  %v2993_v8 = vsel %vm2988_vm12, %v2536_v54, 0  ;;  %v12594_v54 = vpop.f32.mrf.mxu1 }
 0x3ec   : > { %2427 = vst [vmem:[#allocation1 + $0x1] ss:$9 sm:$0xff] %v12561_v16  ;;  %3002 = vmatpush.bf16.xpose.msrb.mxu0 %v2993_v8  ;;  %v16994_v8 = vrot.slane %v12561_v16, 6  ;;  %v16996_v57 = vrot.slane %v12594_v54, 4 }
 0x3ed   : > { %2428 = vst [vmem:[#allocation1 + $0x2] ss:$9 sm:$0xff] %v16987_v41  ;;  %v16991_v41 = vrot.slane %v12561_v16, 7 }
 0x3ee   : > { %2429 = vst [vmem:[#allocation1 + $0x3] ss:$9 sm:$0xff] %v17015_v47 }
 0x3ef   : > { %2430 = vst [vmem:[#allocation1 + $0x4] ss:$9 sm:$0xff] %v16988_v9  ;;  %v2116_v9 = vpack.c.bf16 %v11684_v44, %v11684_v44  ;;  %v2538_v44 = vpack.c.bf16 %v12291_v36, %v12291_v36  ;;  %v16995_v36 = vrot.slane %v12594_v54, 5 }
 0x3f0   : > { %17315 = vst [vmem:[#allocation51_spill] sm:$0xff] %v12594_v54 }
 0x3f3   : > { %9891 = vmatmul.msk.bf16.vlgmr.msrb.gmra.mxu0 %vm2988_vm12, %v2116_v9  ;;  %v3031_v9 = vsel %vm2988_vm12, %v2538_v44, 0 }
 0x3f6   : > { %v12582_v20 = vld [vmem:[#allocation1] sm:$0xff] }
 0x3f7   : > { %2432 = vst [vmem:[#allocation1] ss:$9 sm:$0xff] %v16989_v2  ;;  %v3012_v2 = vsel %vm2988_vm12, %v2537_v63, 0  ;;  %v16992_v63 = vrot.slane %v12594_v54, 2 }
 0x3f8   : > { %2433 = vst [vmem:[#allocation1 + $0x1] ss:$9 sm:$0xff] %v16990_v53  ;;  %3021 = vmatpush.bf16.xpose.msra.mxu3 %v3012_v2  ;;  %v16993_v53 = vrot.slane %v12594_v54, 1  ;;  %v17012_v2 = vrot.slane %v12594_v54, 3 }
 0x3f9   : > { %2435 = vst [vmem:[#allocation1 + $0x3] ss:$9 sm:$0xff] %v16991_v41 }
 0x3fa   : > { %2436 = vst [vmem:[#allocation1 + $0x4] ss:$9 sm:$0xff] %v12594_v54 }
 0x3fb   : > { %2434 = vst [vmem:[#allocation1 + $0x2] ss:$9 sm:$0xff] %v16994_v8  ;;  %v12633_v8 = vpop.f32.mrf.mxu1 }
 0x3fc   : > { %17316 = vst [vmem:[#allocation52_spill] sm:$0xff] %v12633_v8 }
 0x3ff   : > { %9892 = vmatmul.msk.bf16.vlgmr.msra.gmra.mxu3 %vm2988_vm12, %v2117_v58  ;;  %v2539_v58 = vpack.c.bf16 %v12307_v33, %v12307_v33  ;;  %v2540_v33 = vpack.c.bf16 %v12324_v52, %v12324_v52  ;;  %v16999_v52 = vrot.slane %v12633_v8, 3 }
 0x400   : > { %3040 = vmatpush.bf16.xpose.msrb.mxu3 %v3031_v9  ;;  %v16998_v9 = vrot.slane %v12594_v54, 6 }
 0x401   : > { %v3050_v44 = vsel %vm2988_vm12, %v2539_v58, 0  ;;  %v17003_v58 = vrot.slane %v12633_v8, 1 }
 0x402   : > { %v12611_v41 = vld [vmem:[#allocation1] sm:$0xff] }
 0x403   : > { %2438 = vst [vmem:[#allocation1] ss:$9 sm:$0xff] %v16993_v53 }
 0x404   : > { %2439 = vst [vmem:[#allocation1 + $0x1] ss:$9 sm:$0xff] %v16992_v63  ;;  %v16997_v63 = vrot.slane %v12594_v54, 7 }
 0x405   : > { %2440 = vst [vmem:[#allocation1 + $0x2] ss:$9 sm:$0xff] %v17012_v2 }
 0x406   : > { %2441 = vst [vmem:[#allocation1 + $0x3] ss:$9 sm:$0xff] %v16996_v57  ;;  %v3069_v57 = vsel %vm2988_vm12, %v2540_v33, 0  ;;  %v2541_v33 = vpack.c.bf16 %v12343_v3, %v12343_v3 }
 0x407   : > { %2442 = vst [vmem:[#allocation1 + $0x4] ss:$9 sm:$0xff] %v16995_v36  ;;  %v2118_v36 = vpack.c.bf16 %v11731_v40, %v11731_v40  ;;  %v17000_v40 = vrot.slane %v12633_v8, 4 }
 0x408   : > { %3059 = vmatpush.bf16.xpose.msra.mxu3 %v3050_v44  ;;  %v17001_v44 = vrot.slane %v12633_v8, 2 }
 0x40e   : > { %v12631_v53 = vld [vmem:[#allocation1] sm:$0xff] }
 0x40f   : > { %2444 = vst [vmem:[#allocation1] ss:$9 sm:$0xff] %v16998_v9  ;;  %9893 = vmatmul.msk.bf16.vlgmr.msrb.gmra.mxu3 %vm2988_vm12, %v2118_v36  ;;  %v17002_v9 = vrot.slane %v12633_v8, 5  ;;  %v17007_v36 = vrot.slane %v12633_v8, 6 }
 0x410   : > { %2445 = vst [vmem:[#allocation1 + $0x1] ss:$9 sm:$0xff] %v16997_v63  ;;  %3078 = vmatpush.bf16.xpose.msrb.mxu3 %v3069_v57  ;;  %v17004_v57 = vrot.slane %v12633_v8, 7 }
 0x411   : > { %2446 = vst [vmem:[#allocation1 + $0x2] ss:$9 sm:$0xff] %v12633_v8 }
 0x412   : > { %2447 = vst [vmem:[#allocation1 + $0x3] ss:$9 sm:$0xff] %v17003_v58 }
 0x413   : > { %2448 = vst [vmem:[#allocation1 + $0x4] ss:$9 sm:$0xff] %v17001_v44  ;;  %v12675_v44 = vpop.f32.mrf.mxu1 }
 0x414   : > { %17317 = vst [vmem:[#allocation53_spill] sm:$0xff] %v12675_v44  ;;  %v17006_v3 = vrot.slane %v12675_v44, 2 }
 0x41a   : > { %v12654_v63 = vld [vmem:[#allocation1] sm:$0xff] }
 0x41b   : > { %2450 = vst [vmem:[#allocation1] ss:$9 sm:$0xff] %v16999_v52  ;;  %v2119_v52 = vpack.c.bf16 %v11755_v25, %v11755_v25  ;;  %v17009_v25 = vrot.slane %v12675_v44, 4 }
 0x41c   : > { %2451 = vst [vmem:[#allocation1 + $0x1] ss:$9 sm:$0xff] %v17000_v40  ;;  %v3088_v40 = vsel %vm2988_vm12, %v2541_v33, 0  ;;  %v12696_v33 = vpop.f32.mrf.mxu2 }
 0x41d   : > { %2452 = vst [vmem:[#allocation1 + $0x2] ss:$9 sm:$0xff] %v17002_v9  ;;  %v17005_v9 = vrot.slane %v12675_v44, 1 }
 0x41e   : > { %2453 = vst [vmem:[#allocation1 + $0x3] ss:$9 sm:$0xff] %v17007_v36  ;;  %v17011_v36 = vrot.slane %v12675_v44, 6 }
 0x41f   : > { %2454 = vst [vmem:[#allocation1 + $0x4] ss:$9 sm:$0xff] %v17004_v57  ;;  %9894 = vmatmul.msk.bf16.vlgmr.msra.gmra.mxu3 %vm2988_vm12, %v2119_v52  ;;  %v17008_v57 = vrot.slane %v12675_v44, 3  ;;  %v2542_v52 = vpack.c.bf16 %v12358_v43, %v12358_v43  ;;  %v12707_v43 = vpop.f32.mrf.mxu1 }
 0x420   : > { %3097 = vmatpush.bf16.xpose.msra.mxu3 %v3088_v40  ;;  %v2120_v40 = vpack.c.bf16 %v11772_v34, %v11772_v34  ;;  %17318 = vst [vmem:[#allocation54_spill] sm:$0xff] %v12696_v33  ;;  %v17014_v34 = vrot.slane %v12707_v43, 1  ;;  %v17020_v2 = vrot.slane %v12707_v43, 4  ;;  %v17021_v47 = vrot.slane %v12707_v43, 6 }
 0x421   : > { %17319 = vst [vmem:[#allocation55_spill] sm:$0xff] %v12707_v43 }
 0x426   : > { %v12678_v58 = vld [vmem:[#allocation1] sm:$0xff] }
 0x427   : > { %2456 = vst [vmem:[#allocation1] ss:$9 sm:$0xff] %v12675_v44 }
 0x428   : > { %2457 = vst [vmem:[#allocation1 + $0x1] ss:$9 sm:$0xff] %v17005_v9  ;;  %v17010_v9 = vrot.slane %v12675_v44, 5 }
 0x429   : > { %2458 = vst [vmem:[#allocation1 + $0x2] ss:$9 sm:$0xff] %v17006_v3  ;;  %v3107_v3 = vsel %vm2988_vm12, %v2542_v52, 0  ;;  %v17016_v52 = vrot.slane %v12707_v43, 2 }
 0x42a   : > { %2459 = vst [vmem:[#allocation1 + $0x3] ss:$9 sm:$0xff] %v17008_v57 }
 0x42b   : > { %2460 = vst [vmem:[#allocation1 + $0x4] ss:$9 sm:$0xff] %v17009_v25  ;;  %v17013_v25 = vrot.slane %v12675_v44, 7 }
 0x42f   : > { %9895 = vmatmul.msk.bf16.vlgmr.msrb.gmra.mxu3 %vm2988_vm12, %v2120_v40  ;;  %v2543_v40 = vpack.c.bf16 %v12376_v10, %v12376_v10 }
 0x430   : > { %3116 = vmatpush.bf16.xpose.msrb.mxu3 %v3107_v3  ;;  %v12717_v3 = vpop.f32.mrf.mxu2 }
 0x431   : > { %17320 = vst [vmem:[#allocation56_spill] sm:$0xff] %v12717_v3  ;;  %v3126_v10 = vsel %vm2988_vm12, %v2543_v40, 0 }
 0x432   : > { %v12702_v57 = vld [vmem:[#allocation1] sm:$0xff] }
 0x433   : > { %2462 = vst [vmem:[#allocation1] ss:$9 sm:$0xff] %v17010_v9  ;;  %v17017_v9 = vrot.slane %v12707_v43, 3 }
 0x434   : > { %2463 = vst [vmem:[#allocation1 + $0x1] ss:$9 sm:$0xff] %v17011_v36 }
 0x435   : > { %2464 = vst [vmem:[#allocation1 + $0x2] ss:$9 sm:$0xff] %v17013_v25  ;;  %v2121_v25 = vpack.c.bf16 %v11791_v60, %v11791_v60 }
 0x436   : > { %2465 = vst [vmem:[#allocation1 + $0x3] ss:$9 sm:$0xff] %v12707_v43 }
 0x437   : > { %2466 = vst [vmem:[#allocation1 + $0x4] ss:$9 sm:$0xff] %v17014_v34  ;;  %v17023_v34 = vrot.slane %v12707_v43, 5 }
 0x438   : > { %v12742_v60 = vpop.f32.mrf.mxu2 }
 0x439   : > { %17321 = vst [vmem:[#allocation57_spill] sm:$0xff] %v12742_v60 }
 0x43e   : > { %v12723_v36 = vld [vmem:[#allocation1] sm:$0xff] }
 0x43f   : > { %2468 = vst [vmem:[#allocation1] ss:$9 sm:$0xff] %v17016_v52  ;;  %9896 = vmatmul.msk.bf16.vlgmr.msra.gmra.mxu3 %vm2988_vm12, %v2121_v25  ;;  %v12744_v52 = vpop.f32.mrf.mxu1 }
 0x440   : > { %2469 = vst [vmem:[#allocation1 + $0x1] ss:$9 sm:$0xff] %v17017_v9  ;;  %3135 = vmatpush.bf16.xpose.msra.mxu3 %v3126_v10  ;;  %v17022_v9 = vrot.slane %v12707_v43, 7  ;;  %v17027_v25 = vrot.slane %v12744_v52, 2  ;;  %v17030_v40 = vrot.slane %v12744_v52, 3  ;;  %v2544_v10 = vpack.c.bf16 %v12394_v59, %v12394_v59 }
 0x441   : > { %2470 = vst [vmem:[#allocation1 + $0x2] ss:$9 sm:$0xff] %v17020_v2  ;;  %v17024_v2 = vrot.slane %v12744_v52, 1  ;;  %v17101_v43 = vrot.slane %v12744_v52, 4 }
 0x442   : > { %2471 = vst [vmem:[#allocation1 + $0x3] ss:$9 sm:$0xff] %v17023_v34  ;;  %v2548_v34 = vpack.c.bf16 %v12460_v26, %v12460_v26  ;;  %v2128_v26 = vpack.c.bf16 %v11916_v17, %v11916_v17  ;;  %v2123_v17 = vpack.c.bf16 %v11832_v0, %v11832_v0 }
 0x443   : > { %2472 = vst [vmem:[#allocation1 + $0x4] ss:$9 sm:$0xff] %v17021_v47  ;;  %v12759_v47 = vpop.f32.mrf.mxu2 }
 0x444   : > { %17322 = vst [vmem:[#allocation58_spill] sm:$0xff] %v12744_v52  ;;  %v3221_v59 = vsel %vm2988_vm12, %v2548_v34, 0 }
 0x445   : > { %17323 = vst [vmem:[#allocation59_spill] sm:$0xff] %v12759_v47  ;;  %3230 = vmatpush.bf16.xpose.msra.mxu0 %v3221_v59  ;;  %v2129_v59 = vpack.c.bf16 %v11935_v61, %v11935_v61 }
 0x44a   : > { %v12747_v44 = vld [vmem:[#allocation1] sm:$0xff] }
 0x44b   : > { %2474 = vst [vmem:[#allocation1] ss:$9 sm:$0xff] %v17022_v9  ;;  %v2122_v9 = vpack.c.bf16 %v11811_v39, %v11811_v39  ;;  %v2549_v39 = vpack.c.bf16 %v12479_v62, %v12479_v62  ;;  %v2545_v62 = vpack.c.bf16 %v12409_v56, %v12409_v56 }
 0x44c   : > { %2475 = vst [vmem:[#allocation1 + $0x1] ss:$9 sm:$0xff] %v12744_v52  ;;  %9903 = vmatmul.msk.bf16.vlgmr.msra.gmra.mxu0 %vm2988_vm12, %v2128_v26  ;;  %v2550_v26 = vpack.c.bf16 %v12494_v38, %v12494_v38 }
 0x44d   : > { %2476 = vst [vmem:[#allocation1 + $0x2] ss:$9 sm:$0xff] %v17024_v2  ;;  %v3145_v2 = vsel %vm2988_vm12, %v2544_v10, 0  ;;  %v3240_v34 = vsel %vm2988_vm12, %v2549_v39, 0  ;;  %v12792_v10 = vpop.f32.mrf.mxu1 }
 0x44e   : > { %2477 = vst [vmem:[#allocation1 + $0x3] ss:$9 sm:$0xff] %v17027_v25  ;;  %v17090_v25 = vrot.slane %v12744_v52, 5  ;;  %3249 = vmatpush.bf16.xpose.msrb.mxu1 %v3240_v34  ;;  %v17089_v39 = vrot.slane %v12792_v10, 1  ;;  %v3164_v34 = vsel %vm2988_vm12, %v2545_v62, 0  ;;  %v17036_v0 = vrot.slane %v12792_v10, 2 }
 0x44f   : > { %2478 = vst [vmem:[#allocation1 + $0x4] ss:$9 sm:$0xff] %v17030_v40  ;;  %9897 = vmatmul.msk.bf16.vlgmr.msrb.gmra.mxu3 %vm2988_vm12, %v2122_v9  ;;  %v17032_v40 = vrot.slane %v12744_v52, 6  ;;  %v12783_v9 = vpop.f32.mrf.mxu2  ;;  %v17033_v38 = vrot.slane %v12792_v10, 3  ;;  %v17034_v61 = vrot.slane %v12792_v10, 4  ;;  %v17035_v62 = vrot.slane %v12792_v10, 5 }
 0x450   : > { %3154 = vmatpush.bf16.xpose.msrb.mxu3 %v3145_v2  ;;  %17324 = vst [vmem:[#allocation60_spill] sm:$0xff] %v12783_v9  ;;  %v17031_v2 = vrot.slane %v12744_v52, 7 }
 0x451   : > { %17325 = vst [vmem:[#allocation61_spill] sm:$0xff] %v12792_v10 }
 0x455   : > { %9904 = vmatmul.msk.bf16.vlgmr.msrb.gmra.mxu1 %vm2988_vm12, %v2129_v59  ;;  %v17037_v59 = vrot.slane %v12792_v10, 6 }
 0x456   : > { %v12774_v8 = vld [vmem:[#allocation1] sm:$0xff] }
 0x457   : > { %2480 = vst [vmem:[#allocation1] ss:$9 sm:$0xff] %v17101_v43  ;;  %v12810_v56 = vpop.f32.mrf.mxu2 }
 0x458   : > { %2481 = vst [vmem:[#allocation1 + $0x1] ss:$9 sm:$0xff] %v17090_v25 }
 0x459   : > { %2482 = vst [vmem:[#allocation1 + $0x2] ss:$9 sm:$0xff] %v17032_v40 }
 0x45a   : > { %2483 = vst [vmem:[#allocation1 + $0x3] ss:$9 sm:$0xff] %v17031_v2  ;;  %v3259_v2 = vsel %vm2988_vm12, %v2550_v26, 0  ;;  %v12834_v26 = vpop.f32.mrf.mxu1 }
 0x45b   : > { %2484 = vst [vmem:[#allocation1 + $0x4] ss:$9 sm:$0xff] %v12792_v10  ;;  %3268 = vmatpush.bf16.xpose.msrb.mxu2 %v3259_v2  ;;  %v2130_v2 = vpack.c.bf16 %v11950_v7, %v11950_v7  ;;  %v2124_v7 = vpack.c.bf16 %v11848_v13, %v11848_v13 }
 0x45c   : > { %17326 = vst [vmem:[#allocation62_spill] sm:$0xff] %v12810_v56 }
 0x45d   : > { %17328 = vst [vmem:[#allocation64_spill] sm:$0xff] %v12834_v26 }
 0x45f   : > { %9898 = vmatmul.msk.bf16.vlgmr.msra.gmra.mxu3 %vm2988_vm12, %v2123_v17  ;;  %v12831_v17 = vpop.f32.mrf.mxu2 }
 0x460   : > { %3173 = vmatpush.bf16.xpose.msra.mxu3 %v3164_v34  ;;  %17327 = vst [vmem:[#allocation63_spill] sm:$0xff] %v12831_v17  ;;  %v2546_v34 = vpack.c.bf16 %v12427_v31, %v12427_v31  ;;  %v17038_v31 = vrot.slane %v12834_v26, 2 }
 0x462   : > { %v12813_v40 = vld [vmem:[#allocation1] sm:$0xff]  ;;  %9905 = vmatmul.msk.bf16.vlgmr.msrb.gmra.mxu2 %vm2988_vm12, %v2130_v2  ;;  %v2552_v2 = vpack.c.bf16 %v12530_v32, %v12530_v32 }
 0x463   : > { %2486 = vst [vmem:[#allocation1] ss:$9 sm:$0xff] %v17089_v39 }
 0x464   : > { %2487 = vst [vmem:[#allocation1 + $0x1] ss:$9 sm:$0xff] %v17036_v0  ;;  %v3183_v0 = vsel %vm2988_vm12, %v2546_v34, 0  ;;  %v2132_v34 = vpack.c.bf16 %v11984_v6, %v11984_v6  ;;  %v17048_v6 = vrot.slane %v12834_v26, 6 }
 0x465   : > { %2488 = vst [vmem:[#allocation1 + $0x2] ss:$9 sm:$0xff] %v17033_v38  ;;  %v17040_v38 = vrot.slane %v12792_v10, 7 }
 0x466   : > { %2489 = vst [vmem:[#allocation1 + $0x3] ss:$9 sm:$0xff] %v17034_v61 }
 0x467   : > { %2490 = vst [vmem:[#allocation1 + $0x4] ss:$9 sm:$0xff] %v17035_v62  ;;  %v17039_v62 = vrot.slane %v12834_v26, 1  ;;  %v12859_v13 = vpop.f32.mrf.mxu2 }
 0x468   : > { %17329 = vst [vmem:[#allocation65_spill] sm:$0xff] %v12859_v13 }
 0x46e   : > { %v12839_v61 = vld [vmem:[#allocation1] sm:$0xff] }
 0x46f   : > { %2492 = vst [vmem:[#allocation1] ss:$9 sm:$0xff] %v17037_v59  ;;  %9899 = vmatmul.msk.bf16.vlgmr.msrb.gmra.mxu3 %vm2988_vm12, %v2124_v7  ;;  %v3297_v59 = vsel %vm2988_vm12, %v2552_v2, 0  ;;  %v2553_v2 = vpack.c.bf16 %v12545_v15, %v12545_v15  ;;  %v17043_v15 = vrot.slane %v12834_v26, 7 }
 0x470   : > { %2493 = vst [vmem:[#allocation1 + $0x1] ss:$9 sm:$0xff] %v17040_v38  ;;  %3192 = vmatpush.bf16.xpose.msrb.mxu3 %v3183_v0  ;;  %3306 = vmatpush.bf16.xpose.msrb.mxu0 %v3297_v59  ;;  %v12861_v32 = vpop.f32.mrf.mxu0  ;;  %v17087_v0 = vrot.slane %v12834_v26, 3  ;;  %v17042_v38 = vrot.slane %v12834_v26, 5 }
 0x471   : > { %2494 = vst [vmem:[#allocation1 + $0x2] ss:$9 sm:$0xff] %v12834_v26  ;;  %v3598_v7 = vsel %vm3597_vm13, %v12861_v32, -inf  ;;  %v3316_v59 = vsel %vm2988_vm12, %v2553_v2, 0  ;;  %v2125_v2 = vpack.c.bf16 %v11865_v55, %v11865_v55  ;;  %v17045_v55 = vrot.slane %v12696_v33, 1 }
 0x472   : > { %2495 = vst [vmem:[#allocation1 + $0x3] ss:$9 sm:$0xff] %v17039_v62  ;;  %3599 = vmax.xlane.f32.xlu1 %v3598_v7  ;;  %3325 = vmatpush.bf16.xpose.msra.mxu1 %v3316_v59  ;;  %v2547_v7 = vpack.c.bf16 %v12443_v46, %v12443_v46  ;;  %v2133_v59 = vpack.c.bf16 %v12001_v5, %v12001_v5 }
 0x473   : > { %2496 = vst [vmem:[#allocation1 + $0x4] ss:$9 sm:$0xff] %v17038_v31  ;;  %v17041_v31 = vrot.slane %v12834_v26, 4 }
 0x474   : > { %v3202_v46 = vsel %vm2988_vm12, %v2547_v7, 0  ;;  %v2134_v7 = vpack.c.bf16 %v12017_v1, %v12017_v1 }
 0x477   : > { %9907 = vmatmul.msk.bf16.vlgmr.msrb.gmra.mxu0 %vm2988_vm12, %v2132_v34 }
 0x478   : > { %v3006_v34 = vpop.f32.mrf.mxu0 }
 0x479   : > { %9908 = vmatmul.msk.bf16.vlgmr.msra.gmra.mxu1 %vm2988_vm12, %v2133_v59  ;;  %v17047_v59 = vrot.slane %v12696_v33, 4 }
 0x47a   : > { %v12873_v62 = vld [vmem:[#allocation1] sm:$0xff] }
 0x47b   : > { %2498 = vst [vmem:[#allocation1] ss:$9 sm:$0xff] %v17087_v0  ;;  %v17096_v0 = vrot.slane %v12831_v17, 3 }
 0x47c   : > { %2499 = vst [vmem:[#allocation1 + $0x1] ss:$9 sm:$0xff] %v17041_v31  ;;  %v2554_v31 = vpack.c.bf16 %v12563_v23, %v12563_v23 }
 0x47d   : > { %2500 = vst [vmem:[#allocation1 + $0x2] ss:$9 sm:$0xff] %v17042_v38  ;;  %v12896_v38 = vpop.f32.mrf.mxu2 }
 0x47e   : > { %2501 = vst [vmem:[#allocation1 + $0x3] ss:$9 sm:$0xff] %v17048_v6  ;;  %v3335_v34 = vsel %vm2988_vm12, %v2554_v31, 0  ;;  %v17046_v31 = vrot.slane %v12696_v33, 3 }
 0x47f   : > { %2502 = vst [vmem:[#allocation1 + $0x4] ss:$9 sm:$0xff] %v17043_v15  ;;  %9900 = vmatmul.msk.bf16.vlgmr.msra.gmra.mxu3 %vm2988_vm12, %v2125_v2  ;;  %3344 = vmatpush.bf16.xpose.msra.mxu2 %v3335_v34  ;;  %v17044_v2 = vrot.slane %v12696_v33, 2  ;;  %v2551_v34 = vpack.c.bf16 %v12512_v18, %v12512_v18  ;;  %v17049_v18 = vrot.slane %v12696_v33, 7 }
 0x480   : > { %17330 = vst [vmem:[#allocation66_spill] sm:$0xff] %v12896_v38  ;;  %3211 = vmatpush.bf16.xpose.msra.mxu3 %v3202_v46 }
 0x482   : > { %v12902_v15 = vpop.f32.mrf.mxu3 }
 0x483   : > { %v3601_v5 = vsel %vm3597_vm13, %v12902_v15, -inf }
 0x484   : > { %3602 = vmax.xlane.f32.xlu2 %v3601_v5  ;;  %v2126_v5 = vpack.c.bf16 %v11883_v12, %v11883_v12  ;;  %v17051_v12 = vrot.slane %v12717_v3, 1 }
 0x485   : > { %v12920_v46 = vpop.f32.mrf.mxu2 }
 0x486   : > { %v12907_v23 = vld [vmem:[#allocation1] sm:$0xff]  ;;  %9909 = vmatmul.msk.bf16.vlgmr.msra.gmra.mxu2 %vm2988_vm12, %v2134_v7  ;;  %17331 = vst [vmem:[#allocation67_spill] sm:$0xff] %v12920_v46  ;;  %v17052_v7 = vrot.slane %v12696_v33, 5 }
 0x487   : > { %2728 = vst [vmem:[#allocation1] ss:$9 sm:$0xff] %v12696_v33 }
 0x488   : > { %2730 = vst [vmem:[#allocation1 + $0x1] ss:$9 sm:$0xff] %v17045_v55  ;;  %v3278_v55 = vsel %vm2988_vm12, %v2551_v34, 0 }
 0x489   : > { %2732 = vst [vmem:[#allocation1 + $0x2] ss:$9 sm:$0xff] %v17044_v2  ;;  %v2556_v2 = vpack.c.bf16 %v12611_v41, %v12611_v41 }
 0x48a   : > { %2734 = vst [vmem:[#allocation1 + $0x3] ss:$9 sm:$0xff] %v17046_v31  ;;  %v3025_v1 = vpop.f32.mrf.mxu3 }
 0x48b   : > { %2736 = vst [vmem:[#allocation1 + $0x4] ss:$9 sm:$0xff] %v17047_v59  ;;  %v3373_v31 = vsel %vm2988_vm12, %v2556_v2, 0  ;;  %v17050_v59 = vrot.slane %v12696_v33, 6 }
 0x48c   : > { %3382 = vmatpush.bf16.xpose.msra.mxu0 %v3373_v31  ;;  %v2557_v31 = vpack.c.bf16 %v12631_v53, %v12631_v53  ;;  %v2127_v53 = vpack.c.bf16 %v11899_v42, %v11899_v42 }
 0x48d   : > { %v12937_v1 = vpop.f32.mrf.mxu2 }
 0x48e   : > { %17332 = vst [vmem:[#allocation68_spill] sm:$0xff] %v12937_v1  ;;  %v3392_v34 = vsel %vm2988_vm12, %v2557_v31, 0  ;;  %v17053_v31 = vrot.slane %v12717_v3, 6 }
 0x48f   : > { %9901 = vmatmul.msk.bf16.vlgmr.msrb.gmra.mxu3 %vm2988_vm12, %v2126_v5  ;;  %3401 = vmatpush.bf16.xpose.msrb.mxu1 %v3392_v34 }
 0x490   : > { %3287 = vmatpush.bf16.xpose.msrb.mxu3 %v3278_v55  ;;  %v2136_v55 = vpack.c.bf16 %v12052_v19, %v12052_v19  ;;  %v17059_v19 = vrot.slane %v12717_v3, 4 }
 0x492   : > { %v12939_v6 = vld [vmem:[#allocation1] sm:$0xff]  ;;  %v12946_v41 = vpop.f32.mrf.mxu3 }
 0x493   : > { %2738 = vst [vmem:[#allocation1] ss:$9 sm:$0xff] %v17052_v7  ;;  %v3604_v2 = vsel %vm3597_vm13, %v12946_v41, -inf  ;;  %9911 = vmatmul.msk.bf16.vlgmr.msra.gmra.mxu0 %vm2988_vm12, %v2136_v55  ;;  %v2558_v55 = vpack.c.bf16 %v12654_v63, %v12654_v63 }
 0x494   : > { %2739 = vst [vmem:[#allocation1 + $0x1] ss:$9 sm:$0xff] %v17050_v59  ;;  %3605 = vmax.xlane.f32.xlu0 %v3604_v2  ;;  %v17086_v59 = vrot.slane %v12717_v3, 2  ;;  %v2555_v2 = vpack.c.bf16 %v12582_v20, %v12582_v20  ;;  %v17056_v20 = vrot.slane %v12717_v3, 5 }
 0x495   : > { %2740 = vst [vmem:[#allocation1 + $0x2] ss:$9 sm:$0xff] %v17049_v18  ;;  %v12962_v5 = vpop.f32.mrf.mxu2 }
 0x496   : > { %2741 = vst [vmem:[#allocation1 + $0x3] ss:$9 sm:$0xff] %v12717_v3  ;;  %v3354_v42 = vsel %vm2988_vm12, %v2555_v2, 0  ;;  %v2138_v2 = vpack.c.bf16 %v12086_v49, %v12086_v49  ;;  %v2559_v49 = vpack.c.bf16 %v12678_v58, %v12678_v58  ;;  %v17156_v10 = vrot.slane %v12962_v5, 3 }
 0x497   : > { %2742 = vst [vmem:[#allocation1 + $0x4] ss:$9 sm:$0xff] %v17051_v12  ;;  %v17079_v12 = vrot.slane %v12717_v3, 3 }
 0x498   : > { %17333 = vst [vmem:[#allocation69_spill] sm:$0xff] %v12962_v5 }
 0x49a   : > { %v3044_v18 = vpop.f32.mrf.mxu3 }
 0x49b   : > { %v2137_v18 = vpack.c.bf16 %v12069_v24, %v12069_v24  ;;  %v3411_v24 = vsel %vm2988_vm12, %v2558_v55, 0 }
 0x49c   : > { %3420 = vmatpush.bf16.xpose.msrb.mxu2 %v3411_v24  ;;  %v17057_v24 = vrot.slane %v12742_v60, 2 }
 0x49d   : > { %9912 = vmatmul.msk.bf16.vlgmr.msrb.gmra.mxu1 %vm2988_vm12, %v2137_v18  ;;  %v12993_v63 = vpop.f32.mrf.mxu2  ;;  %v17054_v18 = vrot.slane %v12717_v3, 7  ;;  %v17143_v3 = vrot.slane %v12937_v1, 6 }
 0x49e   : > { %v12968_v7 = vld [vmem:[#allocation1] sm:$0xff]  ;;  %v17170_v16 = vrot.slane %v12993_v63, 2  ;;  %v17171_v48 = vrot.slane %v12993_v63, 3 }
 0x49f   : > { %2744 = vst [vmem:[#allocation1] ss:$9 sm:$0xff] %v17086_v59  ;;  %9902 = vmatmul.msk.bf16.vlgmr.msra.gmra.mxu3 %vm2988_vm12, %v2127_v53  ;;  %v17099_v59 = vrot.slane %v12831_v17, 2 }
 0x4a0   : > { %2745 = vst [vmem:[#allocation1 + $0x1] ss:$9 sm:$0xff] %v17079_v12  ;;  %3363 = vmatpush.bf16.xpose.msra.mxu3 %v3354_v42  ;;  %v17055_v42 = vrot.slane %v12742_v60, 1 }
 0x4a1   : > { %2746 = vst [vmem:[#allocation1 + $0x2] ss:$9 sm:$0xff] %v17059_v19 }
 0x4a2   : > { %2747 = vst [vmem:[#allocation1 + $0x3] ss:$9 sm:$0xff] %v17056_v20  ;;  %v12995_v34 = vpop.f32.mrf.mxu3 }
 0x4a3   : > { %2748 = vst [vmem:[#allocation1 + $0x4] ss:$9 sm:$0xff] %v17053_v31  ;;  %v3607_v53 = vsel %vm3597_vm13, %v12995_v34, -inf  ;;  %9913 = vmatmul.msk.bf16.vlgmr.msrb.gmra.mxu2 %vm2988_vm12, %v2138_v2 }
 0x4a4   : > { %3608 = vmax.xlane.f32.xlu1 %v3607_v53  ;;  %v17058_v53 = vrot.slane %v12742_v60, 3 }
 0x4a5   : > { %v13015_v2 = vpop.f32.mrf.mxu2 }
 0x4a6   : > { %17334 = vst [vmem:[#allocation70_spill] sm:$0xff] %v13015_v2 }
 0x4aa   : > { %v13003_v55 = vld [vmem:[#allocation1] sm:$0xff]  ;;  %v3063_v31 = vpop.f32.mrf.mxu3 }
 0x4ab   : > { %2750 = vst [vmem:[#allocation1] ss:$9 sm:$0xff] %v17054_v18  ;;  %v2131_v18 = vpack.c.bf16 %v11968_v35, %v11968_v35  ;;  %v2560_v31 = vpack.c.bf16 %v12702_v57, %v12702_v57  ;;  %v17061_v35 = vrot.slane %v12742_v60, 5 }
 0x4ac   : > { %2751 = vst [vmem:[#allocation1 + $0x1] ss:$9 sm:$0xff] %v12742_v60 }
 0x4ad   : > { %2752 = vst [vmem:[#allocation1 + $0x2] ss:$9 sm:$0xff] %v17055_v42  ;;  %v3430_v42 = vsel %vm2988_vm12, %v2559_v49, 0  ;;  %v3449_v58 = vsel %vm2988_vm12, %v2560_v31, 0  ;;  %v13034_v19 = vpop.f32.mrf.mxu2  ;;  %v2561_v49 = vpack.c.bf16 %v12723_v36, %v12723_v36  ;;  %v17066_v31 = vrot.slane %v12742_v60, 7 }
 0x4ae   : > { %2753 = vst [vmem:[#allocation1 + $0x3] ss:$9 sm:$0xff] %v17057_v24  ;;  %3458 = vmatpush.bf16.xpose.msrb.mxu0 %v3449_v58  ;;  %v17077_v24 = vrot.slane %v12742_v60, 4  ;;  %v2135_v36 = vpack.c.bf16 %v12035_v11, %v12035_v11  ;;  %v2141_v58 = vpack.c.bf16 %v12137_v29, %v12137_v29  ;;  %v17063_v29 = vrot.slane %v12759_v47, 3 }
 0x4af   : > { %2754 = vst [vmem:[#allocation1 + $0x4] ss:$9 sm:$0xff] %v17058_v53  ;;  %9906 = vmatmul.msk.bf16.vlgmr.msrb.gmra.mxu3 %vm2988_vm12, %v2131_v18  ;;  %v17060_v18 = vrot.slane %v12742_v60, 6  ;;  %v17065_v11 = vrot.slane %v12759_v47, 4 }
 0x4b0   : > { %3439 = vmatpush.bf16.xpose.msrb.mxu3 %v3430_v42  ;;  %17335 = vst [vmem:[#allocation71_spill] sm:$0xff] %v13034_v19  ;;  %v2140_v42 = vpack.c.bf16 %v12120_v22, %v12120_v22 }
 0x4b2   : > { %v13028_v20 = vpop.f32.mrf.mxu3 }
 0x4b3   : > { %v3610_v53 = vsel %vm3597_vm13, %v13028_v20, -inf }
 0x4b4   : > { %3611 = vmax.xlane.f32.xlu2 %v3610_v53  ;;  %v3468_v53 = vsel %vm2988_vm12, %v2561_v49, 0 }
 0x4b5   : > { %9915 = vmatmul.msk.bf16.vlgmr.msrb.gmra.mxu0 %vm2988_vm12, %v2140_v42  ;;  %3477 = vmatpush.bf16.xpose.msra.mxu1 %v3468_v53  ;;  %v17064_v42 = vrot.slane %v12759_v47, 1  ;;  %v17062_v53 = vrot.slane %v12759_v47, 2 }
 0x4b6   : > { %v13036_v57 = vld [vmem:[#allocation1] sm:$0xff] }
 0x4b7   : > { %2756 = vst [vmem:[#allocation1] ss:$9 sm:$0xff] %v17077_v24  ;;  %v17082_v24 = vrot.slane %v12810_v56, 4 }
 0x4b8   : > { %2757 = vst [vmem:[#allocation1 + $0x1] ss:$9 sm:$0xff] %v17061_v35  ;;  %v13061_v35 = vpop.f32.mrf.mxu2 }
 0x4b9   : > { %2758 = vst [vmem:[#allocation1 + $0x2] ss:$9 sm:$0xff] %v17060_v18  ;;  %v2562_v18 = vpack.c.bf16 %v12747_v44, %v12747_v44 }
 0x4ba   : > { %2759 = vst [vmem:[#allocation1 + $0x3] ss:$9 sm:$0xff] %v17066_v31  ;;  %v3082_v22 = vpop.f32.mrf.mxu3 }
 0x4bb   : > { %2760 = vst [vmem:[#allocation1 + $0x4] ss:$9 sm:$0xff] %v12759_v47  ;;  %v3487_v49 = vsel %vm2988_vm12, %v2562_v18, 0 }
 0x4bc   : > { %9916 = vmatmul.msk.bf16.vlgmr.msra.gmra.mxu1 %vm2988_vm12, %v2141_v58  ;;  %3496 = vmatpush.bf16.xpose.msra.mxu2 %v3487_v49  ;;  %v2142_v58 = vpack.c.bf16 %v12155_v27, %v12155_v27  ;;  %v2563_v49 = vpack.c.bf16 %v12774_v8, %v12774_v8  ;;  %v2139_v27 = vpack.c.bf16 %v12103_v45, %v12103_v45 }
 0x4bd   : > { %v2564_v8 = vpack.c.bf16 %v12813_v40, %v12813_v40 }
 0x4bf   : > { %9910 = vmatmul.msk.bf16.vlgmr.msra.gmra.mxu3 %vm2988_vm12, %v2135_v36  ;;  %v17071_v36 = vrot.slane %v12759_v47, 5 }
 0x4c2   : > { %v13068_v22 = vld [vmem:[#allocation1] sm:$0xff]  ;;  %v13076_v44 = vpop.f32.mrf.mxu3 }
 0x4c3   : > { %2762 = vst [vmem:[#allocation1] ss:$9 sm:$0xff] %v17064_v42  ;;  %v3613_v18 = vsel %vm3597_vm13, %v13076_v44, -inf  ;;  %9917 = vmatmul.msk.bf16.vlgmr.msra.gmra.mxu2 %vm2988_vm12, %v2142_v58  ;;  %v17068_v58 = vrot.slane %v12783_v9, 1 }
 0x4c4   : > { %2763 = vst [vmem:[#allocation1 + $0x1] ss:$9 sm:$0xff] %v17062_v53  ;;  %3614 = vmax.xlane.f32.xlu1 %v3613_v18  ;;  %v13091_v53 = vpop.f32.mrf.mxu2  ;;  %v17067_v18 = vrot.slane %v12759_v47, 7 }
 0x4c5   : > { %2764 = vst [vmem:[#allocation1 + $0x2] ss:$9 sm:$0xff] %v17063_v29  ;;  %v3506_v29 = vsel %vm2988_vm12, %v2563_v49, 0 }
 0x4c6   : > { %2765 = vst [vmem:[#allocation1 + $0x3] ss:$9 sm:$0xff] %v17065_v11  ;;  %3515 = vmatpush.bf16.xpose.msra.mxu3 %v3506_v29  ;;  %v17070_v11 = vrot.slane %v12759_v47, 6  ;;  %v3525_v29 = vsel %vm2988_vm12, %v2564_v8, 0  ;;  %v2565_v8 = vpack.c.bf16 %v12839_v61, %v12839_v61 }
 0x4c7   : > { %2766 = vst [vmem:[#allocation1 + $0x4] ss:$9 sm:$0xff] %v17071_v36  ;;  %3534 = vmatpush.bf16.xpose.msra.mxu0 %v3525_v29 }
 0x4c8   : > { %v3544_v29 = vsel %vm2988_vm12, %v2565_v8, 0 }
 0x4c9   : > { %3553 = vmatpush.bf16.xpose.msrb.mxu1 %v3544_v29 }
 0x4ca   : > { %v3101_v42 = vpop.f32.mrf.mxu3 }
 0x4cb   : > { %v17069_v42 = vrot.slane %v12783_v9, 2 }
 0x4cc   : > { %v13112_v49 = vpop.f32.mrf.mxu2 }
 0x4ce   : > { %v13097_v31 = vld [vmem:[#allocation1] sm:$0xff] }
 0x4cf   : > { %2768 = vst [vmem:[#allocation1] ss:$9 sm:$0xff] %v17070_v11  ;;  %9914 = vmatmul.msk.bf16.vlgmr.msrb.gmra.mxu3 %vm2988_vm12, %v2139_v27  ;;  %v2144_v27 = vpack.c.bf16 %v12188_v4, %v12188_v4  ;;  %v17074_v4 = vrot.slane %v12783_v9, 6 }
 0x4d0   : > { %2769 = vst [vmem:[#allocation1 + $0x1] ss:$9 sm:$0xff] %v17067_v18  ;;  %v13122_v18 = vpop.f32.mrf.mxu0 }
 0x4d1   : > { %2770 = vst [vmem:[#allocation1 + $0x2] ss:$9 sm:$0xff] %v12783_v9  ;;  %9919 = vmatmul.msk.bf16.vlgmr.msra.gmra.mxu0 %vm2988_vm12, %v2144_v27  ;;  %v17076_v27 = vrot.slane %v12783_v9, 7 }
 0x4d2   : > { %2771 = vst [vmem:[#allocation1 + $0x3] ss:$9 sm:$0xff] %v17068_v58  ;;  %v13118_v45 = vpop.f32.mrf.mxu3  ;;  %v17072_v58 = vrot.slane %v12783_v9, 3  ;;  %v13147_v29 = vpop.f32.mrf.mxu1 }
 0x4d3   : > { %2772 = vst [vmem:[#allocation1 + $0x4] ss:$9 sm:$0xff] %v17069_v42  ;;  %v3616_v40 = vsel %vm3597_vm13, %v13118_v45, -inf  ;;  %v17073_v42 = vrot.slane %v12783_v9, 4 }
 0x4d4   : > { %3617 = vmax.xlane.f32.xlu0 %v3616_v40  ;;  %v13132_v11 = vpop.f32.mrf.mxu2  ;;  %v17075_v40 = vrot.slane %v12783_v9, 5  ;;  %v17128_v9 = vrot.slane %v12920_v46, 7 }
 0x4d8   : > { %v3234_v8 = vpop.f32.mrf.mxu0 }
 0x4da   : > { %v13134_v36 = vld [vmem:[#allocation1] sm:$0xff]  ;;  %v3120_v61 = vpop.f32.mrf.mxu3 }
 0x4db   : > { %2774 = vst [vmem:[#allocation1] ss:$9 sm:$0xff] %v17072_v58  ;;  %v2143_v58 = vpack.c.bf16 %v12171_v51, %v12171_v51  ;;  %v2145_v61 = vpack.c.bf16 %v12207_v50, %v12207_v50 }
 0x4dc   : > { %2775 = vst [vmem:[#allocation1 + $0x1] ss:$9 sm:$0xff] %v17073_v42  ;;  %v2566_v42 = vpack.c.bf16 %v12873_v62, %v12873_v62  ;;  %v3253_v62 = vpop.f32.mrf.mxu1 }
 0x4dd   : > { %2776 = vst [vmem:[#allocation1 + $0x2] ss:$9 sm:$0xff] %v17075_v40  ;;  %9920 = vmatmul.msk.bf16.vlgmr.msrb.gmra.mxu1 %vm2988_vm12, %v2145_v61  ;;  %v2567_v61 = vpack.c.bf16 %v12907_v23, %v12907_v23 }
 0x4de   : > { %2777 = vst [vmem:[#allocation1 + $0x3] ss:$9 sm:$0xff] %v17074_v4  ;;  %v3563_v8 = vsel %vm2988_vm12, %v2566_v42, 0  ;;  %v13160_v4 = vpop.f32.mrf.mxu2  ;;  %v2146_v42 = vpack.c.bf16 %v12222_v30, %v12222_v30 }
 0x4df   : > { %2778 = vst [vmem:[#allocation1 + $0x4] ss:$9 sm:$0xff] %v17076_v27  ;;  %9918 = vmatmul.msk.bf16.vlgmr.msra.gmra.mxu3 %vm2988_vm12, %v2143_v58  ;;  %3572 = vmatpush.bf16.xpose.msrb.mxu2 %v3563_v8  ;;  %v17078_v27 = vrot.slane %v12810_v56, 1  ;;  %v17081_v58 = vrot.slane %v12810_v56, 2  ;;  %v17080_v8 = vrot.slane %v12810_v56, 3 }
 0x4e2   : > { %v13162_v40 = vpop.f32.mrf.mxu3 }
 0x4e3   : > { %v3619_v51 = vsel %vm3597_vm13, %v13162_v40, -inf }
 0x4e4   : > { %3620 = vmax.xlane.f32.xlu2 %v3619_v51  ;;  %v3582_v51 = vsel %vm2988_vm12, %v2567_v61, 0  ;;  %v2956_v61 = vpack.c.bf16 %v12939_v6, %v12939_v6 }
 0x4e5   : > { %3591 = vmatpush.bf16.xpose.msrb.mxu3 %v3582_v51  ;;  %v3600_v30 = vpop.xlane.xlu1 %3599 }
 0x4e6   : > { %v13167_v50 = vld [vmem:[#allocation1] sm:$0xff]  ;;  %9921 = vmatmul.msk.bf16.vlgmr.msrb.gmra.mxu2 %vm2988_vm12, %v2146_v42  ;;  %v3694_v23 = vsub.f32 %v12861_v32, %v3600_v30  ;;  %v2147_v42 = vpack.c.bf16 %v12240_v14, %v12240_v14  ;;  %v17084_v30 = vrot.slane %v12810_v56, 6  ;;  %v17083_v14 = vrot.slane %v12810_v56, 7 }
 0x4e7   : > { %2780 = vst [vmem:[#allocation1] ss:$9 sm:$0xff] %v12810_v56 }
 0x4e8   : > { %2781 = vst [vmem:[#allocation1 + $0x1] ss:$9 sm:$0xff] %v17078_v27  ;;  %v13188_v27 = vpop.f32.mrf.mxu2  ;;  %v3726_v12 = vmul.f32 1.442695, %v3694_v23 }
 0x4e9   : > { %2782 = vst [vmem:[#allocation1 + $0x2] ss:$9 sm:$0xff] %v17081_v58 }
 0x4ea   : > { %2783 = vst [vmem:[#allocation1 + $0x3] ss:$9 sm:$0xff] %v17080_v8  ;;  %v3139_v62 = vpop.f32.mrf.mxu3  ;;  %v10900_v8 = vmov 65535   ;;  %10299 = vpow2.f32 %v3726_v12 }
 0x4eb   : > { %2784 = vst [vmem:[#allocation1 + $0x4] ss:$9 sm:$0xff] %v17082_v24  ;;  %v3988_v51 = vsel %vm3986_vm14, 4294967295, %v10900_v8  ;;  %v17085_v24 = vrot.slane %v12810_v56, 5  ;;  %v17088_v8 = vrot.slane %v12831_v17, 1 }
 0x4ec   : > { %v13194_v58 = vsel %vm3987_vm15, %v3988_v51, 0 }
 0x4ed   : > { %v3991_v32 = vand.u32 %v13194_v58, %v2956_v61 }
 0x4ef   : > { %9922 = vmatmul.msk.bf16.vlgmr.msrb.gmra.mxu3 %vm2988_vm12, %v2147_v42  ;;  %4000 = vmatpush.bf16.msrb.mxu0 %v3991_v32  ;;  %v2957_v32 = vpack.c.bf16 %v12968_v7, %v12968_v7  ;;  %v17093_v7 = vrot.slane %v12831_v17, 4 }
 0x4f0   : > { %v3272_v12 = vpop.f32.mrf.mxu2  ;;  %v13214_v42 = vpop.eup %10299 }
 0x4f1   : > { %v3790_v51 = vsel %vm3597_vm13, %v13214_v42, 0.0 }
 0x4f2   : > { %v13200_v23 = vld [vmem:[#allocation1] sm:$0xff]  ;;  %v13207_v6 = vpop.f32.mrf.mxu3  ;;  %3791 = vadd.xlane.f32.xlu1 %v3790_v51 }
 0x4f3   : > { %2786 = vst [vmem:[#allocation1] ss:$9 sm:$0xff] %v17085_v24  ;;  %v3622_v62 = vsel %vm3597_vm13, %v13207_v6, -inf }
 0x4f4   : > { %2787 = vst [vmem:[#allocation1 + $0x1] ss:$9 sm:$0xff] %v17084_v30  ;;  %3623 = vmax.xlane.f32.xlu0 %v3622_v62  ;;  %v13217_v61 = vpop.f32.mrf.mxu0 }
 0x4f5   : > { %2788 = vst [vmem:[#allocation1 + $0x2] ss:$9 sm:$0xff] %v17083_v14  ;;  %v4010_v14 = vand.u32 %v13194_v58, %v2957_v32  ;;  %v3646_v26 = vsel %vm3597_vm13, %v13217_v61, -inf }
 0x4f6   : > { %2789 = vst [vmem:[#allocation1 + $0x3] ss:$9 sm:$0xff] %v12831_v17  ;;  %v13231_v25 = vpop.f32.mrf.mxu1 }
 0x4f7   : > { %2790 = vst [vmem:[#allocation1 + $0x4] ss:$9 sm:$0xff] %v17088_v8  ;;  %v3603_v12 = vpop.xlane.xlu2 %3602  ;;  %4019 = vmatpush.bf16.msra.mxu1 %v4010_v14  ;;  %v17091_v14 = vrot.slane %v12831_v17, 6 }
 0x4f8   : > { %v3695_v30 = vsub.f32 %v12902_v15, %v3603_v12  ;;  %v2958_v15 = vpack.c.bf16 %v13003_v55, %v13003_v55 }
 0x4fa   : > { %v3728_v24 = vmul.f32 1.442695, %v3695_v30  ;;  %v3158_v62 = vpop.f32.mrf.mxu3  ;;  %v17092_v30 = vrot.slane %v12831_v17, 5 }
 0x4fb   : > { %v2959_v62 = vpack.c.bf16 %v13036_v57, %v13036_v57  ;;  %v17098_v57 = vrot.slane %v12859_v13, 3 }
 0x4fc   : > { %10301 = vpow2.f32 %v3728_v24  ;;  %v3310_v39 = vpop.f32.mrf.mxu0 }
 0x4fd   : > { %v4029_v39 = vand.u32 %v13194_v58, %v2958_v15  ;;  %v17094_v15 = vrot.slane %v12831_v17, 7 }
 0x4fe   : > { %v13229_v8 = vld [vmem:[#allocation1] sm:$0xff]  ;;  %v3329_v12 = vpop.f32.mrf.mxu1 }
 0x4ff   : > { %2792 = vst [vmem:[#allocation1] ss:$9 sm:$0xff] %v17099_v59  ;;  %4038 = vmatpush.bf16.msra.mxu2 %v4029_v39  ;;  %v4048_v39 = vand.u32 %v13194_v58, %v2959_v62  ;;  %v3634_v12 = vsel %vm3597_vm13, %v13122_v18, -inf  ;;  %v2960_v62 = vpack.c.bf16 %v13068_v22, %v13068_v22 }
 0x500   : > { %2793 = vst [vmem:[#allocation1 + $0x1] ss:$9 sm:$0xff] %v17096_v0 }
 0x501   : > { %2794 = vst [vmem:[#allocation1 + $0x2] ss:$9 sm:$0xff] %v17093_v7  ;;  %4057 = vmatpush.bf16.msra.mxu3 %v4048_v39  ;;  %v17097_v7 = vrot.slane %v12859_v13, 2  ;;  %v4067_v39 = vand.u32 %v13194_v58, %v2960_v62  ;;  %v17107_v62 = vrot.slane %v12859_v13, 6 }
 0x502   : > { %2795 = vst [vmem:[#allocation1 + $0x3] ss:$9 sm:$0xff] %v17092_v30  ;;  %v13249_v55 = vpop.eup %10301  ;;  %v13251_v24 = vpop.f32.mrf.mxu3  ;;  %v17095_v30 = vrot.slane %v12859_v13, 1 }
 0x503   : > { %2796 = vst [vmem:[#allocation1 + $0x4] ss:$9 sm:$0xff] %v17091_v14  ;;  %v3793_v51 = vsel %vm3597_vm13, %v13249_v55, 0.0  ;;  %v3625_v32 = vsel %vm3597_vm13, %v13251_v24, -inf  ;;  %4076 = vmatpush.bf16.msra.mxu0 %v4067_v39  ;;  %v17110_v39 = vrot.slane %v12859_v13, 7 }
 0x504   : > { %3794 = vadd.xlane.f32.xlu2 %v3793_v51  ;;  %3626 = vmax.xlane.f32.xlu1 %v3625_v32 }
 0x509   : > { %v13268_v32 = vpop.f32.mrf.mxu2 }
 0x50a   : > { %v13261_v14 = vld [vmem:[#allocation1] sm:$0xff]  ;;  %v3177_v51 = vpop.f32.mrf.mxu3 }
 0x50b   : > { %2798 = vst [vmem:[#allocation1] ss:$9 sm:$0xff] %v17094_v15 }
 0x50c   : > { %2799 = vst [vmem:[#allocation1 + $0x1] ss:$9 sm:$0xff] %v12859_v13  ;;  %3635 = vmax.xlane.f32.xlu1 %v3634_v12  ;;  %v3637_v12 = vsel %vm3597_vm13, %v13147_v29, -inf }
 0x50d   : > { %2800 = vst [vmem:[#allocation1 + $0x2] ss:$9 sm:$0xff] %v17095_v30  ;;  %v17100_v30 = vrot.slane %v12859_v13, 4 }
 0x50e   : > { %2801 = vst [vmem:[#allocation1 + $0x3] ss:$9 sm:$0xff] %v17097_v7  ;;  %v17104_v7 = vrot.slane %v12859_v13, 5  ;;  %v17113_v13 = vrot.slane %v12896_v38, 1 }
 0x50f   : > { %2802 = vst [vmem:[#allocation1 + $0x4] ss:$9 sm:$0xff] %v17098_v57 }
 0x510   : > { %v13292_v22 = vpop.f32.mrf.mxu0 }
 0x511   : > { %v3348_v15 = vpop.f32.mrf.mxu2 }
 0x512   : > { %v13282_v51 = vpop.f32.mrf.mxu3  ;;  %v2961_v15 = vpack.c.bf16 %v13097_v31, %v13097_v31 }
 0x513   : > { %v3628_v0 = vsel %vm3597_vm13, %v13282_v51, -inf }
 0x514   : > { %3629 = vmax.xlane.f32.xlu2 %v3628_v0  ;;  %3638 = vmax.xlane.f32.xlu1 %v3637_v12  ;;  %v3606_v0 = vpop.xlane.xlu0 %3605  ;;  %v4086_v59 = vand.u32 %v13194_v58, %v2961_v15 }
 0x515   : > { %v3696_v31 = vsub.f32 %v12946_v41, %v3606_v0 }
 0x516   : > { %v13290_v57 = vld [vmem:[#allocation1] sm:$0xff]  ;;  %4095 = vmatpush.bf16.msrb.mxu1 %v4086_v59  ;;  %v17111_v59 = vrot.slane %v12896_v38, 3 }
 0x517   : > { %2804 = vst [vmem:[#allocation1] ss:$9 sm:$0xff] %v17100_v30  ;;  %v3609_v12 = vpop.xlane.xlu1 %3608  ;;  %v3730_v15 = vmul.f32 1.442695, %v3696_v31 }
 0x518   : > { %2805 = vst [vmem:[#allocation1 + $0x1] ss:$9 sm:$0xff] %v17104_v7  ;;  %v3697_v30 = vsub.f32 %v12995_v34, %v3609_v12  ;;  %v3386_v7 = vpop.f32.mrf.mxu0  ;;  %v17112_v34 = vrot.slane %v12896_v38, 2 }
 0x519   : > { %2806 = vst [vmem:[#allocation1 + $0x2] ss:$9 sm:$0xff] %v17107_v62  ;;  %v2962_v62 = vpack.c.bf16 %v13134_v36, %v13134_v36  ;;  %v17114_v36 = vrot.slane %v12896_v38, 5 }
 0x51a   : > { %2807 = vst [vmem:[#allocation1 + $0x3] ss:$9 sm:$0xff] %v17110_v39  ;;  %v3732_v43 = vmul.f32 1.442695, %v3697_v30  ;;  %v3196_v17 = vpop.f32.mrf.mxu3  ;;  %v13310_v56 = vpop.f32.mrf.mxu1 }
 0x51b   : > { %2808 = vst [vmem:[#allocation1 + $0x4] ss:$9 sm:$0xff] %v12896_v38  ;;  %v4105_v39 = vand.u32 %v13194_v58, %v2962_v62  ;;  %v17119_v17 = vrot.slane %v12896_v38, 4 }
 0x51c   : > { %10303 = vpow2.f32 %v3732_v43 }
 0x51d   : > { %4114 = vmatpush.bf16.msrb.mxu2 %v4105_v39  ;;  %10305 = vpow2.f32 %v3730_v15  ;;  %v2963_v39 = vpack.c.bf16 %v13167_v50, %v13167_v50  ;;  %v17116_v50 = vrot.slane %v12920_v46, 1 }
 0x51f   : > { %v4124_v31 = vand.u32 %v13194_v58, %v2963_v39 }
 0x521   : > { %4133 = vmatpush.bf16.msrb.mxu3 %v4124_v31  ;;  %v3640_v31 = vsel %vm3597_vm13, %v13188_v27, -inf }
 0x522   : > { %v13317_v12 = vld [vmem:[#allocation1] sm:$0xff]  ;;  %v13322_v43 = vpop.eup %10303  ;;  %v13327_v41 = vpop.f32.mrf.mxu3 }
 0x523   : > { %2810 = vst [vmem:[#allocation1] ss:$9 sm:$0xff] %v17113_v13  ;;  %v3799_v7 = vsel %vm3597_vm13, %v13322_v43, 0.0  ;;  %v3631_v30 = vsel %vm3597_vm13, %v13327_v41, -inf  ;;  %v3405_v62 = vpop.f32.mrf.mxu1  ;;  %v13343_v15 = vpop.eup %10305 }
 0x524   : > { %2811 = vst [vmem:[#allocation1 + $0x1] ss:$9 sm:$0xff] %v17112_v34  ;;  %3800 = vadd.xlane.f32.xlu2 %v3799_v7  ;;  %3632 = vmax.xlane.f32.xlu0 %v3631_v30  ;;  %v17117_v7 = vrot.slane %v12896_v38, 6  ;;  %v3796_v30 = vsel %vm3597_vm13, %v13343_v15, 0.0  ;;  %v17115_v62 = vrot.slane %v12896_v38, 7 }
 0x525   : > { %2812 = vst [vmem:[#allocation1 + $0x2] ss:$9 sm:$0xff] %v17111_v59 }
 0x526   : > { %2813 = vst [vmem:[#allocation1 + $0x3] ss:$9 sm:$0xff] %v17119_v17  ;;  %v13346_v13 = vpop.f32.mrf.mxu2  ;;  %v17125_v17 = vrot.slane %v12920_v46, 5 }
 0x527   : > { %2814 = vst [vmem:[#allocation1 + $0x4] ss:$9 sm:$0xff] %v17114_v36  ;;  %v3612_v0 = vpop.xlane.xlu2 %3611 }
 0x528   : > { %v3698_v59 = vsub.f32 %v13028_v20, %v3612_v0 }
 0x52a   : > { %v3215_v34 = vpop.f32.mrf.mxu3  ;;  %v3734_v20 = vmul.f32 1.442695, %v3698_v59 }
 0x52b   : > { %v17118_v34 = vrot.slane %v12920_v46, 2 }
 0x52c   : > { %3797 = vadd.xlane.f32.xlu0 %v3796_v30  ;;  %10307 = vpow2.f32 %v3734_v20  ;;  %v17126_v20 = vrot.slane %v12920_v46, 4 }
 0x52e   : > { %v13352_v36 = vld [vmem:[#allocation1] sm:$0xff]  ;;  %v3424_v0 = vpop.f32.mrf.mxu2 }
 0x52f   : > { %2816 = vst [vmem:[#allocation1] ss:$9 sm:$0xff] %v17117_v7 }
 0x530   : > { %2817 = vst [vmem:[#allocation1 + $0x1] ss:$9 sm:$0xff] %v17115_v62  ;;  %v17124_v62 = vrot.slane %v12920_v46, 3 }
 0x531   : > { %2818 = vst [vmem:[#allocation1 + $0x2] ss:$9 sm:$0xff] %v12920_v46 }
 0x532   : > { %2819 = vst [vmem:[#allocation1 + $0x3] ss:$9 sm:$0xff] %v17116_v50  ;;  %v13365_v39 = vpop.f32.mrf.mxu3  ;;  %v13371_v30 = vpop.f32.mrf.mxu0 }
 0x533   : > { %2820 = vst [vmem:[#allocation1 + $0x4] ss:$9 sm:$0xff] %v17118_v34  ;;  %v3643_v59 = vsel %vm3597_vm13, %v13365_v39, -inf  ;;  %v13374_v7 = vpop.eup %10307 }
 0x534   : > { %3641 = vmax.xlane.f32.xlu0 %v3640_v31  ;;  %3644 = vmax.xlane.f32.xlu2 %v3643_v59  ;;  %v17127_v31 = vrot.slane %v12920_v46, 6  ;;  %v17141_v46 = vrot.slane %v12937_v1, 4 }
 0x537   : > { %v3615_v50 = vpop.xlane.xlu1 %3614 }
 0x538   : > { %v3699_v0 = vsub.f32 %v13076_v44, %v3615_v50  ;;  %v3802_v44 = vsel %vm3597_vm13, %v13374_v7, 0.0 }
 0x53a   : > { %v13377_v34 = vld [vmem:[#allocation1] sm:$0xff]  ;;  %v3736_v59 = vmul.f32 1.442695, %v3699_v0  ;;  %v3291_v38 = vpop.f32.mrf.mxu3  ;;  %v3462_v50 = vpop.f32.mrf.mxu0 }
 0x53b   : > { %2822 = vst [vmem:[#allocation1] ss:$9 sm:$0xff] %v17124_v62  ;;  %v13393_v62 = vpop.f32.mrf.mxu1  ;;  %v17136_v50 = vrot.slane %v12937_v1, 2 }
 0x53c   : > { %2823 = vst [vmem:[#allocation1 + $0x1] ss:$9 sm:$0xff] %v17126_v20  ;;  %10309 = vpow2.f32 %v3736_v59  ;;  %3803 = vadd.xlane.f32.xlu0 %v3802_v44  ;;  %v3652_v20 = vsel %vm3597_vm13, %v13268_v32, -inf }
 0x53d   : > { %2824 = vst [vmem:[#allocation1 + $0x2] ss:$9 sm:$0xff] %v17125_v17 }
 0x53e   : > { %2825 = vst [vmem:[#allocation1 + $0x3] ss:$9 sm:$0xff] %v17127_v31  ;;  %v17135_v31 = vrot.slane %v12937_v1, 1 }
 0x53f   : > { %2826 = vst [vmem:[#allocation1 + $0x4] ss:$9 sm:$0xff] %v17128_v9  ;;  %v17144_v9 = vrot.slane %v12937_v1, 3 }
 0x542   : > { %v13397_v38 = vpop.eup %10309  ;;  %v13399_v0 = vpop.f32.mrf.mxu3 }
 0x543   : > { %v3805_v17 = vsel %vm3597_vm13, %v13397_v38, 0.0  ;;  %v3481_v44 = vpop.f32.mrf.mxu1 }
 0x544   : > { %3806 = vadd.xlane.f32.xlu2 %v3805_v17  ;;  %3653 = vmax.xlane.f32.xlu0 %v3652_v20 }
 0x546   : > { %v13406_v59 = vld [vmem:[#allocation1] sm:$0xff]  ;;  %v13421_v60 = vpop.f32.mrf.mxu2 }
 0x547   : > { %2828 = vst [vmem:[#allocation1] ss:$9 sm:$0xff] %v12937_v1  ;;  %v3618_v47 = vpop.xlane.xlu0 %3617 }
 0x548   : > { %2829 = vst [vmem:[#allocation1 + $0x1] ss:$9 sm:$0xff] %v17135_v31  ;;  %v3700_v17 = vsub.f32 %v13118_v45, %v3618_v47  ;;  %v3649_v31 = vsel %vm3597_vm13, %v13231_v25, -inf  ;;  %v17145_v47 = vrot.slane %v12937_v1, 7 }
 0x549   : > { %2830 = vst [vmem:[#allocation1 + $0x2] ss:$9 sm:$0xff] %v17136_v50  ;;  %v17142_v50 = vrot.slane %v12937_v1, 5  ;;  %v17159_v1 = vrot.slane %v12962_v5, 2 }
 0x54a   : > { %2831 = vst [vmem:[#allocation1 + $0x3] ss:$9 sm:$0xff] %v17144_v9  ;;  %v3738_v20 = vmul.f32 1.442695, %v3700_v17  ;;  %v3367_v44 = vpop.f32.mrf.mxu3 }
 0x54b   : > { %2832 = vst [vmem:[#allocation1 + $0x4] ss:$9 sm:$0xff] %v17141_v46  ;;  %v3658_v46 = vsel %vm3597_vm13, %v13292_v22, -inf }
 0x54c   : > { %10311 = vpow2.f32 %v3738_v20  ;;  %3650 = vmax.xlane.f32.xlu2 %v3649_v31  ;;  %v17154_v31 = vrot.slane %v12962_v5, 1 }
 0x54e   : > { %v3500_v20 = vpop.f32.mrf.mxu2 }
 0x552   : > { %v13427_v33 = vld [vmem:[#allocation1] sm:$0xff]  ;;  %v13432_v45 = vpop.eup %10311  ;;  %v13436_v17 = vpop.f32.mrf.mxu3 }
 0x553   : > { %2834 = vst [vmem:[#allocation1] ss:$9 sm:$0xff] %v17142_v50  ;;  %v3808_v44 = vsel %vm3597_vm13, %v13432_v45, 0.0  ;;  %v13446_v50 = vpop.f32.mrf.mxu0 }
 0x554   : > { %2835 = vst [vmem:[#allocation1 + $0x1] ss:$9 sm:$0xff] %v17143_v3  ;;  %3809 = vadd.xlane.f32.xlu1 %v3808_v44  ;;  %3659 = vmax.xlane.f32.xlu2 %v3658_v46 }
 0x555   : > { %2836 = vst [vmem:[#allocation1 + $0x2] ss:$9 sm:$0xff] %v17145_v47 }
 0x556   : > { %2837 = vst [vmem:[#allocation1 + $0x3] ss:$9 sm:$0xff] %v12962_v5 }
 0x557   : > { %2838 = vst [vmem:[#allocation1 + $0x4] ss:$9 sm:$0xff] %v17154_v31  ;;  %v3621_v20 = vpop.xlane.xlu2 %3620  ;;  %v17155_v31 = vrot.slane %v12962_v5, 5 }
 0x558   : > { %v3701_v3 = vsub.f32 %v13162_v40, %v3621_v20  ;;  %v17158_v40 = vrot.slane %v12962_v5, 4  ;;  %v3655_v20 = vsel %vm3597_vm13, %v13399_v0, -inf }
 0x55a   : > { %v3740_v9 = vmul.f32 1.442695, %v3701_v3  ;;  %v3443_v47 = vpop.f32.mrf.mxu3  ;;  %v13457_v44 = vpop.f32.mrf.mxu1  ;;  %v17157_v3 = vrot.slane %v12962_v5, 6 }
 0x55b   : > { %v3538_v46 = vpop.f32.mrf.mxu0 }
 0x55c   : > { %10313 = vpow2.f32 %v3740_v9  ;;  %3647 = vmax.xlane.f32.xlu1 %v3646_v26 }
 0x55e   : > { %v13455_v52 = vld [vmem:[#allocation1] sm:$0xff] }
 0x55f   : > { %2840 = vst [vmem:[#allocation1] ss:$9 sm:$0xff] %v17159_v1  ;;  %v17167_v1 = vrot.slane %v12993_v63, 1 }
 0x560   : > { %2841 = vst [vmem:[#allocation1 + $0x1] ss:$9 sm:$0xff] %v17156_v10 }
 0x561   : > { %2843 = vst [vmem:[#allocation1 + $0x3] ss:$9 sm:$0xff] %v17155_v31  ;;  %v17166_v31 = vrot.slane %v12962_v5, 7 }
 0x562   : > { %2844 = vst [vmem:[#allocation1 + $0x4] ss:$9 sm:$0xff] %v17157_v3  ;;  %v13472_v9 = vpop.eup %10313  ;;  %v13474_v26 = vpop.f32.mrf.mxu3 }
 0x563   : > { %2842 = vst [vmem:[#allocation1 + $0x2] ss:$9 sm:$0xff] %v17158_v40  ;;  %v3811_v47 = vsel %vm3597_vm13, %v13472_v9, 0.0  ;;  %v3557_v46 = vpop.f32.mrf.mxu1 }
 0x564   : > { %3812 = vadd.xlane.f32.xlu0 %v3811_v47  ;;  %3656 = vmax.xlane.f32.xlu1 %v3655_v20 }
 0x565   : > { %v3792_v54 = vpop.xlane.xlu1 %3791 }
 0x566   : > { %10315 = vrcp.f32 %v3792_v54 }
 0x567   : > { %v3624_v10 = vpop.xlane.xlu0 %3623 }
 0x568   : > { %v3702_v40 = vsub.f32 %v13207_v6, %v3624_v10  ;;  %v2964_v6 = vpack.c.bf16 %v13200_v23, %v13200_v23 }
 0x569   : > { %v13489_v46 = vpop.f32.mrf.mxu2 }
 0x56a   : > { %v13481_v3 = vld [vmem:[#allocation1] sm:$0xff]  ;;  %v3742_v47 = vmul.f32 1.442695, %v3702_v40  ;;  %v3519_v20 = vpop.f32.mrf.mxu3  ;;  %v4143_v23 = vand.u32 %v13194_v58, %v2964_v6 }
 0x56b   : > { %2846 = vst [vmem:[#allocation1] ss:$9 sm:$0xff] %v17166_v31 }
 0x56c   : > { %2847 = vst [vmem:[#allocation1 + $0x1] ss:$9 sm:$0xff] %v12993_v63  ;;  %10317 = vpow2.f32 %v3742_v47  ;;  %v10316_v10 = vpop.eup %10315 }
 0x56d   : > { %2848 = vst [vmem:[#allocation1 + $0x2] ss:$9 sm:$0xff] %v17167_v1  ;;  %v3918_v54 = vmul.f32 %v10316_v10, %v13214_v42  ;;  %v17172_v1 = vrot.slane %v12993_v63, 4  ;;  %v17173_v42 = vrot.slane %v12993_v63, 6  ;;  %v17175_v10 = vrot.slane %v12993_v63, 7 }
 0x56e   : > { %2849 = vst [vmem:[#allocation1 + $0x3] ss:$9 sm:$0xff] %v17170_v16  ;;  %v17174_v16 = vrot.slane %v12993_v63, 5 }
 0x56f   : > { %2850 = vst [vmem:[#allocation1 + $0x4] ss:$9 sm:$0xff] %v17171_v48  ;;  %v3950_v5 = vpack.c.bf16 %v3918_v54, %v3918_v54 }
 0x571   : > { %v3576_v20 = vpop.f32.mrf.mxu2  ;;  %9923 = vmatmul.msk.bf16.vlgmr.msrb.gmra.mxu0 %vm3982_vm0, %v3950_v5 }
 0x572   : > { %v13501_v40 = vpop.eup %10317  ;;  %v13503_v31 = vpop.f32.mrf.mxu3  ;;  %4152 = vmatpush.bf16.msrb.mxu0 %v4143_v23 }
 0x573   : > { %v3814_v47 = vsel %vm3597_vm13, %v13501_v40, 0.0 }
 0x574   : > { %3815 = vadd.xlane.f32.xlu2 %v3814_v47 }
 0x576   : > { %v13509_v48 = vld [vmem:[#allocation1] sm:$0xff] }
 0x577   : > { %2852 = vst [vmem:[#allocation1] ss:$9 sm:$0xff] %v17172_v1  ;;  %v3795_v54 = vpop.xlane.xlu2 %3794  ;;  %v3627_v20 = vpop.xlane.xlu1 %3626  ;;  %v3661_v1 = vsel %vm3597_vm13, %v13310_v56, -inf }
 0x578   : > { %2853 = vst [vmem:[#allocation1 + $0x1] ss:$9 sm:$0xff] %v17174_v16  ;;  %10319 = vrcp.f32 %v3795_v54  ;;  %v3703_v6 = vsub.f32 %v13251_v24, %v3627_v20  ;;  %v17182_v16 = vrot.slane %v13015_v2, 1  ;;  %v17176_v54 = vrot.slane %v13015_v2, 2 }
 0x579   : > { %2854 = vst [vmem:[#allocation1 + $0x2] ss:$9 sm:$0xff] %v17173_v42  ;;  %v2965_v42 = vpack.c.bf16 %v13229_v8, %v13229_v8  ;;  %v17177_v20 = vrot.slane %v13015_v2, 3 }
 0x57a   : > { %2855 = vst [vmem:[#allocation1 + $0x3] ss:$9 sm:$0xff] %v17175_v10  ;;  %v3744_v5 = vmul.f32 1.442695, %v3703_v6  ;;  %v3595_v47 = vpop.f32.mrf.mxu3 }
 0x57b   : > { %2856 = vst [vmem:[#allocation1 + $0x4] ss:$9 sm:$0xff] %v13015_v2  ;;  %v4162_v8 = vand.u32 %v13194_v58, %v2965_v42 }
 0x57c   : > { %10321 = vpow2.f32 %v3744_v5  ;;  %3662 = vmax.xlane.f32.xlu2 %v3661_v1  ;;  %v17181_v1 = vrot.slane %v13015_v2, 4 }
 0x57e   : > { %v10320_v23 = vpop.eup %10319 }
 0x57f   : > { %v3919_v10 = vmul.f32 %v10320_v23, %v13249_v55  ;;  %v17180_v55 = vrot.slane %v13015_v2, 5 }
 0x581   : > { %v3951_v6 = vpack.c.bf16 %v3919_v10, %v3919_v10 }
 0x582   : > { %v13532_v24 = vld [vmem:[#allocation1] sm:$0xff]  ;;  %v13537_v5 = vpop.eup %10321 }
 0x583   : > { %2858 = vst [vmem:[#allocation1] ss:$9 sm:$0xff] %v17182_v16  ;;  %9924 = vmatmul.msk.bf16.vlgmr.msra.gmra.mxu1 %vm3982_vm0, %v3951_v6  ;;  %v3817_v47 = vsel %vm3597_vm13, %v13537_v5, 0.0  ;;  %v17188_v16 = vrot.slane %v13034_v19, 4 }
 0x584   : > { %2859 = vst [vmem:[#allocation1 + $0x1] ss:$9 sm:$0xff] %v17176_v54  ;;  %4171 = vmatpush.bf16.msra.mxu1 %v4162_v8  ;;  %3818 = vadd.xlane.f32.xlu0 %v3817_v47  ;;  %v17179_v54 = vrot.slane %v13015_v2, 6  ;;  %v17183_v8 = vrot.slane %v13034_v19, 1  ;;  %v17184_v47 = vrot.slane %v13034_v19, 2 }
 0x585   : > { %2860 = vst [vmem:[#allocation1 + $0x2] ss:$9 sm:$0xff] %v17177_v20  ;;  %v17178_v20 = vrot.slane %v13015_v2, 7  ;;  %v17187_v2 = vrot.slane %v13034_v19, 5 }
 0x586   : > { %2861 = vst [vmem:[#allocation1 + $0x3] ss:$9 sm:$0xff] %v17181_v1 }
 0x587   : > { %2862 = vst [vmem:[#allocation1 + $0x4] ss:$9 sm:$0xff] %v17180_v55  ;;  %v3630_v10 = vpop.xlane.xlu2 %3629 }
 0x588   : > { %v3704_v42 = vsub.f32 %v13282_v51, %v3630_v10  ;;  %v3636_v51 = vpop.xlane.xlu1 %3635 }
 0x58a   : > { %v3746_v23 = vmul.f32 1.442695, %v3704_v42  ;;  %v3706_v42 = vsub.f32 %v13122_v18, %v3636_v51  ;;  %v17191_v18 = vrot.slane %v13034_v19, 6 }
 0x58c   : > { %10323 = vpow2.f32 %v3746_v23 }
 0x58e   : > { %v13556_v6 = vld [vmem:[#allocation1] sm:$0xff] }
 0x58f   : > { %2864 = vst [vmem:[#allocation1] ss:$9 sm:$0xff] %v17179_v54  ;;  %v3750_v54 = vmul.f32 1.442695, %v3706_v42  ;;  %v17190_v42 = vrot.slane %v13034_v19, 7 }
 0x590   : > { %2865 = vst [vmem:[#allocation1 + $0x1] ss:$9 sm:$0xff] %v17178_v20  ;;  %v17189_v20 = vrot.slane %v13034_v19, 3 }
 0x591   : > { %2866 = vst [vmem:[#allocation1 + $0x2] ss:$9 sm:$0xff] %v13034_v19 }
 0x592   : > { %2867 = vst [vmem:[#allocation1 + $0x3] ss:$9 sm:$0xff] %v17183_v8  ;;  %v13569_v10 = vpop.eup %10323 }
 0x593   : > { %2868 = vst [vmem:[#allocation1 + $0x4] ss:$9 sm:$0xff] %v17184_v47  ;;  %v3820_v23 = vsel %vm3597_vm13, %v13569_v10, 0.0 }
 0x594   : > { %3821 = vadd.xlane.f32.xlu1 %v3820_v23 }
 0x597   : > { %v3801_v55 = vpop.xlane.xlu2 %3800  ;;  %v3633_v1 = vpop.xlane.xlu0 %3632 }
 0x598   : > { %10325 = vrcp.f32 %v3801_v55  ;;  %v3705_v47 = vsub.f32 %v13327_v41, %v3633_v1  ;;  %v3664_v41 = vsel %vm3597_vm13, %v13346_v13, -inf  ;;  %v2967_v55 = vpack.c.bf16 %v13290_v57, %v13290_v57 }
 0x599   : > { %10327 = vpow2.f32 %v3750_v54  ;;  %v17192_v57 = vrot.slane %v13061_v35, 1 }
 0x59a   : > { %v13576_v8 = vld [vmem:[#allocation1] sm:$0xff]  ;;  %v3748_v51 = vmul.f32 1.442695, %v3705_v47  ;;  %v3639_v47 = vpop.xlane.xlu1 %3638 }
 0x59b   : > { %2870 = vst [vmem:[#allocation1] ss:$9 sm:$0xff] %v17189_v20 }
 0x59c   : > { %2871 = vst [vmem:[#allocation1 + $0x1] ss:$9 sm:$0xff] %v17188_v16  ;;  %10329 = vpow2.f32 %v3748_v51  ;;  %3665 = vmax.xlane.f32.xlu1 %v3664_v41  ;;  %v3707_v51 = vsub.f32 %v13147_v29, %v3639_v47  ;;  %v4200_v41 = vand.u32 %v13194_v58, %v2967_v55  ;;  %v2966_v55 = vpack.c.bf16 %v13261_v14, %v13261_v14 }
 0x59d   : > { %2872 = vst [vmem:[#allocation1 + $0x2] ss:$9 sm:$0xff] %v17187_v2 }
 0x59e   : > { %2873 = vst [vmem:[#allocation1 + $0x3] ss:$9 sm:$0xff] %v17191_v18  ;;  %v10326_v1 = vpop.eup %10325 }
 0x59f   : > { %2874 = vst [vmem:[#allocation1 + $0x4] ss:$9 sm:$0xff] %v17190_v42  ;;  %v3921_v23 = vmul.f32 %v10326_v1, %v13322_v43  ;;  %v3798_v2 = vpop.xlane.xlu0 %3797  ;;  %v13597_v54 = vpop.eup %10327  ;;  %v17195_v43 = vrot.slane %v13061_v35, 2  ;;  %v3752_v1 = vmul.f32 1.442695, %v3707_v51 }
 0x5a0   : > { %10331 = vrcp.f32 %v3798_v2  ;;  %v3826_v2 = vsel %vm3597_vm13, %v13597_v54, 0.0 }
 0x5a1   : > { %v3953_v16 = vpack.c.bf16 %v3921_v23, %v3921_v23  ;;  %10333 = vpow2.f32 %v3752_v1  ;;  %v17197_v1 = vrot.slane %v13061_v35, 6 }
 0x5a2   : > { %v13599_v20 = vpop.eup %10329 }
 0x5a3   : > { %9926 = vmatmul.msk.bf16.vlgmr.msra.gmra.mxu3 %vm3982_vm0, %v3953_v16  ;;  %v3823_v42 = vsel %vm3597_vm13, %v13599_v20, 0.0  ;;  %v17228_v16 = vrot.slane %v13061_v35, 3 }
 0x5a4   : > { %4209 = vmatpush.bf16.msra.mxu3 %v4200_v41  ;;  %3824 = vadd.xlane.f32.xlu0 %v3823_v42  ;;  %v17227_v42 = vrot.slane %v13061_v35, 4 }
 0x5a5   : > { %3827 = vadd.xlane.f32.xlu1 %v3826_v2 }
 0x5a6   : > { %v13607_v18 = vld [vmem:[#allocation1] sm:$0xff]  ;;  %v10332_v29 = vpop.eup %10331 }
 0x5a7   : > { %2876 = vst [vmem:[#allocation1] ss:$9 sm:$0xff] %v13061_v35  ;;  %v3920_v47 = vmul.f32 %v10332_v29, %v13343_v15  ;;  %v3642_v23 = vpop.xlane.xlu0 %3641  ;;  %v3645_v41 = vpop.xlane.xlu2 %3644  ;;  %v3667_v15 = vsel %vm3597_vm13, %v13436_v17, -inf }
 0x5a8   : > { %2877 = vst [vmem:[#allocation1 + $0x1] ss:$9 sm:$0xff] %v17192_v57  ;;  %v3708_v2 = vsub.f32 %v13188_v27, %v3642_v23  ;;  %v3709_v57 = vsub.f32 %v13365_v39, %v3645_v41  ;;  %v17198_v27 = vrot.slane %v13061_v35, 5  ;;  %v13633_v29 = vpop.eup %10333 }
 0x5a9   : > { %2878 = vst [vmem:[#allocation1 + $0x2] ss:$9 sm:$0xff] %v17195_v43  ;;  %v3952_v14 = vpack.c.bf16 %v3920_v47, %v3920_v47  ;;  %v4181_v43 = vand.u32 %v13194_v58, %v2966_v55  ;;  %v3829_v41 = vsel %vm3597_vm13, %v13633_v29, 0.0 }
 0x5aa   : > { %2879 = vst [vmem:[#allocation1 + $0x3] ss:$9 sm:$0xff] %v17228_v16  ;;  %v3754_v51 = vmul.f32 1.442695, %v3708_v2  ;;  %v3756_v19 = vmul.f32 1.442695, %v3709_v57 }
 0x5ab   : > { %2880 = vst [vmem:[#allocation1 + $0x4] ss:$9 sm:$0xff] %v17227_v42  ;;  %9925 = vmatmul.msk.bf16.vlgmr.msra.gmra.mxu2 %vm3982_vm0, %v3952_v14  ;;  %v17196_v57 = vrot.slane %v13061_v35, 7 }
 0x5ac   : > { %10335 = vpow2.f32 %v3754_v51  ;;  %4190 = vmatpush.bf16.msra.mxu2 %v4181_v43  ;;  %3668 = vmax.xlane.f32.xlu0 %v3667_v15  ;;  %v17199_v43 = vrot.slane %v13091_v53, 1  ;;  %v2968_v51 = vpack.c.bf16 %v13317_v12, %v13317_v12 }
 0x5ad   : > { %10337 = vpow2.f32 %v3756_v19 }
 0x5af   : > { %v3804_v39 = vpop.xlane.xlu0 %3803 }
 0x5b0   : > { %10339 = vrcp.f32 %v3804_v39 }
 0x5b2   : > { %v13636_v47 = vld [vmem:[#allocation1] sm:$0xff]  ;;  %v13641_v55 = vpop.eup %10335 }
 0x5b3   : > { %2882 = vst [vmem:[#allocation1] ss:$9 sm:$0xff] %v17198_v27  ;;  %v13645_v19 = vpop.eup %10337  ;;  %v3832_v23 = vsel %vm3597_vm13, %v13641_v55, 0.0  ;;  %v4219_v27 = vand.u32 %v13194_v58, %v2968_v51  ;;  %v2969_v51 = vpack.c.bf16 %v13352_v36, %v13352_v36 }
 0x5b4   : > { %2883 = vst [vmem:[#allocation1 + $0x1] ss:$9 sm:$0xff] %v17197_v1  ;;  %3833 = vadd.xlane.f32.xlu2 %v3832_v23  ;;  %v3835_v2 = vsel %vm3597_vm13, %v13645_v19, 0.0  ;;  %3830 = vadd.xlane.f32.xlu0 %v3829_v41  ;;  %v17226_v41 = vrot.slane %v13091_v53, 2 }
 0x5b5   : > { %2884 = vst [vmem:[#allocation1 + $0x2] ss:$9 sm:$0xff] %v17196_v57  ;;  %3836 = vadd.xlane.f32.xlu1 %v3835_v2  ;;  %v3670_v2 = vsel %vm3597_vm13, %v13371_v30, -inf  ;;  %v4238_v36 = vand.u32 %v13194_v58, %v2969_v51 }
 0x5b6   : > { %2885 = vst [vmem:[#allocation1 + $0x3] ss:$9 sm:$0xff] %v13091_v53  ;;  %v10340_v14 = vpop.eup %10339 }
 0x5b7   : > { %2886 = vst [vmem:[#allocation1 + $0x4] ss:$9 sm:$0xff] %v17199_v43  ;;  %v3922_v15 = vmul.f32 %v10340_v14, %v13374_v7  ;;  %v3807_v39 = vpop.xlane.xlu2 %3806  ;;  %v3654_v57 = vpop.xlane.xlu0 %3653  ;;  %v17205_v43 = vrot.slane %v13091_v53, 3  ;;  %v3673_v7 = vsel %vm3597_vm13, %v13393_v62, -inf  ;;  %v17204_v14 = vrot.slane %v13091_v53, 5 }
 0x5b8   : > { %10341 = vrcp.f32 %v3807_v39  ;;  %v3712_v23 = vsub.f32 %v13268_v32, %v3654_v57  ;;  %v3676_v32 = vsel %vm3597_vm13, %v13421_v60, -inf  ;;  %v17200_v57 = vrot.slane %v13091_v53, 4 }
 0x5b9   : > { %v3954_v1 = vpack.c.bf16 %v3922_v15, %v3922_v15  ;;  %v17201_v15 = vrot.slane %v13091_v53, 6 }
 0x5bb   : > { %9927 = vmatmul.msk.bf16.vlgmr.msra.gmra.mxu0 %vm3982_vm0, %v3954_v1 }
 0x5bc   : > { %4228 = vmatpush.bf16.msra.mxu0 %v4219_v27  ;;  %3671 = vmax.xlane.f32.xlu2 %v3670_v2  ;;  %v3762_v27 = vmul.f32 1.442695, %v3712_v23 }
 0x5bd   : > { %3674 = vmax.xlane.f32.xlu0 %v3673_v7  ;;  %3677 = vmax.xlane.f32.xlu1 %v3676_v32 }
 0x5be   : > { %v13669_v12 = vld [vmem:[#allocation1] sm:$0xff]  ;;  %v10342_v1 = vpop.eup %10341  ;;  %10343 = vpow2.f32 %v3762_v27  ;;  %v17202_v27 = vrot.slane %v13112_v49, 1 }
 0x5bf   : > { %2888 = vst [vmem:[#allocation1] ss:$9 sm:$0xff] %v17226_v41  ;;  %v3923_v39 = vmul.f32 %v10342_v1, %v13397_v38  ;;  %v3651_v2 = vpop.xlane.xlu2 %3650  ;;  %v17203_v38 = vrot.slane %v13091_v53, 7 }
 0x5c0   : > { %2889 = vst [vmem:[#allocation1 + $0x1] ss:$9 sm:$0xff] %v17205_v43  ;;  %v3711_v7 = vsub.f32 %v13231_v25, %v3651_v2 }
 0x5c1   : > { %2890 = vst [vmem:[#allocation1 + $0x2] ss:$9 sm:$0xff] %v17200_v57  ;;  %v3955_v23 = vpack.c.bf16 %v3923_v39, %v3923_v39  ;;  %v3679_v57 = vsel %vm3597_vm13, %v13474_v26, -inf  ;;  %v17206_v39 = vrot.slane %v13112_v49, 2 }
 0x5c2   : > { %2891 = vst [vmem:[#allocation1 + $0x3] ss:$9 sm:$0xff] %v17204_v14  ;;  %v3760_v32 = vmul.f32 1.442695, %v3711_v7  ;;  %v17225_v7 = vrot.slane %v13112_v49, 3 }
 0x5c3   : > { %2892 = vst [vmem:[#allocation1 + $0x4] ss:$9 sm:$0xff] %v17201_v15  ;;  %9928 = vmatmul.msk.bf16.vlgmr.msrb.gmra.mxu1 %vm3982_vm0, %v3955_v23 }
 0x5c4   : > { %10345 = vpow2.f32 %v3760_v32  ;;  %4247 = vmatpush.bf16.msrb.mxu1 %v4238_v36  ;;  %3680 = vmax.xlane.f32.xlu2 %v3679_v57  ;;  %v13697_v2 = vpop.eup %10343 }
 0x5c5   : > { %v3844_v32 = vsel %vm3597_vm13, %v13697_v2, 0.0 }
 0x5c7   : > { %v3810_v1 = vpop.xlane.xlu1 %3809  ;;  %v3660_v25 = vpop.xlane.xlu2 %3659 }
 0x5c8   : > { %10347 = vrcp.f32 %v3810_v1  ;;  %v3714_v57 = vsub.f32 %v13292_v22, %v3660_v25  ;;  %v2970_v1 = vpack.c.bf16 %v13377_v34, %v13377_v34 }
 0x5ca   : > { %v13699_v15 = vld [vmem:[#allocation1] sm:$0xff]  ;;  %v13704_v51 = vpop.eup %10345  ;;  %v3766_v36 = vmul.f32 1.442695, %v3714_v57  ;;  %v3688_v57 = vsel %vm3597_vm13, %v13489_v46, -inf }
 0x5cb   : > { %2894 = vst [vmem:[#allocation1] ss:$9 sm:$0xff] %v17203_v38  ;;  %v3841_v23 = vsel %vm3597_vm13, %v13704_v51, 0.0 }
 0x5cc   : > { %2895 = vst [vmem:[#allocation1 + $0x1] ss:$9 sm:$0xff] %v13112_v49  ;;  %3842 = vadd.xlane.f32.xlu1 %v3841_v23  ;;  %3845 = vadd.xlane.f32.xlu2 %v3844_v32  ;;  %10349 = vpow2.f32 %v3766_v36  ;;  %v17222_v23 = vrot.slane %v13112_v49, 4  ;;  %v17216_v32 = vrot.slane %v13112_v49, 5 }
 0x5cd   : > { %2896 = vst [vmem:[#allocation1 + $0x2] ss:$9 sm:$0xff] %v17202_v27 }
 0x5ce   : > { %2897 = vst [vmem:[#allocation1 + $0x3] ss:$9 sm:$0xff] %v17206_v39  ;;  %v10348_v22 = vpop.eup %10347  ;;  %v4257_v39 = vand.u32 %v13194_v58, %v2970_v1 }
 0x5cf   : > { %2898 = vst [vmem:[#allocation1 + $0x4] ss:$9 sm:$0xff] %v17225_v7  ;;  %v3924_v25 = vmul.f32 %v10348_v22, %v13432_v45  ;;  %v3648_v27 = vpop.xlane.xlu1 %3647  ;;  %v17207_v45 = vrot.slane %v13112_v49, 7 }
 0x5d0   : > { %v3710_v38 = vsub.f32 %v13217_v61, %v3648_v27  ;;  %v17215_v61 = vrot.slane %v13112_v49, 6 }
 0x5d1   : > { %v3956_v14 = vpack.c.bf16 %v3924_v25, %v3924_v25 }
 0x5d2   : > { %v3758_v43 = vmul.f32 1.442695, %v3710_v38  ;;  %v13740_v27 = vpop.eup %10349 }
 0x5d3   : > { %9929 = vmatmul.msk.bf16.vlgmr.msrb.gmra.mxu2 %vm3982_vm0, %v3956_v14  ;;  %v3850_v1 = vsel %vm3597_vm13, %v13740_v27, 0.0 }
 0x5d4   : > { %10351 = vpow2.f32 %v3758_v43  ;;  %4266 = vmatpush.bf16.msrb.mxu2 %v4257_v39  ;;  %3689 = vmax.xlane.f32.xlu2 %v3688_v57  ;;  %v2971_v57 = vpack.c.bf16 %v13406_v59, %v13406_v59 }
 0x5d6   : > { %v13730_v34 = vld [vmem:[#allocation1] sm:$0xff]  ;;  %v4276_v59 = vand.u32 %v13194_v58, %v2971_v57 }
 0x5d7   : > { %2900 = vst [vmem:[#allocation1] ss:$9 sm:$0xff] %v17222_v23  ;;  %v3813_v14 = vpop.xlane.xlu0 %3812  ;;  %v3657_v38 = vpop.xlane.xlu1 %3656 }
 0x5d8   : > { %2901 = vst [vmem:[#allocation1 + $0x1] ss:$9 sm:$0xff] %v17216_v32  ;;  %10353 = vrcp.f32 %v3813_v14  ;;  %v3713_v43 = vsub.f32 %v13399_v0, %v3657_v38  ;;  %v17210_v0 = vrot.slane %v13132_v11, 1  ;;  %v17209_v38 = vrot.slane %v13132_v11, 2 }
 0x5d9   : > { %2902 = vst [vmem:[#allocation1 + $0x2] ss:$9 sm:$0xff] %v17215_v61  ;;  %v17218_v32 = vrot.slane %v13160_v4, 4 }
 0x5da   : > { %2903 = vst [vmem:[#allocation1 + $0x3] ss:$9 sm:$0xff] %v17207_v45  ;;  %v13746_v39 = vpop.eup %10351  ;;  %v3764_v22 = vmul.f32 1.442695, %v3713_v43  ;;  %v17208_v45 = vrot.slane %v13132_v11, 3 }
 0x5db   : > { %2904 = vst [vmem:[#allocation1 + $0x4] ss:$9 sm:$0xff] %v13132_v11  ;;  %v3838_v36 = vsel %vm3597_vm13, %v13746_v39, 0.0 }
 0x5dc   : > { %10355 = vpow2.f32 %v3764_v22  ;;  %3839 = vadd.xlane.f32.xlu0 %v3838_v36  ;;  %3851 = vadd.xlane.f32.xlu2 %v3850_v1  ;;  %v17212_v1 = vrot.slane %v13132_v11, 4 }
 0x5de   : > { %v10354_v25 = vpop.eup %10353 }
 0x5df   : > { %v3925_v14 = vmul.f32 %v10354_v25, %v13472_v9  ;;  %v17211_v9 = vrot.slane %v13132_v11, 5 }
 0x5e1   : > { %v3957_v22 = vpack.c.bf16 %v3925_v14, %v3925_v14  ;;  %v3682_v14 = vsel %vm3597_vm13, %v13446_v50, -inf }
 0x5e2   : > { %v13757_v43 = vld [vmem:[#allocation1] sm:$0xff]  ;;  %v13762_v36 = vpop.eup %10355 }
 0x5e3   : > { %2906 = vst [vmem:[#allocation1] ss:$9 sm:$0xff] %v17210_v0  ;;  %9930 = vmatmul.msk.bf16.vlgmr.msrb.gmra.mxu3 %vm3982_vm0, %v3957_v22  ;;  %v3847_v25 = vsel %vm3597_vm13, %v13762_v36, 0.0  ;;  %v3691_v22 = vsel %vm3597_vm13, %v13503_v31, -inf }
 0x5e4   : > { %2907 = vst [vmem:[#allocation1 + $0x1] ss:$9 sm:$0xff] %v17209_v38  ;;  %4285 = vmatpush.bf16.msrb.mxu3 %v4276_v59  ;;  %3848 = vadd.xlane.f32.xlu1 %v3847_v25  ;;  %v17214_v38 = vrot.slane %v13132_v11, 7  ;;  %v3685_v59 = vsel %vm3597_vm13, %v13457_v44, -inf }
 0x5e5   : > { %2908 = vst [vmem:[#allocation1 + $0x2] ss:$9 sm:$0xff] %v17208_v45  ;;  %3683 = vmax.xlane.f32.xlu0 %v3682_v14  ;;  %v17213_v45 = vrot.slane %v13132_v11, 6  ;;  %v17217_v14 = vrot.slane %v13160_v4, 1 }
 0x5e6   : > { %2909 = vst [vmem:[#allocation1 + $0x3] ss:$9 sm:$0xff] %v17212_v1 }
 0x5e7   : > { %2910 = vst [vmem:[#allocation1 + $0x4] ss:$9 sm:$0xff] %v17211_v9  ;;  %v3816_v57 = vpop.xlane.xlu2 %3815  ;;  %v17221_v9 = vrot.slane %v13160_v4, 2 }
 0x5e8   : > { %10357 = vrcp.f32 %v3816_v57  ;;  %v2972_v57 = vpack.c.bf16 %v13427_v33, %v13427_v33 }
 0x5ea   : > { %v4295_v33 = vand.u32 %v13194_v58, %v2972_v57  ;;  %v17223_v57 = vrot.slane %v13160_v4, 6 }
 0x5ec   : > { %3692 = vmax.xlane.f32.xlu1 %v3691_v22 }
 0x5ed   : > { %3686 = vmax.xlane.f32.xlu0 %v3685_v59 }
 0x5ee   : > { %v13784_v0 = vld [vmem:[#allocation1] sm:$0xff]  ;;  %v10358_v25 = vpop.eup %10357  ;;  %v4002_v61 = vpop.f32.mrf.mxu0 }
 0x5ef   : > { %2912 = vst [vmem:[#allocation1] ss:$9 sm:$0xff] %v17213_v45  ;;  %v3926_v1 = vmul.f32 %v10358_v25, %v13501_v40  ;;  %v3663_v22 = vpop.xlane.xlu2 %3662  ;;  %v17219_v40 = vrot.slane %v13160_v4, 3 }
 0x5f0   : > { %2913 = vst [vmem:[#allocation1 + $0x1] ss:$9 sm:$0xff] %v17214_v38  ;;  %v3715_v59 = vsub.f32 %v13310_v56, %v3663_v22  ;;  %v17220_v56 = vrot.slane %v13160_v4, 5 }
 0x5f1   : > { %2914 = vst [vmem:[#allocation1 + $0x2] ss:$9 sm:$0xff] %v13160_v4  ;;  %v3958_v45 = vpack.c.bf16 %v3926_v1, %v3926_v1 }
 0x5f2   : > { %2915 = vst [vmem:[#allocation1 + $0x3] ss:$9 sm:$0xff] %v17217_v14  ;;  %v3768_v38 = vmul.f32 1.442695, %v3715_v59 }
 0x5f3   : > { %2916 = vst [vmem:[#allocation1 + $0x4] ss:$9 sm:$0xff] %v17221_v9  ;;  %9931 = vmatmul.msk.bf16.vlgmr.msrb.gmra.mxu0 %vm3982_vm0, %v3958_v45  ;;  %v4628_v9 = vrot.slane %v4002_v61, 2 }
 0x5f4   : > { %10359 = vpow2.f32 %v3768_v38  ;;  %4304 = vmatpush.bf16.msrb.mxu0 %v4295_v33  ;;  %v17224_v38 = vrot.slane %v13160_v4, 7  ;;  %v2973_v33 = vpack.c.bf16 %v13455_v52, %v13455_v52 }
 0x5f6   : > { %v4004_v45 = vpop.f32.mrf.mxu0 }
 0x5f7   : > { %v3819_v25 = vpop.xlane.xlu0 %3818 }
 0x5f8   : > { %10361 = vrcp.f32 %v3819_v25 }
 0x5fa   : > { %v13807_v14 = vld [vmem:[#allocation1] sm:$0xff]  ;;  %v13812_v1 = vpop.eup %10359 }
 0x5fb   : > { %2918 = vst [vmem:[#allocation1] ss:$9 sm:$0xff] %v17219_v40  ;;  %v3853_v22 = vsel %vm3597_vm13, %v13812_v1, 0.0  ;;  %v4627_v40 = vrot.slane %v4002_v61, 1 }
 0x5fc   : > { %2919 = vst [vmem:[#allocation1 + $0x1] ss:$9 sm:$0xff] %v17218_v32  ;;  %3854 = vadd.xlane.f32.xlu1 %v3853_v22  ;;  %v4629_v22 = vrot.slane %v4002_v61, 3 }
 0x5fd   : > { %2920 = vst [vmem:[#allocation1 + $0x2] ss:$9 sm:$0xff] %v17220_v56  ;;  %v4314_v56 = vand.u32 %v13194_v58, %v2973_v33 }
 0x5fe   : > { %2921 = vst [vmem:[#allocation1 + $0x3] ss:$9 sm:$0xff] %v17223_v57  ;;  %v10362_v59 = vpop.eup %10361  ;;  %v4630_v57 = vrot.slane %v4002_v61, 4 }
 0x5ff   : > { %2922 = vst [vmem:[#allocation1 + $0x4] ss:$9 sm:$0xff] %v17224_v38  ;;  %v3927_v25 = vmul.f32 %v10362_v59, %v13537_v5 }
 0x600   : > { %v4021_v45 = vpop.f32.mrf.mxu1 }
 0x601   : > { %v3959_v32 = vpack.c.bf16 %v3927_v25, %v3927_v25  ;;  %v4631_v38 = vrot.slane %v4021_v45, 1  ;;  %v4632_v5 = vrot.slane %v4021_v45, 2 }
 0x603   : > { %9932 = vmatmul.msk.bf16.vlgmr.msra.gmra.mxu1 %vm3982_vm0, %v3959_v32  ;;  %v2974_v32 = vpack.c.bf16 %v13481_v3, %v13481_v3 }
 0x604   : > { %4323 = vmatpush.bf16.msra.mxu1 %v4314_v56 }
 0x606   : > { %v13831_v23 = vld [vmem:[#allocation1] sm:$0xff] }
 0x607   : > { %4755 = vst [vmem:[#allocation1] ss:$9 sm:$0xff] %v4002_v61  ;;  %v3822_v52 = vpop.xlane.xlu1 %3821 }
 0x608   : > { %4757 = vst [vmem:[#allocation1 + $0x1] ss:$9 sm:$0xff] %v4627_v40  ;;  %10363 = vrcp.f32 %v3822_v52  ;;  %v4023_v59 = vpop.f32.mrf.mxu1  ;;  %v4633_v40 = vrot.slane %v4021_v45, 3  ;;  %v4634_v52 = vrot.slane %v4021_v45, 4 }
 0x609   : > { %4759 = vst [vmem:[#allocation1 + $0x2] ss:$9 sm:$0xff] %v4628_v9 }
 0x60a   : > { %4761 = vst [vmem:[#allocation1 + $0x3] ss:$9 sm:$0xff] %v4629_v22  ;;  %v4333_v22 = vand.u32 %v13194_v58, %v2974_v32  ;;  %v2976_v32 = vpack.c.bf16 %v13532_v24, %v13532_v24 }
 0x60b   : > { %4763 = vst [vmem:[#allocation1 + $0x4] ss:$9 sm:$0xff] %v4630_v57 }
 0x60c   : > { %4765 = vst [vmem:[#allocation1 + $0x5] ss:$9 sm:$0xff] %v4021_v45  ;;  %v2975_v45 = vpack.c.bf16 %v13509_v48, %v13509_v48  ;;  %v4371_v48 = vand.u32 %v13194_v58, %v2976_v32 }
 0x60d   : > { %4767 = vst [vmem:[#allocation1 + $0x6] ss:$9 sm:$0xff] %v4631_v38 }
 0x60e   : > { %4769 = vst [vmem:[#allocation1 + $0x7] ss:$9 sm:$0xff] %v4632_v5  ;;  %v10364_v33 = vpop.eup %10363 }
 0x60f   : > { %v3928_v56 = vmul.f32 %v10364_v33, %v13569_v10  ;;  %v3666_v25 = vpop.xlane.xlu1 %3665 }
 0x610   : > { %v3716_v61 = vsub.f32 %v13346_v13, %v3666_v25 }
 0x611   : > { %v3960_v9 = vpack.c.bf16 %v3928_v56, %v3928_v56 }
 0x612   : > { %v3770_v7 = vmul.f32 1.442695, %v3716_v61 }
 0x613   : > { %9933 = vmatmul.msk.bf16.vlgmr.msra.gmra.mxu2 %vm3982_vm0, %v3960_v9 }
 0x614   : > { %10365 = vpow2.f32 %v3770_v7  ;;  %4342 = vmatpush.bf16.msra.mxu2 %v4333_v22  ;;  %v4352_v22 = vand.u32 %v13194_v58, %v2975_v45  ;;  %v2978_v45 = vpack.c.bf16 %v13576_v8, %v13576_v8  ;;  %v2977_v8 = vpack.c.bf16 %v13556_v6, %v13556_v6 }
 0x615   : > { %v13838_v59 = vld [vmem:[#allocation1] sm:$0xff] }
 0x616   : > { %17336 = vst [vmem:[#allocation72_spill] sm:$0xff] %v13838_v59 }
 0x617   : > { %4771 = vst [vmem:[#allocation1] ss:$9 sm:$0xff] %v4633_v40  ;;  %v3825_v3 = vpop.xlane.xlu0 %3824 }
 0x618   : > { %4772 = vst [vmem:[#allocation1 + $0x1] ss:$9 sm:$0xff] %v4634_v52  ;;  %10367 = vrcp.f32 %v3825_v3  ;;  %v3828_v10 = vpop.xlane.xlu1 %3827 }
 0x619   : > { %10369 = vrcp.f32 %v3828_v10 }
 0x61a   : > { %v13841_v57 = vpop.eup %10365 }
 0x61b   : > { %v3856_v13 = vsel %vm3597_vm13, %v13841_v57, 0.0 }
 0x61c   : > { %3857 = vadd.xlane.f32.xlu0 %v3856_v13 }
 0x61e   : > { %v10368_v38 = vpop.eup %10367 }
 0x61f   : > { %v10370_v5 = vpop.eup %10369  ;;  %v3929_v33 = vmul.f32 %v10368_v38, %v13599_v20  ;;  %v3669_v7 = vpop.xlane.xlu0 %3668 }
 0x620   : > { %v3930_v56 = vmul.f32 %v10370_v5, %v13597_v54  ;;  %v3717_v25 = vsub.f32 %v13436_v17, %v3669_v7  ;;  %v2979_v5 = vpack.c.bf16 %v13607_v18, %v13607_v18 }
 0x621   : > { %v3961_v61 = vpack.c.bf16 %v3929_v33, %v3929_v33 }
 0x622   : > { %v3962_v9 = vpack.c.bf16 %v3930_v56, %v3930_v56  ;;  %v3772_v40 = vmul.f32 1.442695, %v3717_v25  ;;  %v4428_v6 = vand.u32 %v13194_v58, %v2979_v5 }
 0x623   : > { %9934 = vmatmul.msk.bf16.vlgmr.msra.gmra.mxu3 %vm3982_vm0, %v3961_v61 }
 0x624   : > { %10371 = vpow2.f32 %v3772_v40  ;;  %9935 = vmatmul.msk.bf16.vlgmr.msra.gmra.mxu0 %vm3982_vm0, %v3962_v9  ;;  %4361 = vmatpush.bf16.msra.mxu3 %v4352_v22 }
 0x625   : > { %4380 = vmatpush.bf16.msra.mxu0 %v4371_v48 }
 0x626   : > { %v13856_v20 = vpop.f32.mrf.mxu3 }
 0x627   : > { %4778 = vst [vmem:[#allocation1 + $0x7] ss:$9 sm:$0xff] %v13856_v20  ;;  %v3834_v24 = vpop.xlane.xlu2 %3833  ;;  %v3831_v17 = vpop.xlane.xlu0 %3830  ;;  %v4641_v5 = vrot.slane %v13856_v20, 3 }
 0x628   : > { %10373 = vrcp.f32 %v3834_v24  ;;  %v3837_v54 = vpop.xlane.xlu1 %3836 }
 0x629   : > { %10375 = vrcp.f32 %v3837_v54 }
 0x62a   : > { %v13859_v52 = vpop.eup %10371  ;;  %10377 = vrcp.f32 %v3831_v17 }
 0x62b   : > { %v3859_v3 = vsel %vm3597_vm13, %v13859_v52, 0.0 }
 0x62c   : > { %3860 = vadd.xlane.f32.xlu2 %v3859_v3 }
 0x62e   : > { %v10374_v10 = vpop.eup %10373  ;;  %v4040_v13 = vpop.f32.mrf.mxu2 }
 0x62f   : > { %v4061_v38 = vpop.f32.mrf.mxu3  ;;  %v10376_v33 = vpop.eup %10375  ;;  %v3932_v7 = vmul.f32 %v10374_v10, %v13641_v55  ;;  %v4635_v32 = vrot.slane %v4040_v13, 1  ;;  %v4636_v56 = vrot.slane %v4040_v13, 2  ;;  %v4637_v25 = vrot.slane %v4040_v13, 3  ;;  %4773 = vst [vmem:[#allocation1 + $0x2] ss:$9 sm:$0xff] %v4040_v13 }
 0x630   : > { %v3672_v61 = vpop.xlane.xlu2 %3671  ;;  %v10378_v9 = vpop.eup %10377  ;;  %v3933_v40 = vmul.f32 %v10376_v33, %v13645_v19  ;;  %v4638_v22 = vrot.slane %v4040_v13, 4  ;;  %v4409_v19 = vand.u32 %v13194_v58, %v2978_v45 }
 0x631   : > { %v3718_v48 = vsub.f32 %v13371_v30, %v3672_v61  ;;  %v3675_v24 = vpop.xlane.xlu0 %3674  ;;  %v3678_v17 = vpop.xlane.xlu1 %3677  ;;  %v3964_v18 = vpack.c.bf16 %v3932_v7, %v3932_v7  ;;  %v3931_v54 = vmul.f32 %v10378_v9, %v13633_v29  ;;  %4774 = vst [vmem:[#allocation1 + $0x3] ss:$9 sm:$0xff] %v4635_v32  ;;  %v4642_v61 = vrot.slane %v13856_v20, 4 }
 0x632   : > { %v3719_v55 = vsub.f32 %v13393_v62, %v3675_v24  ;;  %v3720_v3 = vsub.f32 %v13421_v60, %v3678_v17  ;;  %v3965_v10 = vpack.c.bf16 %v3933_v40, %v3933_v40  ;;  %4775 = vst [vmem:[#allocation1 + $0x4] ss:$9 sm:$0xff] %v4636_v56  ;;  %v4390_v62 = vand.u32 %v13194_v58, %v2977_v8 }
 0x633   : > { %v3774_v38 = vmul.f32 1.442695, %v3718_v48  ;;  %v3963_v13 = vpack.c.bf16 %v3931_v54, %v3931_v54  ;;  %4776 = vst [vmem:[#allocation1 + $0x5] ss:$9 sm:$0xff] %v4637_v25  ;;  %9937 = vmatmul.msk.bf16.vlgmr.msrb.gmra.mxu2 %vm3982_vm0, %v3964_v18  ;;  %v4639_v48 = vrot.slane %v13856_v20, 1  ;;  %v4640_v24 = vrot.slane %v13856_v20, 2 }
 0x634   : > { %v3776_v30 = vmul.f32 1.442695, %v3719_v55  ;;  %v3778_v33 = vmul.f32 1.442695, %v3720_v3  ;;  %4777 = vst [vmem:[#allocation1 + $0x6] ss:$9 sm:$0xff] %v4638_v22  ;;  %9938 = vmatmul.msk.bf16.vlgmr.msrb.gmra.mxu3 %vm3982_vm0, %v3965_v10  ;;  %4418 = vmatpush.bf16.msrb.mxu2 %v4409_v19 }
 0x635   : > { %10379 = vpow2.f32 %v3774_v38  ;;  %9936 = vmatmul.msk.bf16.vlgmr.msrb.gmra.mxu1 %vm3982_vm0, %v3963_v13  ;;  %4437 = vmatpush.bf16.msrb.mxu3 %v4428_v6 }
 0x636   : > { %10381 = vpow2.f32 %v3776_v30  ;;  %4399 = vmatpush.bf16.msrb.mxu1 %v4390_v62  ;;  %v4042_v60 = vpop.f32.mrf.mxu2  ;;  %v2981_v30 = vpack.c.bf16 %v13669_v12, %v13669_v12 }
 0x637   : > { %10383 = vpow2.f32 %v3778_v33  ;;  %v2982_v60 = vpack.c.bf16 %v13699_v15, %v13699_v15 }
 0x638   : > { %v3681_v29 = vpop.xlane.xlu2 %3680  ;;  %v4078_v7 = vpop.f32.mrf.mxu0 }
 0x639   : > { %v3721_v45 = vsub.f32 %v13474_v26, %v3681_v29  ;;  %v4643_v17 = vrot.slane %v4078_v7, 1  ;;  %v4644_v18 = vrot.slane %v4078_v7, 2  ;;  %v4645_v54 = vrot.slane %v4078_v7, 3 }
 0x63a   : > { %v4485_v15 = vand.u32 %v13194_v58, %v2982_v60  ;;  %v2983_v60 = vpack.c.bf16 %v13730_v34, %v13730_v34 }
 0x63b   : > { %v13882_v32 = vpop.eup %10379  ;;  %v3780_v56 = vmul.f32 1.442695, %v3721_v45  ;;  %v13888_v9 = vld [vmem:[#allocation1] sm:$0xff] }
 0x63c   : > { %v13885_v25 = vpop.eup %10381  ;;  %17337 = vst [vmem:[#allocation73_spill] sm:$0xff] %v13888_v9  ;;  %v3862_v40 = vsel %vm3597_vm13, %v13882_v32, 0.0  ;;  %v4504_v34 = vand.u32 %v13194_v58, %v2983_v60 }
 0x63d   : > { %v13892_v22 = vpop.eup %10383  ;;  %4782 = vst [vmem:[#allocation1 + $0x2] ss:$9 sm:$0xff] %v4641_v5  ;;  %10385 = vpow2.f32 %v3780_v56  ;;  %3863 = vadd.xlane.f32.xlu0 %v3862_v40  ;;  %v3865_v26 = vsel %vm3597_vm13, %v13885_v25, 0.0  ;;  %v4646_v56 = vrot.slane %v4078_v7, 4 }
 0x63e   : > { %4783 = vst [vmem:[#allocation1 + $0x3] ss:$9 sm:$0xff] %v4642_v61  ;;  %v3868_v8 = vsel %vm3597_vm13, %v13892_v22, 0.0  ;;  %3866 = vadd.xlane.f32.xlu1 %v3865_v26 }
 0x63f   : > { %4780 = vst [vmem:[#allocation1] ss:$9 sm:$0xff] %v4639_v48  ;;  %3869 = vadd.xlane.f32.xlu2 %v3868_v8  ;;  %v3843_v55 = vpop.xlane.xlu1 %3842 }
 0x640   : > { %4781 = vst [vmem:[#allocation1 + $0x1] ss:$9 sm:$0xff] %v4640_v24  ;;  %v3846_v3 = vpop.xlane.xlu2 %3845  ;;  %10387 = vrcp.f32 %v3843_v55  ;;  %v4080_v10 = vpop.f32.mrf.mxu0  ;;  %v2980_v55 = vpack.c.bf16 %v13636_v47, %v13636_v47 }
 0x641   : > { %4784 = vst [vmem:[#allocation1 + $0x4] ss:$9 sm:$0xff] %v4078_v7  ;;  %v4097_v38 = vpop.f32.mrf.mxu1  ;;  %10389 = vrcp.f32 %v3846_v3 }
 0x642   : > { %4785 = vst [vmem:[#allocation1 + $0x5] ss:$9 sm:$0xff] %v4643_v17  ;;  %v4647_v40 = vrot.slane %v4097_v38, 1  ;;  %v4648_v24 = vrot.slane %v4097_v38, 2  ;;  %v4466_v17 = vand.u32 %v13194_v58, %v2981_v30 }
 0x643   : > { %v13900_v20 = vpop.eup %10385  ;;  %4786 = vst [vmem:[#allocation1 + $0x6] ss:$9 sm:$0xff] %v4644_v18 }
 0x644   : > { %4787 = vst [vmem:[#allocation1 + $0x7] ss:$9 sm:$0xff] %v4645_v54  ;;  %v3871_v19 = vsel %vm3597_vm13, %v13900_v20, 0.0 }
 0x645   : > { %3872 = vadd.xlane.f32.xlu0 %v3871_v19 }
 0x646   : > { %v10388_v13 = vpop.eup %10387 }
 0x647   : > { %v10390_v33 = vpop.eup %10389  ;;  %v3935_v6 = vmul.f32 %v10388_v13, %v13704_v51  ;;  %v4649_v51 = vrot.slane %v4097_v38, 3 }
 0x648   : > { %v3690_v62 = vpop.xlane.xlu2 %3689  ;;  %v3936_v29 = vmul.f32 %v10390_v33, %v13697_v2  ;;  %v4650_v2 = vrot.slane %v4097_v38, 4 }
 0x649   : > { %v3724_v45 = vsub.f32 %v13489_v46, %v3690_v62  ;;  %v4099_v5 = vpop.f32.mrf.mxu1  ;;  %v3967_v61 = vpack.c.bf16 %v3935_v6, %v3935_v6  ;;  %v4447_v6 = vand.u32 %v13194_v58, %v2980_v55 }
 0x64a   : > { %v3968_v26 = vpack.c.bf16 %v3936_v29, %v3936_v29 }
 0x64b   : > { %v13911_v48 = vld [vmem:[#allocation1] sm:$0xff]  ;;  %v3786_v12 = vmul.f32 1.442695, %v3724_v45  ;;  %9940 = vmatmul.msk.bf16.vlgmr.msra.gmra.mxu1 %vm3982_vm0, %v3967_v61 }
 0x64c   : > { %17338 = vst [vmem:[#allocation74_spill] sm:$0xff] %v13911_v48  ;;  %9941 = vmatmul.msk.bf16.vlgmr.msra.gmra.mxu2 %vm3982_vm0, %v3968_v26  ;;  %4475 = vmatpush.bf16.msra.mxu1 %v4466_v17 }
 0x64d   : > { %4789 = vst [vmem:[#allocation1] ss:$9 sm:$0xff] %v4646_v56  ;;  %10391 = vpow2.f32 %v3786_v12  ;;  %4494 = vmatpush.bf16.msra.mxu2 %v4485_v15 }
 0x64e   : > { %4790 = vst [vmem:[#allocation1 + $0x1] ss:$9 sm:$0xff] %v4097_v38 }
 0x64f   : > { %4791 = vst [vmem:[#allocation1 + $0x2] ss:$9 sm:$0xff] %v4647_v40  ;;  %v3840_v46 = vpop.xlane.xlu0 %3839 }
 0x650   : > { %4792 = vst [vmem:[#allocation1 + $0x3] ss:$9 sm:$0xff] %v4648_v24  ;;  %10393 = vrcp.f32 %v3840_v46  ;;  %v3852_v30 = vpop.xlane.xlu2 %3851  ;;  %v2984_v46 = vpack.c.bf16 %v13757_v43, %v13757_v43 }
 0x651   : > { %4793 = vst [vmem:[#allocation1 + $0x4] ss:$9 sm:$0xff] %v4649_v51 }
 0x652   : > { %4794 = vst [vmem:[#allocation1 + $0x5] ss:$9 sm:$0xff] %v4650_v2 }
 0x653   : > { %v13917_v7 = vpop.eup %10391 }
 0x654   : > { %v3880_v8 = vsel %vm3597_vm13, %v13917_v7, 0.0 }
 0x655   : > { %3881 = vadd.xlane.f32.xlu2 %v3880_v8 }
 0x656   : > { %v10394_v18 = vpop.eup %10393  ;;  %v4116_v54 = vpop.f32.mrf.mxu2 }
 0x657   : > { %v3934_v3 = vmul.f32 %v10394_v18, %v13746_v39  ;;  %v4651_v10 = vrot.slane %v4116_v54, 1  ;;  %4795 = vst [vmem:[#allocation1 + $0x6] ss:$9 sm:$0xff] %v4116_v54  ;;  %v3849_v38 = vpop.xlane.xlu1 %3848  ;;  %v4652_v29 = vrot.slane %v4116_v54, 2  ;;  %v4653_v56 = vrot.slane %v4116_v54, 3 }
 0x658   : > { %10395 = vrcp.f32 %v3849_v38  ;;  %v3684_v19 = vpop.xlane.xlu0 %3683  ;;  %v4654_v26 = vrot.slane %v4116_v54, 4  ;;  %v4523_v38 = vand.u32 %v13194_v58, %v2984_v46 }
 0x659   : > { %v3966_v13 = vpack.c.bf16 %v3934_v3, %v3934_v3  ;;  %4796 = vst [vmem:[#allocation1 + $0x7] ss:$9 sm:$0xff] %v4651_v10  ;;  %v3722_v33 = vsub.f32 %v13446_v50, %v3684_v19  ;;  %10397 = vrcp.f32 %v3852_v30 }
 0x65b   : > { %v3782_v62 = vmul.f32 1.442695, %v3722_v33  ;;  %9939 = vmatmul.msk.bf16.vlgmr.msrb.gmra.mxu0 %vm3982_vm0, %v3966_v13 }
 0x65c   : > { %4456 = vmatpush.bf16.msrb.mxu0 %v4447_v6 }
 0x65d   : > { %10399 = vpow2.f32 %v3782_v62 }
 0x65e   : > { %v10396_v47 = vpop.eup %10395  ;;  %v4118_v39 = vpop.f32.mrf.mxu2 }
 0x65f   : > { %v3937_v45 = vmul.f32 %v10396_v47, %v13762_v36  ;;  %v3693_v5 = vpop.xlane.xlu1 %3692  ;;  %v10398_v17 = vpop.eup %10397 }
 0x660   : > { %v13930_v61 = vld [vmem:[#allocation1] sm:$0xff]  ;;  %v3687_v50 = vpop.xlane.xlu0 %3686  ;;  %v3725_v40 = vsub.f32 %v13503_v31, %v3693_v5  ;;  %v3938_v2 = vmul.f32 %v10398_v17, %v13740_v27 }
 0x661   : > { %17339 = vst [vmem:[#allocation75_spill] sm:$0xff] %v13930_v61  ;;  %v3969_v24 = vpack.c.bf16 %v3937_v45, %v3937_v45  ;;  %v3723_v12 = vsub.f32 %v13457_v44, %v3687_v50  ;;  %v2985_v45 = vpack.c.bf16 %v13784_v0, %v13784_v0  ;;  %v17778_v61 = vld [vmem:[#allocation70_spill] sm:$0xff] }
 0x662   : > { %4798 = vst [vmem:[#allocation1] ss:$9 sm:$0xff] %v4652_v29  ;;  %v3788_v51 = vmul.f32 1.442695, %v3725_v40  ;;  %v3970_v3 = vpack.c.bf16 %v3938_v2, %v3938_v2  ;;  %v2986_v2 = vpack.c.bf16 %v13807_v14, %v13807_v14  ;;  %v17784_v48 = vrot.slane %v17778_v61, 6 }
 0x663   : > { %4799 = vst [vmem:[#allocation1 + $0x1] ss:$9 sm:$0xff] %v4653_v56  ;;  %v13935_v15 = vpop.eup %10399  ;;  %v3784_v36 = vmul.f32 1.442695, %v3723_v12  ;;  %9942 = vmatmul.msk.bf16.vlgmr.msra.gmra.mxu3 %vm3982_vm0, %v3969_v24  ;;  %v4542_v40 = vand.u32 %v13194_v58, %v2985_v45 }
 0x664   : > { %4800 = vst [vmem:[#allocation1 + $0x2] ss:$9 sm:$0xff] %v4654_v26  ;;  %10401 = vpow2.f32 %v3788_v51  ;;  %4513 = vmatpush.bf16.msra.mxu3 %v4504_v34  ;;  %v3874_v31 = vsel %vm3597_vm13, %v13935_v15, 0.0 }
 0x665   : > { %10403 = vpow2.f32 %v3784_v36  ;;  %3875 = vadd.xlane.f32.xlu1 %v3874_v31 }
 0x666   : > { %v4135_v44 = vpop.f32.mrf.mxu3 }
 0x667   : > { %v4655_v8 = vrot.slane %v4135_v44, 1  ;;  %v4656_v18 = vrot.slane %v4135_v44, 2  ;;  %v4657_v54 = vrot.slane %v4135_v44, 3  ;;  %4801 = vst [vmem:[#allocation1 + $0x3] ss:$9 sm:$0xff] %v4135_v44  ;;  %v4658_v55 = vrot.slane %v4135_v44, 4 }
 0x669   : > { %4802 = vst [vmem:[#allocation1 + $0x4] ss:$9 sm:$0xff] %v4655_v8 }
 0x66a   : > { %v13943_v10 = vpop.eup %10401  ;;  %4803 = vst [vmem:[#allocation1 + $0x5] ss:$9 sm:$0xff] %v4656_v18 }
 0x66b   : > { %v13946_v19 = vpop.eup %10403  ;;  %4804 = vst [vmem:[#allocation1 + $0x6] ss:$9 sm:$0xff] %v4657_v54  ;;  %9943 = vmatmul.msk.bf16.vlgmr.msra.gmra.mxu0 %vm3982_vm0, %v3970_v3  ;;  %v3883_v27 = vsel %vm3597_vm13, %v13943_v10, 0.0  ;;  %v4561_v3 = vand.u32 %v13194_v58, %v2986_v2 }
 0x66c   : > { %4805 = vst [vmem:[#allocation1 + $0x7] ss:$9 sm:$0xff] %v4658_v55  ;;  %4532 = vmatpush.bf16.msra.mxu0 %v4523_v38  ;;  %v3877_v43 = vsel %vm3597_vm13, %v13946_v19, 0.0 }
 0x66d   : > { %3878 = vadd.xlane.f32.xlu0 %v3877_v43  ;;  %3884 = vadd.xlane.f32.xlu1 %v3883_v27 }
 0x66e   : > { %v4137_v13 = vpop.f32.mrf.mxu3 }
 0x66f   : > { %v3855_v30 = vpop.xlane.xlu1 %3854  ;;  %v2987_v13 = vpack.c.bf16 %v13831_v23, %v13831_v23 }
 0x670   : > { %10405 = vrcp.f32 %v3855_v30  ;;  %v4154_v33 = vpop.f32.mrf.mxu0 }
 0x671   : > { %v4659_v6 = vrot.slane %v4154_v33, 1  ;;  %v4660_v62 = vrot.slane %v4154_v33, 2  ;;  %v4661_v39 = vrot.slane %v4154_v33, 3  ;;  %v4662_v60 = vrot.slane %v4154_v33, 4 }
 0x673   : > { %v13953_v47 = vld [vmem:[#allocation1] sm:$0xff] }
 0x674   : > { %17340 = vst [vmem:[#allocation76_spill] sm:$0xff] %v13953_v47 }
 0x675   : > { %4807 = vst [vmem:[#allocation1] ss:$9 sm:$0xff] %v4154_v33 }
 0x676   : > { %4808 = vst [vmem:[#allocation1 + $0x1] ss:$9 sm:$0xff] %v4659_v6  ;;  %v10406_v29 = vpop.eup %10405 }
 0x677   : > { %4809 = vst [vmem:[#allocation1 + $0x2] ss:$9 sm:$0xff] %v4660_v62  ;;  %v3939_v5 = vmul.f32 %v10406_v29, %v13812_v1  ;;  %v4580_v62 = vand.u32 %v13194_v58, %v2987_v13 }
 0x678   : > { %4810 = vst [vmem:[#allocation1 + $0x3] ss:$9 sm:$0xff] %v4661_v39  ;;  %v4156_v56 = vpop.f32.mrf.mxu0 }
 0x679   : > { %4811 = vst [vmem:[#allocation1 + $0x4] ss:$9 sm:$0xff] %v4662_v60  ;;  %v3971_v50 = vpack.c.bf16 %v3939_v5, %v3939_v5 }
 0x67b   : > { %9944 = vmatmul.msk.bf16.vlgmr.msrb.gmra.mxu1 %vm3982_vm0, %v3971_v50 }
 0x67c   : > { %4551 = vmatpush.bf16.msrb.mxu1 %v4542_v40 }
 0x680   : > { %v4173_v26 = vpop.f32.mrf.mxu1 }
 0x681   : > { %v4663_v24 = vrot.slane %v4173_v26, 1  ;;  %v4664_v12 = vrot.slane %v4173_v26, 2  ;;  %4812 = vst [vmem:[#allocation1 + $0x5] ss:$9 sm:$0xff] %v4173_v26  ;;  %v4665_v51 = vrot.slane %v4173_v26, 3  ;;  %v4666_v0 = vrot.slane %v4173_v26, 4 }
 0x683   : > { %4813 = vst [vmem:[#allocation1 + $0x6] ss:$9 sm:$0xff] %v4663_v24 }
 0x684   : > { %4814 = vst [vmem:[#allocation1 + $0x7] ss:$9 sm:$0xff] %v4664_v12 }
 0x688   : > { %v4175_v17 = vpop.f32.mrf.mxu1 }
 0x68b   : > { %v13960_v34 = vld [vmem:[#allocation1] sm:$0xff] }
 0x68c   : > { %17341 = vst [vmem:[#allocation77_spill] sm:$0xff] %v13960_v34  ;;  %v17774_v34 = vrot.slane %v12993_v63, 4 }
 0x68d   : > { %4816 = vst [vmem:[#allocation1] ss:$9 sm:$0xff] %v4665_v51 }
 0x68e   : > { %4817 = vst [vmem:[#allocation1 + $0x1] ss:$9 sm:$0xff] %v4666_v0 }
 0x68f   : > { %v3858_v1 = vpop.xlane.xlu0 %3857 }
 0x690   : > { %10407 = vrcp.f32 %v3858_v1 }
 0x696   : > { %v10408_v36 = vpop.eup %10407  ;;  %v4192_v31 = vpop.f32.mrf.mxu2 }
 0x697   : > { %v3940_v44 = vmul.f32 %v10408_v36, %v13841_v57  ;;  %v4667_v46 = vrot.slane %v4192_v31, 1  ;;  %v4668_v8 = vrot.slane %v4192_v31, 2  ;;  %v4669_v18 = vrot.slane %v4192_v31, 3  ;;  %4818 = vst [vmem:[#allocation1 + $0x2] ss:$9 sm:$0xff] %v4192_v31 }
 0x698   : > { %v4670_v54 = vrot.slane %v4192_v31, 4 }
 0x699   : > { %v3972_v55 = vpack.c.bf16 %v3940_v44, %v3940_v44  ;;  %4819 = vst [vmem:[#allocation1 + $0x3] ss:$9 sm:$0xff] %v4667_v46 }
 0x69a   : > { %4820 = vst [vmem:[#allocation1 + $0x4] ss:$9 sm:$0xff] %v4668_v8 }
 0x69b   : > { %4821 = vst [vmem:[#allocation1 + $0x5] ss:$9 sm:$0xff] %v4669_v18  ;;  %9945 = vmatmul.msk.bf16.vlgmr.msrb.gmra.mxu2 %vm3982_vm0, %v3972_v55 }
 0x69c   : > { %4822 = vst [vmem:[#allocation1 + $0x6] ss:$9 sm:$0xff] %v4670_v54  ;;  %4570 = vmatpush.bf16.msrb.mxu2 %v4561_v3 }
 0x69e   : > { %v4194_v38 = vpop.f32.mrf.mxu2 }
 0x69f   : > { %v3861_v27 = vpop.xlane.xlu2 %3860 }
 0x6a0   : > { %10409 = vrcp.f32 %v3861_v27 }
 0x6a1   : > { %v4230_v14 = vpop.f32.mrf.mxu0 }
 0x6a2   : > { %v4675_v40 = vrot.slane %v4230_v14, 1  ;;  %v4676_v24 = vrot.slane %v4230_v14, 2  ;;  %v4677_v12 = vrot.slane %v4230_v14, 3  ;;  %v4678_v3 = vrot.slane %v4230_v14, 4 }
 0x6a6   : > { %v10410_v57 = vpop.eup %10409  ;;  %v4211_v43 = vpop.f32.mrf.mxu3 }
 0x6a7   : > { %v3941_v30 = vmul.f32 %v10410_v57, %v13859_v52  ;;  %4823 = vst [vmem:[#allocation1 + $0x7] ss:$9 sm:$0xff] %v4211_v43  ;;  %v4671_v39 = vrot.slane %v4211_v43, 1  ;;  %v4672_v60 = vrot.slane %v4211_v43, 2  ;;  %v4673_v5 = vrot.slane %v4211_v43, 3 }
 0x6a8   : > { %v4674_v50 = vrot.slane %v4211_v43, 4 }
 0x6a9   : > { %v3973_v33 = vpack.c.bf16 %v3941_v30, %v3941_v30  ;;  %v4232_v6 = vpop.f32.mrf.mxu0 }
 0x6ab   : > { %9946 = vmatmul.msk.bf16.vlgmr.msrb.gmra.mxu3 %vm3982_vm0, %v3973_v33 }
 0x6ac   : > { %4589 = vmatpush.bf16.msrb.mxu3 %v4580_v62 }
 0x6ae   : > { %v13972_v29 = vld [vmem:[#allocation1] sm:$0xff]  ;;  %v4213_v45 = vpop.f32.mrf.mxu3 }
 0x6af   : > { %17342 = vst [vmem:[#allocation78_spill] sm:$0xff] %v13972_v29 }
 0x6b0   : > { %4825 = vst [vmem:[#allocation1] ss:$9 sm:$0xff] %v4671_v39  ;;  %v3864_v56 = vpop.xlane.xlu0 %3863 }
 0x6b1   : > { %4826 = vst [vmem:[#allocation1 + $0x1] ss:$9 sm:$0xff] %v4672_v60  ;;  %10411 = vrcp.f32 %v3864_v56  ;;  %v3867_v23 = vpop.xlane.xlu1 %3866 }
 0x6b2   : > { %4827 = vst [vmem:[#allocation1 + $0x2] ss:$9 sm:$0xff] %v4673_v5  ;;  %v3870_v52 = vpop.xlane.xlu2 %3869  ;;  %10413 = vrcp.f32 %v3867_v23  ;;  %v4249_v26 = vpop.f32.mrf.mxu1 }
 0x6b3   : > { %4828 = vst [vmem:[#allocation1 + $0x3] ss:$9 sm:$0xff] %v4674_v50  ;;  %10415 = vrcp.f32 %v3870_v52  ;;  %v4681_v43 = vrot.slane %v4249_v26, 3  ;;  %v4682_v13 = vrot.slane %v4249_v26, 4 }
 0x6b4   : > { %4829 = vst [vmem:[#allocation1 + $0x4] ss:$9 sm:$0xff] %v4230_v14 }
 0x6b5   : > { %4830 = vst [vmem:[#allocation1 + $0x5] ss:$9 sm:$0xff] %v4675_v40 }
 0x6b6   : > { %4831 = vst [vmem:[#allocation1 + $0x6] ss:$9 sm:$0xff] %v4676_v24  ;;  %v4268_v51 = vpop.f32.mrf.mxu2 }
 0x6b7   : > { %v10412_v17 = vpop.eup %10411  ;;  %4832 = vst [vmem:[#allocation1 + $0x7] ss:$9 sm:$0xff] %v4677_v12  ;;  %v4287_v36 = vpop.f32.mrf.mxu3  ;;  %v4683_v30 = vrot.slane %v4268_v51, 1  ;;  %v4684_v39 = vrot.slane %v4268_v51, 2  ;;  %v4685_v60 = vrot.slane %v4268_v51, 3  ;;  %v4686_v5 = vrot.slane %v4268_v51, 4 }
 0x6b8   : > { %v10414_v0 = vpop.eup %10413  ;;  %v3942_v1 = vmul.f32 %v10412_v17, %v13882_v32  ;;  %v3873_v31 = vpop.xlane.xlu0 %3872  ;;  %v4679_v32 = vrot.slane %v4249_v26, 1  ;;  %v4688_v52 = vrot.slane %v4287_v36, 2  ;;  %v4690_v12 = vrot.slane %v4287_v36, 4 }
 0x6b9   : > { %v10416_v2 = vpop.eup %10415  ;;  %v3943_v44 = vmul.f32 %v10414_v0, %v13885_v25  ;;  %10417 = vrcp.f32 %v3873_v31  ;;  %v4680_v25 = vrot.slane %v4249_v26, 2 }
 0x6ba   : > { %v3974_v46 = vpack.c.bf16 %v3942_v1, %v3942_v1  ;;  %v3944_v8 = vmul.f32 %v10416_v2, %v13892_v22  ;;  %v4251_v54 = vpop.f32.mrf.mxu1 }
 0x6bb   : > { %v3975_v18 = vpack.c.bf16 %v3943_v44, %v3943_v44 }
 0x6bc   : > { %v3976_v55 = vpack.c.bf16 %v3944_v8, %v3944_v8  ;;  %9947 = vmatmul.msk.bf16.vlgmr.msrb.gmra.mxu0 %vm3982_vm0, %v3974_v46 }
 0x6bd   : > { %9948 = vmatmul.msk.bf16.vlgmr.msra.gmra.mxu1 %vm3982_vm0, %v3975_v18 }
 0x6be   : > { %v13979_v38 = vld [vmem:[#allocation1] sm:$0xff]  ;;  %9949 = vmatmul.msk.bf16.vlgmr.msra.gmra.mxu2 %vm3982_vm0, %v3976_v55  ;;  %v4270_v27 = vpop.f32.mrf.mxu2 }
 0x6bf   : > { %17343 = vst [vmem:[#allocation79_spill] sm:$0xff] %v13979_v38  ;;  %v4289_v57 = vpop.f32.mrf.mxu3  ;;  %v10418_v22 = vpop.eup %10417 }
 0x6c0   : > { %4834 = vst [vmem:[#allocation1] ss:$9 sm:$0xff] %v4678_v3  ;;  %v3945_v14 = vmul.f32 %v10418_v22, %v13900_v20  ;;  %v4687_v20 = vrot.slane %v4287_v36, 1 }
 0x6c1   : > { %4835 = vst [vmem:[#allocation1 + $0x1] ss:$9 sm:$0xff] %v4249_v26  ;;  %v4689_v26 = vrot.slane %v4287_v36, 3 }
 0x6c2   : > { %4836 = vst [vmem:[#allocation1 + $0x2] ss:$9 sm:$0xff] %v4679_v32  ;;  %v3977_v33 = vpack.c.bf16 %v3945_v14, %v3945_v14 }
 0x6c3   : > { %4837 = vst [vmem:[#allocation1 + $0x3] ss:$9 sm:$0xff] %v4680_v25 }
 0x6c4   : > { %4838 = vst [vmem:[#allocation1 + $0x4] ss:$9 sm:$0xff] %v4681_v43  ;;  %9950 = vmatmul.msk.bf16.vlgmr.msra.gmra.mxu3 %vm3982_vm0, %v3977_v33 }
 0x6c5   : > { %4839 = vst [vmem:[#allocation1 + $0x5] ss:$9 sm:$0xff] %v4682_v13 }
 0x6c6   : > { %4840 = vst [vmem:[#allocation1 + $0x6] ss:$9 sm:$0xff] %v4268_v51 }
 0x6c7   : > { %4841 = vst [vmem:[#allocation1 + $0x7] ss:$9 sm:$0xff] %v4683_v30 }
 0x6c8   : > { %v3882_v6 = vpop.xlane.xlu2 %3881  ;;  %v13984_v62 = vpop.f32.mrf.mxu1 }
 0x6c9   : > { %10419 = vrcp.f32 %v3882_v6  ;;  %v4695_v1 = vrot.slane %v13984_v62, 1  ;;  %v4697_v43 = vrot.slane %v13984_v62, 3  ;;  %v4698_v30 = vrot.slane %v13984_v62, 4 }
 0x6ce   : > { %v13986_v45 = vld [vmem:[#allocation1] sm:$0xff] }
 0x6cf   : > { %17344 = vst [vmem:[#allocation80_spill] sm:$0xff] %v13986_v45  ;;  %v10420_v56 = vpop.eup %10419  ;;  %v13989_v23 = vpop.f32.mrf.mxu2 }
 0x6d0   : > { %4843 = vst [vmem:[#allocation1] ss:$9 sm:$0xff] %v4684_v39  ;;  %v3948_v50 = vmul.f32 %v10420_v56, %v13917_v7  ;;  %v4327_v40 = vpop.f32.mrf.mxu1  ;;  %v4696_v7 = vrot.slane %v13984_v62, 2  ;;  %v4699_v39 = vrot.slane %v13989_v23, 1 }
 0x6d1   : > { %4844 = vst [vmem:[#allocation1 + $0x1] ss:$9 sm:$0xff] %v4685_v60  ;;  %v4700_v60 = vrot.slane %v13989_v23, 2 }
 0x6d2   : > { %4845 = vst [vmem:[#allocation1 + $0x2] ss:$9 sm:$0xff] %v4686_v5  ;;  %v3980_v24 = vpack.c.bf16 %v3948_v50, %v3948_v50 }
 0x6d3   : > { %4846 = vst [vmem:[#allocation1 + $0x3] ss:$9 sm:$0xff] %v4287_v36 }
 0x6d4   : > { %4847 = vst [vmem:[#allocation1 + $0x4] ss:$9 sm:$0xff] %v4687_v20  ;;  %9953 = vmatmul.msk.bf16.vlgmr.msrb.gmra.mxu2 %vm3982_vm0, %v3980_v24 }
 0x6d5   : > { %4848 = vst [vmem:[#allocation1 + $0x5] ss:$9 sm:$0xff] %v4688_v52 }
 0x6d6   : > { %4849 = vst [vmem:[#allocation1 + $0x6] ss:$9 sm:$0xff] %v4689_v26 }
 0x6d7   : > { %4850 = vst [vmem:[#allocation1 + $0x7] ss:$9 sm:$0xff] %v4690_v12  ;;  %v4346_v17 = vpop.f32.mrf.mxu2 }
 0x6d8   : > { %v3876_v51 = vpop.xlane.xlu1 %3875  ;;  %v4306_v0 = vpop.f32.mrf.mxu0 }
 0x6d9   : > { %10421 = vrcp.f32 %v3876_v51  ;;  %v4691_v2 = vrot.slane %v4306_v0, 1  ;;  %v4692_v36 = vrot.slane %v4306_v0, 2  ;;  %v4693_v44 = vrot.slane %v4306_v0, 3 }
 0x6da   : > { %v4694_v8 = vrot.slane %v4306_v0, 4 }
 0x6de   : > { %v13994_v31 = vld [vmem:[#allocation1] sm:$0xff] }
 0x6df   : > { %17345 = vst [vmem:[#allocation81_spill] sm:$0xff] %v13994_v31  ;;  %v10422_v46 = vpop.eup %10421 }
 0x6e0   : > { %4857 = vst [vmem:[#allocation1 + $0x5] ss:$9 sm:$0xff] %v13984_v62  ;;  %v3946_v18 = vmul.f32 %v10422_v46, %v13935_v15  ;;  %v3879_v54 = vpop.xlane.xlu0 %3878  ;;  %v3885_v55 = vpop.xlane.xlu1 %3884  ;;  %v4702_v62 = vrot.slane %v13989_v23, 4 }
 0x6e1   : > { %4858 = vst [vmem:[#allocation1 + $0x6] ss:$9 sm:$0xff] %v4695_v1  ;;  %10423 = vrcp.f32 %v3879_v54  ;;  %v4308_v3 = vpop.f32.mrf.mxu0 }
 0x6e2   : > { %4859 = vst [vmem:[#allocation1 + $0x7] ss:$9 sm:$0xff] %v4696_v7  ;;  %v3978_v32 = vpack.c.bf16 %v3946_v18, %v3946_v18  ;;  %10425 = vrcp.f32 %v3885_v55 }
 0x6e3   : > { %4852 = vst [vmem:[#allocation1] ss:$9 sm:$0xff] %v4306_v0 }
 0x6e4   : > { %4853 = vst [vmem:[#allocation1 + $0x1] ss:$9 sm:$0xff] %v4691_v2  ;;  %9951 = vmatmul.msk.bf16.vlgmr.msra.gmra.mxu0 %vm3982_vm0, %v3978_v32 }
 0x6e5   : > { %4854 = vst [vmem:[#allocation1 + $0x2] ss:$9 sm:$0xff] %v4692_v36 }
 0x6e6   : > { %4855 = vst [vmem:[#allocation1 + $0x3] ss:$9 sm:$0xff] %v4693_v44  ;;  %v4363_v27 = vpop.f32.mrf.mxu3 }
 0x6e7   : > { %4856 = vst [vmem:[#allocation1 + $0x4] ss:$9 sm:$0xff] %v4694_v8  ;;  %v10424_v25 = vpop.eup %10423  ;;  %v4703_v56 = vrot.slane %v4363_v27, 1  ;;  %v4704_v50 = vrot.slane %v4363_v27, 2  ;;  %v4705_v40 = vrot.slane %v4363_v27, 3  ;;  %v4706_v26 = vrot.slane %v4363_v27, 4 }
 0x6e8   : > { %v10426_v57 = vpop.eup %10425  ;;  %v3947_v22 = vmul.f32 %v10424_v25, %v13946_v19 }
 0x6e9   : > { %v3949_v15 = vmul.f32 %v10426_v57, %v13943_v10  ;;  %v4382_v13 = vpop.f32.mrf.mxu0  ;;  %v4701_v10 = vrot.slane %v13989_v23, 3 }
 0x6ea   : > { %v3979_v33 = vpack.c.bf16 %v3947_v22, %v3947_v22  ;;  %v4707_v24 = vrot.slane %v4382_v13, 1  ;;  %v4708_v12 = vrot.slane %v4382_v13, 2  ;;  %v4710_v51 = vrot.slane %v4382_v13, 4 }
 0x6eb   : > { %v3981_v6 = vpack.c.bf16 %v3949_v15, %v3949_v15 }
 0x6ec   : > { %9952 = vmatmul.msk.bf16.vlgmr.msrb.gmra.mxu1 %vm3982_vm0, %v3979_v33 }
 0x6ed   : > { %9954 = vmatmul.msk.bf16.vlgmr.msrb.gmra.mxu3 %vm3982_vm0, %v3981_v6 }
 0x6ee   : > { %v14003_v14 = vld [vmem:[#allocation1] sm:$0xff]  ;;  %v4365_v19 = vpop.f32.mrf.mxu3 }
 0x6ef   : > { %17346 = vst [vmem:[#allocation82_spill] sm:$0xff] %v14003_v14 }
 0x6f0   : > { %4861 = vst [vmem:[#allocation1] ss:$9 sm:$0xff] %v4697_v43 }
 0x6f1   : > { %4862 = vst [vmem:[#allocation1 + $0x1] ss:$9 sm:$0xff] %v4698_v30  ;;  %v4384_v5 = vpop.f32.mrf.mxu0 }
 0x6f2   : > { %4863 = vst [vmem:[#allocation1 + $0x2] ss:$9 sm:$0xff] %v13989_v23  ;;  %v4709_v23 = vrot.slane %v4382_v13, 3 }
 0x6f3   : > { %4864 = vst [vmem:[#allocation1 + $0x3] ss:$9 sm:$0xff] %v4699_v39 }
 0x6f4   : > { %4865 = vst [vmem:[#allocation1 + $0x4] ss:$9 sm:$0xff] %v4700_v60 }
 0x6f5   : > { %4866 = vst [vmem:[#allocation1 + $0x5] ss:$9 sm:$0xff] %v4701_v10 }
 0x6f6   : > { %4867 = vst [vmem:[#allocation1 + $0x6] ss:$9 sm:$0xff] %v4702_v62 }
 0x6f7   : > { %4868 = vst [vmem:[#allocation1 + $0x7] ss:$9 sm:$0xff] %v4363_v27 }
 0x6f8   : > { %v4401_v20 = vpop.f32.mrf.mxu1 }
 0x6f9   : > { %v4711_v0 = vrot.slane %v4401_v20, 1  ;;  %v4712_v7 = vrot.slane %v4401_v20, 2  ;;  %v4713_v2 = vrot.slane %v4401_v20, 3  ;;  %v4714_v36 = vrot.slane %v4401_v20, 4 }
 0x6fe   : > { %v14012_v52 = vld [vmem:[#allocation1] sm:$0xff] }
 0x6ff   : > { %17347 = vst [vmem:[#allocation83_spill] sm:$0xff] %v14012_v52 }
 0x700   : > { %4870 = vst [vmem:[#allocation1] ss:$9 sm:$0xff] %v4703_v56  ;;  %v4403_v17 = vpop.f32.mrf.mxu1 }
 0x701   : > { %4871 = vst [vmem:[#allocation1 + $0x1] ss:$9 sm:$0xff] %v4704_v50 }
 0x702   : > { %4872 = vst [vmem:[#allocation1 + $0x2] ss:$9 sm:$0xff] %v4705_v40 }
 0x703   : > { %4873 = vst [vmem:[#allocation1 + $0x3] ss:$9 sm:$0xff] %v4706_v26 }
 0x704   : > { %4874 = vst [vmem:[#allocation1 + $0x4] ss:$9 sm:$0xff] %v4382_v13 }
 0x705   : > { %4875 = vst [vmem:[#allocation1 + $0x5] ss:$9 sm:$0xff] %v4707_v24 }
 0x706   : > { %4876 = vst [vmem:[#allocation1 + $0x6] ss:$9 sm:$0xff] %v4708_v12 }
 0x707   : > { %4877 = vst [vmem:[#allocation1 + $0x7] ss:$9 sm:$0xff] %v4709_v23 }
 0x70e   : > { %v14014_v1 = vld [vmem:[#allocation1] sm:$0xff] }
 0x70f   : > { %17348 = vst [vmem:[#allocation84_spill] sm:$0xff] %v14014_v1 }
 0x710   : > { %4879 = vst [vmem:[#allocation1] ss:$9 sm:$0xff] %v4710_v51 }
 0x711   : > { %4880 = vst [vmem:[#allocation1 + $0x1] ss:$9 sm:$0xff] %v4401_v20 }
 0x712   : > { %4881 = vst [vmem:[#allocation1 + $0x2] ss:$9 sm:$0xff] %v4711_v0 }
 0x713   : > { %4882 = vst [vmem:[#allocation1 + $0x3] ss:$9 sm:$0xff] %v4712_v7 }
 0x714   : > { %4883 = vst [vmem:[#allocation1 + $0x4] ss:$9 sm:$0xff] %v4713_v2 }
 0x715   : > { %4884 = vst [vmem:[#allocation1 + $0x5] ss:$9 sm:$0xff] %v4714_v36 }
 0x71e   : > { %v4420_v44 = vpop.f32.mrf.mxu2 }
 0x71f   : > { %v4715_v46 = vrot.slane %v4420_v44, 1  ;;  %4885 = vst [vmem:[#allocation1 + $0x6] ss:$9 sm:$0xff] %v4420_v44  ;;  %v4716_v18 = vrot.slane %v4420_v44, 2  ;;  %v4717_v54 = vrot.slane %v4420_v44, 3  ;;  %v4718_v3 = vrot.slane %v4420_v44, 4 }
 0x721   : > { %4886 = vst [vmem:[#allocation1 + $0x7] ss:$9 sm:$0xff] %v4715_v46 }
 0x726   : > { %v4422_v8 = vpop.f32.mrf.mxu2 }
 0x728   : > { %v14016_v55 = vld [vmem:[#allocation1] sm:$0xff] }
 0x729   : > { %17349 = vst [vmem:[#allocation85_spill] sm:$0xff] %v14016_v55 }
 0x72a   : > { %4888 = vst [vmem:[#allocation1] ss:$9 sm:$0xff] %v4716_v18 }
 0x72b   : > { %4889 = vst [vmem:[#allocation1 + $0x1] ss:$9 sm:$0xff] %v4717_v54 }
 0x72c   : > { %4890 = vst [vmem:[#allocation1 + $0x2] ss:$9 sm:$0xff] %v4718_v3 }
 0x72e   : > { %v4439_v32 = vpop.f32.mrf.mxu3 }
 0x72f   : > { %v4719_v27 = vrot.slane %v4439_v32, 1  ;;  %v4720_v25 = vrot.slane %v4439_v32, 2  ;;  %v4721_v57 = vrot.slane %v4439_v32, 3  ;;  %4891 = vst [vmem:[#allocation1 + $0x3] ss:$9 sm:$0xff] %v4439_v32  ;;  %v4722_v22 = vrot.slane %v4439_v32, 4 }
 0x731   : > { %4892 = vst [vmem:[#allocation1 + $0x4] ss:$9 sm:$0xff] %v4719_v27 }
 0x732   : > { %4893 = vst [vmem:[#allocation1 + $0x5] ss:$9 sm:$0xff] %v4720_v25 }
 0x733   : > { %4894 = vst [vmem:[#allocation1 + $0x6] ss:$9 sm:$0xff] %v4721_v57 }
 0x734   : > { %4895 = vst [vmem:[#allocation1 + $0x7] ss:$9 sm:$0xff] %v4722_v22 }
 0x736   : > { %v4441_v43 = vpop.f32.mrf.mxu3 }
 0x739   : > { %v4458_v15 = vpop.f32.mrf.mxu0 }
 0x73a   : > { %v4723_v13 = vrot.slane %v4458_v15, 1  ;;  %v4477_v30 = vpop.f32.mrf.mxu1  ;;  %v4724_v33 = vrot.slane %v4458_v15, 2  ;;  %v4725_v39 = vrot.slane %v4458_v15, 3  ;;  %v4726_v60 = vrot.slane %v4458_v15, 4 }
 0x73b   : > { %v14018_v6 = vld [vmem:[#allocation1] sm:$0xff]  ;;  %v4727_v10 = vrot.slane %v4477_v30, 1  ;;  %v4728_v19 = vrot.slane %v4477_v30, 2  ;;  %v4729_v40 = vrot.slane %v4477_v30, 3  ;;  %v4730_v26 = vrot.slane %v4477_v30, 4 }
 0x73c   : > { %17350 = vst [vmem:[#allocation86_spill] sm:$0xff] %v14018_v6  ;;  %v17747_v6 = vld [vmem:[#allocation67_spill] sm:$0xff] }
 0x73d   : > { %4897 = vst [vmem:[#allocation1] ss:$9 sm:$0xff] %v4458_v15  ;;  %v17748_v55 = vrot.slane %v17747_v6, 1 }
 0x73e   : > { %4898 = vst [vmem:[#allocation1 + $0x1] ss:$9 sm:$0xff] %v4723_v13 }
 0x73f   : > { %4899 = vst [vmem:[#allocation1 + $0x2] ss:$9 sm:$0xff] %v4724_v33 }
 0x740   : > { %4900 = vst [vmem:[#allocation1 + $0x3] ss:$9 sm:$0xff] %v4725_v39 }
 0x741   : > { %4901 = vst [vmem:[#allocation1 + $0x4] ss:$9 sm:$0xff] %v4726_v60  ;;  %v4496_v62 = vpop.f32.mrf.mxu2  ;;  %v4460_v5 = vpop.f32.mrf.mxu0 }
 0x742   : > { %4902 = vst [vmem:[#allocation1 + $0x5] ss:$9 sm:$0xff] %v4477_v30  ;;  %v4479_v56 = vpop.f32.mrf.mxu1  ;;  %v4731_v12 = vrot.slane %v4496_v62, 1  ;;  %v4732_v23 = vrot.slane %v4496_v62, 2  ;;  %v4733_v17 = vrot.slane %v4496_v62, 3  ;;  %v4734_v51 = vrot.slane %v4496_v62, 4 }
 0x743   : > { %4903 = vst [vmem:[#allocation1 + $0x6] ss:$9 sm:$0xff] %v4727_v10 }
 0x744   : > { %4904 = vst [vmem:[#allocation1 + $0x7] ss:$9 sm:$0xff] %v4728_v19 }
 0x747   : > { %v4515_v50 = vpop.f32.mrf.mxu3 }
 0x748   : > { %v4735_v2 = vrot.slane %v4515_v50, 1  ;;  %v4736_v36 = vrot.slane %v4515_v50, 2  ;;  %v4737_v46 = vrot.slane %v4515_v50, 3  ;;  %v4738_v8 = vrot.slane %v4515_v50, 4 }
 0x749   : > { %v4498_v20 = vpop.f32.mrf.mxu2 }
 0x74b   : > { %v14020_v24 = vld [vmem:[#allocation1] sm:$0xff] }
 0x74c   : > { %17351 = vst [vmem:[#allocation87_spill] sm:$0xff] %v14020_v24  ;;  %v17593_v24 = vld [vmem:[#allocation48_spill] sm:$0xff] }
 0x74d   : > { %4906 = vst [vmem:[#allocation1] ss:$9 sm:$0xff] %v4729_v40 }
 0x74e   : > { %4907 = vst [vmem:[#allocation1 + $0x1] ss:$9 sm:$0xff] %v4730_v26 }
 0x74f   : > { %4908 = vst [vmem:[#allocation1 + $0x2] ss:$9 sm:$0xff] %v4496_v62  ;;  %v4517_v0 = vpop.f32.mrf.mxu3 }
 0x750   : > { %4909 = vst [vmem:[#allocation1 + $0x3] ss:$9 sm:$0xff] %v4731_v12  ;;  %v17358_v0 = vrot.slane %v11665_v37, 3 }
 0x751   : > { %4910 = vst [vmem:[#allocation1 + $0x4] ss:$9 sm:$0xff] %v4732_v23 }
 0x752   : > { %4911 = vst [vmem:[#allocation1 + $0x5] ss:$9 sm:$0xff] %v4733_v17  ;;  %v17356_v17 = vrot.slane %v11665_v37, 1 }
 0x753   : > { %4912 = vst [vmem:[#allocation1 + $0x6] ss:$9 sm:$0xff] %v4734_v51  ;;  %v17357_v51 = vrot.slane %v11665_v37, 2 }
 0x754   : > { %4913 = vst [vmem:[#allocation1 + $0x7] ss:$9 sm:$0xff] %v4515_v50 }
 0x757   : > { %v4572_v7 = vpop.f32.mrf.mxu2 }
 0x758   : > { %v4747_v15 = vrot.slane %v4572_v7, 1  ;;  %v4749_v62 = vrot.slane %v4572_v7, 3  ;;  %v4750_v5 = vrot.slane %v4572_v7, 4  ;;  %v4748_v20 = vrot.slane %v4572_v7, 2 }
 0x75b   : > { %v14022_v44 = vld [vmem:[#allocation1] sm:$0xff] }
 0x75c   : > { %17352 = vst [vmem:[#allocation88_spill] sm:$0xff] %v14022_v44 }
 0x75d   : > { %4915 = vst [vmem:[#allocation1] ss:$9 sm:$0xff] %v4735_v2 }
 0x75e   : > { %4916 = vst [vmem:[#allocation1 + $0x1] ss:$9 sm:$0xff] %v4736_v36  ;;  %v17360_v36 = vrot.slane %v11665_v37, 5 }
 0x75f   : > { %4917 = vst [vmem:[#allocation1 + $0x2] ss:$9 sm:$0xff] %v4737_v46  ;;  %v4574_v18 = vpop.f32.mrf.mxu2  ;;  %v17361_v46 = vrot.slane %v11665_v37, 6 }
 0x760   : > { %4918 = vst [vmem:[#allocation1 + $0x3] ss:$9 sm:$0xff] %v4738_v8  ;;  %v17362_v8 = vrot.slane %v11665_v37, 7  ;;  %v17363_v18 = vrot.slane %v11680_v28, 1 }
 0x761   : > { %v4534_v54 = vpop.f32.mrf.mxu0 }
 0x762   : > { %v4739_v3 = vrot.slane %v4534_v54, 1  ;;  %v4740_v32 = vrot.slane %v4534_v54, 2  ;;  %v4741_v27 = vrot.slane %v4534_v54, 3  ;;  %4919 = vst [vmem:[#allocation1 + $0x4] ss:$9 sm:$0xff] %v4534_v54  ;;  %v4742_v22 = vrot.slane %v4534_v54, 4 }
 0x764   : > { %4920 = vst [vmem:[#allocation1 + $0x5] ss:$9 sm:$0xff] %v4739_v3  ;;  %v17364_v3 = vrot.slane %v11680_v28, 2 }
 0x765   : > { %4921 = vst [vmem:[#allocation1 + $0x6] ss:$9 sm:$0xff] %v4740_v32  ;;  %v17365_v32 = vrot.slane %v11680_v28, 3 }
 0x766   : > { %4922 = vst [vmem:[#allocation1 + $0x7] ss:$9 sm:$0xff] %v4741_v27  ;;  %v17366_v27 = vrot.slane %v11680_v28, 4 }
 0x769   : > { %v4536_v25 = vpop.f32.mrf.mxu0  ;;  %v4553_v57 = vpop.f32.mrf.mxu1 }
 0x76a   : > { %v4743_v13 = vrot.slane %v4553_v57, 1  ;;  %v4744_v30 = vrot.slane %v4553_v57, 2  ;;  %v4745_v33 = vrot.slane %v4553_v57, 3  ;;  %v4746_v60 = vrot.slane %v4553_v57, 4 }
 0x76b   : > { %v17367_v25 = vrot.slane %v11680_v28, 5 }
 0x76d   : > { %v14024_v43 = vld [vmem:[#allocation1] sm:$0xff] }
 0x76e   : > { %17353 = vst [vmem:[#allocation89_spill] sm:$0xff] %v14024_v43 }
 0x76f   : > { %4924 = vst [vmem:[#allocation1] ss:$9 sm:$0xff] %v4742_v22  ;;  %v17369_v22 = vrot.slane %v11680_v28, 7 }
 0x770   : > { %4930 = vst [vmem:[#allocation1 + $0x6] ss:$9 sm:$0xff] %v4572_v7  ;;  %v4591_v39 = vpop.f32.mrf.mxu3  ;;  %v17359_v7 = vrot.slane %v11665_v37, 4 }
 0x771   : > { %4931 = vst [vmem:[#allocation1 + $0x7] ss:$9 sm:$0xff] %v4747_v15  ;;  %v4555_v10 = vpop.f32.mrf.mxu1  ;;  %v4751_v50 = vrot.slane %v4591_v39, 1  ;;  %v4752_v40 = vrot.slane %v4591_v39, 2  ;;  %v4753_v26 = vrot.slane %v4591_v39, 3  ;;  %v4754_v12 = vrot.slane %v4591_v39, 4 }
 0x772   : > { %4925 = vst [vmem:[#allocation1 + $0x1] ss:$9 sm:$0xff] %v4553_v57  ;;  %v17370_v15 = vrot.slane %v11724_v21, 1  ;;  %v17376_v10 = vrot.slane %v11724_v21, 7 }
 0x773   : > { %4926 = vst [vmem:[#allocation1 + $0x2] ss:$9 sm:$0xff] %v4743_v13  ;;  %v17371_v13 = vrot.slane %v11724_v21, 2 }
 0x774   : > { %4927 = vst [vmem:[#allocation1 + $0x3] ss:$9 sm:$0xff] %v4744_v30  ;;  %v17372_v30 = vrot.slane %v11724_v21, 3 }
 0x775   : > { %4928 = vst [vmem:[#allocation1 + $0x4] ss:$9 sm:$0xff] %v4745_v33 }
 0x776   : > { %4929 = vst [vmem:[#allocation1 + $0x5] ss:$9 sm:$0xff] %v4746_v60  ;;  %v17374_v60 = vrot.slane %v11724_v21, 5 }
 0x778   : > { %v4593_v19 = vpop.f32.mrf.mxu3 }
 0x779   : > { %v17377_v19 = vld [vmem:[#allocation21_spill] sm:$0xff] }
 0x77d   : > { %v14026_v56 = vld [vmem:[#allocation1] sm:$0xff] }
 0x77e   : > { %17354 = vst [vmem:[#allocation90_spill] sm:$0xff] %v14026_v56 }
 0x77f   : > { %4934 = vst [vmem:[#allocation1 + $0x1] ss:$9 sm:$0xff] %v4749_v62 }
 0x780   : > { %4935 = vst [vmem:[#allocation1 + $0x2] ss:$9 sm:$0xff] %v4750_v5 }
 0x781   : > { %4933 = vst [vmem:[#allocation1] ss:$9 sm:$0xff] %v4748_v20 }
 0x782   : > { %4936 = vst [vmem:[#allocation1 + $0x3] ss:$9 sm:$0xff] %v4591_v39  ;;  %v17373_v39 = vrot.slane %v11724_v21, 4 }
 0x783   : > { %4937 = vst [vmem:[#allocation1 + $0x4] ss:$9 sm:$0xff] %v4751_v50 }
 0x784   : > { %4938 = vst [vmem:[#allocation1 + $0x5] ss:$9 sm:$0xff] %v4752_v40  ;;  %v17378_v40 = vrot.slane %v17377_v19, 1 }
 0x785   : > { %4939 = vst [vmem:[#allocation1 + $0x6] ss:$9 sm:$0xff] %v4753_v26 }
 0x786   : > { %4940 = vst [vmem:[#allocation1 + $0x7] ss:$9 sm:$0xff] %v4754_v12  ;;  %v17379_v12 = vrot.slane %v17377_v19, 2 }
 0x78d   : > { %v14028_v23 = vld [vmem:[#allocation1] sm:$0xff] }
 0x78e   : > { %17355 = vst [vmem:[#allocation91_spill] sm:$0xff] %v14028_v23 }
 0x78f   : > { %4972 = vst [vmem:[#allocation1] ss:$9 sm:$0xff] %v11665_v37  ;;  %v17368_v37 = vrot.slane %v11680_v28, 6 }
 0x790   : > { %4974 = vst [vmem:[#allocation1 + $0x1] ss:$9 sm:$0xff] %v17356_v17  ;;  %v17380_v17 = vrot.slane %v17377_v19, 3 }
 0x791   : > { %4976 = vst [vmem:[#allocation1 + $0x2] ss:$9 sm:$0xff] %v17357_v51  ;;  %v17381_v51 = vrot.slane %v17377_v19, 4 }
 0x792   : > { %4978 = vst [vmem:[#allocation1 + $0x3] ss:$9 sm:$0xff] %v17358_v0  ;;  %v17382_v0 = vrot.slane %v17377_v19, 5 }
 0x793   : > { %4980 = vst [vmem:[#allocation1 + $0x4] ss:$9 sm:$0xff] %v17359_v7 }
 0x79a   : > { %v4981_v2 = vld [vmem:[#allocation1] sm:$0xff] }
 0x79b   : > { %4982 = vst [vmem:[#allocation1] ss:$9 sm:$0xff] %v17360_v36  ;;  %v5200_v62 = vpack.c.bf16 %v4981_v2, %v4981_v2 }
 0x79c   : > { %4983 = vst [vmem:[#allocation1 + $0x1] ss:$9 sm:$0xff] %v17361_v46 }
 0x79d   : > { %4984 = vst [vmem:[#allocation1 + $0x2] ss:$9 sm:$0xff] %v17362_v8  ;;  %v5753_v5 = vunpack.c.l.b16 %v5200_v62  ;;  %v17383_v8 = vrot.slane %v17377_v19, 6 }
 0x79e   : > { %4985 = vst [vmem:[#allocation1 + $0x3] ss:$9 sm:$0xff] %v11680_v28  ;;  %v17375_v28 = vrot.slane %v11724_v21, 6 }
 0x79f   : > { %4986 = vst [vmem:[#allocation1 + $0x4] ss:$9 sm:$0xff] %v17363_v18  ;;  %v5754_v20 = vpack.c.b16 %v5753_v5, %v5753_v5 }
 0x7a1   : > { %5755 = vrot.lane.b32.xlu1 %v5754_v20, %s10901_s8  ;;  %v17393_v20 = vld [vmem:[#allocation23_spill] sm:$0xff] }
 0x7a6   : > { %v4987_v54 = vld [vmem:[#allocation1] sm:$0xff] }
 0x7a7   : > { %4988 = vst [vmem:[#allocation1] ss:$9 sm:$0xff] %v17364_v3  ;;  %v5201_v26 = vpack.c.bf16 %v4987_v54, %v4987_v54  ;;  %v17384_v54 = vrot.slane %v17377_v19, 7  ;;  %v17385_v3 = vld [vmem:[#allocation22_spill] sm:$0xff] }
 0x7a8   : > { %4989 = vst [vmem:[#allocation1 + $0x1] ss:$9 sm:$0xff] %v17365_v32  ;;  %v17386_v32 = vrot.slane %v17385_v3, 1 }
 0x7a9   : > { %4990 = vst [vmem:[#allocation1 + $0x2] ss:$9 sm:$0xff] %v17366_v27  ;;  %v17387_v27 = vrot.slane %v17385_v3, 2 }
 0x7aa   : > { %4991 = vst [vmem:[#allocation1 + $0x3] ss:$9 sm:$0xff] %v17367_v25 }
 0x7ab   : > { %4992 = vst [vmem:[#allocation1 + $0x4] ss:$9 sm:$0xff] %v17368_v37 }
 0x7b2   : > { %v4993_v57 = vld [vmem:[#allocation1] sm:$0xff] }
 0x7b3   : > { %4994 = vst [vmem:[#allocation1] ss:$9 sm:$0xff] %v17369_v22  ;;  %v5202_v2 = vpack.c.bf16 %v4993_v57, %v4993_v57 }
 0x7b4   : > { %4995 = vst [vmem:[#allocation1 + $0x1] ss:$9 sm:$0xff] %v11724_v21  ;;  %v5782_v21 = vunpack.c.l.b16 %v5201_v26  ;;  %v17395_v26 = vrot.slane %v17393_v20, 2 }
 0x7b5   : > { %4996 = vst [vmem:[#allocation1 + $0x2] ss:$9 sm:$0xff] %v17370_v15  ;;  %v5811_v36 = vunpack.c.l.b16 %v5202_v2  ;;  %v17388_v15 = vrot.slane %v17385_v3, 3  ;;  %v17398_v2 = vrot.slane %v17393_v20, 5 }
 0x7b6   : > { %4997 = vst [vmem:[#allocation1 + $0x3] ss:$9 sm:$0xff] %v17371_v13  ;;  %v5783_v7 = vpack.c.b16 %v5782_v21, %v5782_v21 }
 0x7b7   : > { %4998 = vst [vmem:[#allocation1 + $0x4] ss:$9 sm:$0xff] %v17372_v30  ;;  %v5812_v18 = vpack.c.b16 %v5811_v36, %v5811_v36  ;;  %v17389_v30 = vrot.slane %v17385_v3, 4 }
 0x7b8   : > { %5784 = vrot.lane.b32.xlu0 %v5783_v7, %s10901_s8 }
 0x7be   : > { %v4999_v33 = vld [vmem:[#allocation1] sm:$0xff] }
 0x7bf   : > { %5000 = vst [vmem:[#allocation1] ss:$9 sm:$0xff] %v17373_v39  ;;  %v5203_v25 = vpack.c.bf16 %v4999_v33, %v4999_v33  ;;  %v17390_v39 = vrot.slane %v17385_v3, 5  ;;  %v17392_v33 = vrot.slane %v17385_v3, 7 }
 0x7c0   : > { %5001 = vst [vmem:[#allocation1 + $0x1] ss:$9 sm:$0xff] %v17374_v60  ;;  %5813 = vrot.lane.b32.xlu0 %v5812_v18, %s10901_s8 }
 0x7c1   : > { %5002 = vst [vmem:[#allocation1 + $0x2] ss:$9 sm:$0xff] %v17375_v28  ;;  %v5840_v37 = vunpack.c.l.b16 %v5203_v25  ;;  %v17391_v28 = vrot.slane %v17385_v3, 6 }
 0x7c2   : > { %5003 = vst [vmem:[#allocation1 + $0x3] ss:$9 sm:$0xff] %v17376_v10 }
 0x7c3   : > { %5004 = vst [vmem:[#allocation1 + $0x4] ss:$9 sm:$0xff] %v17377_v19  ;;  %v5841_v57 = vpack.c.b16 %v5840_v37, %v5840_v37 }
 0x7c5   : > { %5842 = vrot.lane.b32.xlu2 %v5841_v57, %s10901_s8 }
 0x7ca   : > { %v5005_v50 = vld [vmem:[#allocation1] sm:$0xff] }
 0x7cb   : > { %5006 = vst [vmem:[#allocation1] ss:$9 sm:$0xff] %v17378_v40  ;;  %v5204_v13 = vpack.c.bf16 %v5005_v50, %v5005_v50  ;;  %v17394_v40 = vrot.slane %v17393_v20, 1 }
 0x7cc   : > { %5007 = vst [vmem:[#allocation1 + $0x1] ss:$9 sm:$0xff] %v17379_v12  ;;  %v17396_v12 = vrot.slane %v17393_v20, 3 }
 0x7cd   : > { %5008 = vst [vmem:[#allocation1 + $0x2] ss:$9 sm:$0xff] %v17380_v17  ;;  %v5869_v60 = vunpack.c.l.b16 %v5204_v13  ;;  %v17397_v17 = vrot.slane %v17393_v20, 4 }
 0x7ce   : > { %5009 = vst [vmem:[#allocation1 + $0x3] ss:$9 sm:$0xff] %v17381_v51 }
 0x7cf   : > { %5010 = vst [vmem:[#allocation1 + $0x4] ss:$9 sm:$0xff] %v17382_v0  ;;  %v5870_v10 = vpack.c.b16 %v5869_v60, %v5869_v60 }
 0x7d1   : > { %5871 = vrot.lane.b32.xlu1 %v5870_v10, %s10901_s8 }
 0x7d6   : > { %v5011_v46 = vld [vmem:[#allocation1] sm:$0xff] }
 0x7d7   : > { %5012 = vst [vmem:[#allocation1] ss:$9 sm:$0xff] %v17383_v8  ;;  %v5205_v19 = vpack.c.bf16 %v5011_v46, %v5011_v46  ;;  %v17399_v46 = vrot.slane %v17393_v20, 6  ;;  %v17400_v8 = vrot.slane %v17393_v20, 7 }
 0x7d8   : > { %5013 = vst [vmem:[#allocation1 + $0x1] ss:$9 sm:$0xff] %v17384_v54  ;;  %v17401_v54 = vld [vmem:[#allocation24_spill] sm:$0xff] }
 0x7d9   : > { %5014 = vst [vmem:[#allocation1 + $0x2] ss:$9 sm:$0xff] %v17385_v3  ;;  %v5898_v62 = vunpack.c.l.b16 %v5205_v19  ;;  %v17402_v3 = vrot.slane %v17401_v54, 1  ;;  %v17403_v57 = vrot.slane %v17401_v54, 2  ;;  %v17405_v13 = vrot.slane %v17401_v54, 4 }
 0x7da   : > { %5015 = vst [vmem:[#allocation1 + $0x3] ss:$9 sm:$0xff] %v17386_v32  ;;  %v17408_v19 = vrot.slane %v17401_v54, 7 }
 0x7db   : > { %5016 = vst [vmem:[#allocation1 + $0x4] ss:$9 sm:$0xff] %v17387_v27  ;;  %v5899_v50 = vpack.c.b16 %v5898_v62, %v5898_v62 }
 0x7dd   : > { %5900 = vrot.lane.b32.xlu1 %v5899_v50, %s10901_s8 }
 0x7e2   : > { %v5017_v22 = vld [vmem:[#allocation1] sm:$0xff] }
 0x7e3   : > { %5018 = vst [vmem:[#allocation1] ss:$9 sm:$0xff] %v17388_v15  ;;  %v5206_v21 = vpack.c.bf16 %v5017_v22, %v5017_v22  ;;  %v17404_v15 = vrot.slane %v17401_v54, 3 }
 0x7e4   : > { %5019 = vst [vmem:[#allocation1 + $0x1] ss:$9 sm:$0xff] %v17389_v30  ;;  %v17406_v30 = vrot.slane %v17401_v54, 5 }
 0x7e5   : > { %5020 = vst [vmem:[#allocation1 + $0x2] ss:$9 sm:$0xff] %v17390_v39  ;;  %v5927_v51 = vunpack.c.l.b16 %v5206_v21  ;;  %v17407_v39 = vrot.slane %v17401_v54, 6 }
 0x7e6   : > { %5021 = vst [vmem:[#allocation1 + $0x3] ss:$9 sm:$0xff] %v17391_v28 }
 0x7e7   : > { %5022 = vst [vmem:[#allocation1 + $0x4] ss:$9 sm:$0xff] %v17392_v33  ;;  %v5928_v0 = vpack.c.b16 %v5927_v51, %v5927_v51 }
 0x7e9   : > { %5929 = vrot.lane.b32.xlu0 %v5928_v0, %s10901_s8 }
 0x7ee   : > { %v5023_v5 = vld [vmem:[#allocation1] sm:$0xff] }
 0x7ef   : > { %5024 = vst [vmem:[#allocation1] ss:$9 sm:$0xff] %v17393_v20  ;;  %v5207_v36 = vpack.c.bf16 %v5023_v5, %v5023_v5  ;;  %v17409_v5 = vld [vmem:[#allocation25_spill] sm:$0xff] }
 0x7f0   : > { %5025 = vst [vmem:[#allocation1 + $0x1] ss:$9 sm:$0xff] %v17394_v40  ;;  %v17410_v20 = vrot.slane %v17409_v5, 1  ;;  %v17411_v40 = vrot.slane %v17409_v5, 2  ;;  %v17413_v21 = vrot.slane %v17409_v5, 4  ;;  %v17414_v0 = vrot.slane %v17409_v5, 5 }
 0x7f1   : > { %5026 = vst [vmem:[#allocation1 + $0x2] ss:$9 sm:$0xff] %v17395_v26  ;;  %v5956_v18 = vunpack.c.l.b16 %v5207_v36  ;;  %v17412_v26 = vrot.slane %v17409_v5, 3  ;;  %v17416_v36 = vrot.slane %v17409_v5, 7 }
 0x7f2   : > { %5027 = vst [vmem:[#allocation1 + $0x3] ss:$9 sm:$0xff] %v17396_v12 }
 0x7f3   : > { %5028 = vst [vmem:[#allocation1 + $0x4] ss:$9 sm:$0xff] %v17397_v17  ;;  %v5957_v32 = vpack.c.b16 %v5956_v18, %v5956_v18 }
 0x7f5   : > { %5958 = vrot.lane.b32.xlu2 %v5957_v32, %s10901_s8 }
 0x7fa   : > { %v5029_v7 = vld [vmem:[#allocation1] sm:$0xff] }
 0x7fb   : > { %5030 = vst [vmem:[#allocation1] ss:$9 sm:$0xff] %v17398_v2  ;;  %v5208_v27 = vpack.c.bf16 %v5029_v7, %v5029_v7  ;;  %v17415_v7 = vrot.slane %v17409_v5, 6 }
 0x7fc   : > { %5031 = vst [vmem:[#allocation1 + $0x1] ss:$9 sm:$0xff] %v17399_v46  ;;  %v17417_v46 = vld [vmem:[#allocation26_spill] sm:$0xff] }
 0x7fd   : > { %5032 = vst [vmem:[#allocation1 + $0x2] ss:$9 sm:$0xff] %v17400_v8  ;;  %v5985_v25 = vunpack.c.l.b16 %v5208_v27  ;;  %v17419_v32 = vrot.slane %v17417_v46, 2  ;;  %v17420_v27 = vrot.slane %v17417_v46, 3 }
 0x7fe   : > { %5033 = vst [vmem:[#allocation1 + $0x3] ss:$9 sm:$0xff] %v17401_v54  ;;  %v17418_v54 = vrot.slane %v17417_v46, 1 }
 0x7ff   : > { %5034 = vst [vmem:[#allocation1 + $0x4] ss:$9 sm:$0xff] %v17402_v3  ;;  %v5986_v22 = vpack.c.b16 %v5985_v25, %v5985_v25 }
 0x801   : > { %5987 = vrot.lane.b32.xlu0 %v5986_v22, %s10901_s8 }
 0x806   : > { %v5035_v37 = vld [vmem:[#allocation1] sm:$0xff] }
 0x807   : > { %5036 = vst [vmem:[#allocation1] ss:$9 sm:$0xff] %v17403_v57  ;;  %v5209_v60 = vpack.c.bf16 %v5035_v37, %v5035_v37  ;;  %v17421_v37 = vrot.slane %v17417_v46, 4  ;;  %v17422_v57 = vrot.slane %v17417_v46, 5 }
 0x808   : > { %5037 = vst [vmem:[#allocation1 + $0x1] ss:$9 sm:$0xff] %v17404_v15 }
 0x809   : > { %5038 = vst [vmem:[#allocation1 + $0x2] ss:$9 sm:$0xff] %v17405_v13  ;;  %v6014_v28 = vunpack.c.l.b16 %v5209_v60  ;;  %v17423_v13 = vrot.slane %v17417_v46, 6  ;;  %v17425_v60 = vld [vmem:[#allocation27_spill] sm:$0xff] }
 0x80a   : > { %5039 = vst [vmem:[#allocation1 + $0x3] ss:$9 sm:$0xff] %v17406_v30 }
 0x80b   : > { %5040 = vst [vmem:[#allocation1 + $0x4] ss:$9 sm:$0xff] %v17407_v39  ;;  %v6015_v33 = vpack.c.b16 %v6014_v28, %v6014_v28  ;;  %v17424_v39 = vrot.slane %v17417_v46, 7 }
 0x80d   : > { %6016 = vrot.lane.b32.xlu2 %v6015_v33, %s10901_s8  ;;  %v17426_v33 = vrot.slane %v17425_v60, 1 }
 0x812   : > { %v5041_v10 = vld [vmem:[#allocation1] sm:$0xff] }
 0x813   : > { %5042 = vst [vmem:[#allocation1] ss:$9 sm:$0xff] %v17408_v19  ;;  %v5210_v62 = vpack.c.bf16 %v5041_v10, %v5041_v10  ;;  %v17427_v10 = vrot.slane %v17425_v60, 2 }
 0x814   : > { %5043 = vst [vmem:[#allocation1 + $0x1] ss:$9 sm:$0xff] %v17409_v5  ;;  %v17428_v5 = vrot.slane %v17425_v60, 3 }
 0x815   : > { %5044 = vst [vmem:[#allocation1 + $0x2] ss:$9 sm:$0xff] %v17410_v20  ;;  %v6043_v50 = vunpack.c.l.b16 %v5210_v62 }
 0x816   : > { %5045 = vst [vmem:[#allocation1 + $0x3] ss:$9 sm:$0xff] %v17411_v40  ;;  %v17430_v40 = vrot.slane %v17425_v60, 5 }
 0x817   : > { %5046 = vst [vmem:[#allocation1 + $0x4] ss:$9 sm:$0xff] %v17412_v26  ;;  %v6044_v12 = vpack.c.b16 %v6043_v50, %v6043_v50  ;;  %v17429_v50 = vrot.slane %v17425_v60, 4 }
 0x819   : > { %6045 = vrot.lane.b32.xlu2 %v6044_v12, %s10901_s8  ;;  %v17431_v12 = vrot.slane %v17425_v60, 6 }
 0x81e   : > { %v5047_v17 = vld [vmem:[#allocation1] sm:$0xff] }
 0x81f   : > { %5048 = vst [vmem:[#allocation1] ss:$9 sm:$0xff] %v17413_v21  ;;  %v5211_v51 = vpack.c.bf16 %v5047_v17, %v5047_v17  ;;  %v17432_v17 = vrot.slane %v17425_v60, 7 }
 0x820   : > { %5049 = vst [vmem:[#allocation1 + $0x1] ss:$9 sm:$0xff] %v17414_v0  ;;  %v17433_v0 = vld [vmem:[#allocation28_spill] sm:$0xff] }
 0x821   : > { %5050 = vst [vmem:[#allocation1 + $0x2] ss:$9 sm:$0xff] %v17415_v7  ;;  %v6072_v2 = vunpack.c.l.b16 %v5211_v51 }
 0x822   : > { %5051 = vst [vmem:[#allocation1 + $0x3] ss:$9 sm:$0xff] %v17416_v36  ;;  %v17435_v36 = vrot.slane %v17433_v0, 2 }
 0x823   : > { %5052 = vst [vmem:[#allocation1 + $0x4] ss:$9 sm:$0xff] %v17417_v46  ;;  %v6073_v8 = vpack.c.b16 %v6072_v2, %v6072_v2  ;;  %v17434_v2 = vrot.slane %v17433_v0, 1 }
 0x825   : > { %6074 = vrot.lane.b32.xlu1 %v6073_v8, %s10901_s8  ;;  %v17436_v8 = vrot.slane %v17433_v0, 3 }
 0x82a   : > { %v5053_v18 = vld [vmem:[#allocation1] sm:$0xff] }
 0x82b   : > { %5054 = vst [vmem:[#allocation1] ss:$9 sm:$0xff] %v17418_v54  ;;  %v5212_v3 = vpack.c.bf16 %v5053_v18, %v5053_v18  ;;  %v17437_v18 = vrot.slane %v17433_v0, 4 }
 0x82c   : > { %5055 = vst [vmem:[#allocation1 + $0x1] ss:$9 sm:$0xff] %v17419_v32  ;;  %v17438_v32 = vrot.slane %v17433_v0, 5 }
 0x82d   : > { %5056 = vst [vmem:[#allocation1 + $0x2] ss:$9 sm:$0xff] %v17420_v27  ;;  %v6101_v25 = vunpack.c.l.b16 %v5212_v3 }
 0x82e   : > { %5057 = vst [vmem:[#allocation1 + $0x3] ss:$9 sm:$0xff] %v17421_v37  ;;  %v17440_v37 = vrot.slane %v17433_v0, 7 }
 0x82f   : > { %5058 = vst [vmem:[#allocation1 + $0x4] ss:$9 sm:$0xff] %v17422_v57  ;;  %v6102_v22 = vpack.c.b16 %v6101_v25, %v6101_v25  ;;  %v17439_v25 = vrot.slane %v17433_v0, 6 }
 0x831   : > { %6103 = vrot.lane.b32.xlu0 %v6102_v22, %s10901_s8  ;;  %v17441_v22 = vld [vmem:[#allocation29_spill] sm:$0xff] }
 0x836   : > { %v5059_v15 = vld [vmem:[#allocation1] sm:$0xff] }
 0x837   : > { %5060 = vst [vmem:[#allocation1] ss:$9 sm:$0xff] %v17423_v13  ;;  %v5213_v30 = vpack.c.bf16 %v5059_v15, %v5059_v15  ;;  %v17442_v15 = vrot.slane %v17441_v22, 1 }
 0x838   : > { %5061 = vst [vmem:[#allocation1 + $0x1] ss:$9 sm:$0xff] %v17424_v39  ;;  %v17443_v39 = vrot.slane %v17441_v22, 2 }
 0x839   : > { %5062 = vst [vmem:[#allocation1 + $0x2] ss:$9 sm:$0xff] %v17425_v60  ;;  %v6130_v28 = vunpack.c.l.b16 %v5213_v30 }
 0x83a   : > { %5063 = vst [vmem:[#allocation1 + $0x3] ss:$9 sm:$0xff] %v17426_v33  ;;  %v17445_v33 = vrot.slane %v17441_v22, 4 }
 0x83b   : > { %5064 = vst [vmem:[#allocation1 + $0x4] ss:$9 sm:$0xff] %v17427_v10  ;;  %v6131_v19 = vpack.c.b16 %v6130_v28, %v6130_v28  ;;  %v17444_v28 = vrot.slane %v17441_v22, 3 }
 0x83d   : > { %6132 = vrot.lane.b32.xlu0 %v6131_v19, %s10901_s8  ;;  %v17446_v19 = vrot.slane %v17441_v22, 5 }
 0x842   : > { %v5065_v62 = vld [vmem:[#allocation1] sm:$0xff] }
 0x843   : > { %5066 = vst [vmem:[#allocation1] ss:$9 sm:$0xff] %v17428_v5  ;;  %v5214_v20 = vpack.c.bf16 %v5065_v62, %v5065_v62  ;;  %v17447_v62 = vrot.slane %v17441_v22, 6 }
 0x844   : > { %5067 = vst [vmem:[#allocation1 + $0x1] ss:$9 sm:$0xff] %v17429_v50 }
 0x845   : > { %5068 = vst [vmem:[#allocation1 + $0x2] ss:$9 sm:$0xff] %v17430_v40  ;;  %v6159_v26 = vunpack.c.l.b16 %v5214_v20  ;;  %v17448_v40 = vrot.slane %v17441_v22, 7 }
 0x846   : > { %5069 = vst [vmem:[#allocation1 + $0x3] ss:$9 sm:$0xff] %v17431_v12 }
 0x847   : > { %5070 = vst [vmem:[#allocation1 + $0x4] ss:$9 sm:$0xff] %v17432_v17  ;;  %v6160_v21 = vpack.c.b16 %v6159_v26, %v6159_v26  ;;  %v17449_v26 = vld [vmem:[#allocation30_spill] sm:$0xff] }
 0x848   : > { %v17450_v17 = vrot.slane %v17449_v26, 1 }
 0x849   : > { %6161 = vrot.lane.b32.xlu2 %v6160_v21, %s10901_s8  ;;  %v17451_v21 = vrot.slane %v17449_v26, 2 }
 0x84e   : > { %v5071_v51 = vld [vmem:[#allocation1] sm:$0xff] }
 0x84f   : > { %5072 = vst [vmem:[#allocation1] ss:$9 sm:$0xff] %v17433_v0  ;;  %v5215_v7 = vpack.c.bf16 %v5071_v51, %v5071_v51  ;;  %v17452_v0 = vrot.slane %v17449_v26, 3 }
 0x850   : > { %5073 = vst [vmem:[#allocation1 + $0x1] ss:$9 sm:$0xff] %v17434_v2 }
 0x851   : > { %5074 = vst [vmem:[#allocation1 + $0x2] ss:$9 sm:$0xff] %v17435_v36  ;;  %v6188_v46 = vunpack.c.l.b16 %v5215_v7  ;;  %v17453_v36 = vrot.slane %v17449_v26, 4 }
 0x852   : > { %5075 = vst [vmem:[#allocation1 + $0x3] ss:$9 sm:$0xff] %v17436_v8 }
 0x853   : > { %5076 = vst [vmem:[#allocation1 + $0x4] ss:$9 sm:$0xff] %v17437_v18  ;;  %v6189_v54 = vpack.c.b16 %v6188_v46, %v6188_v46  ;;  %v17454_v46 = vrot.slane %v17449_v26, 5  ;;  %v17455_v18 = vrot.slane %v17449_v26, 6 }
 0x855   : > { %6190 = vrot.lane.b32.xlu1 %v6189_v54, %s10901_s8  ;;  %v17456_v54 = vrot.slane %v17449_v26, 7 }
 0x85a   : > { %v5077_v3 = vld [vmem:[#allocation1] sm:$0xff] }
 0x85b   : > { %5078 = vst [vmem:[#allocation1] ss:$9 sm:$0xff] %v17438_v32  ;;  %v5216_v27 = vpack.c.bf16 %v5077_v3, %v5077_v3  ;;  %v17457_v32 = vld [vmem:[#allocation31_spill] sm:$0xff] }
 0x85c   : > { %5079 = vst [vmem:[#allocation1 + $0x1] ss:$9 sm:$0xff] %v17439_v25 }
 0x85d   : > { %5080 = vst [vmem:[#allocation1 + $0x2] ss:$9 sm:$0xff] %v17440_v37  ;;  %v6217_v57 = vunpack.c.l.b16 %v5216_v27  ;;  %v17458_v37 = vrot.slane %v17457_v32, 1 }
 0x85e   : > { %5081 = vst [vmem:[#allocation1 + $0x3] ss:$9 sm:$0xff] %v17441_v22 }
 0x85f   : > { %5082 = vst [vmem:[#allocation1 + $0x4] ss:$9 sm:$0xff] %v17442_v15  ;;  %v6218_v13 = vpack.c.b16 %v6217_v57, %v6217_v57  ;;  %v17459_v57 = vrot.slane %v17457_v32, 2  ;;  %v17460_v15 = vrot.slane %v17457_v32, 3 }
 0x861   : > { %6219 = vrot.lane.b32.xlu2 %v6218_v13, %s10901_s8  ;;  %v17461_v13 = vrot.slane %v17457_v32, 4 }
 0x866   : > { %v5083_v30 = vld [vmem:[#allocation1] sm:$0xff] }
 0x867   : > { %5084 = vst [vmem:[#allocation1] ss:$9 sm:$0xff] %v17443_v39  ;;  %v5217_v60 = vpack.c.bf16 %v5083_v30, %v5083_v30  ;;  %v17462_v39 = vrot.slane %v17457_v32, 5 }
 0x868   : > { %5085 = vst [vmem:[#allocation1 + $0x1] ss:$9 sm:$0xff] %v17444_v28 }
 0x869   : > { %5086 = vst [vmem:[#allocation1 + $0x2] ss:$9 sm:$0xff] %v17445_v33  ;;  %v6246_v10 = vunpack.c.l.b16 %v5217_v60  ;;  %v17463_v33 = vrot.slane %v17457_v32, 6 }
 0x86a   : > { %5087 = vst [vmem:[#allocation1 + $0x3] ss:$9 sm:$0xff] %v17446_v19 }
 0x86b   : > { %5088 = vst [vmem:[#allocation1 + $0x4] ss:$9 sm:$0xff] %v17447_v62  ;;  %v6247_v5 = vpack.c.b16 %v6246_v10, %v6246_v10  ;;  %v17464_v10 = vrot.slane %v17457_v32, 7  ;;  %v17465_v62 = vld [vmem:[#allocation32_spill] sm:$0xff] }
 0x86d   : > { %6248 = vrot.lane.b32.xlu1 %v6247_v5, %s10901_s8  ;;  %v17466_v5 = vrot.slane %v17465_v62, 1 }
 0x872   : > { %v5089_v20 = vld [vmem:[#allocation1] sm:$0xff] }
 0x873   : > { %v5218_v50 = vpack.c.bf16 %v5089_v20, %v5089_v20  ;;  %5090 = vst [vmem:[#allocation1] ss:$9 sm:$0xff] %v17448_v40 }
 0x874   : > { %5091 = vst [vmem:[#allocation1 + $0x1] ss:$9 sm:$0xff] %v17449_v26 }
 0x875   : > { %v6275_v12 = vunpack.c.l.b16 %v5218_v50  ;;  %5092 = vst [vmem:[#allocation1 + $0x2] ss:$9 sm:$0xff] %v17450_v17  ;;  %v17467_v50 = vrot.slane %v17465_v62, 2  ;;  %v17469_v17 = vrot.slane %v17465_v62, 4 }
 0x876   : > { %5093 = vst [vmem:[#allocation1 + $0x3] ss:$9 sm:$0xff] %v17451_v21 }
 0x877   : > { %v6276_v51 = vpack.c.b16 %v6275_v12, %v6275_v12  ;;  %5094 = vst [vmem:[#allocation1 + $0x4] ss:$9 sm:$0xff] %v17452_v0  ;;  %v17468_v12 = vrot.slane %v17465_v62, 3  ;;  %v17471_v0 = vrot.slane %v17465_v62, 6 }
 0x879   : > { %6277 = vrot.lane.b32.xlu1 %v6276_v51, %s10901_s8  ;;  %v17470_v51 = vrot.slane %v17465_v62, 5 }
 0x87e   : > { %v5095_v7 = vld [vmem:[#allocation1] sm:$0xff] }
 0x87f   : > { %v5219_v2 = vpack.c.bf16 %v5095_v7, %v5095_v7  ;;  %5096 = vst [vmem:[#allocation1] ss:$9 sm:$0xff] %v17453_v36 }
 0x880   : > { %5097 = vst [vmem:[#allocation1 + $0x1] ss:$9 sm:$0xff] %v17454_v46 }
 0x881   : > { %v6304_v8 = vunpack.c.l.b16 %v5219_v2  ;;  %5098 = vst [vmem:[#allocation1 + $0x2] ss:$9 sm:$0xff] %v17455_v18  ;;  %v17472_v2 = vrot.slane %v17465_v62, 7 }
 0x882   : > { %5099 = vst [vmem:[#allocation1 + $0x3] ss:$9 sm:$0xff] %v17456_v54 }
 0x883   : > { %v6305_v3 = vpack.c.b16 %v6304_v8, %v6304_v8  ;;  %5100 = vst [vmem:[#allocation1 + $0x4] ss:$9 sm:$0xff] %v17457_v32  ;;  %v17473_v8 = vld [vmem:[#allocation33_spill] sm:$0xff] }
 0x884   : > { %v17474_v18 = vrot.slane %v17473_v8, 1  ;;  %v17476_v32 = vrot.slane %v17473_v8, 3 }
 0x885   : > { %6306 = vrot.lane.b32.xlu0 %v6305_v3, %s10901_s8  ;;  %v17475_v3 = vrot.slane %v17473_v8, 2 }
 0x88a   : > { %v5101_v27 = vld [vmem:[#allocation1] sm:$0xff] }
 0x88b   : > { %v5220_v25 = vpack.c.bf16 %v5101_v27, %v5101_v27  ;;  %5102 = vst [vmem:[#allocation1] ss:$9 sm:$0xff] %v17458_v37 }
 0x88c   : > { %5103 = vst [vmem:[#allocation1 + $0x1] ss:$9 sm:$0xff] %v17459_v57 }
 0x88d   : > { %v6333_v22 = vunpack.c.l.b16 %v5220_v25  ;;  %5104 = vst [vmem:[#allocation1 + $0x2] ss:$9 sm:$0xff] %v17460_v15  ;;  %v17477_v25 = vrot.slane %v17473_v8, 4  ;;  %v17479_v15 = vrot.slane %v17473_v8, 6 }
 0x88e   : > { %5105 = vst [vmem:[#allocation1 + $0x3] ss:$9 sm:$0xff] %v17461_v13 }
 0x88f   : > { %v6334_v30 = vpack.c.b16 %v6333_v22, %v6333_v22  ;;  %5106 = vst [vmem:[#allocation1 + $0x4] ss:$9 sm:$0xff] %v17462_v39  ;;  %v17478_v22 = vrot.slane %v17473_v8, 5  ;;  %v17481_v39 = vld [vmem:[#allocation34_spill] sm:$0xff] }
 0x891   : > { %6335 = vrot.lane.b32.xlu1 %v6334_v30, %s10901_s8  ;;  %v17480_v30 = vrot.slane %v17473_v8, 7 }
 0x896   : > { %v5107_v60 = vld [vmem:[#allocation1] sm:$0xff] }
 0x897   : > { %v5221_v28 = vpack.c.bf16 %v5107_v60, %v5107_v60  ;;  %5108 = vst [vmem:[#allocation1] ss:$9 sm:$0xff] %v17463_v33 }
 0x898   : > { %5109 = vst [vmem:[#allocation1 + $0x1] ss:$9 sm:$0xff] %v17464_v10 }
 0x899   : > { %v6362_v19 = vunpack.c.l.b16 %v5221_v28  ;;  %5110 = vst [vmem:[#allocation1 + $0x2] ss:$9 sm:$0xff] %v17465_v62  ;;  %v17482_v28 = vrot.slane %v17481_v39, 1  ;;  %v17484_v62 = vrot.slane %v17481_v39, 3 }
 0x89a   : > { %5111 = vst [vmem:[#allocation1 + $0x3] ss:$9 sm:$0xff] %v17466_v5 }
 0x89b   : > { %v6363_v20 = vpack.c.b16 %v6362_v19, %v6362_v19  ;;  %5112 = vst [vmem:[#allocation1 + $0x4] ss:$9 sm:$0xff] %v17467_v50  ;;  %v17483_v19 = vrot.slane %v17481_v39, 2  ;;  %v17486_v50 = vrot.slane %v17481_v39, 5 }
 0x89d   : > { %6364 = vrot.lane.b32.xlu0 %v6363_v20, %s10901_s8  ;;  %v17485_v20 = vrot.slane %v17481_v39, 4 }
 0x8a2   : > { %v5113_v40 = vld [vmem:[#allocation1] sm:$0xff] }
 0x8a3   : > { %v5222_v26 = vpack.c.bf16 %v5113_v40, %v5113_v40  ;;  %5114 = vst [vmem:[#allocation1] ss:$9 sm:$0xff] %v17468_v12 }
 0x8a4   : > { %5115 = vst [vmem:[#allocation1 + $0x1] ss:$9 sm:$0xff] %v17469_v17 }
 0x8a5   : > { %v6391_v21 = vunpack.c.l.b16 %v5222_v26  ;;  %5116 = vst [vmem:[#allocation1 + $0x2] ss:$9 sm:$0xff] %v17470_v51  ;;  %v17487_v26 = vrot.slane %v17481_v39, 6  ;;  %v17489_v51 = vld [vmem:[#allocation35_spill] sm:$0xff] }
 0x8a6   : > { %5117 = vst [vmem:[#allocation1 + $0x3] ss:$9 sm:$0xff] %v17471_v0 }
 0x8a7   : > { %v6392_v7 = vpack.c.b16 %v6391_v21, %v6391_v21  ;;  %5118 = vst [vmem:[#allocation1 + $0x4] ss:$9 sm:$0xff] %v17472_v2  ;;  %v17488_v21 = vrot.slane %v17481_v39, 7  ;;  %v17491_v2 = vrot.slane %v17489_v51, 2 }
 0x8a9   : > { %6393 = vrot.lane.b32.xlu0 %v6392_v7, %s10901_s8  ;;  %v17490_v7 = vrot.slane %v17489_v51, 1 }
 0x8ae   : > { %v5119_v36 = vld [vmem:[#allocation1] sm:$0xff] }
 0x8af   : > { %v5223_v46 = vpack.c.bf16 %v5119_v36, %v5119_v36  ;;  %5120 = vst [vmem:[#allocation1] ss:$9 sm:$0xff] %v17473_v8 }
 0x8b0   : > { %5121 = vst [vmem:[#allocation1 + $0x1] ss:$9 sm:$0xff] %v17474_v18 }
 0x8b1   : > { %v6420_v54 = vunpack.c.l.b16 %v5223_v46  ;;  %5122 = vst [vmem:[#allocation1 + $0x2] ss:$9 sm:$0xff] %v17475_v3  ;;  %v17492_v46 = vrot.slane %v17489_v51, 3  ;;  %v17494_v3 = vrot.slane %v17489_v51, 5 }
 0x8b2   : > { %5123 = vst [vmem:[#allocation1 + $0x3] ss:$9 sm:$0xff] %v17476_v32 }
 0x8b3   : > { %v6421_v27 = vpack.c.b16 %v6420_v54, %v6420_v54  ;;  %5124 = vst [vmem:[#allocation1 + $0x4] ss:$9 sm:$0xff] %v17477_v25  ;;  %v17493_v54 = vrot.slane %v17489_v51, 4  ;;  %v17496_v25 = vrot.slane %v17489_v51, 7 }
 0x8b5   : > { %6422 = vrot.lane.b32.xlu2 %v6421_v27, %s10901_s8  ;;  %v17495_v27 = vrot.slane %v17489_v51, 6 }
 0x8ba   : > { %v5125_v37 = vld [vmem:[#allocation1] sm:$0xff] }
 0x8bb   : > { %v5224_v57 = vpack.c.bf16 %v5125_v37, %v5125_v37  ;;  %5126 = vst [vmem:[#allocation1] ss:$9 sm:$0xff] %v17478_v22 }
 0x8bc   : > { %5127 = vst [vmem:[#allocation1 + $0x1] ss:$9 sm:$0xff] %v17479_v15 }
 0x8bd   : > { %v6449_v13 = vunpack.c.l.b16 %v5224_v57  ;;  %5128 = vst [vmem:[#allocation1 + $0x2] ss:$9 sm:$0xff] %v17480_v30  ;;  %v17497_v57 = vld [vmem:[#allocation36_spill] sm:$0xff] }
 0x8be   : > { %5129 = vst [vmem:[#allocation1 + $0x3] ss:$9 sm:$0xff] %v17481_v39  ;;  %v17499_v30 = vrot.slane %v17497_v57, 2 }
 0x8bf   : > { %v6450_v60 = vpack.c.b16 %v6449_v13, %v6449_v13  ;;  %5130 = vst [vmem:[#allocation1 + $0x4] ss:$9 sm:$0xff] %v17482_v28  ;;  %v17498_v13 = vrot.slane %v17497_v57, 1  ;;  %v17501_v28 = vrot.slane %v17497_v57, 4 }
 0x8c1   : > { %6451 = vrot.lane.b32.xlu0 %v6450_v60, %s10901_s8  ;;  %v17500_v60 = vrot.slane %v17497_v57, 3 }
 0x8c6   : > { %v5131_v33 = vld [vmem:[#allocation1] sm:$0xff] }
 0x8c7   : > { %v5225_v10 = vpack.c.bf16 %v5131_v33, %v5131_v33  ;;  %5132 = vst [vmem:[#allocation1] ss:$9 sm:$0xff] %v17483_v19 }
 0x8c8   : > { %5133 = vst [vmem:[#allocation1 + $0x1] ss:$9 sm:$0xff] %v17484_v62 }
 0x8c9   : > { %v6478_v5 = vunpack.c.l.b16 %v5225_v10  ;;  %5134 = vst [vmem:[#allocation1 + $0x2] ss:$9 sm:$0xff] %v17485_v20  ;;  %v17502_v10 = vrot.slane %v17497_v57, 5  ;;  %v17504_v20 = vrot.slane %v17497_v57, 7 }
 0x8ca   : > { %5135 = vst [vmem:[#allocation1 + $0x3] ss:$9 sm:$0xff] %v17486_v50 }
 0x8cb   : > { %v6479_v40 = vpack.c.b16 %v6478_v5, %v6478_v5  ;;  %5136 = vst [vmem:[#allocation1 + $0x4] ss:$9 sm:$0xff] %v17487_v26  ;;  %v17503_v5 = vrot.slane %v17497_v57, 6 }
 0x8cd   : > { %6480 = vrot.lane.b32.xlu2 %v6479_v40, %s10901_s8  ;;  %v17505_v40 = vld [vmem:[#allocation37_spill] sm:$0xff] }
 0x8ce   : > { %v17506_v26 = vrot.slane %v17505_v40, 1 }
 0x8d2   : > { %v5137_v12 = vld [vmem:[#allocation1] sm:$0xff] }
 0x8d3   : > { %v5226_v17 = vpack.c.bf16 %v5137_v12, %v5137_v12  ;;  %5138 = vst [vmem:[#allocation1] ss:$9 sm:$0xff] %v17488_v21 }
 0x8d4   : > { %5139 = vst [vmem:[#allocation1 + $0x1] ss:$9 sm:$0xff] %v17489_v51 }
 0x8d5   : > { %v6507_v0 = vunpack.c.l.b16 %v5226_v17  ;;  %5140 = vst [vmem:[#allocation1 + $0x2] ss:$9 sm:$0xff] %v17490_v7  ;;  %v17507_v17 = vrot.slane %v17505_v40, 2  ;;  %v17509_v7 = vrot.slane %v17505_v40, 4 }
 0x8d6   : > { %5141 = vst [vmem:[#allocation1 + $0x3] ss:$9 sm:$0xff] %v17491_v2 }
 0x8d7   : > { %v6508_v36 = vpack.c.b16 %v6507_v0, %v6507_v0  ;;  %5142 = vst [vmem:[#allocation1 + $0x4] ss:$9 sm:$0xff] %v17492_v46  ;;  %v17508_v0 = vrot.slane %v17505_v40, 3  ;;  %v17511_v46 = vrot.slane %v17505_v40, 6 }
 0x8d9   : > { %6509 = vrot.lane.b32.xlu1 %v6508_v36, %s10901_s8  ;;  %v17510_v36 = vrot.slane %v17505_v40, 5 }
 0x8de   : > { %v5143_v8 = vld [vmem:[#allocation1] sm:$0xff] }
 0x8df   : > { %v5227_v18 = vpack.c.bf16 %v5143_v8, %v5143_v8  ;;  %5144 = vst [vmem:[#allocation1] ss:$9 sm:$0xff] %v17493_v54 }
 0x8e0   : > { %5145 = vst [vmem:[#allocation1 + $0x1] ss:$9 sm:$0xff] %v17494_v3 }
 0x8e1   : > { %v6536_v32 = vunpack.c.l.b16 %v5227_v18  ;;  %5146 = vst [vmem:[#allocation1 + $0x2] ss:$9 sm:$0xff] %v17495_v27  ;;  %v17512_v18 = vrot.slane %v17505_v40, 7 }
 0x8e2   : > { %5147 = vst [vmem:[#allocation1 + $0x3] ss:$9 sm:$0xff] %v17496_v25 }
 0x8e3   : > { %v6537_v37 = vpack.c.b16 %v6536_v32, %v6536_v32  ;;  %5148 = vst [vmem:[#allocation1 + $0x4] ss:$9 sm:$0xff] %v17497_v57  ;;  %v17513_v32 = vld [vmem:[#allocation38_spill] sm:$0xff] }
 0x8e4   : > { %v17514_v27 = vrot.slane %v17513_v32, 1  ;;  %v17516_v57 = vrot.slane %v17513_v32, 3 }
 0x8e5   : > { %6538 = vrot.lane.b32.xlu0 %v6537_v37, %s10901_s8  ;;  %v17515_v37 = vrot.slane %v17513_v32, 2 }
 0x8ea   : > { %v5149_v22 = vld [vmem:[#allocation1] sm:$0xff] }
 0x8eb   : > { %v5228_v15 = vpack.c.bf16 %v5149_v22, %v5149_v22  ;;  %5150 = vst [vmem:[#allocation1] ss:$9 sm:$0xff] %v17498_v13 }
 0x8ec   : > { %5151 = vst [vmem:[#allocation1 + $0x1] ss:$9 sm:$0xff] %v17499_v30 }
 0x8ed   : > { %v6565_v39 = vunpack.c.l.b16 %v5228_v15  ;;  %5152 = vst [vmem:[#allocation1 + $0x2] ss:$9 sm:$0xff] %v17500_v60  ;;  %v17517_v15 = vrot.slane %v17513_v32, 4  ;;  %v17519_v60 = vrot.slane %v17513_v32, 6 }
 0x8ee   : > { %5153 = vst [vmem:[#allocation1 + $0x3] ss:$9 sm:$0xff] %v17501_v28 }
 0x8ef   : > { %v6566_v33 = vpack.c.b16 %v6565_v39, %v6565_v39  ;;  %5154 = vst [vmem:[#allocation1 + $0x4] ss:$9 sm:$0xff] %v17502_v10  ;;  %v17518_v39 = vrot.slane %v17513_v32, 5  ;;  %v17521_v10 = vld [vmem:[#allocation39_spill] sm:$0xff] }
 0x8f1   : > { %6567 = vrot.lane.b32.xlu2 %v6566_v33, %s10901_s8  ;;  %v17520_v33 = vrot.slane %v17513_v32, 7 }
 0x8f6   : > { %v5155_v19 = vld [vmem:[#allocation1] sm:$0xff] }
 0x8f7   : > { %v5229_v62 = vpack.c.bf16 %v5155_v19, %v5155_v19  ;;  %5156 = vst [vmem:[#allocation1] ss:$9 sm:$0xff] %v17503_v5 }
 0x8f8   : > { %5157 = vst [vmem:[#allocation1 + $0x1] ss:$9 sm:$0xff] %v17504_v20 }
 0x8f9   : > { %v6594_v50 = vunpack.c.l.b16 %v5229_v62  ;;  %5158 = vst [vmem:[#allocation1 + $0x2] ss:$9 sm:$0xff] %v17505_v40  ;;  %v17522_v62 = vrot.slane %v17521_v10, 1  ;;  %v17524_v40 = vrot.slane %v17521_v10, 3 }
 0x8fa   : > { %5159 = vst [vmem:[#allocation1 + $0x3] ss:$9 sm:$0xff] %v17506_v26 }
 0x8fb   : > { %v6595_v12 = vpack.c.b16 %v6594_v50, %v6594_v50  ;;  %5160 = vst [vmem:[#allocation1 + $0x4] ss:$9 sm:$0xff] %v17507_v17  ;;  %v17523_v50 = vrot.slane %v17521_v10, 2  ;;  %v17526_v17 = vrot.slane %v17521_v10, 5 }
 0x8fd   : > { %6596 = vrot.lane.b32.xlu1 %v6595_v12, %s10901_s8  ;;  %v17525_v12 = vrot.slane %v17521_v10, 4 }
 0x902   : > { %v5161_v21 = vld [vmem:[#allocation1] sm:$0xff] }
 0x903   : > { %v5230_v51 = vpack.c.bf16 %v5161_v21, %v5161_v21  ;;  %5162 = vst [vmem:[#allocation1] ss:$9 sm:$0xff] %v17508_v0 }
 0x904   : > { %5163 = vst [vmem:[#allocation1 + $0x1] ss:$9 sm:$0xff] %v17509_v7 }
 0x905   : > { %v6623_v2 = vunpack.c.l.b16 %v5230_v51  ;;  %5164 = vst [vmem:[#allocation1 + $0x2] ss:$9 sm:$0xff] %v17510_v36  ;;  %v17527_v51 = vrot.slane %v17521_v10, 6  ;;  %v17529_v36 = vld [vmem:[#allocation40_spill] sm:$0xff] }
 0x906   : > { %5165 = vst [vmem:[#allocation1 + $0x3] ss:$9 sm:$0xff] %v17511_v46 }
 0x907   : > { %v6624_v8 = vpack.c.b16 %v6623_v2, %v6623_v2  ;;  %5166 = vst [vmem:[#allocation1 + $0x4] ss:$9 sm:$0xff] %v17512_v18  ;;  %v17528_v2 = vrot.slane %v17521_v10, 7  ;;  %v17531_v18 = vrot.slane %v17529_v36, 2 }
 0x909   : > { %6625 = vrot.lane.b32.xlu0 %v6624_v8, %s10901_s8  ;;  %v17530_v8 = vrot.slane %v17529_v36, 1 }
 0x90e   : > { %v5167_v54 = vld [vmem:[#allocation1] sm:$0xff] }
 0x90f   : > { %v5231_v3 = vpack.c.bf16 %v5167_v54, %v5167_v54  ;;  %5232 = vst [vmem:[#allocation1] ss:$9 sm:$0xff] %v17513_v32 }
 0x910   : > { %5234 = vst [vmem:[#allocation1 + $0x1] ss:$9 sm:$0xff] %v17514_v27 }
 0x911   : > { %v6652_v25 = vunpack.c.l.b16 %v5231_v3  ;;  %5236 = vst [vmem:[#allocation1 + $0x2] ss:$9 sm:$0xff] %v17515_v37  ;;  %v17532_v3 = vrot.slane %v17529_v36, 3  ;;  %v17534_v37 = vrot.slane %v17529_v36, 5 }
 0x912   : > { %5238 = vst [vmem:[#allocation1 + $0x3] ss:$9 sm:$0xff] %v17516_v57 }
 0x913   : > { %v6653_v22 = vpack.c.b16 %v6652_v25, %v6652_v25  ;;  %5240 = vst [vmem:[#allocation1 + $0x4] ss:$9 sm:$0xff] %v17517_v15  ;;  %v17533_v25 = vrot.slane %v17529_v36, 4  ;;  %v17536_v15 = vrot.slane %v17529_v36, 7 }
 0x915   : > { %6654 = vrot.lane.b32.xlu1 %v6653_v22, %s10901_s8  ;;  %v17535_v22 = vrot.slane %v17529_v36, 6 }
 0x91a   : > { %v5241_v13 = vld [vmem:[#allocation1] sm:$0xff] }
 0x91b   : > { %v5460_v30 = vpack.c.bf16 %v5241_v13, %v5241_v13  ;;  %5242 = vst [vmem:[#allocation1] ss:$9 sm:$0xff] %v17518_v39  ;;  %v14412_v39 = vpop.permute.xlu2 %5842 }
 0x91c   : > { %5243 = vst [vmem:[#allocation1 + $0x1] ss:$9 sm:$0xff] %v17519_v60 }
 0x91d   : > { %v5758_v28 = vunpack.c.l.b16 %v5460_v30  ;;  %5244 = vst [vmem:[#allocation1 + $0x2] ss:$9 sm:$0xff] %v17520_v33  ;;  %v17537_v30 = vld [vmem:[#allocation41_spill] sm:$0xff] }
 0x91e   : > { %5245 = vst [vmem:[#allocation1 + $0x3] ss:$9 sm:$0xff] %v17521_v10  ;;  %v17538_v10 = vrot.slane %v17537_v30, 1 }
 0x91f   : > { %v5759_v19 = vpack.c.b16 %v5758_v28, %v5758_v28  ;;  %5246 = vst [vmem:[#allocation1 + $0x4] ss:$9 sm:$0xff] %v17522_v62  ;;  %v14414_v28 = vpop.permute.xlu1 %5755 }
 0x921   : > { %5760 = vrot.lane.b32.xlu1 %v5759_v19, %s10901_s8  ;;  %v17539_v19 = vrot.slane %v17537_v30, 2 }
 0x926   : > { %v5247_v5 = vld [vmem:[#allocation1] sm:$0xff] }
 0x927   : > { %v5461_v20 = vpack.c.bf16 %v5247_v5, %v5247_v5  ;;  %5248 = vst [vmem:[#allocation1] ss:$9 sm:$0xff] %v17523_v50  ;;  %v17540_v5 = vrot.slane %v17537_v30, 3  ;;  %v14424_v50 = vpop.permute.xlu2 %5958 }
 0x928   : > { %5249 = vst [vmem:[#allocation1 + $0x1] ss:$9 sm:$0xff] %v17524_v40 }
 0x929   : > { %v5787_v26 = vunpack.c.l.b16 %v5461_v20  ;;  %5250 = vst [vmem:[#allocation1 + $0x2] ss:$9 sm:$0xff] %v17525_v12  ;;  %v17541_v20 = vrot.slane %v17537_v30, 4  ;;  %v14429_v12 = vpop.permute.xlu1 %5871 }
 0x92a   : > { %5251 = vst [vmem:[#allocation1 + $0x3] ss:$9 sm:$0xff] %v17526_v17 }
 0x92b   : > { %v5788_v21 = vpack.c.b16 %v5787_v26, %v5787_v26  ;;  %5252 = vst [vmem:[#allocation1 + $0x4] ss:$9 sm:$0xff] %v17527_v51  ;;  %v17542_v26 = vrot.slane %v17537_v30, 5 }
 0x92d   : > { %5789 = vrot.lane.b32.xlu2 %v5788_v21, %s10901_s8 }
 0x92f   : > { %v14431_v21 = vpop.permute.xlu2 %6016 }
 0x932   : > { %v5253_v0 = vld [vmem:[#allocation1] sm:$0xff] }
 0x933   : > { %v5462_v7 = vpack.c.bf16 %v5253_v0, %v5253_v0  ;;  %5254 = vst [vmem:[#allocation1] ss:$9 sm:$0xff] %v17528_v2  ;;  %v17543_v0 = vrot.slane %v17537_v30, 6 }
 0x934   : > { %5255 = vst [vmem:[#allocation1 + $0x1] ss:$9 sm:$0xff] %v17529_v36  ;;  %v17545_v36 = vld [vmem:[#allocation42_spill] sm:$0xff] }
 0x935   : > { %v5816_v46 = vunpack.c.l.b16 %v5462_v7  ;;  %5256 = vst [vmem:[#allocation1 + $0x2] ss:$9 sm:$0xff] %v17530_v8  ;;  %v17544_v7 = vrot.slane %v17537_v30, 7 }
 0x936   : > { %5257 = vst [vmem:[#allocation1 + $0x3] ss:$9 sm:$0xff] %v17531_v18  ;;  %v17547_v18 = vrot.slane %v17545_v36, 2 }
 0x937   : > { %v5817_v54 = vpack.c.b16 %v5816_v46, %v5816_v46  ;;  %5258 = vst [vmem:[#allocation1 + $0x4] ss:$9 sm:$0xff] %v17532_v3  ;;  %v17546_v46 = vrot.slane %v17545_v36, 1  ;;  %v14445_v3 = vpop.permute.xlu2 %6045 }
 0x939   : > { %5818 = vrot.lane.b32.xlu2 %v5817_v54, %s10901_s8  ;;  %v14442_v54 = vpop.permute.xlu1 %5900 }
 0x93e   : > { %v5259_v32 = vld [vmem:[#allocation1] sm:$0xff] }
 0x93f   : > { %v5463_v27 = vpack.c.bf16 %v5259_v32, %v5259_v32  ;;  %5260 = vst [vmem:[#allocation1] ss:$9 sm:$0xff] %v17533_v25  ;;  %v17548_v25 = vrot.slane %v17545_v36, 3 }
 0x940   : > { %5261 = vst [vmem:[#allocation1 + $0x1] ss:$9 sm:$0xff] %v17534_v37  ;;  %v17549_v37 = vrot.slane %v17545_v36, 4 }
 0x941   : > { %v5845_v57 = vunpack.c.l.b16 %v5463_v27  ;;  %5262 = vst [vmem:[#allocation1 + $0x2] ss:$9 sm:$0xff] %v17535_v22 }
 0x942   : > { %5263 = vst [vmem:[#allocation1 + $0x3] ss:$9 sm:$0xff] %v17536_v15  ;;  %v17550_v15 = vrot.slane %v17545_v36, 5 }
 0x943   : > { %v5846_v13 = vpack.c.b16 %v5845_v57, %v5845_v57  ;;  %5264 = vst [vmem:[#allocation1 + $0x4] ss:$9 sm:$0xff] %v17537_v30  ;;  %v14451_v57 = vpop.permute.xlu1 %6074  ;;  %v14457_v30 = vpop.permute.xlu0 %5784 }
 0x945   : > { %5847 = vrot.lane.b32.xlu0 %v5846_v13, %s10901_s8  ;;  %v17551_v13 = vrot.slane %v17545_v36, 6 }
 0x94a   : > { %v5265_v60 = vld [vmem:[#allocation1] sm:$0xff] }
 0x94b   : > { %v5464_v33 = vpack.c.bf16 %v5265_v60, %v5265_v60  ;;  %5266 = vst [vmem:[#allocation1] ss:$9 sm:$0xff] %v17538_v10  ;;  %v14461_v10 = vpop.permute.xlu2 %6161 }
 0x94c   : > { %5267 = vst [vmem:[#allocation1 + $0x1] ss:$9 sm:$0xff] %v17539_v19  ;;  %v14464_v19 = vpop.permute.xlu1 %6190 }
 0x94d   : > { %v5874_v62 = vunpack.c.l.b16 %v5464_v33  ;;  %5268 = vst [vmem:[#allocation1 + $0x2] ss:$9 sm:$0xff] %v17540_v5  ;;  %v17552_v33 = vrot.slane %v17545_v36, 7 }
 0x94e   : > { %5269 = vst [vmem:[#allocation1 + $0x3] ss:$9 sm:$0xff] %v17541_v20  ;;  %v17553_v20 = vld [vmem:[#allocation43_spill] sm:$0xff] }
 0x94f   : > { %v5875_v40 = vpack.c.b16 %v5874_v62, %v5874_v62  ;;  %5270 = vst [vmem:[#allocation1 + $0x4] ss:$9 sm:$0xff] %v17542_v26  ;;  %v14469_v26 = vpop.permute.xlu0 %5813 }
 0x951   : > { %5876 = vrot.lane.b32.xlu1 %v5875_v40, %s10901_s8  ;;  %v17554_v40 = vrot.slane %v17553_v20, 1 }
 0x956   : > { %v5271_v17 = vld [vmem:[#allocation1] sm:$0xff] }
 0x957   : > { %v5465_v51 = vpack.c.bf16 %v5271_v17, %v5271_v17  ;;  %5272 = vst [vmem:[#allocation1] ss:$9 sm:$0xff] %v17543_v0  ;;  %v14471_v17 = vpop.permute.xlu2 %6219  ;;  %v17555_v0 = vrot.slane %v17553_v20, 2 }
 0x958   : > { %5273 = vst [vmem:[#allocation1 + $0x1] ss:$9 sm:$0xff] %v17544_v7  ;;  %v17556_v7 = vrot.slane %v17553_v20, 3 }
 0x959   : > { %v5903_v2 = vunpack.c.l.b16 %v5465_v51  ;;  %5274 = vst [vmem:[#allocation1 + $0x2] ss:$9 sm:$0xff] %v17545_v36  ;;  %v17557_v36 = vrot.slane %v17553_v20, 4 }
 0x95a   : > { %5275 = vst [vmem:[#allocation1 + $0x3] ss:$9 sm:$0xff] %v17546_v46  ;;  %v14479_v46 = vpop.permute.xlu1 %6248 }
 0x95b   : > { %v5904_v8 = vpack.c.b16 %v5903_v2, %v5903_v2  ;;  %5276 = vst [vmem:[#allocation1 + $0x4] ss:$9 sm:$0xff] %v17547_v18 }
 0x95d   : > { %5905 = vrot.lane.b32.xlu0 %v5904_v8, %s10901_s8  ;;  %v14482_v8 = vpop.permute.xlu0 %5929 }
 0x95f   : > { %v14484_v18 = vpop.permute.xlu2 %6422 }
 0x962   : > { %v5277_v32 = vld [vmem:[#allocation1] sm:$0xff] }
 0x963   : > { %v5466_v27 = vpack.c.bf16 %v5277_v32, %v5277_v32  ;;  %5278 = vst [vmem:[#allocation1] ss:$9 sm:$0xff] %v17548_v25  ;;  %v17558_v25 = vrot.slane %v17553_v20, 5 }
 0x964   : > { %5279 = vst [vmem:[#allocation1 + $0x1] ss:$9 sm:$0xff] %v17549_v37  ;;  %v17559_v37 = vrot.slane %v17553_v20, 6 }
 0x965   : > { %v5932_v22 = vunpack.c.l.b16 %v5466_v27  ;;  %5280 = vst [vmem:[#allocation1 + $0x2] ss:$9 sm:$0xff] %v17550_v15  ;;  %v17560_v15 = vrot.slane %v17553_v20, 7 }
 0x966   : > { %5281 = vst [vmem:[#allocation1 + $0x3] ss:$9 sm:$0xff] %v17551_v13  ;;  %v17561_v13 = vld [vmem:[#allocation44_spill] sm:$0xff] }
 0x967   : > { %v5933_v60 = vpack.c.b16 %v5932_v22, %v5932_v22  ;;  %5282 = vst [vmem:[#allocation1 + $0x4] ss:$9 sm:$0xff] %v17552_v33 }
 0x969   : > { %5934 = vrot.lane.b32.xlu2 %v5933_v60, %s10901_s8  ;;  %v14493_v60 = vpop.permute.xlu1 %6277 }
 0x96e   : > { %v5283_v62 = vld [vmem:[#allocation1] sm:$0xff] }
 0x96f   : > { %v5467_v5 = vpack.c.bf16 %v5283_v62, %v5283_v62  ;;  %5284 = vst [vmem:[#allocation1] ss:$9 sm:$0xff] %v17553_v20  ;;  %v17562_v62 = vrot.slane %v17561_v13, 1  ;;  %v17563_v20 = vrot.slane %v17561_v13, 2 }
 0x970   : > { %5285 = vst [vmem:[#allocation1 + $0x1] ss:$9 sm:$0xff] %v17554_v40  ;;  %v14499_v40 = vpop.permute.xlu2 %6480 }
 0x971   : > { %v5961_v51 = vunpack.c.l.b16 %v5467_v5  ;;  %5286 = vst [vmem:[#allocation1 + $0x2] ss:$9 sm:$0xff] %v17555_v0  ;;  %v14497_v5 = vpop.permute.xlu0 %5987  ;;  %v14502_v0 = vpop.permute.xlu1 %6335 }
 0x972   : > { %5287 = vst [vmem:[#allocation1 + $0x3] ss:$9 sm:$0xff] %v17556_v7 }
 0x973   : > { %v5962_v2 = vpack.c.b16 %v5961_v51, %v5961_v51  ;;  %5288 = vst [vmem:[#allocation1 + $0x4] ss:$9 sm:$0xff] %v17557_v36 }
 0x975   : > { %5963 = vrot.lane.b32.xlu2 %v5962_v2, %s10901_s8  ;;  %v17564_v2 = vrot.slane %v17561_v13, 3 }
 0x979   : > { %v14508_v36 = vpop.permute.xlu0 %6103 }
 0x97a   : > { %v5289_v32 = vld [vmem:[#allocation1] sm:$0xff] }
 0x97b   : > { %v5468_v27 = vpack.c.bf16 %v5289_v32, %v5289_v32  ;;  %5290 = vst [vmem:[#allocation1] ss:$9 sm:$0xff] %v17558_v25  ;;  %v14510_v32 = vpop.permute.xlu2 %6567  ;;  %v17565_v25 = vrot.slane %v17561_v13, 4 }
 0x97c   : > { %5291 = vst [vmem:[#allocation1 + $0x1] ss:$9 sm:$0xff] %v17559_v37  ;;  %v17566_v37 = vrot.slane %v17561_v13, 5 }
 0x97d   : > { %v5990_v22 = vunpack.c.l.b16 %v5468_v27  ;;  %5292 = vst [vmem:[#allocation1 + $0x2] ss:$9 sm:$0xff] %v17560_v15  ;;  %v17567_v15 = vrot.slane %v17561_v13, 6 }
 0x97e   : > { %5293 = vst [vmem:[#allocation1 + $0x3] ss:$9 sm:$0xff] %v17561_v13 }
 0x97f   : > { %v5991_v33 = vpack.c.b16 %v5990_v22, %v5990_v22  ;;  %5294 = vst [vmem:[#allocation1 + $0x4] ss:$9 sm:$0xff] %v17562_v62 }
 0x981   : > { %5992 = vrot.lane.b32.xlu1 %v5991_v33, %s10901_s8  ;;  %v14519_v33 = vpop.permute.xlu1 %6509 }
 0x986   : > { %v5295_v51 = vld [vmem:[#allocation1] sm:$0xff] }
 0x987   : > { %v5469_v7 = vpack.c.bf16 %v5295_v51, %v5295_v51  ;;  %5296 = vst [vmem:[#allocation1] ss:$9 sm:$0xff] %v17563_v20  ;;  %v5790_v62 = vpop.permute.xlu2 %5789 }
 0x988   : > { %5297 = vst [vmem:[#allocation1 + $0x1] ss:$9 sm:$0xff] %v17564_v2  ;;  %v5795_v20 = vsel %vm2988_vm12, %v5790_v62, 0  ;;  %v14522_v2 = vpop.permute.xlu0 %6132 }
 0x989   : > { %v6019_v27 = vunpack.c.l.b16 %v5469_v7  ;;  %5298 = vst [vmem:[#allocation1 + $0x2] ss:$9 sm:$0xff] %v17565_v25  ;;  %v17568_v25 = vrot.slane %v17561_v13, 7  ;;  %5804 = vmatpush.bf16.xpose.msra.mxu1 %v5795_v20  ;;  %v14533_v62 = vpop.permute.xlu1 %6596 }
 0x98a   : > { %5299 = vst [vmem:[#allocation1 + $0x3] ss:$9 sm:$0xff] %v17566_v37  ;;  %v17569_v37 = vld [vmem:[#allocation45_spill] sm:$0xff] }
 0x98b   : > { %v6020_v22 = vpack.c.b16 %v6019_v27, %v6019_v27  ;;  %5300 = vst [vmem:[#allocation1 + $0x4] ss:$9 sm:$0xff] %v17567_v15  ;;  %v17570_v15 = vrot.slane %v17569_v37, 1  ;;  %v17572_v42 = vrot.slane %v17569_v37, 3 }
 0x98d   : > { %6021 = vrot.lane.b32.xlu0 %v6020_v22, %s10901_s8  ;;  %v17571_v22 = vrot.slane %v17569_v37, 2 }
 0x990   : > { %9956 = vmatmul.msk.bf16.vlgmr.msra.gmra.mxu1 %vm2988_vm12, %v14457_v30  ;;  %v14538_v13 = vpop.permute.xlu0 %6306  ;;  %v17576_v30 = vrot.slane %v17569_v37, 7 }
 0x992   : > { %v5301_v51 = vld [vmem:[#allocation1] sm:$0xff] }
 0x993   : > { %v5470_v7 = vpack.c.bf16 %v5301_v51, %v5301_v51  ;;  %5302 = vst [vmem:[#allocation1] ss:$9 sm:$0xff] %v17568_v25  ;;  %v5819_v51 = vpop.permute.xlu2 %5818 }
 0x994   : > { %5303 = vst [vmem:[#allocation1 + $0x1] ss:$9 sm:$0xff] %v17569_v37 }
 0x995   : > { %v6048_v27 = vunpack.c.l.b16 %v5470_v7  ;;  %5304 = vst [vmem:[#allocation1 + $0x2] ss:$9 sm:$0xff] %v17570_v15  ;;  %v5824_v7 = vsel %vm2988_vm12, %v5819_v51, 0  ;;  %v17573_v15 = vrot.slane %v17569_v37, 4 }
 0x996   : > { %5305 = vst [vmem:[#allocation1 + $0x3] ss:$9 sm:$0xff] %v17571_v22  ;;  %5833 = vmatpush.bf16.xpose.msra.mxu2 %v5824_v7  ;;  %v17575_v22 = vrot.slane %v17569_v37, 6 }
 0x997   : > { %v6049_v41 = vpack.c.b16 %v6048_v27, %v6048_v27  ;;  %5306 = vst [vmem:[#allocation1 + $0x4] ss:$9 sm:$0xff] %v17572_v42  ;;  %v14543_v27 = vpop.permute.xlu1 %6654  ;;  %v17574_v42 = vrot.slane %v17569_v37, 5 }
 0x998   : > { %v14551_v16 = vpop.permute.xlu0 %6364 }
 0x999   : > { %6050 = vrot.lane.b32.xlu0 %v6049_v41, %s10901_s8 }
 0x99d   : > { %9957 = vmatmul.msk.bf16.vlgmr.msra.gmra.mxu2 %vm2988_vm12, %v14469_v26 }
 0x99e   : > { %v5307_v20 = vld [vmem:[#allocation1] sm:$0xff] }
 0x99f   : > { %v5471_v25 = vpack.c.bf16 %v5307_v20, %v5307_v20  ;;  %5308 = vst [vmem:[#allocation1] ss:$9 sm:$0xff] %v17573_v15  ;;  %v17577_v20 = vld [vmem:[#allocation46_spill] sm:$0xff]  ;;  %v5761_v7 = vpop.permute.xlu1 %5760 }
 0x9a0   : > { %5309 = vst [vmem:[#allocation1 + $0x1] ss:$9 sm:$0xff] %v17574_v42  ;;  %v17579_v37 = vrot.slane %v17577_v20, 2  ;;  %v17581_v26 = vrot.slane %v17577_v20, 4 }
 0x9a1   : > { %v6077_v41 = vunpack.c.l.b16 %v5471_v25  ;;  %5310 = vst [vmem:[#allocation1 + $0x2] ss:$9 sm:$0xff] %v17575_v22  ;;  %v5766_v25 = vsel %vm2988_vm12, %v5761_v7, 0  ;;  %v17578_v22 = vrot.slane %v17577_v20, 1  ;;  %v17582_v7 = vrot.slane %v17577_v20, 5 }
 0x9a2   : > { %5311 = vst [vmem:[#allocation1 + $0x3] ss:$9 sm:$0xff] %v17576_v30  ;;  %5775 = vmatpush.bf16.xpose.msrb.mxu0 %v5766_v25 }
 0x9a3   : > { %v6078_v51 = vpack.c.b16 %v6077_v41, %v6077_v41  ;;  %5312 = vst [vmem:[#allocation1 + $0x4] ss:$9 sm:$0xff] %v17577_v20  ;;  %v14562_v41 = vpop.permute.xlu0 %6393 }
 0x9a5   : > { %6079 = vrot.lane.b32.xlu2 %v6078_v51, %s10901_s8  ;;  %v17580_v51 = vrot.slane %v17577_v20, 3 }
 0x9a9   : > { %9955 = vmatmul.msk.bf16.vlgmr.msrb.gmra.mxu0 %vm2988_vm12, %v14414_v28 }
 0x9aa   : > { %v5313_v15 = vld [vmem:[#allocation1] sm:$0xff] }
 0x9ab   : > { %v5472_v42 = vpack.c.bf16 %v5313_v15, %v5313_v15  ;;  %5314 = vst [vmem:[#allocation1] ss:$9 sm:$0xff] %v17578_v22  ;;  %v14573_v15 = vpop.permute.xlu0 %6451 }
 0x9ac   : > { %5315 = vst [vmem:[#allocation1 + $0x1] ss:$9 sm:$0xff] %v17579_v37  ;;  %v17584_v37 = vrot.slane %v17577_v20, 7 }
 0x9ad   : > { %v6106_v30 = vunpack.c.l.b16 %v5472_v42  ;;  %5316 = vst [vmem:[#allocation1 + $0x2] ss:$9 sm:$0xff] %v17580_v51  ;;  %v17583_v42 = vrot.slane %v17577_v20, 6 }
 0x9ae   : > { %5317 = vst [vmem:[#allocation1 + $0x3] ss:$9 sm:$0xff] %v17581_v26 }
 0x9af   : > { %v6107_v23 = vpack.c.b16 %v6106_v30, %v6106_v30  ;;  %5318 = vst [vmem:[#allocation1 + $0x4] ss:$9 sm:$0xff] %v17582_v7  ;;  %v17585_v30 = vld [vmem:[#allocation47_spill] sm:$0xff] }
 0x9b0   : > { %v17586_v26 = vrot.slane %v17585_v30, 1  ;;  %v17587_v7 = vrot.slane %v17585_v30, 2  ;;  %v17589_v20 = vrot.slane %v17585_v30, 4 }
 0x9b1   : > { %6108 = vrot.lane.b32.xlu0 %v6107_v23, %s10901_s8 }
 0x9b3   : > { %v14584_v28 = vpop.permute.xlu0 %6538 }
 0x9b6   : > { %v5319_v25 = vld [vmem:[#allocation1] sm:$0xff] }
 0x9b7   : > { %v5473_v22 = vpack.c.bf16 %v5319_v25, %v5319_v25  ;;  %5320 = vst [vmem:[#allocation1] ss:$9 sm:$0xff] %v17583_v42  ;;  %v17588_v42 = vrot.slane %v17585_v30, 3 }
 0x9b8   : > { %5321 = vst [vmem:[#allocation1 + $0x1] ss:$9 sm:$0xff] %v17584_v37 }
 0x9b9   : > { %v6135_v51 = vunpack.c.l.b16 %v5473_v22  ;;  %5322 = vst [vmem:[#allocation1 + $0x2] ss:$9 sm:$0xff] %v17585_v30 }
 0x9ba   : > { %5323 = vst [vmem:[#allocation1 + $0x3] ss:$9 sm:$0xff] %v17586_v26  ;;  %v17591_v26 = vrot.slane %v17585_v30, 6 }
 0x9bb   : > { %v6136_v23 = vpack.c.b16 %v6135_v51, %v6135_v51  ;;  %5324 = vst [vmem:[#allocation1 + $0x4] ss:$9 sm:$0xff] %v17587_v7  ;;  %v14591_v22 = vpop.permute.xlu0 %6625  ;;  %v17590_v51 = vrot.slane %v17585_v30, 5 }
 0x9bd   : > { %6137 = vrot.lane.b32.xlu2 %v6136_v23, %s10901_s8  ;;  %v17592_v23 = vrot.slane %v17585_v30, 7  ;;  %v17595_v30 = vrot.slane %v17593_v24, 2 }
 0x9c2   : > { %v5325_v25 = vld [vmem:[#allocation1] sm:$0xff] }
 0x9c3   : > { %v5474_v56 = vpack.c.bf16 %v5325_v25, %v5325_v25  ;;  %5326 = vst [vmem:[#allocation1] ss:$9 sm:$0xff] %v17588_v42  ;;  %v5848_v25 = vpop.permute.xlu0 %5847  ;;  %v5935_v42 = vpop.permute.xlu2 %5934 }
 0x9c4   : > { %5327 = vst [vmem:[#allocation1 + $0x1] ss:$9 sm:$0xff] %v17589_v20  ;;  %v5853_v20 = vsel %vm2988_vm12, %v5848_v25, 0  ;;  %v5940_v44 = vsel %vm2988_vm12, %v5935_v42, 0 }
 0x9c5   : > { %v6164_v37 = vunpack.c.l.b16 %v5474_v56  ;;  %5328 = vst [vmem:[#allocation1 + $0x2] ss:$9 sm:$0xff] %v17590_v51  ;;  %5862 = vmatpush.bf16.xpose.msra.mxu3 %v5853_v20  ;;  %5949 = vmatpush.bf16.xpose.msrb.mxu2 %v5940_v44  ;;  %v17594_v51 = vrot.slane %v17593_v24, 1 }
 0x9c6   : > { %5329 = vst [vmem:[#allocation1 + $0x3] ss:$9 sm:$0xff] %v17591_v26  ;;  %v17596_v26 = vrot.slane %v17593_v24, 3 }
 0x9c7   : > { %v6165_v7 = vpack.c.b16 %v6164_v37, %v6164_v37  ;;  %5330 = vst [vmem:[#allocation1 + $0x4] ss:$9 sm:$0xff] %v17592_v23  ;;  %v17597_v23 = vrot.slane %v17593_v24, 4 }
 0x9c9   : > { %6166 = vrot.lane.b32.xlu1 %v6165_v7, %s10901_s8 }
 0x9cc   : > { %9958 = vmatmul.msk.bf16.vlgmr.msra.gmra.mxu3 %vm2988_vm12, %v14412_v39  ;;  %9961 = vmatmul.msk.bf16.vlgmr.msrb.gmra.mxu2 %vm2988_vm12, %v14482_v8  ;;  %v17601_v8 = vld [vmem:[#allocation49_spill] sm:$0xff] }
 0x9ce   : > { %v5331_v43 = vld [vmem:[#allocation1] sm:$0xff] }
 0x9cf   : > { %v5475_v56 = vpack.c.bf16 %v5331_v43, %v5331_v43  ;;  %5332 = vst [vmem:[#allocation1] ss:$9 sm:$0xff] %v17593_v24  ;;  %v5964_v44 = vpop.permute.xlu2 %5963  ;;  %v5877_v43 = vpop.permute.xlu1 %5876 }
 0x9d0   : > { %5333 = vst [vmem:[#allocation1 + $0x1] ss:$9 sm:$0xff] %v17594_v51  ;;  %v5969_v42 = vsel %vm2988_vm12, %v5964_v44, 0  ;;  %v5882_v20 = vsel %vm2988_vm12, %v5877_v43, 0  ;;  %v17598_v51 = vrot.slane %v17593_v24, 5 }
 0x9d1   : > { %v6193_v37 = vunpack.c.l.b16 %v5475_v56  ;;  %5334 = vst [vmem:[#allocation1 + $0x2] ss:$9 sm:$0xff] %v17595_v30  ;;  %5891 = vmatpush.bf16.xpose.msra.mxu0 %v5882_v20  ;;  %5978 = vmatpush.bf16.xpose.msrb.mxu3 %v5969_v42  ;;  %v17600_v30 = vrot.slane %v17593_v24, 7  ;;  %v17604_v42 = vrot.slane %v17601_v8, 3 }
 0x9d2   : > { %5335 = vst [vmem:[#allocation1 + $0x3] ss:$9 sm:$0xff] %v17596_v26 }
 0x9d3   : > { %v6194_v7 = vpack.c.b16 %v6193_v37, %v6193_v37  ;;  %5336 = vst [vmem:[#allocation1 + $0x4] ss:$9 sm:$0xff] %v17597_v23  ;;  %v17599_v37 = vrot.slane %v17593_v24, 6  ;;  %v5906_v23 = vpop.permute.xlu0 %5905 }
 0x9d4   : > { %v5911_v43 = vsel %vm2988_vm12, %v5906_v23, 0 }
 0x9d5   : > { %6195 = vrot.lane.b32.xlu1 %v6194_v7, %s10901_s8  ;;  %v17602_v7 = vrot.slane %v17601_v8, 1  ;;  %5920 = vmatpush.bf16.xpose.msrb.mxu1 %v5911_v43 }
 0x9d8   : > { %9959 = vmatmul.msk.bf16.vlgmr.msra.gmra.mxu0 %vm2988_vm12, %v14429_v12  ;;  %v17606_v12 = vrot.slane %v17601_v8, 5 }
 0x9da   : > { %v5337_v25 = vld [vmem:[#allocation1] sm:$0xff] }
 0x9db   : > { %v5476_v56 = vpack.c.bf16 %v5337_v25, %v5337_v25  ;;  %5338 = vst [vmem:[#allocation1] ss:$9 sm:$0xff] %v17598_v51  ;;  %v17603_v25 = vrot.slane %v17601_v8, 2 }
 0x9dc   : > { %5339 = vst [vmem:[#allocation1 + $0x1] ss:$9 sm:$0xff] %v17599_v37  ;;  %9962 = vmatmul.msk.bf16.vlgmr.msrb.gmra.mxu3 %vm2988_vm12, %v14424_v50  ;;  %v17607_v37 = vrot.slane %v17601_v8, 6  ;;  %9960 = vmatmul.msk.bf16.vlgmr.msrb.gmra.mxu1 %vm2988_vm12, %v14442_v54 }
 0x9dd   : > { %v6222_v39 = vunpack.c.l.b16 %v5476_v56  ;;  %5340 = vst [vmem:[#allocation1 + $0x2] ss:$9 sm:$0xff] %v17600_v30  ;;  %v17605_v56 = vrot.slane %v17601_v8, 4  ;;  %v17608_v30 = vrot.slane %v17601_v8, 7 }
 0x9de   : > { %5341 = vst [vmem:[#allocation1 + $0x3] ss:$9 sm:$0xff] %v17601_v8 }
 0x9df   : > { %v6223_v26 = vpack.c.b16 %v6222_v39, %v6222_v39  ;;  %5342 = vst [vmem:[#allocation1 + $0x4] ss:$9 sm:$0xff] %v17602_v7 }
 0x9e1   : > { %6224 = vrot.lane.b32.xlu0 %v6223_v26, %s10901_s8  ;;  %v17609_v26 = vld [vmem:[#allocation50_spill] sm:$0xff] }
 0x9e2   : > { %v17610_v23 = vrot.slane %v17609_v26, 1  ;;  %v17613_v8 = vrot.slane %v17609_v26, 4 }
 0x9e6   : > { %v5343_v44 = vld [vmem:[#allocation1] sm:$0xff] }
 0x9e7   : > { %v5477_v24 = vpack.c.bf16 %v5343_v44, %v5343_v44  ;;  %5344 = vst [vmem:[#allocation1] ss:$9 sm:$0xff] %v17603_v25  ;;  %v17611_v44 = vrot.slane %v17609_v26, 2 }
 0x9e8   : > { %5345 = vst [vmem:[#allocation1 + $0x1] ss:$9 sm:$0xff] %v17604_v42  ;;  %v17614_v42 = vrot.slane %v17609_v26, 5 }
 0x9e9   : > { %v6251_v20 = vunpack.c.l.b16 %v5477_v24  ;;  %5346 = vst [vmem:[#allocation1 + $0x2] ss:$9 sm:$0xff] %v17605_v56  ;;  %v17612_v24 = vrot.slane %v17609_v26, 3  ;;  %v17615_v56 = vrot.slane %v17609_v26, 6 }
 0x9ea   : > { %5347 = vst [vmem:[#allocation1 + $0x3] ss:$9 sm:$0xff] %v17606_v12  ;;  %v17616_v12 = vrot.slane %v17609_v26, 7 }
 0x9eb   : > { %v6252_v51 = vpack.c.b16 %v6251_v20, %v6251_v20  ;;  %5348 = vst [vmem:[#allocation1 + $0x4] ss:$9 sm:$0xff] %v17607_v37  ;;  %v17617_v37 = vld [vmem:[#allocation51_spill] sm:$0xff] }
 0x9ed   : > { %6253 = vrot.lane.b32.xlu2 %v6252_v51, %s10901_s8 }
 0x9f2   : > { %v5349_v50 = vld [vmem:[#allocation1] sm:$0xff] }
 0x9f3   : > { %v5478_v39 = vpack.c.bf16 %v5349_v50, %v5349_v50  ;;  %5350 = vst [vmem:[#allocation1] ss:$9 sm:$0xff] %v17608_v30 }
 0x9f4   : > { %5351 = vst [vmem:[#allocation1 + $0x1] ss:$9 sm:$0xff] %v17609_v26  ;;  %v17619_v26 = vrot.slane %v17617_v37, 2 }
 0x9f5   : > { %v6280_v7 = vunpack.c.l.b16 %v5478_v39  ;;  %5352 = vst [vmem:[#allocation1 + $0x2] ss:$9 sm:$0xff] %v17610_v23  ;;  %v5993_v39 = vpop.permute.xlu1 %5992 }
 0x9f6   : > { %5353 = vst [vmem:[#allocation1 + $0x3] ss:$9 sm:$0xff] %v17611_v44  ;;  %v5998_v23 = vsel %vm2988_vm12, %v5993_v39, 0  ;;  %v17624_v39 = vrot.slane %v17617_v37, 7 }
 0x9f7   : > { %v6281_v43 = vpack.c.b16 %v6280_v7, %v6280_v7  ;;  %5354 = vst [vmem:[#allocation1 + $0x4] ss:$9 sm:$0xff] %v17612_v24  ;;  %6007 = vmatpush.bf16.xpose.msrb.mxu0 %v5998_v23 }
 0x9f9   : > { %6282 = vrot.lane.b32.xlu2 %v6281_v43, %s10901_s8  ;;  %v17618_v43 = vrot.slane %v17617_v37, 1 }
 0x9fe   : > { %v5355_v54 = vld [vmem:[#allocation1] sm:$0xff]  ;;  %9963 = vmatmul.msk.bf16.vlgmr.msrb.gmra.mxu0 %vm2988_vm12, %v14497_v5 }
 0x9ff   : > { %v5479_v25 = vpack.c.bf16 %v5355_v54, %v5355_v54  ;;  %5356 = vst [vmem:[#allocation1] ss:$9 sm:$0xff] %v17613_v8  ;;  %v6080_v50 = vpop.permute.xlu2 %6079  ;;  %v17620_v54 = vrot.slane %v17617_v37, 3 }
 0xa00   : > { %5357 = vst [vmem:[#allocation1 + $0x1] ss:$9 sm:$0xff] %v17614_v42  ;;  %v6085_v7 = vsel %vm2988_vm12, %v6080_v50, 0  ;;  %v17622_v42 = vrot.slane %v17617_v37, 5  ;;  %v17623_v50 = vrot.slane %v17617_v37, 6 }
 0xa01   : > { %v6309_v20 = vunpack.c.l.b16 %v5479_v25  ;;  %5358 = vst [vmem:[#allocation1 + $0x2] ss:$9 sm:$0xff] %v17615_v56  ;;  %6094 = vmatpush.bf16.xpose.msra.mxu3 %v6085_v7  ;;  %v17621_v25 = vrot.slane %v17617_v37, 4  ;;  %v17625_v7 = vld [vmem:[#allocation52_spill] sm:$0xff] }
 0xa02   : > { %5359 = vst [vmem:[#allocation1 + $0x3] ss:$9 sm:$0xff] %v17616_v12  ;;  %v17626_v5 = vrot.slane %v17625_v7, 1 }
 0xa03   : > { %v6310_v51 = vpack.c.b16 %v6309_v20, %v6309_v20  ;;  %5360 = vst [vmem:[#allocation1 + $0x4] ss:$9 sm:$0xff] %v17617_v37  ;;  %v6022_v20 = vpop.permute.xlu0 %6021 }
 0xa04   : > { %v6027_v12 = vsel %vm2988_vm12, %v6022_v20, 0  ;;  %v17630_v20 = vrot.slane %v17625_v7, 5 }
 0xa05   : > { %6311 = vrot.lane.b32.xlu1 %v6310_v51, %s10901_s8  ;;  %6036 = vmatpush.bf16.xpose.msra.mxu1 %v6027_v12  ;;  %v17632_v12 = vrot.slane %v17625_v7, 7 }
 0xa08   : > { %9966 = vmatmul.msk.bf16.vlgmr.msra.gmra.mxu3 %vm2988_vm12, %v14451_v57  ;;  %v17627_v57 = vrot.slane %v17625_v7, 2 }
 0xa0a   : > { %v5361_v30 = vld [vmem:[#allocation1] sm:$0xff] }
 0xa0b   : > { %v5480_v44 = vpack.c.bf16 %v5361_v30, %v5361_v30  ;;  %5362 = vst [vmem:[#allocation1] ss:$9 sm:$0xff] %v17618_v43 }
 0xa0c   : > { %5363 = vst [vmem:[#allocation1 + $0x1] ss:$9 sm:$0xff] %v17619_v26  ;;  %9964 = vmatmul.msk.bf16.vlgmr.msra.gmra.mxu1 %vm2988_vm12, %v14431_v21  ;;  %v17631_v21 = vrot.slane %v17625_v7, 6 }
 0xa0d   : > { %v6338_v24 = vunpack.c.l.b16 %v5480_v44  ;;  %5364 = vst [vmem:[#allocation1 + $0x2] ss:$9 sm:$0xff] %v17620_v54  ;;  %v6051_v44 = vpop.permute.xlu0 %6050 }
 0xa0e   : > { %5365 = vst [vmem:[#allocation1 + $0x3] ss:$9 sm:$0xff] %v17621_v25  ;;  %v6056_v37 = vsel %vm2988_vm12, %v6051_v44, 0  ;;  %v17628_v25 = vrot.slane %v17625_v7, 3 }
 0xa0f   : > { %v6339_v8 = vpack.c.b16 %v6338_v24, %v6338_v24  ;;  %5366 = vst [vmem:[#allocation1 + $0x4] ss:$9 sm:$0xff] %v17622_v42  ;;  %6065 = vmatpush.bf16.xpose.msra.mxu2 %v6056_v37 }
 0xa11   : > { %6340 = vrot.lane.b32.xlu2 %v6339_v8, %s10901_s8  ;;  %v17629_v8 = vrot.slane %v17625_v7, 4 }
 0xa16   : > { %v5367_v56 = vld [vmem:[#allocation1] sm:$0xff]  ;;  %9965 = vmatmul.msk.bf16.vlgmr.msra.gmra.mxu2 %vm2988_vm12, %v14445_v3 }
 0xa17   : > { %v5481_v51 = vpack.c.bf16 %v5367_v56, %v5367_v56  ;;  %5368 = vst [vmem:[#allocation1] ss:$9 sm:$0xff] %v17623_v50  ;;  %v6138_v43 = vpop.permute.xlu2 %6137 }
 0xa18   : > { %5369 = vst [vmem:[#allocation1 + $0x1] ss:$9 sm:$0xff] %v17624_v39  ;;  %v6143_v24 = vsel %vm2988_vm12, %v6138_v43, 0  ;;  %v17633_v39 = vld [vmem:[#allocation53_spill] sm:$0xff] }
 0xa19   : > { %v6367_v30 = vunpack.c.l.b16 %v5481_v51  ;;  %5370 = vst [vmem:[#allocation1 + $0x2] ss:$9 sm:$0xff] %v17625_v7  ;;  %6152 = vmatpush.bf16.xpose.msrb.mxu1 %v6143_v24  ;;  %v17636_v7 = vrot.slane %v17633_v39, 3  ;;  %v17637_v3 = vrot.slane %v17633_v39, 4  ;;  %v17638_v37 = vrot.slane %v17633_v39, 5 }
 0xa1a   : > { %5371 = vst [vmem:[#allocation1 + $0x3] ss:$9 sm:$0xff] %v17626_v5  ;;  %v17639_v24 = vrot.slane %v17633_v39, 6 }
 0xa1b   : > { %v6368_v23 = vpack.c.b16 %v6367_v30, %v6367_v30  ;;  %5372 = vst [vmem:[#allocation1 + $0x4] ss:$9 sm:$0xff] %v17627_v57  ;;  %v17634_v30 = vrot.slane %v17633_v39, 1 }
 0xa1d   : > { %6369 = vrot.lane.b32.xlu1 %v6368_v23, %s10901_s8  ;;  %v17635_v23 = vrot.slane %v17633_v39, 2 }
 0xa20   : > { %9968 = vmatmul.msk.bf16.vlgmr.msrb.gmra.mxu1 %vm2988_vm12, %v14522_v2 }
 0xa22   : > { %v5373_v26 = vld [vmem:[#allocation1] sm:$0xff] }
 0xa23   : > { %v5482_v54 = vpack.c.bf16 %v5373_v26, %v5373_v26  ;;  %5374 = vst [vmem:[#allocation1] ss:$9 sm:$0xff] %v17628_v25  ;;  %v6109_v2 = vpop.permute.xlu0 %6108  ;;  %v17640_v25 = vrot.slane %v17633_v39, 7 }
 0xa24   : > { %5375 = vst [vmem:[#allocation1 + $0x1] ss:$9 sm:$0xff] %v17629_v8  ;;  %v6114_v43 = vsel %vm2988_vm12, %v6109_v2, 0  ;;  %v17641_v8 = vld [vmem:[#allocation55_spill] sm:$0xff] }
 0xa25   : > { %v6396_v42 = vunpack.c.l.b16 %v5482_v54  ;;  %5376 = vst [vmem:[#allocation1 + $0x2] ss:$9 sm:$0xff] %v17630_v20  ;;  %6123 = vmatpush.bf16.xpose.msra.mxu0 %v6114_v43  ;;  %v17642_v20 = vrot.slane %v17641_v8, 1 }
 0xa26   : > { %5377 = vst [vmem:[#allocation1 + $0x3] ss:$9 sm:$0xff] %v17631_v21 }
 0xa27   : > { %v6397_v56 = vpack.c.b16 %v6396_v42, %v6396_v42  ;;  %5378 = vst [vmem:[#allocation1 + $0x4] ss:$9 sm:$0xff] %v17632_v12  ;;  %v17643_v12 = vrot.slane %v17641_v8, 2 }
 0xa29   : > { %6398 = vrot.lane.b32.xlu0 %v6397_v56, %s10901_s8 }
 0xa2c   : > { %9967 = vmatmul.msk.bf16.vlgmr.msra.gmra.mxu0 %vm2988_vm12, %v14508_v36 }
 0xa2e   : > { %v5379_v51 = vld [vmem:[#allocation1] sm:$0xff] }
 0xa2f   : > { %v5483_v50 = vpack.c.bf16 %v5379_v51, %v5379_v51  ;;  %5380 = vst [vmem:[#allocation1] ss:$9 sm:$0xff] %v17633_v39  ;;  %v17644_v51 = vrot.slane %v17641_v8, 3  ;;  %v17645_v39 = vrot.slane %v17641_v8, 4 }
 0xa30   : > { %5381 = vst [vmem:[#allocation1 + $0x1] ss:$9 sm:$0xff] %v17634_v30  ;;  %v17646_v30 = vrot.slane %v17641_v8, 5 }
 0xa31   : > { %v6425_v5 = vunpack.c.l.b16 %v5483_v50  ;;  %5382 = vst [vmem:[#allocation1 + $0x2] ss:$9 sm:$0xff] %v17635_v23  ;;  %v17647_v23 = vrot.slane %v17641_v8, 6 }
 0xa32   : > { %5383 = vst [vmem:[#allocation1 + $0x3] ss:$9 sm:$0xff] %v17636_v7 }
 0xa33   : > { %v6426_v57 = vpack.c.b16 %v6425_v5, %v6425_v5  ;;  %5384 = vst [vmem:[#allocation1 + $0x4] ss:$9 sm:$0xff] %v17637_v3 }
 0xa35   : > { %6427 = vrot.lane.b32.xlu2 %v6426_v57, %s10901_s8 }
 0xa3a   : > { %v5385_v44 = vld [vmem:[#allocation1] sm:$0xff] }
 0xa3b   : > { %v5484_v26 = vpack.c.bf16 %v5385_v44, %v5385_v44  ;;  %5386 = vst [vmem:[#allocation1] ss:$9 sm:$0xff] %v17638_v37  ;;  %v6167_v7 = vpop.permute.xlu1 %6166  ;;  %v14749_v44 = vpop.f32.mrf.mxu1  ;;  %v17649_v37 = vld [vmem:[#allocation58_spill] sm:$0xff] }
 0xa3c   : > { %5387 = vst [vmem:[#allocation1 + $0x1] ss:$9 sm:$0xff] %v17639_v24  ;;  %v6172_v2 = vsel %vm2988_vm12, %v6167_v7, 0  ;;  %v17657_v7 = vld [vmem:[#allocation61_spill] sm:$0xff] }
 0xa3d   : > { %v6454_v54 = vunpack.c.l.b16 %v5484_v26  ;;  %5388 = vst [vmem:[#allocation1 + $0x2] ss:$9 sm:$0xff] %v17640_v25  ;;  %v17648_v26 = vrot.slane %v17641_v8, 7  ;;  %6181 = vmatpush.bf16.xpose.msrb.mxu2 %v6172_v2  ;;  %v17651_v25 = vrot.slane %v17649_v37, 2 }
 0xa3e   : > { %5389 = vst [vmem:[#allocation1 + $0x3] ss:$9 sm:$0xff] %v17641_v8 }
 0xa3f   : > { %v6455_v42 = vpack.c.b16 %v6454_v54, %v6454_v54  ;;  %5390 = vst [vmem:[#allocation1 + $0x4] ss:$9 sm:$0xff] %v17642_v20  ;;  %v17650_v54 = vrot.slane %v17649_v37, 1  ;;  %v17652_v20 = vrot.slane %v17649_v37, 3 }
 0xa41   : > { %6456 = vrot.lane.b32.xlu1 %v6455_v42, %s10901_s8 }
 0xa43   : > { %v5808_v8 = vpop.f32.mrf.mxu1 }
 0xa44   : > { %9969 = vmatmul.msk.bf16.vlgmr.msrb.gmra.mxu2 %vm2988_vm12, %v14461_v10 }
 0xa46   : > { %v5391_v21 = vld [vmem:[#allocation1] sm:$0xff] }
 0xa47   : > { %v5485_v56 = vpack.c.bf16 %v5391_v21, %v5391_v21  ;;  %5392 = vst [vmem:[#allocation1] ss:$9 sm:$0xff] %v17643_v12  ;;  %v6254_v36 = vpop.permute.xlu2 %6253 }
 0xa48   : > { %5393 = vst [vmem:[#allocation1 + $0x1] ss:$9 sm:$0xff] %v17644_v51  ;;  %v6259_v3 = vsel %vm2988_vm12, %v6254_v36, 0 }
 0xa49   : > { %v6483_v50 = vunpack.c.l.b16 %v5485_v56  ;;  %5394 = vst [vmem:[#allocation1 + $0x2] ss:$9 sm:$0xff] %v17645_v39  ;;  %6268 = vmatpush.bf16.xpose.msra.mxu1 %v6259_v3  ;;  %v6196_v56 = vpop.permute.xlu1 %6195  ;;  %v14779_v3 = vpop.f32.mrf.mxu2 }
 0xa4a   : > { %5395 = vst [vmem:[#allocation1 + $0x3] ss:$9 sm:$0xff] %v17646_v30  ;;  %v17653_v30 = vrot.slane %v17649_v37, 4 }
 0xa4b   : > { %v6484_v5 = vpack.c.b16 %v6483_v50, %v6483_v50  ;;  %5396 = vst [vmem:[#allocation1 + $0x4] ss:$9 sm:$0xff] %v17647_v23  ;;  %v6201_v50 = vsel %vm2988_vm12, %v6196_v56, 0  ;;  %v17656_v23 = vrot.slane %v17649_v37, 7  ;;  %v17663_v56 = vrot.slane %v17657_v7, 6 }
 0xa4c   : > { %6210 = vmatpush.bf16.xpose.msrb.mxu3 %v6201_v50  ;;  %v17665_v50 = vld [vmem:[#allocation64_spill] sm:$0xff] }
 0xa4d   : > { %6485 = vrot.lane.b32.xlu0 %v6484_v5, %s10901_s8  ;;  %v17654_v5 = vrot.slane %v17649_v37, 5 }
 0xa50   : > { %9972 = vmatmul.msk.bf16.vlgmr.msra.gmra.mxu1 %vm2988_vm12, %v14479_v46  ;;  %v17655_v46 = vrot.slane %v17649_v37, 6 }
 0xa52   : > { %v5397_v57 = vld [vmem:[#allocation1] sm:$0xff] }
 0xa53   : > { %v5486_v43 = vpack.c.bf16 %v5397_v57, %v5397_v57  ;;  %5398 = vst [vmem:[#allocation1] ss:$9 sm:$0xff] %v17648_v26  ;;  %v6283_v21 = vpop.permute.xlu2 %6282  ;;  %9970 = vmatmul.msk.bf16.vlgmr.msrb.gmra.mxu3 %vm2988_vm12, %v14464_v19  ;;  %v6225_v57 = vpop.permute.xlu0 %6224  ;;  %v17660_v19 = vrot.slane %v17657_v7, 3 }
 0xa54   : > { %5399 = vst [vmem:[#allocation1 + $0x1] ss:$9 sm:$0xff] %v17649_v37  ;;  %v6288_v51 = vsel %vm2988_vm12, %v6283_v21, 0  ;;  %v17658_v37 = vrot.slane %v17657_v7, 1 }
 0xa55   : > { %v6512_v24 = vunpack.c.l.b16 %v5486_v43  ;;  %5400 = vst [vmem:[#allocation1 + $0x2] ss:$9 sm:$0xff] %v17650_v54  ;;  %6297 = vmatpush.bf16.xpose.msra.mxu2 %v6288_v51  ;;  %v6230_v43 = vsel %vm2988_vm12, %v6225_v57, 0 }
 0xa56   : > { %5401 = vst [vmem:[#allocation1 + $0x3] ss:$9 sm:$0xff] %v17651_v25  ;;  %6239 = vmatpush.bf16.xpose.msrb.mxu0 %v6230_v43  ;;  %v17661_v25 = vrot.slane %v17657_v7, 4  ;;  %v17669_v43 = vrot.slane %v17665_v50, 4 }
 0xa57   : > { %v6513_v42 = vpack.c.b16 %v6512_v24, %v6512_v24  ;;  %5402 = vst [vmem:[#allocation1 + $0x4] ss:$9 sm:$0xff] %v17652_v20  ;;  %v17659_v24 = vrot.slane %v17657_v7, 2  ;;  %v17662_v20 = vrot.slane %v17657_v7, 5 }
 0xa59   : > { %6514 = vrot.lane.b32.xlu2 %v6513_v42, %s10901_s8 }
 0xa5c   : > { %9973 = vmatmul.msk.bf16.vlgmr.msra.gmra.mxu2 %vm2988_vm12, %v14493_v60  ;;  %v5837_v60 = vpop.f32.mrf.mxu2 }
 0xa5d   : > { %9971 = vmatmul.msk.bf16.vlgmr.msrb.gmra.mxu0 %vm2988_vm12, %v14471_v17  ;;  %v14807_v17 = vpop.f32.mrf.mxu0 }
 0xa5e   : > { %v5403_v12 = vld [vmem:[#allocation1] sm:$0xff] }
 0xa5f   : > { %v5487_v39 = vpack.c.bf16 %v5403_v12, %v5403_v12  ;;  %5404 = vst [vmem:[#allocation1] ss:$9 sm:$0xff] %v17653_v30  ;;  %v17664_v12 = vrot.slane %v17657_v7, 7 }
 0xa60   : > { %5405 = vst [vmem:[#allocation1 + $0x1] ss:$9 sm:$0xff] %v17654_v5  ;;  %v17667_v5 = vrot.slane %v17665_v50, 2 }
 0xa61   : > { %v6541_v10 = vunpack.c.l.b16 %v5487_v39  ;;  %5406 = vst [vmem:[#allocation1 + $0x2] ss:$9 sm:$0xff] %v17655_v46  ;;  %v17666_v39 = vrot.slane %v17665_v50, 1 }
 0xa62   : > { %5407 = vst [vmem:[#allocation1 + $0x3] ss:$9 sm:$0xff] %v17656_v23 }
 0xa63   : > { %v6542_v36 = vpack.c.b16 %v6541_v10, %v6541_v10  ;;  %5408 = vst [vmem:[#allocation1 + $0x4] ss:$9 sm:$0xff] %v17657_v7 }
 0xa65   : > { %6543 = vrot.lane.b32.xlu1 %v6542_v36, %s10901_s8 }
 0xa6a   : > { %v5409_v2 = vld [vmem:[#allocation1] sm:$0xff] }
 0xa6b   : > { %v5488_v26 = vpack.c.bf16 %v5409_v2, %v5409_v2  ;;  %5410 = vst [vmem:[#allocation1] ss:$9 sm:$0xff] %v17658_v37  ;;  %v6341_v10 = vpop.permute.xlu2 %6340  ;;  %v17668_v2 = vrot.slane %v17665_v50, 3  ;;  %v17670_v37 = vrot.slane %v17665_v50, 5 }
 0xa6c   : > { %5411 = vst [vmem:[#allocation1 + $0x1] ss:$9 sm:$0xff] %v17659_v24  ;;  %v6346_v23 = vsel %vm2988_vm12, %v6341_v10, 0  ;;  %v5779_v24 = vpop.f32.mrf.mxu0 }
 0xa6d   : > { %v6570_v54 = vunpack.c.l.b16 %v5488_v26  ;;  %5412 = vst [vmem:[#allocation1 + $0x2] ss:$9 sm:$0xff] %v17660_v19  ;;  %6355 = vmatpush.bf16.xpose.msra.mxu0 %v6346_v23 }
 0xa6e   : > { %5413 = vst [vmem:[#allocation1 + $0x3] ss:$9 sm:$0xff] %v17661_v25  ;;  %v17672_v25 = vrot.slane %v17665_v50, 7 }
 0xa6f   : > { %v6571_v42 = vpack.c.b16 %v6570_v54, %v6570_v54  ;;  %5414 = vst [vmem:[#allocation1 + $0x4] ss:$9 sm:$0xff] %v17662_v20  ;;  %v17671_v54 = vrot.slane %v17665_v50, 6  ;;  %v14823_v20 = vpop.f32.mrf.mxu2 }
 0xa71   : > { %6572 = vrot.lane.b32.xlu2 %v6571_v42, %s10901_s8  ;;  %v14821_v42 = vpop.f32.mrf.mxu3 }
 0xa74   : > { %9975 = vmatmul.msk.bf16.vlgmr.msra.gmra.mxu0 %vm2988_vm12, %v14502_v0  ;;  %v14830_v60 = vpop.f32.mrf.mxu0 }
 0xa76   : > { %v5415_v8 = vld [vmem:[#allocation1] sm:$0xff] }
 0xa77   : > { %v5489_v21 = vpack.c.bf16 %v5415_v8, %v5415_v8  ;;  %5416 = vst [vmem:[#allocation1] ss:$9 sm:$0xff] %v17663_v56  ;;  %v6312_v46 = vpop.permute.xlu1 %6311  ;;  %v17673_v56 = vld [vmem:[#allocation54_spill] sm:$0xff] }
 0xa78   : > { %5417 = vst [vmem:[#allocation1 + $0x1] ss:$9 sm:$0xff] %v17664_v12  ;;  %v6317_v36 = vsel %vm2988_vm12, %v6312_v46, 0  ;;  %v17675_v0 = vrot.slane %v17673_v56, 2  ;;  %v17677_v10 = vrot.slane %v17673_v56, 4  ;;  %v17680_v24 = vrot.slane %v17673_v56, 7 }
 0xa79   : > { %v6599_v51 = vunpack.c.l.b16 %v5489_v21  ;;  %5418 = vst [vmem:[#allocation1 + $0x2] ss:$9 sm:$0xff] %v17665_v50  ;;  %6326 = vmatpush.bf16.xpose.msra.mxu3 %v6317_v36  ;;  %v17674_v50 = vrot.slane %v17673_v56, 1  ;;  %v14842_v36 = vpop.f32.mrf.mxu1 }
 0xa7a   : > { %5419 = vst [vmem:[#allocation1 + $0x3] ss:$9 sm:$0xff] %v17666_v39 }
 0xa7b   : > { %v6600_v30 = vpack.c.b16 %v6599_v51, %v6599_v51  ;;  %5420 = vst [vmem:[#allocation1 + $0x4] ss:$9 sm:$0xff] %v17667_v5  ;;  %v5866_v51 = vpop.f32.mrf.mxu3  ;;  %v17676_v5 = vrot.slane %v17673_v56, 3 }
 0xa7d   : > { %6601 = vrot.lane.b32.xlu1 %v6600_v30, %s10901_s8  ;;  %v5953_v30 = vpop.f32.mrf.mxu2 }
 0xa80   : > { %9974 = vmatmul.msk.bf16.vlgmr.msra.gmra.mxu3 %vm2988_vm12, %v14538_v13 }
 0xa82   : > { %v5421_v7 = vld [vmem:[#allocation1] sm:$0xff] }
 0xa83   : > { %v5490_v57 = vpack.c.bf16 %v5421_v7, %v5421_v7  ;;  %5422 = vst [vmem:[#allocation1] ss:$9 sm:$0xff] %v17668_v2 }
 0xa84   : > { %5423 = vst [vmem:[#allocation1 + $0x1] ss:$9 sm:$0xff] %v17669_v43  ;;  %v17678_v43 = vrot.slane %v17673_v56, 5 }
 0xa85   : > { %v6628_v26 = vunpack.c.l.b16 %v5490_v57  ;;  %5424 = vst [vmem:[#allocation1 + $0x2] ss:$9 sm:$0xff] %v17670_v37  ;;  %v5895_v57 = vpop.f32.mrf.mxu0  ;;  %v17679_v37 = vrot.slane %v17673_v56, 6 }
 0xa86   : > { %5425 = vst [vmem:[#allocation1 + $0x3] ss:$9 sm:$0xff] %v17671_v54  ;;  %v17681_v54 = vld [vmem:[#allocation56_spill] sm:$0xff]  ;;  %v17689_v57 = vld [vmem:[#allocation57_spill] sm:$0xff] }
 0xa87   : > { %v6629_v19 = vpack.c.b16 %v6628_v26, %v6628_v26  ;;  %5426 = vst [vmem:[#allocation1 + $0x4] ss:$9 sm:$0xff] %v17672_v25  ;;  %v5924_v26 = vpop.f32.mrf.mxu1  ;;  %v14857_v25 = vpop.f32.mrf.mxu3  ;;  %v17686_v30 = vrot.slane %v17681_v54, 5 }
 0xa88   : > { %v17690_v26 = vrot.slane %v17689_v57, 1 }
 0xa89   : > { %6630 = vrot.lane.b32.xlu0 %v6629_v19, %s10901_s8 }
 0xa8d   : > { %v14870_v51 = vpop.f32.mrf.mxu0 }
 0xa8e   : > { %v5427_v8 = vld [vmem:[#allocation1] sm:$0xff] }
 0xa8f   : > { %v5491_v21 = vpack.c.bf16 %v5427_v8, %v5427_v8  ;;  %5492 = vst [vmem:[#allocation1] ss:$9 sm:$0xff] %v17673_v56  ;;  %v6428_v12 = vpop.permute.xlu2 %6427  ;;  %v6370_v23 = vpop.permute.xlu1 %6369  ;;  %v17683_v56 = vrot.slane %v17681_v54, 2 }
 0xa90   : > { %5494 = vst [vmem:[#allocation1 + $0x1] ss:$9 sm:$0xff] %v17674_v50  ;;  %v6433_v39 = vsel %vm2988_vm12, %v6428_v12, 0  ;;  %v6375_v7 = vsel %vm2988_vm12, %v6370_v23, 0  ;;  %v17684_v50 = vrot.slane %v17681_v54, 3 }
 0xa91   : > { %5496 = vst [vmem:[#allocation1 + $0x2] ss:$9 sm:$0xff] %v17675_v0  ;;  %v6657_v13 = vunpack.c.l.b16 %v5491_v21  ;;  %6442 = vmatpush.bf16.xpose.msrb.mxu3 %v6433_v39  ;;  %6384 = vmatpush.bf16.xpose.msrb.mxu1 %v6375_v7  ;;  %v6686_v21 = vsel %vm3597_vm13, %v14779_v3, -inf  ;;  %v17685_v39 = vrot.slane %v17681_v54, 4  ;;  %v17687_v0 = vrot.slane %v17681_v54, 6 }
 0xa92   : > { %5498 = vst [vmem:[#allocation1 + $0x3] ss:$9 sm:$0xff] %v17676_v5  ;;  %v6680_v5 = vsel %vm3597_vm13, %v14807_v17, -inf }
 0xa93   : > { %5500 = vst [vmem:[#allocation1 + $0x4] ss:$9 sm:$0xff] %v17677_v10  ;;  %v6658_v46 = vpack.c.b16 %v6657_v13, %v6657_v13 }
 0xa95   : > { %6659 = vrot.lane.b32.xlu2 %v6658_v46, %s10901_s8  ;;  %v6011_v13 = vpop.f32.mrf.mxu0  ;;  %v17688_v46 = vrot.slane %v17681_v54, 7 }
 0xa98   : > { %9978 = vmatmul.msk.bf16.vlgmr.msrb.gmra.mxu3 %vm2988_vm12, %v14484_v18  ;;  %9976 = vmatmul.msk.bf16.vlgmr.msrb.gmra.mxu1 %vm2988_vm12, %v14551_v16  ;;  %v17682_v18 = vrot.slane %v17681_v54, 1  ;;  %v5982_v16 = vpop.f32.mrf.mxu3 }
 0xa99   : > { %v6683_v16 = vsel %vm3597_vm13, %v14749_v44, -inf }
 0xa9a   : > { %v5501_v2 = vld [vmem:[#allocation1] sm:$0xff] }
 0xa9b   : > { %5502 = vst [vmem:[#allocation1] ss:$9 sm:$0xff] %v17678_v43  ;;  %v6399_v19 = vpop.permute.xlu0 %6398 }
 0xa9c   : > { %5503 = vst [vmem:[#allocation1 + $0x1] ss:$9 sm:$0xff] %v17679_v37  ;;  %v6404_v8 = vsel %vm2988_vm12, %v6399_v19, 0 }
 0xa9d   : > { %5504 = vst [vmem:[#allocation1 + $0x2] ss:$9 sm:$0xff] %v17680_v24  ;;  %6413 = vmatpush.bf16.xpose.msrb.mxu2 %v6404_v8  ;;  %v17691_v24 = vrot.slane %v17689_v57, 2  ;;  %v14897_v8 = vpop.f32.mrf.mxu2 }
 0xa9e   : > { %5505 = vst [vmem:[#allocation1 + $0x3] ss:$9 sm:$0xff] %v17681_v54  ;;  %v14893_v54 = vpop.f32.mrf.mxu1 }
 0xa9f   : > { %5506 = vst [vmem:[#allocation1 + $0x4] ss:$9 sm:$0xff] %v17682_v18  ;;  %v17692_v18 = vrot.slane %v17689_v57, 3 }
 0xaa0   : > { %v14891_v19 = vpop.f32.mrf.mxu3 }
 0xaa4   : > { %9977 = vmatmul.msk.bf16.vlgmr.msrb.gmra.mxu2 %vm2988_vm12, %v14562_v41 }
 0xaa6   : > { %v14864_v12 = vld [vmem:[#allocation1] sm:$0xff] }
 0xaa7   : > { %6687 = vmax.xlane.f32.xlu1 %v6686_v21  ;;  %5508 = vst [vmem:[#allocation1] ss:$9 sm:$0xff] %v17683_v56  ;;  %v5720_v56 = vpack.c.bf16 %v5501_v2, %v5501_v2  ;;  %v6069_v2 = vpop.f32.mrf.mxu2 }
 0xaa8   : > { %5509 = vst [vmem:[#allocation1 + $0x1] ss:$9 sm:$0xff] %v17684_v50 }
 0xaa9   : > { %5510 = vst [vmem:[#allocation1 + $0x2] ss:$9 sm:$0xff] %v17685_v39  ;;  %v6098_v39 = vpop.f32.mrf.mxu3 }
 0xaaa   : > { %5511 = vst [vmem:[#allocation1 + $0x3] ss:$9 sm:$0xff] %v17686_v30  ;;  %v6040_v30 = vpop.f32.mrf.mxu1 }
 0xaab   : > { %5512 = vst [vmem:[#allocation1 + $0x4] ss:$9 sm:$0xff] %v17687_v0  ;;  %v14938_v30 = vpop.f32.mrf.mxu0 }
 0xab2   : > { %v5513_v10 = vld [vmem:[#allocation1] sm:$0xff] }
 0xab3   : > { %6681 = vmax.xlane.f32.xlu0 %v6680_v5  ;;  %v6515_v41 = vpop.permute.xlu2 %6514  ;;  %5514 = vst [vmem:[#allocation1] ss:$9 sm:$0xff] %v17688_v46  ;;  %v6457_v23 = vpop.permute.xlu1 %6456  ;;  %v5722_v37 = vpack.c.bf16 %v5513_v10, %v5513_v10  ;;  %v17693_v5 = vrot.slane %v17689_v57, 4  ;;  %v7065_v10 = vunpack.c.l.b16 %v5720_v56  ;;  %v17696_v46 = vrot.slane %v17689_v57, 7 }
 0xab4   : > { %v6520_v7 = vsel %vm2988_vm12, %v6515_v41, 0  ;;  %5515 = vst [vmem:[#allocation1 + $0x1] ss:$9 sm:$0xff] %v17689_v57  ;;  %v6462_v43 = vsel %vm2988_vm12, %v6457_v23, 0  ;;  %v17695_v41 = vrot.slane %v17689_v57, 6  ;;  %v17697_v23 = vld [vmem:[#allocation59_spill] sm:$0xff]  ;;  %v6127_v2 = vpop.f32.mrf.mxu0 }
 0xab5   : > { %5516 = vst [vmem:[#allocation1 + $0x2] ss:$9 sm:$0xff] %v17690_v26  ;;  %6529 = vmatpush.bf16.xpose.msra.mxu2 %v6520_v7  ;;  %6471 = vmatpush.bf16.xpose.msrb.mxu0 %v6462_v43  ;;  %v7113_v21 = vunpack.c.l.b16 %v5722_v37  ;;  %v7066_v7 = vpack.c.b16 %v7065_v10, %v7065_v10  ;;  %v14918_v43 = vpop.f32.mrf.mxu1  ;;  %v17704_v10 = vrot.slane %v17697_v23, 7 }
 0xab6   : > { %5517 = vst [vmem:[#allocation1 + $0x3] ss:$9 sm:$0xff] %v17691_v24  ;;  %v17698_v24 = vrot.slane %v17697_v23, 1 }
 0xab7   : > { %5518 = vst [vmem:[#allocation1 + $0x4] ss:$9 sm:$0xff] %v17692_v18  ;;  %v7114_v50 = vpack.c.b16 %v7113_v21, %v7113_v21  ;;  %v17699_v21 = vrot.slane %v17697_v23, 2 }
 0xabc   : > { %9979 = vmatmul.msk.bf16.vlgmr.msrb.gmra.mxu0 %vm2988_vm12, %v14573_v15  ;;  %9981 = vmatmul.msk.bf16.vlgmr.msra.gmra.mxu2 %vm2988_vm12, %v14519_v33  ;;  %v17694_v33 = vrot.slane %v17689_v57, 5  ;;  %v5721_v57 = vpack.c.bf16 %v14864_v12, %v14864_v12 }
 0xabd   : > { %v6156_v56 = vpop.f32.mrf.mxu1 }
 0xabe   : > { %6684 = vmax.xlane.f32.xlu2 %v6683_v16  ;;  %v14905_v0 = vld [vmem:[#allocation1] sm:$0xff]  ;;  %v17700_v16 = vrot.slane %v17697_v23, 3  ;;  %v7089_v39 = vunpack.c.l.b16 %v5721_v57 }
 0xabf   : > { %v6486_v13 = vpop.permute.xlu0 %6485  ;;  %5520 = vst [vmem:[#allocation1] ss:$9 sm:$0xff] %v17693_v5 }
 0xac0   : > { %7115 = vrot.lane.b32.xlu1 %v7114_v50, %s10901_s8  ;;  %v6491_v15 = vsel %vm2988_vm12, %v6486_v13, 0  ;;  %5521 = vst [vmem:[#allocation1 + $0x1] ss:$9 sm:$0xff] %v17694_v33  ;;  %v17702_v50 = vrot.slane %v17697_v23, 5  ;;  %v7090_v12 = vpack.c.b16 %v7089_v39, %v7089_v39 }
 0xac1   : > { %6500 = vmatpush.bf16.xpose.msra.mxu1 %v6491_v15  ;;  %5522 = vst [vmem:[#allocation1 + $0x2] ss:$9 sm:$0xff] %v17695_v41  ;;  %v17703_v15 = vrot.slane %v17697_v23, 6  ;;  %v17705_v41 = vld [vmem:[#allocation60_spill] sm:$0xff] }
 0xac2   : > { %5523 = vst [vmem:[#allocation1 + $0x3] ss:$9 sm:$0xff] %v17696_v46  ;;  %v17706_v46 = vrot.slane %v17705_v41, 1  ;;  %v17712_v56 = vrot.slane %v17705_v41, 7 }
 0xac3   : > { %5524 = vst [vmem:[#allocation1 + $0x4] ss:$9 sm:$0xff] %v17697_v23 }
 0xac7   : > { %7067 = vrot.lane.b32.xlu0 %v7066_v7, %s10901_s8  ;;  %v14965_v57 = vpop.f32.mrf.mxu2 }
 0xac8   : > { %9980 = vmatmul.msk.bf16.vlgmr.msra.gmra.mxu1 %vm2988_vm12, %v14499_v40  ;;  %v17701_v40 = vrot.slane %v17697_v23, 4  ;;  %v17708_v23 = vrot.slane %v17705_v41, 3 }
 0xaca   : > { %v14923_v26 = vld [vmem:[#allocation1] sm:$0xff] }
 0xacb   : > { %v6573_v37 = vpop.permute.xlu2 %6572  ;;  %5526 = vst [vmem:[#allocation1] ss:$9 sm:$0xff] %v17698_v24  ;;  %v17709_v24 = vrot.slane %v17705_v41, 4 }
 0xacc   : > { %v6578_v18 = vsel %vm2988_vm12, %v6573_v37, 0  ;;  %5527 = vst [vmem:[#allocation1 + $0x1] ss:$9 sm:$0xff] %v17699_v21  ;;  %v17711_v21 = vrot.slane %v17705_v41, 6 }
 0xacd   : > { %6587 = vmatpush.bf16.xpose.msra.mxu0 %v6578_v18  ;;  %5528 = vst [vmem:[#allocation1 + $0x2] ss:$9 sm:$0xff] %v17700_v16  ;;  %v14955_v7 = vpop.f32.mrf.mxu1  ;;  %v17710_v18 = vrot.slane %v17705_v41, 5 }
 0xace   : > { %5529 = vst [vmem:[#allocation1 + $0x3] ss:$9 sm:$0xff] %v17701_v40 }
 0xacf   : > { %5530 = vst [vmem:[#allocation1 + $0x4] ss:$9 sm:$0xff] %v17702_v50  ;;  %v6185_v40 = vpop.f32.mrf.mxu2 }
 0xad4   : > { %9983 = vmatmul.msk.bf16.vlgmr.msra.gmra.mxu0 %vm2988_vm12, %v14510_v32  ;;  %v17707_v32 = vrot.slane %v17705_v41, 2 }
 0xad5   : > { %v6272_v16 = vpop.f32.mrf.mxu1 }
 0xad6   : > { %7091 = vrot.lane.b32.xlu2 %v7090_v12, %s10901_s8  ;;  %v14943_v13 = vld [vmem:[#allocation1] sm:$0xff]  ;;  %v14975_v50 = vpop.f32.mrf.mxu3 }
 0xad7   : > { %v6544_v5 = vpop.permute.xlu1 %6543  ;;  %5532 = vst [vmem:[#allocation1] ss:$9 sm:$0xff] %v17703_v15  ;;  %v17713_v15 = vld [vmem:[#allocation62_spill] sm:$0xff] }
 0xad8   : > { %v6549_v33 = vsel %vm2988_vm12, %v6544_v5, 0  ;;  %5533 = vst [vmem:[#allocation1 + $0x1] ss:$9 sm:$0xff] %v17704_v10  ;;  %v6689_v10 = vsel %vm3597_vm13, %v14821_v42, -inf }
 0xad9   : > { %6558 = vmatpush.bf16.xpose.msra.mxu3 %v6549_v33  ;;  %5534 = vst [vmem:[#allocation1 + $0x2] ss:$9 sm:$0xff] %v17705_v41  ;;  %v17714_v41 = vrot.slane %v17713_v15, 1 }
 0xada   : > { %5535 = vst [vmem:[#allocation1 + $0x3] ss:$9 sm:$0xff] %v17706_v46  ;;  %v14986_v46 = vpop.f32.mrf.mxu0 }
 0xadb   : > { %5536 = vst [vmem:[#allocation1 + $0x4] ss:$9 sm:$0xff] %v17707_v32  ;;  %v6704_v32 = vsel %vm3597_vm13, %v14870_v51, -inf }
 0xadf   : > { %v14996_v16 = vpop.f32.mrf.mxu2 }
 0xae0   : > { %9982 = vmatmul.msk.bf16.vlgmr.msra.gmra.mxu3 %vm2988_vm12, %v14584_v28  ;;  %v6698_v28 = vsel %vm3597_vm13, %v14823_v20, -inf }
 0xae2   : > { %v14959_v37 = vld [vmem:[#allocation1] sm:$0xff] }
 0xae3   : > { %5538 = vst [vmem:[#allocation1] ss:$9 sm:$0xff] %v17708_v23  ;;  %v17715_v23 = vrot.slane %v17713_v15, 2 }
 0xae4   : > { %5539 = vst [vmem:[#allocation1 + $0x1] ss:$9 sm:$0xff] %v17709_v24  ;;  %v17716_v24 = vrot.slane %v17713_v15, 3 }
 0xae5   : > { %5540 = vst [vmem:[#allocation1 + $0x2] ss:$9 sm:$0xff] %v17710_v18  ;;  %v17717_v18 = vrot.slane %v17713_v15, 4 }
 0xae6   : > { %5541 = vst [vmem:[#allocation1 + $0x3] ss:$9 sm:$0xff] %v17711_v21  ;;  %v6214_v21 = vpop.f32.mrf.mxu3 }
 0xae7   : > { %5542 = vst [vmem:[#allocation1 + $0x4] ss:$9 sm:$0xff] %v17712_v56  ;;  %v6243_v56 = vpop.f32.mrf.mxu0 }
 0xaea   : > { %6699 = vmax.xlane.f32.xlu1 %v6698_v28 }
 0xaee   : > { %v14977_v39 = vld [vmem:[#allocation1] sm:$0xff] }
 0xaef   : > { %v6660_v12 = vpop.permute.xlu2 %6659  ;;  %v6602_v5 = vpop.permute.xlu1 %6601  ;;  %5544 = vst [vmem:[#allocation1] ss:$9 sm:$0xff] %v17713_v15 }
 0xaf0   : > { %v6665_v33 = vsel %vm2988_vm12, %v6660_v12, 0  ;;  %v6607_v2 = vsel %vm2988_vm12, %v6602_v5, 0  ;;  %5545 = vst [vmem:[#allocation1 + $0x1] ss:$9 sm:$0xff] %v17714_v41  ;;  %v5723_v12 = vpack.c.bf16 %v14905_v0, %v14905_v0  ;;  %v17718_v5 = vrot.slane %v17713_v15, 5 }
 0xaf1   : > { %6674 = vmatpush.bf16.xpose.msrb.mxu3 %v6665_v33  ;;  %6690 = vmax.xlane.f32.xlu0 %v6689_v10  ;;  %5546 = vst [vmem:[#allocation1 + $0x2] ss:$9 sm:$0xff] %v17715_v23  ;;  %v17719_v10 = vrot.slane %v17713_v15, 6  ;;  %v15021_v21 = vpop.f32.mrf.mxu0 }
 0xaf2   : > { %6616 = vmatpush.bf16.xpose.msrb.mxu1 %v6607_v2  ;;  %6705 = vmax.xlane.f32.xlu1 %v6704_v32  ;;  %5547 = vst [vmem:[#allocation1 + $0x3] ss:$9 sm:$0xff] %v17716_v24  ;;  %v17721_v2 = vld [vmem:[#allocation63_spill] sm:$0xff]  ;;  %v7137_v41 = vunpack.c.l.b16 %v5723_v12  ;;  %v6301_v32 = vpop.f32.mrf.mxu2 }
 0xaf3   : > { %5548 = vst [vmem:[#allocation1 + $0x4] ss:$9 sm:$0xff] %v17717_v18  ;;  %v17722_v0 = vrot.slane %v17721_v2, 1  ;;  %v5724_v18 = vpack.c.bf16 %v14923_v26, %v14923_v26  ;;  %v17724_v12 = vrot.slane %v17721_v2, 2  ;;  %v17726_v26 = vrot.slane %v17721_v2, 4 }
 0xaf4   : > { %v7138_v24 = vpack.c.b16 %v7137_v41, %v7137_v41  ;;  %17723 = vst [vmem:[#allocation21_spill] sm:$0xff] %v15021_v21  ;;  %v17729_v32 = vrot.slane %v17721_v2, 7 }
 0xaf8   : > { %9986 = vmatmul.msk.bf16.vlgmr.msrb.gmra.mxu3 %vm2988_vm12, %v14543_v27  ;;  %v17720_v27 = vrot.slane %v17713_v15, 7 }
 0xaf9   : > { %9984 = vmatmul.msk.bf16.vlgmr.msrb.gmra.mxu1 %vm2988_vm12, %v14533_v62  ;;  %v6692_v62 = vsel %vm3597_vm13, %v14830_v60, -inf }
 0xafa   : > { %v5549_v28 = vld [vmem:[#allocation1] sm:$0xff] }
 0xafb   : > { %v6631_v40 = vpop.permute.xlu0 %6630  ;;  %5550 = vst [vmem:[#allocation1] ss:$9 sm:$0xff] %v17718_v5  ;;  %v5728_v23 = vpack.c.bf16 %v5549_v28, %v5549_v28  ;;  %v17725_v28 = vrot.slane %v17721_v2, 3 }
 0xafc   : > { %v6636_v33 = vsel %vm2988_vm12, %v6631_v40, 0  ;;  %5551 = vst [vmem:[#allocation1 + $0x1] ss:$9 sm:$0xff] %v17719_v10  ;;  %v7161_v40 = vunpack.c.l.b16 %v5724_v18  ;;  %v17728_v10 = vrot.slane %v17721_v2, 6  ;;  %v5726_v18 = vpack.c.bf16 %v14959_v37, %v14959_v37 }
 0xafd   : > { %6645 = vmatpush.bf16.xpose.msrb.mxu2 %v6636_v33  ;;  %5552 = vst [vmem:[#allocation1 + $0x2] ss:$9 sm:$0xff] %v17720_v27  ;;  %v7257_v15 = vunpack.c.l.b16 %v5728_v23  ;;  %v5725_v27 = vpack.c.bf16 %v14943_v13, %v14943_v13  ;;  %v17730_v23 = vld [vmem:[#allocation65_spill] sm:$0xff] }
 0xafe   : > { %5553 = vst [vmem:[#allocation1 + $0x3] ss:$9 sm:$0xff] %v17721_v2  ;;  %v7162_v33 = vpack.c.b16 %v7161_v40, %v7161_v40  ;;  %v17732_v13 = vrot.slane %v17730_v23, 2  ;;  %v17734_v37 = vrot.slane %v17730_v23, 4 }
 0xaff   : > { %6693 = vmax.xlane.f32.xlu2 %v6692_v62  ;;  %5554 = vst [vmem:[#allocation1 + $0x4] ss:$9 sm:$0xff] %v17722_v0  ;;  %v7258_v5 = vpack.c.b16 %v7257_v15, %v7257_v15  ;;  %v6359_v62 = vpop.f32.mrf.mxu0  ;;  %v7185_v41 = vunpack.c.l.b16 %v5725_v27  ;;  %v17731_v15 = vrot.slane %v17730_v23, 1  ;;  %v17737_v27 = vrot.slane %v17730_v23, 7 }
 0xb00   : > { %v17738_v62 = vld [vmem:[#allocation66_spill] sm:$0xff] }
 0xb03   : > { %v15048_v40 = vpop.f32.mrf.mxu3 }
 0xb04   : > { %9985 = vmatmul.msk.bf16.vlgmr.msrb.gmra.mxu2 %vm2988_vm12, %v14591_v22  ;;  %v17727_v22 = vrot.slane %v17721_v2, 5  ;;  %v7209_v2 = vunpack.c.l.b16 %v5726_v18 }
 0xb05   : > { %7139 = vrot.lane.b32.xlu0 %v7138_v24, %s10901_s8  ;;  %v7186_v24 = vpack.c.b16 %v7185_v41, %v7185_v41 }
 0xb06   : > { %v15023_v56 = vld [vmem:[#allocation1] sm:$0xff] }
 0xb07   : > { %5556 = vst [vmem:[#allocation1] ss:$9 sm:$0xff] %v17724_v12  ;;  %v17733_v12 = vrot.slane %v17730_v23, 3 }
 0xb08   : > { %5557 = vst [vmem:[#allocation1 + $0x1] ss:$9 sm:$0xff] %v17725_v28 }
 0xb09   : > { %5558 = vst [vmem:[#allocation1 + $0x2] ss:$9 sm:$0xff] %v17726_v26 }
 0xb0a   : > { %5559 = vst [vmem:[#allocation1 + $0x3] ss:$9 sm:$0xff] %v17727_v22 }
 0xb0b   : > { %7259 = vrot.lane.b32.xlu1 %v7258_v5, %s10901_s8  ;;  %5560 = vst [vmem:[#allocation1 + $0x4] ss:$9 sm:$0xff] %v17728_v10  ;;  %v7210_v5 = vpack.c.b16 %v7209_v2, %v7209_v2  ;;  %v6330_v26 = vpop.f32.mrf.mxu3  ;;  %v17736_v10 = vrot.slane %v17730_v23, 6  ;;  %v17742_v2 = vrot.slane %v17738_v62, 3 }
 0xb0c   : > { %v17744_v26 = vrot.slane %v17738_v62, 5 }
 0xb0d   : > { %7163 = vrot.lane.b32.xlu0 %v7162_v33, %s10901_s8  ;;  %v17735_v33 = vrot.slane %v17730_v23, 5 }
 0xb12   : > { %v15039_v0 = vld [vmem:[#allocation1] sm:$0xff] }
 0xb13   : > { %5562 = vst [vmem:[#allocation1] ss:$9 sm:$0xff] %v17729_v32 }
 0xb14   : > { %5563 = vst [vmem:[#allocation1 + $0x1] ss:$9 sm:$0xff] %v17730_v23 }
 0xb15   : > { %5564 = vst [vmem:[#allocation1 + $0x2] ss:$9 sm:$0xff] %v17731_v15  ;;  %v15055_v28 = vpop.f32.mrf.mxu1 }
 0xb16   : > { %5565 = vst [vmem:[#allocation1 + $0x3] ss:$9 sm:$0xff] %v17732_v13  ;;  %v17740_v13 = vrot.slane %v17738_v62, 1 }
 0xb17   : > { %7187 = vrot.lane.b32.xlu2 %v7186_v24, %s10901_s8  ;;  %5566 = vst [vmem:[#allocation1 + $0x4] ss:$9 sm:$0xff] %v17733_v12  ;;  %v17741_v12 = vrot.slane %v17738_v62, 2 }
 0xb1a   : > { %v15071_v24 = vpop.xlane.xlu1 %6687 }
 0xb1b   : > { %v15069_v32 = vpop.f32.mrf.mxu3 }
 0xb1d   : > { %v6388_v41 = vpop.f32.mrf.mxu1 }
 0xb1e   : > { %v15057_v22 = vld [vmem:[#allocation1] sm:$0xff] }
 0xb1f   : > { %7211 = vrot.lane.b32.xlu2 %v7210_v5, %s10901_s8  ;;  %5568 = vst [vmem:[#allocation1] ss:$9 sm:$0xff] %v17734_v37  ;;  %v17743_v5 = vrot.slane %v17738_v62, 4 }
 0xb20   : > { %5569 = vst [vmem:[#allocation1 + $0x1] ss:$9 sm:$0xff] %v17735_v33 }
 0xb21   : > { %5570 = vst [vmem:[#allocation1 + $0x2] ss:$9 sm:$0xff] %v17736_v10 }
 0xb22   : > { %5571 = vst [vmem:[#allocation1 + $0x3] ss:$9 sm:$0xff] %v17737_v27 }
 0xb23   : > { %5572 = vst [vmem:[#allocation1 + $0x4] ss:$9 sm:$0xff] %v17738_v62  ;;  %v6446_v23 = vpop.f32.mrf.mxu3 }
 0xb24   : > { %v17745_v23 = vrot.slane %v17738_v62, 6 }
 0xb26   : > { %v15085_v37 = vpop.xlane.xlu0 %6681 }
 0xb27   : > { %v15073_v18 = vpop.f32.mrf.mxu2 }
 0xb28   : > { %17739 = vst [vmem:[#allocation22_spill] sm:$0xff] %v15073_v18 }
 0xb2a   : > { %v5573_v15 = vld [vmem:[#allocation1] sm:$0xff] }
 0xb2b   : > { %5574 = vst [vmem:[#allocation1] ss:$9 sm:$0xff] %v17740_v13  ;;  %v6713_v13 = vsel %vm3597_vm13, %v14891_v19, -inf  ;;  %v5732_v1 = vpack.c.bf16 %v5573_v15, %v5573_v15 }
 0xb2c   : > { %5575 = vst [vmem:[#allocation1 + $0x1] ss:$9 sm:$0xff] %v17741_v12  ;;  %v6695_v12 = vsel %vm3597_vm13, %v14842_v36, -inf }
 0xb2d   : > { %5576 = vst [vmem:[#allocation1 + $0x2] ss:$9 sm:$0xff] %v17742_v2  ;;  %v7353_v15 = vunpack.c.l.b16 %v5732_v1  ;;  %v5731_v1 = vpack.c.bf16 %v15057_v22, %v15057_v22 }
 0xb2e   : > { %5577 = vst [vmem:[#allocation1 + $0x3] ss:$9 sm:$0xff] %v17743_v5  ;;  %v17746_v5 = vrot.slane %v17738_v62, 7  ;;  %v6707_v62 = vsel %vm3597_vm13, %v14893_v54, -inf }
 0xb2f   : > { %5578 = vst [vmem:[#allocation1 + $0x4] ss:$9 sm:$0xff] %v17744_v26  ;;  %v6417_v27 = vpop.f32.mrf.mxu2 }
 0xb31   : > { %v15087_v33 = vpop.xlane.xlu2 %6684 }
 0xb32   : > { %v7116_v10 = vpop.permute.xlu1 %7115 }
 0xb33   : > { %v7121_v41 = vand.u32 %v7116_v10, %v13194_v58 }
 0xb35   : > { %7130 = vmatpush.bf16.msra.mxu2 %v7121_v41  ;;  %6714 = vmax.xlane.f32.xlu1 %v6713_v13 }
 0xb36   : > { %v5579_v2 = vld [vmem:[#allocation1] sm:$0xff] }
 0xb37   : > { %6696 = vmax.xlane.f32.xlu0 %v6695_v12  ;;  %5580 = vst [vmem:[#allocation1] ss:$9 sm:$0xff] %v17745_v23  ;;  %v17749_v12 = vrot.slane %v17747_v6, 2  ;;  %v5733_v14 = vpack.c.bf16 %v5579_v2, %v5579_v2 }
 0xb38   : > { %5581 = vst [vmem:[#allocation1 + $0x1] ss:$9 sm:$0xff] %v17746_v5 }
 0xb39   : > { %v7092_v26 = vpop.permute.xlu2 %7091  ;;  %v7068_v27 = vpop.permute.xlu0 %7067  ;;  %5582 = vst [vmem:[#allocation1 + $0x2] ss:$9 sm:$0xff] %v17747_v6  ;;  %v7377_v38 = vunpack.c.l.b16 %v5733_v14 }
 0xb3a   : > { %v7097_v10 = vand.u32 %v7092_v26, %v13194_v58  ;;  %v7073_v41 = vand.u32 %v7068_v27, %v13194_v58  ;;  %v15101_v13 = vpop.f32.mrf.mxu0  ;;  %5583 = vst [vmem:[#allocation1 + $0x3] ss:$9 sm:$0xff] %v17748_v55  ;;  %v17750_v27 = vrot.slane %v17747_v6, 3  ;;  %v17751_v55 = vrot.slane %v17747_v6, 4 }
 0xb3b   : > { %5584 = vst [vmem:[#allocation1 + $0x4] ss:$9 sm:$0xff] %v17749_v12  ;;  %v6701_v12 = vsel %vm3597_vm13, %v14857_v25, -inf  ;;  %v7378_v14 = vpack.c.b16 %v7377_v38, %v7377_v38 }
 0xb3c   : > { %7106 = vmatpush.bf16.msra.mxu1 %v7097_v10  ;;  %7082 = vmatpush.bf16.msrb.mxu0 %v7073_v41  ;;  %v17752_v10 = vrot.slane %v17747_v6, 5  ;;  %v17753_v41 = vrot.slane %v17747_v6, 6 }
 0xb3f   : > { %6708 = vmax.xlane.f32.xlu0 %v6707_v62  ;;  %v15109_v23 = vpop.f32.mrf.mxu2 }
 0xb42   : > { %v6475_v5 = vpop.f32.mrf.mxu0  ;;  %v15111_v26 = vld [vmem:[#allocation1] sm:$0xff] }
 0xb43   : > { %5586 = vst [vmem:[#allocation1] ss:$9 sm:$0xff] %v17750_v27  ;;  %v17754_v5 = vrot.slane %v17747_v6, 7  ;;  %v5729_v27 = vpack.c.bf16 %v15023_v56, %v15023_v56 }
 0xb44   : > { %5587 = vst [vmem:[#allocation1 + $0x1] ss:$9 sm:$0xff] %v17751_v55  ;;  %v7354_v55 = vpack.c.b16 %v7353_v15, %v7353_v15 }
 0xb45   : > { %v15117_v52 = vpop.f32.mrf.mxu1  ;;  %5588 = vst [vmem:[#allocation1 + $0x2] ss:$9 sm:$0xff] %v17752_v10  ;;  %v7281_v31 = vunpack.c.l.b16 %v5729_v27 }
 0xb46   : > { %5589 = vst [vmem:[#allocation1 + $0x3] ss:$9 sm:$0xff] %v17753_v41  ;;  %v17755_v41 = vld [vmem:[#allocation68_spill] sm:$0xff] }
 0xb47   : > { %v6533_v62 = vpop.f32.mrf.mxu2  ;;  %5590 = vst [vmem:[#allocation1 + $0x4] ss:$9 sm:$0xff] %v17754_v5  ;;  %v7282_v6 = vpack.c.b16 %v7281_v31, %v7281_v31  ;;  %v17757_v56 = vrot.slane %v17755_v41, 2  ;;  %v17759_v2 = vrot.slane %v17755_v41, 4  ;;  %v7329_v5 = vunpack.c.l.b16 %v5731_v1 }
 0xb48   : > { %6702 = vmax.xlane.f32.xlu2 %v6701_v12  ;;  %v17756_v62 = vrot.slane %v17755_v41, 1  ;;  %v5727_v31 = vpack.c.bf16 %v14977_v39, %v14977_v39  ;;  %v17762_v38 = vrot.slane %v17755_v41, 7 }
 0xb49   : > { %v7330_v22 = vpack.c.b16 %v7329_v5, %v7329_v5 }
 0xb4a   : > { %v7233_v27 = vunpack.c.l.b16 %v5727_v31 }
 0xb4c   : > { %v7234_v1 = vpack.c.b16 %v7233_v27, %v7233_v27 }
 0xb4d   : > { %v6504_v45 = vpop.f32.mrf.mxu1 }
 0xb4e   : > { %7355 = vrot.lane.b32.xlu1 %v7354_v55, %s10901_s8  ;;  %v15130_v10 = vld [vmem:[#allocation1] sm:$0xff]  ;;  %v17758_v45 = vrot.slane %v17755_v41, 3 }
 0xb4f   : > { %5592 = vst [vmem:[#allocation1] ss:$9 sm:$0xff] %v17755_v41 }
 0xb50   : > { %5593 = vst [vmem:[#allocation1 + $0x1] ss:$9 sm:$0xff] %v17756_v62  ;;  %v17760_v62 = vrot.slane %v17755_v41, 5 }
 0xb51   : > { %v15137_v12 = vpop.f32.mrf.mxu0  ;;  %5594 = vst [vmem:[#allocation1 + $0x2] ss:$9 sm:$0xff] %v17757_v56  ;;  %v17763_v56 = vld [vmem:[#allocation69_spill] sm:$0xff] }
 0xb52   : > { %5595 = vst [vmem:[#allocation1 + $0x3] ss:$9 sm:$0xff] %v17758_v45  ;;  %v17764_v39 = vrot.slane %v17763_v56, 1  ;;  %v17766_v5 = vrot.slane %v17763_v56, 3  ;;  %v17768_v31 = vrot.slane %v17763_v56, 5 }
 0xb53   : > { %7283 = vrot.lane.b32.xlu0 %v7282_v6, %s10901_s8  ;;  %5596 = vst [vmem:[#allocation1 + $0x4] ss:$9 sm:$0xff] %v17759_v2  ;;  %v17761_v6 = vrot.slane %v17755_v41, 6  ;;  %v17767_v41 = vrot.slane %v17763_v56, 4 }
 0xb56   : > { %7379 = vrot.lane.b32.xlu1 %v7378_v14, %s10901_s8  ;;  %v17765_v14 = vrot.slane %v17763_v56, 2 }
 0xb59   : > { %v6591_v15 = vpop.f32.mrf.mxu0 }
 0xb5a   : > { %v15149_v55 = vld [vmem:[#allocation1] sm:$0xff]  ;;  %v17769_v15 = vrot.slane %v17763_v56, 6 }
 0xb5b   : > { %7331 = vrot.lane.b32.xlu0 %v7330_v22, %s10901_s8  ;;  %5598 = vst [vmem:[#allocation1] ss:$9 sm:$0xff] %v17760_v62 }
 0xb5c   : > { %5599 = vst [vmem:[#allocation1 + $0x1] ss:$9 sm:$0xff] %v17761_v6 }
 0xb5d   : > { %5600 = vst [vmem:[#allocation1 + $0x2] ss:$9 sm:$0xff] %v17762_v38  ;;  %v17770_v38 = vrot.slane %v17763_v56, 7 }
 0xb5e   : > { %5601 = vst [vmem:[#allocation1 + $0x3] ss:$9 sm:$0xff] %v17763_v56 }
 0xb5f   : > { %5602 = vst [vmem:[#allocation1 + $0x4] ss:$9 sm:$0xff] %v17764_v39 }
 0xb60   : > { %7235 = vrot.lane.b32.xlu2 %v7234_v1, %s10901_s8  ;;  %v17771_v1 = vrot.slane %v12993_v63, 1 }
 0xb63   : > { %v15162_v45 = vpop.f32.mrf.mxu3 }
 0xb64   : > { %v15176_v27 = vpop.xlane.xlu0 %6690 }
 0xb66   : > { %v15164_v2 = vld [vmem:[#allocation1] sm:$0xff] }
 0xb67   : > { %5604 = vst [vmem:[#allocation1] ss:$9 sm:$0xff] %v17765_v14  ;;  %v17772_v14 = vrot.slane %v12993_v63, 2 }
 0xb68   : > { %5605 = vst [vmem:[#allocation1 + $0x1] ss:$9 sm:$0xff] %v17766_v5 }
 0xb69   : > { %5606 = vst [vmem:[#allocation1 + $0x2] ss:$9 sm:$0xff] %v17767_v41  ;;  %v17773_v41 = vrot.slane %v12993_v63, 3 }
 0xb6a   : > { %5607 = vst [vmem:[#allocation1 + $0x3] ss:$9 sm:$0xff] %v17768_v31 }
 0xb6b   : > { %v6562_v22 = vpop.f32.mrf.mxu3  ;;  %5608 = vst [vmem:[#allocation1 + $0x4] ss:$9 sm:$0xff] %v17769_v15 }
 0xb72   : > { %v15178_v62 = vpop.xlane.xlu2 %6693  ;;  %v15180_v6 = vld [vmem:[#allocation1] sm:$0xff] }
 0xb73   : > { %5610 = vst [vmem:[#allocation1] ss:$9 sm:$0xff] %v17770_v38 }
 0xb74   : > { %5611 = vst [vmem:[#allocation1 + $0x1] ss:$9 sm:$0xff] %v12993_v63 }
 0xb75   : > { %5612 = vst [vmem:[#allocation1 + $0x2] ss:$9 sm:$0xff] %v17771_v1 }
 0xb76   : > { %v15187_v39 = vpop.f32.mrf.mxu1  ;;  %5613 = vst [vmem:[#allocation1 + $0x3] ss:$9 sm:$0xff] %v17772_v14  ;;  %v6722_v14 = vsel %vm3597_vm13, %v14965_v57, -inf }
 0xb77   : > { %v7140_v5 = vpop.permute.xlu0 %7139  ;;  %5614 = vst [vmem:[#allocation1 + $0x4] ss:$9 sm:$0xff] %v17773_v41 }
 0xb78   : > { %v7145_v31 = vand.u32 %v7140_v5, %v13194_v58  ;;  %v17775_v5 = vrot.slane %v12993_v63, 5 }
 0xb7a   : > { %v7188_v22 = vpop.permute.xlu2 %7187  ;;  %7154 = vmatpush.bf16.msra.mxu3 %v7145_v31  ;;  %v17776_v31 = vrot.slane %v12993_v63, 6 }
 0xb7b   : > { %v7193_v56 = vand.u32 %v7188_v22, %v13194_v58  ;;  %v15195_v15 = vpop.f32.mrf.mxu3 }
 0xb7d   : > { %7202 = vmatpush.bf16.msrb.mxu1 %v7193_v56  ;;  %v17777_v56 = vrot.slane %v12993_v63, 7 }
 0xb7e   : > { %v6620_v38 = vpop.f32.mrf.mxu1  ;;  %v15197_v1 = vld [vmem:[#allocation1] sm:$0xff] }
 0xb7f   : > { %v7164_v29 = vpop.permute.xlu0 %7163  ;;  %5616 = vst [vmem:[#allocation1] ss:$9 sm:$0xff] %v17774_v34  ;;  %v6716_v34 = vsel %vm3597_vm13, %v14938_v30, -inf }
 0xb80   : > { %v7169_v41 = vand.u32 %v7164_v29, %v13194_v58  ;;  %6723 = vmax.xlane.f32.xlu1 %v6722_v14  ;;  %5617 = vst [vmem:[#allocation1 + $0x1] ss:$9 sm:$0xff] %v17775_v5  ;;  %v6728_v14 = vsel %vm3597_vm13, %v14986_v46, -inf  ;;  %v17780_v5 = vrot.slane %v17778_v61, 2 }
 0xb81   : > { %5618 = vst [vmem:[#allocation1 + $0x2] ss:$9 sm:$0xff] %v17776_v31  ;;  %v17781_v31 = vrot.slane %v17778_v61, 3 }
 0xb82   : > { %v7212_v22 = vpop.permute.xlu2 %7211  ;;  %7178 = vmatpush.bf16.msra.mxu0 %v7169_v41  ;;  %5619 = vst [vmem:[#allocation1 + $0x3] ss:$9 sm:$0xff] %v17777_v56  ;;  %v6710_v41 = vsel %vm3597_vm13, %v14897_v8, -inf }
 0xb83   : > { %v7217_v38 = vand.u32 %v7212_v22, %v13194_v58  ;;  %v6678_v47 = vpop.f32.mrf.mxu3  ;;  %5620 = vst [vmem:[#allocation1 + $0x4] ss:$9 sm:$0xff] %v17778_v61  ;;  %v17782_v22 = vrot.slane %v17778_v61, 4 }
 0xb84   : > { %v17779_v47 = vrot.slane %v17778_v61, 1 }
 0xb85   : > { %7226 = vmatpush.bf16.msrb.mxu2 %v7217_v38  ;;  %6717 = vmax.xlane.f32.xlu0 %v6716_v34  ;;  %v5734_v38 = vpack.c.bf16 %v15111_v26, %v15111_v26  ;;  %v17783_v34 = vrot.slane %v17778_v61, 5  ;;  %v17786_v26 = vld [vmem:[#allocation71_spill] sm:$0xff] }
 0xb87   : > { %v15214_v29 = vpop.f32.mrf.mxu2 }
 0xb88   : > { %6729 = vmax.xlane.f32.xlu1 %v6728_v14  ;;  %v7401_v14 = vunpack.c.l.b16 %v5734_v38 }
 0xb89   : > { %6711 = vmax.xlane.f32.xlu2 %v6710_v41 }
 0xb8a   : > { %v15220_v63 = vld [vmem:[#allocation1] sm:$0xff] }
 0xb8b   : > { %5622 = vst [vmem:[#allocation1] ss:$9 sm:$0xff] %v17779_v47  ;;  %v7402_v47 = vpack.c.b16 %v7401_v14, %v7401_v14 }
 0xb8c   : > { %5623 = vst [vmem:[#allocation1 + $0x1] ss:$9 sm:$0xff] %v17780_v5  ;;  %v5730_v5 = vpack.c.bf16 %v15039_v0, %v15039_v0  ;;  %v17788_v0 = vrot.slane %v17786_v26, 2 }
 0xb8d   : > { %5624 = vst [vmem:[#allocation1 + $0x2] ss:$9 sm:$0xff] %v17781_v31  ;;  %v5736_v31 = vpack.c.bf16 %v15149_v55, %v15149_v55 }
 0xb8e   : > { %5625 = vst [vmem:[#allocation1 + $0x3] ss:$9 sm:$0xff] %v17782_v22  ;;  %v17785_v22 = vrot.slane %v17778_v61, 7  ;;  %v7305_v38 = vunpack.c.l.b16 %v5730_v5  ;;  %v17789_v61 = vrot.slane %v17786_v26, 3  ;;  %v17791_v5 = vrot.slane %v17786_v26, 5 }
 0xb8f   : > { %v6649_v56 = vpop.f32.mrf.mxu2  ;;  %5626 = vst [vmem:[#allocation1 + $0x4] ss:$9 sm:$0xff] %v17783_v34  ;;  %v7449_v34 = vunpack.c.l.b16 %v5736_v31  ;;  %v17792_v31 = vrot.slane %v17786_v26, 6 }
 0xb90   : > { %v17787_v56 = vrot.slane %v17786_v26, 1  ;;  %v7306_v14 = vpack.c.b16 %v7305_v38, %v7305_v38  ;;  %v17794_v38 = vrot.slane %v13061_v35, 1 }
 0xb91   : > { %v7450_v55 = vpack.c.b16 %v7449_v34, %v7449_v34  ;;  %v17795_v34 = vrot.slane %v13061_v35, 2 }
 0xb96   : > { %v15234_v41 = vld [vmem:[#allocation1] sm:$0xff] }
 0xb97   : > { %5628 = vst [vmem:[#allocation1] ss:$9 sm:$0xff] %v17784_v48 }
 0xb98   : > { %5629 = vst [vmem:[#allocation1 + $0x1] ss:$9 sm:$0xff] %v17785_v22  ;;  %v17793_v22 = vrot.slane %v17786_v26, 7 }
 0xb99   : > { %7403 = vrot.lane.b32.xlu0 %v7402_v47, %s10901_s8  ;;  %5630 = vst [vmem:[#allocation1 + $0x2] ss:$9 sm:$0xff] %v17786_v26  ;;  %v17790_v47 = vrot.slane %v17786_v26, 4  ;;  %v6778_v26 = vsub.f32 %v14779_v3, %v15071_v24  ;;  %v17801_v3 = vrot.slane %v13091_v53, 1 }
 0xb9a   : > { %5631 = vst [vmem:[#allocation1 + $0x3] ss:$9 sm:$0xff] %v17787_v56 }
 0xb9b   : > { %5632 = vst [vmem:[#allocation1 + $0x4] ss:$9 sm:$0xff] %v17788_v0  ;;  %v17796_v0 = vrot.slane %v13061_v35, 3 }
 0xba1   : > { %7307 = vrot.lane.b32.xlu2 %v7306_v14, %s10901_s8  ;;  %7451 = vrot.lane.b32.xlu1 %v7450_v55, %s10901_s8  ;;  %v17797_v14 = vrot.slane %v13061_v35, 4  ;;  %v6776_v55 = vsub.f32 %v14807_v17, %v15085_v37  ;;  %v6725_v17 = vsel %vm3597_vm13, %v14975_v50, -inf }
 0xba2   : > { %v15252_v48 = vld [vmem:[#allocation1] sm:$0xff] }
 0xba3   : > { %5634 = vst [vmem:[#allocation1] ss:$9 sm:$0xff] %v17789_v61 }
 0xba4   : > { %5635 = vst [vmem:[#allocation1 + $0x1] ss:$9 sm:$0xff] %v17790_v47 }
 0xba5   : > { %5636 = vst [vmem:[#allocation1 + $0x2] ss:$9 sm:$0xff] %v17791_v5  ;;  %v17798_v5 = vrot.slane %v13061_v35, 5 }
 0xba6   : > { %5637 = vst [vmem:[#allocation1 + $0x3] ss:$9 sm:$0xff] %v17792_v31  ;;  %v6812_v31 = vmul.f32 1.442695, %v6778_v26  ;;  %v17802_v26 = vrot.slane %v13091_v53, 2 }
 0xba7   : > { %5638 = vst [vmem:[#allocation1 + $0x4] ss:$9 sm:$0xff] %v17793_v22  ;;  %v17799_v22 = vrot.slane %v13061_v35, 6 }
 0xba8   : > { %10427 = vpow2.f32 %v6812_v31  ;;  %v17804_v31 = vrot.slane %v13091_v53, 4 }
 0xbae   : > { %v15264_v56 = vld [vmem:[#allocation1] sm:$0xff] }
 0xbaf   : > { %5640 = vst [vmem:[#allocation1] ss:$9 sm:$0xff] %v13061_v35 }
 0xbb0   : > { %5641 = vst [vmem:[#allocation1 + $0x1] ss:$9 sm:$0xff] %v17794_v38  ;;  %v6808_v38 = vmul.f32 1.442695, %v6776_v55  ;;  %v17803_v55 = vrot.slane %v13091_v53, 3 }
 0xbb1   : > { %5642 = vst [vmem:[#allocation1 + $0x2] ss:$9 sm:$0xff] %v17795_v34  ;;  %v17800_v34 = vrot.slane %v13061_v35, 7 }
 0xbb2   : > { %5643 = vst [vmem:[#allocation1 + $0x3] ss:$9 sm:$0xff] %v17796_v0  ;;  %10429 = vpow2.f32 %v6808_v38  ;;  %v15295_v0 = vpop.eup %10427 }
 0xbb3   : > { %5644 = vst [vmem:[#allocation1 + $0x4] ss:$9 sm:$0xff] %v17797_v14  ;;  %v6878_v38 = vsel %vm3597_vm13, %v15295_v0, 0.0 }
 0xbb8   : > { %v15299_v35 = vpop.eup %10429 }
 0xbba   : > { %v15279_v61 = vld [vmem:[#allocation1] sm:$0xff] }
 0xbbb   : > { %v15281_v47 = vpop.xlane.xlu2 %6702  ;;  %5646 = vst [vmem:[#allocation1] ss:$9 sm:$0xff] %v17798_v5  ;;  %v6719_v5 = vsel %vm3597_vm13, %v14918_v43, -inf }
 0xbbc   : > { %5647 = vst [vmem:[#allocation1 + $0x1] ss:$9 sm:$0xff] %v17799_v22  ;;  %v6872_v22 = vsel %vm3597_vm13, %v15299_v35, 0.0 }
 0xbbd   : > { %5648 = vst [vmem:[#allocation1 + $0x2] ss:$9 sm:$0xff] %v17800_v34  ;;  %v17805_v34 = vrot.slane %v13091_v53, 5 }
 0xbbe   : > { %5649 = vst [vmem:[#allocation1 + $0x3] ss:$9 sm:$0xff] %v13091_v53 }
 0xbbf   : > { %5650 = vst [vmem:[#allocation1 + $0x4] ss:$9 sm:$0xff] %v17801_v3  ;;  %v17806_v3 = vrot.slane %v13091_v53, 6 }
 0xbc3   : > { %v7236_v24 = vpop.permute.xlu2 %7235  ;;  %6726 = vmax.xlane.f32.xlu0 %v6725_v17  ;;  %v6780_v17 = vsub.f32 %v14830_v60, %v15178_v62  ;;  %v17809_v60 = vrot.slane %v13112_v49, 2  ;;  %v17810_v62 = vrot.slane %v13112_v49, 3 }
 0xbc4   : > { %v7241_v37 = vand.u32 %v7236_v24, %v13194_v58  ;;  %v6731_v24 = vsel %vm3597_vm13, %v14955_v7, -inf }
 0xbc6   : > { %7250 = vmatpush.bf16.msrb.mxu3 %v7241_v37  ;;  %v15297_v14 = vld [vmem:[#allocation1] sm:$0xff]  ;;  %v6734_v37 = vsel %vm3597_vm13, %v14996_v16, -inf }
 0xbc7   : > { %5652 = vst [vmem:[#allocation1] ss:$9 sm:$0xff] %v17802_v26 }
 0xbc8   : > { %5653 = vst [vmem:[#allocation1 + $0x1] ss:$9 sm:$0xff] %v17803_v55  ;;  %v17807_v55 = vrot.slane %v13091_v53, 7  ;;  %v6737_v53 = vsel %vm3597_vm13, %v15048_v40, -inf }
 0xbc9   : > { %5654 = vst [vmem:[#allocation1 + $0x2] ss:$9 sm:$0xff] %v17804_v31  ;;  %v17808_v31 = vrot.slane %v13112_v49, 1 }
 0xbca   : > { %6720 = vmax.xlane.f32.xlu2 %v6719_v5  ;;  %5655 = vst [vmem:[#allocation1 + $0x3] ss:$9 sm:$0xff] %v17805_v34  ;;  %v6816_v5 = vmul.f32 1.442695, %v6780_v17  ;;  %v5738_v34 = vpack.c.bf16 %v15180_v6, %v15180_v6 }
 0xbcb   : > { %6873 = vadd.xlane.f32.xlu0 %v6872_v22  ;;  %6879 = vadd.xlane.f32.xlu1 %v6878_v38  ;;  %5656 = vst [vmem:[#allocation1 + $0x4] ss:$9 sm:$0xff] %v17806_v3  ;;  %v5735_v22 = vpack.c.bf16 %v15130_v10, %v15130_v10 }
 0xbcc   : > { %10431 = vpow2.f32 %v6816_v5  ;;  %v7497_v10 = vunpack.c.l.b16 %v5738_v34  ;;  %v17813_v5 = vrot.slane %v13112_v49, 6  ;;  %v17815_v34 = vrot.slane %v13132_v11, 1 }
 0xbcd   : > { %v7425_v38 = vunpack.c.l.b16 %v5735_v22 }
 0xbd2   : > { %v15323_v26 = vld [vmem:[#allocation1] sm:$0xff]  ;;  %v15342_v17 = vpop.eup %10431 }
 0xbd3   : > { %6732 = vmax.xlane.f32.xlu0 %v6731_v24  ;;  %6735 = vmax.xlane.f32.xlu1 %v6734_v37  ;;  %5658 = vst [vmem:[#allocation1] ss:$9 sm:$0xff] %v17807_v55  ;;  %v17811_v24 = vrot.slane %v13112_v49, 4  ;;  %v7426_v37 = vpack.c.b16 %v7425_v38, %v7425_v38  ;;  %v17812_v55 = vrot.slane %v13112_v49, 5  ;;  %v6884_v6 = vsel %vm3597_vm13, %v15342_v17, 0.0 }
 0xbd4   : > { %5659 = vst [vmem:[#allocation1 + $0x1] ss:$9 sm:$0xff] %v13112_v49 }
 0xbd5   : > { %5660 = vst [vmem:[#allocation1 + $0x2] ss:$9 sm:$0xff] %v17808_v31  ;;  %v17814_v31 = vrot.slane %v13112_v49, 7  ;;  %v17816_v49 = vrot.slane %v13132_v11, 2 }
 0xbd6   : > { %5661 = vst [vmem:[#allocation1 + $0x3] ss:$9 sm:$0xff] %v17809_v60  ;;  %v7498_v60 = vpack.c.b16 %v7497_v10, %v7497_v10  ;;  %v17819_v10 = vrot.slane %v13132_v11, 5 }
 0xbd7   : > { %5662 = vst [vmem:[#allocation1 + $0x4] ss:$9 sm:$0xff] %v17810_v62  ;;  %v5739_v62 = vpack.c.bf16 %v15197_v1, %v15197_v1  ;;  %v17817_v1 = vrot.slane %v13132_v11, 3 }
 0xbd9   : > { %v7521_v22 = vunpack.c.l.b16 %v5739_v62  ;;  %v17822_v62 = vrot.slane %v13132_v11, 7 }
 0xbdb   : > { %6738 = vmax.xlane.f32.xlu1 %v6737_v53  ;;  %v6740_v53 = vsel %vm3597_vm13, %v15021_v21, -inf }
 0xbde   : > { %v15340_v3 = vld [vmem:[#allocation1] sm:$0xff] }
 0xbdf   : > { %5664 = vst [vmem:[#allocation1] ss:$9 sm:$0xff] %v17811_v24  ;;  %v7522_v24 = vpack.c.b16 %v7521_v22, %v7521_v22  ;;  %v6777_v22 = vsub.f32 %v14749_v44, %v15087_v33 }
 0xbe0   : > { %5665 = vst [vmem:[#allocation1 + $0x1] ss:$9 sm:$0xff] %v17812_v55  ;;  %v17818_v55 = vrot.slane %v13132_v11, 4 }
 0xbe1   : > { %5666 = vst [vmem:[#allocation1 + $0x2] ss:$9 sm:$0xff] %v17813_v5  ;;  %v15376_v5 = vpop.xlane.xlu1 %6699 }
 0xbe2   : > { %7427 = vrot.lane.b32.xlu2 %v7426_v37, %s10901_s8  ;;  %5667 = vst [vmem:[#allocation1 + $0x3] ss:$9 sm:$0xff] %v17814_v31  ;;  %v5741_v37 = vpack.c.bf16 %v15234_v41, %v15234_v41  ;;  %v17821_v41 = vrot.slane %v13132_v11, 6 }
 0xbe3   : > { %6885 = vadd.xlane.f32.xlu1 %v6884_v6  ;;  %5668 = vst [vmem:[#allocation1 + $0x4] ss:$9 sm:$0xff] %v13132_v11 }
 0xbe4   : > { %v7569_v6 = vunpack.c.l.b16 %v5741_v37  ;;  %v6810_v37 = vmul.f32 1.442695, %v6777_v22 }
 0xbe6   : > { %v7570_v31 = vpack.c.b16 %v7569_v6, %v7569_v6  ;;  %10433 = vpow2.f32 %v6810_v37  ;;  %v17828_v6 = vrot.slane %v13160_v4, 5 }
 0xbe7   : > { %7499 = vrot.lane.b32.xlu0 %v7498_v60, %s10901_s8 }
 0xbea   : > { %v15361_v38 = vld [vmem:[#allocation1] sm:$0xff] }
 0xbeb   : > { %6741 = vmax.xlane.f32.xlu1 %v6740_v53  ;;  %5670 = vst [vmem:[#allocation1] ss:$9 sm:$0xff] %v17815_v34  ;;  %v15388_v53 = vpop.xlane.xlu1 %6705  ;;  %v5740_v34 = vpack.c.bf16 %v15220_v63, %v15220_v63  ;;  %v17827_v63 = vrot.slane %v13160_v4, 4 }
 0xbec   : > { %5671 = vst [vmem:[#allocation1 + $0x1] ss:$9 sm:$0xff] %v17816_v49  ;;  %v17823_v49 = vrot.slane %v13160_v4, 1 }
 0xbed   : > { %5672 = vst [vmem:[#allocation1 + $0x2] ss:$9 sm:$0xff] %v17817_v1  ;;  %v7545_v1 = vunpack.c.l.b16 %v5740_v34 }
 0xbee   : > { %5673 = vst [vmem:[#allocation1 + $0x3] ss:$9 sm:$0xff] %v17818_v55  ;;  %v6697_v55 = vpop.xlane.xlu0 %6696 }
 0xbef   : > { %7523 = vrot.lane.b32.xlu0 %v7522_v24, %s10901_s8  ;;  %5674 = vst [vmem:[#allocation1 + $0x4] ss:$9 sm:$0xff] %v17819_v10  ;;  %v17824_v24 = vrot.slane %v13160_v4, 2  ;;  %v7546_v44 = vpack.c.b16 %v7545_v1, %v7545_v1  ;;  %v17826_v10 = vrot.slane %v13160_v4, 3  ;;  %v5737_v1 = vpack.c.bf16 %v15164_v2, %v15164_v2 }
 0xbf3   : > { %v15396_v11 = vpop.permute.xlu1 %7259 }
 0xbf6   : > { %v15378_v60 = vld [vmem:[#allocation1] sm:$0xff] }
 0xbf7   : > { %17820 = vst [vmem:[#allocation23_spill] sm:$0xff] %v15378_v60  ;;  %7571 = vrot.lane.b32.xlu0 %v7570_v31, %s10901_s8  ;;  %v17829_v31 = vrot.slane %v13160_v4, 6  ;;  %v6749_v60 = vsel %vm3597_vm13, %v15069_v32, -inf }
 0xbf8   : > { %5676 = vst [vmem:[#allocation1] ss:$9 sm:$0xff] %v17821_v41  ;;  %v15409_v41 = vpop.eup %10433 }
 0xbf9   : > { %5677 = vst [vmem:[#allocation1 + $0x1] ss:$9 sm:$0xff] %v17822_v62  ;;  %v17830_v62 = vrot.slane %v13160_v4, 7  ;;  %v6875_v34 = vsel %vm3597_vm13, %v15409_v41, 0.0 }
 0xbfa   : > { %5678 = vst [vmem:[#allocation1 + $0x2] ss:$9 sm:$0xff] %v13160_v4  ;;  %v7473_v4 = vunpack.c.l.b16 %v5737_v1 }
 0xbfb   : > { %5679 = vst [vmem:[#allocation1 + $0x3] ss:$9 sm:$0xff] %v17823_v49  ;;  %v15413_v22 = vpop.xlane.xlu1 %6714  ;;  %v15417_v49 = vpop.xlane.xlu0 %6708 }
 0xbfc   : > { %5680 = vst [vmem:[#allocation1 + $0x4] ss:$9 sm:$0xff] %v17824_v24 }
 0xc03   : > { %v15398_v33 = vld [vmem:[#allocation1] sm:$0xff]  ;;  %v15419_v24 = vpop.permute.xlu1 %7355  ;;  %v15421_v37 = vpop.permute.xlu0 %7283 }
 0xc04   : > { %17825 = vst [vmem:[#allocation24_spill] sm:$0xff] %v15398_v33  ;;  %7547 = vrot.lane.b32.xlu1 %v7546_v44, %s10901_s8  ;;  %v6781_v44 = vsub.f32 %v14842_v36, %v6697_v55  ;;  %v5744_v36 = vpack.c.bf16 %v15279_v61, %v15279_v61  ;;  %v6783_v55 = vsub.f32 %v14857_v25, %v15281_v47  ;;  %v6743_v61 = vsel %vm3597_vm13, %v15055_v28, -inf }
 0xc05   : > { %5682 = vst [vmem:[#allocation1] ss:$9 sm:$0xff] %v17826_v10  ;;  %v6779_v33 = vsub.f32 %v14821_v42, %v15176_v27 }
 0xc06   : > { %5683 = vst [vmem:[#allocation1 + $0x1] ss:$9 sm:$0xff] %v17827_v63 }
 0xc07   : > { %5684 = vst [vmem:[#allocation1 + $0x2] ss:$9 sm:$0xff] %v17828_v6  ;;  %v6818_v6 = vmul.f32 1.442695, %v6781_v44 }
 0xc08   : > { %5685 = vst [vmem:[#allocation1 + $0x3] ss:$9 sm:$0xff] %v17829_v31  ;;  %v6746_v31 = vsel %vm3597_vm13, %v15073_v18, -inf }
 0xc09   : > { %5686 = vst [vmem:[#allocation1 + $0x4] ss:$9 sm:$0xff] %v17830_v62  ;;  %v7474_v62 = vpack.c.b16 %v7473_v4, %v7473_v4  ;;  %10435 = vpow2.f32 %v6818_v6  ;;  %v7641_v6 = vunpack.c.l.b16 %v5744_v36 }
 0xc0b   : > { %6876 = vadd.xlane.f32.xlu2 %v6875_v34  ;;  %v15426_v10 = vpop.permute.xlu1 %7379  ;;  %v15428_v63 = vpop.permute.xlu0 %7331 }
 0xc0f   : > { %v15437_v2 = vpop.eup %10435 }
 0xc10   : > { %v6887_v1 = vsel %vm3597_vm13, %v15437_v2, 0.0 }
 0xc13   : > { %v15433_v34 = vpop.xlane.xlu1 %6723  ;;  %v15435_v9 = vpop.xlane.xlu0 %6717 }
 0xc1b   : > { %v15445_v44 = vpop.xlane.xlu1 %6729  ;;  %v15447_v4 = vpop.permute.xlu0 %7403 }
 0xc21   : > { %6747 = vmax.xlane.f32.xlu0 %v6746_v31  ;;  %v6822_v31 = vmul.f32 1.442695, %v6783_v55  ;;  %v6814_v55 = vmul.f32 1.442695, %v6779_v33 }
 0xc23   : > { %7475 = vrot.lane.b32.xlu2 %v7474_v62, %s10901_s8  ;;  %v7642_v62 = vpack.c.b16 %v7641_v6, %v7641_v6  ;;  %10437 = vpow2.f32 %v6822_v31  ;;  %v15452_v59 = vpop.permute.xlu1 %7451 }
 0xc29   : > { %v15456_v47 = vpop.eup %10437 }
 0xc2a   : > { %v6893_v36 = vsel %vm3597_vm13, %v15456_v47, 0.0 }
 0xc2e   : > { %6888 = vadd.xlane.f32.xlu1 %v6887_v1  ;;  %v15460_v1 = vpop.xlane.xlu2 %6711 }
 0xc35   : > { %7643 = vrot.lane.b32.xlu0 %v7642_v62, %s10901_s8  ;;  %v6782_v62 = vsub.f32 %v14823_v20, %v15376_v5  ;;  %v7265_v20 = vand.u32 %v15396_v11, %v13194_v58  ;;  %v6787_v11 = vsub.f32 %v14891_v19, %v15413_v22  ;;  %v7361_v19 = vand.u32 %v15419_v24, %v13194_v58 }
 0xc36   : > { %v15454_v25 = vpop.xlane.xlu0 %6726  ;;  %6744 = vmax.xlane.f32.xlu1 %v6743_v61  ;;  %v7308_v33 = vpop.permute.xlu2 %7307 }
 0xc37   : > { %v6820_v27 = vmul.f32 1.442695, %v6782_v62  ;;  %v5743_v62 = vpack.c.bf16 %v15264_v56, %v15264_v56  ;;  %v5742_v56 = vpack.c.bf16 %v15252_v48, %v15252_v48  ;;  %v6761_v48 = vsel %vm3597_vm13, %v15162_v45, -inf }
 0xc3e   : > { %v6874_v6 = vpop.xlane.xlu0 %6873  ;;  %v6880_v31 = vpop.xlane.xlu1 %6879  ;;  %6894 = vadd.xlane.f32.xlu1 %v6893_v36 }
 0xc3f   : > { %10439 = vrcp.f32 %v6874_v6 }
 0xc40   : > { %10441 = vrcp.f32 %v6880_v31 }
 0xc41   : > { %10443 = vpow2.f32 %v6814_v55  ;;  %v7313_v55 = vand.u32 %v7308_v33, %v13194_v58 }
 0xc42   : > { %10445 = vpow2.f32 %v6820_v27  ;;  %v7617_v27 = vunpack.c.l.b16 %v5743_v62  ;;  %v15506_v62 = vpop.xlane.xlu2 %6720 }
 0xc45   : > { %v10440_v61 = vpop.eup %10439 }
 0xc46   : > { %v10442_v42 = vpop.eup %10441  ;;  %v7000_v18 = vmul.f32 %v10440_v61, %v15299_v35  ;;  %v15469_v21 = vpop.xlane.xlu1 %6735  ;;  %6750 = vmax.xlane.f32.xlu1 %v6749_v60 }
 0xc47   : > { %v7002_v36 = vmul.f32 %v10442_v42, %v15295_v0  ;;  %v15472_v6 = vpop.eup %10443  ;;  %v6830_v42 = vmul.f32 1.442695, %v6787_v11 }
 0xc48   : > { %v7032_v31 = vpack.c.bf16 %v7000_v18, %v7000_v18  ;;  %v6881_v35 = vsel %vm3597_vm13, %v15472_v6, 0.0  ;;  %v15483_v18 = vpop.eup %10445 }
 0xc49   : > { %v7034_v5 = vpack.c.bf16 %v7002_v36, %v7002_v36  ;;  %v6890_v60 = vsel %vm3597_vm13, %v15483_v18, 0.0  ;;  %v7618_v36 = vpack.c.b16 %v7617_v27, %v7617_v27 }
 0xc4a   : > { %9987 = vmatmul.msk.bf16.vlgmr.msrb.gmra.mxu0 %vm3982_vm0, %v7032_v31 }
 0xc4b   : > { %7274 = vmatpush.bf16.msrb.mxu0 %v7265_v20  ;;  %9989 = vmatmul.msk.bf16.vlgmr.msra.gmra.mxu2 %vm3982_vm0, %v7034_v5  ;;  %v6755_v20 = vsel %vm3597_vm13, %v15117_v52, -inf }
 0xc4c   : > { %6882 = vadd.xlane.f32.xlu2 %v6881_v35  ;;  %7322 = vmatpush.bf16.msra.mxu2 %v7313_v55  ;;  %v7593_v35 = vunpack.c.l.b16 %v5742_v56  ;;  %v6786_v56 = vsub.f32 %v14897_v8, %v15460_v1  ;;  %v6752_v8 = vsel %vm3597_vm13, %v15101_v13, -inf }
 0xc4e   : > { %v15481_v0 = vpop.xlane.xlu1 %6738  ;;  %v7594_v11 = vpack.c.b16 %v7593_v35, %v7593_v35 }
 0xc54   : > { %6891 = vadd.xlane.f32.xlu2 %v6890_v60 }
 0xc56   : > { %v6886_v61 = vpop.xlane.xlu1 %6885 }
 0xc57   : > { %10447 = vrcp.f32 %v6886_v61  ;;  %v15517_v61 = vpop.permute.xlu2 %7427 }
 0xc58   : > { %10449 = vpow2.f32 %v6830_v42 }
 0xc5d   : > { %v10448_v33 = vpop.eup %10447 }
 0xc5e   : > { %v7004_v31 = vmul.f32 %v10448_v33, %v15342_v17  ;;  %v15500_v22 = vpop.eup %10449  ;;  %v6788_v17 = vsub.f32 %v14938_v30, %v15435_v9  ;;  %v6792_v9 = vsub.f32 %v14986_v46, %v15445_v44  ;;  %v6784_v30 = vsub.f32 %v14870_v51, %v15388_v53 }
 0xc5f   : > { %6756 = vmax.xlane.f32.xlu0 %v6755_v20  ;;  %7619 = vrot.lane.b32.xlu1 %v7618_v36, %s10901_s8  ;;  %v6905_v55 = vsel %vm3597_vm13, %v15500_v22, 0.0  ;;  %v6794_v36 = vsub.f32 %v14996_v16, %v15469_v21  ;;  %v6770_v46 = vsel %vm3597_vm13, %v15214_v29, -inf  ;;  %v6785_v44 = vsub.f32 %v14893_v54, %v15417_v49 }
 0xc60   : > { %v7036_v5 = vpack.c.bf16 %v7004_v31, %v7004_v31  ;;  %v6832_v60 = vmul.f32 1.442695, %v6788_v17  ;;  %v6840_v27 = vmul.f32 1.442695, %v6792_v9  ;;  %v6824_v33 = vmul.f32 1.442695, %v6784_v30 }
 0xc61   : > { %v6844_v51 = vmul.f32 1.442695, %v6794_v36  ;;  %v6826_v21 = vmul.f32 1.442695, %v6785_v44  ;;  %v7289_v54 = vand.u32 %v15421_v37, %v13194_v58  ;;  %v5746_v30 = vpack.c.bf16 %v15323_v26, %v15323_v26 }
 0xc62   : > { %9991 = vmatmul.msk.bf16.vlgmr.msra.gmra.mxu0 %vm3982_vm0, %v7036_v5  ;;  %10451 = vpow2.f32 %v6832_v60  ;;  %v15549_v60 = vpop.xlane.xlu1 %6741  ;;  %v6764_v36 = vsel %vm3597_vm13, %v15137_v12, -inf  ;;  %v5745_v44 = vpack.c.bf16 %v15297_v14, %v15297_v14 }
 0xc63   : > { %7370 = vmatpush.bf16.msra.mxu0 %v7361_v19  ;;  %10453 = vpow2.f32 %v6840_v27  ;;  %v7689_v27 = vunpack.c.l.b16 %v5746_v30  ;;  %v5748_v30 = vpack.c.bf16 %v15361_v38, %v15361_v38 }
 0xc64   : > { %10455 = vpow2.f32 %v6824_v33  ;;  %v7665_v26 = vunpack.c.l.b16 %v5745_v44 }
 0xc67   : > { %6906 = vadd.xlane.f32.xlu0 %v6905_v55 }
 0xc68   : > { %v15511_v24 = vpop.eup %10451 }
 0xc69   : > { %v6908_v42 = vsel %vm3597_vm13, %v15511_v24, 0.0  ;;  %v15525_v53 = vpop.eup %10453 }
 0xc6a   : > { %v15529_v20 = vpop.eup %10455  ;;  %v6920_v16 = vsel %vm3597_vm13, %v15525_v53, 0.0 }
 0xc6b   : > { %v6896_v55 = vsel %vm3597_vm13, %v15529_v20, 0.0 }
 0xc6c   : > { %7595 = vrot.lane.b32.xlu2 %v7594_v11, %s10901_s8 }
 0xc6f   : > { %6762 = vmax.xlane.f32.xlu0 %v6761_v48 }
 0xc76   : > { %v15557_v9 = vpop.permute.xlu1 %7547 }
 0xc77   : > { %6909 = vadd.xlane.f32.xlu0 %v6908_v42  ;;  %v6733_v42 = vpop.xlane.xlu0 %6732 }
 0xc78   : > { %v6793_v33 = vsub.f32 %v14955_v7, %v6733_v42  ;;  %v6773_v7 = vsel %vm3597_vm13, %v15195_v15, -inf }
 0xc7e   : > { %v6877_v31 = vpop.xlane.xlu2 %6876 }
 0xc7f   : > { %10457 = vrcp.f32 %v6877_v31  ;;  %6771 = vmax.xlane.f32.xlu0 %v6770_v46  ;;  %v7690_v31 = vpack.c.b16 %v7689_v27, %v7689_v27 }
 0xc80   : > { %10459 = vpow2.f32 %v6844_v51  ;;  %v6842_v51 = vmul.f32 1.442695, %v6793_v33 }
 0xc81   : > { %10461 = vpow2.f32 %v6826_v21 }
 0xc85   : > { %v10458_v5 = vpop.eup %10457 }
 0xc86   : > { %v7001_v19 = vmul.f32 %v10458_v5, %v15409_v41  ;;  %v15541_v49 = vpop.eup %10459  ;;  %v6828_v41 = vmul.f32 1.442695, %v6786_v56  ;;  %v15567_v5 = vpop.permute.xlu0 %7499  ;;  %v7666_v56 = vpack.c.b16 %v7665_v26, %v7665_v26 }
 0xc87   : > { %6921 = vadd.xlane.f32.xlu0 %v6920_v16  ;;  %v6926_v35 = vsel %vm3597_vm13, %v15541_v49, 0.0  ;;  %v15547_v1 = vpop.eup %10461 }
 0xc88   : > { %v7033_v17 = vpack.c.bf16 %v7001_v19, %v7001_v19  ;;  %10463 = vpow2.f32 %v6828_v41  ;;  %v6899_v37 = vsel %vm3597_vm13, %v15547_v1, 0.0 }
 0xc89   : > { %6897 = vadd.xlane.f32.xlu1 %v6896_v55 }
 0xc8a   : > { %9988 = vmatmul.msk.bf16.vlgmr.msra.gmra.mxu1 %vm3982_vm0, %v7033_v17  ;;  %v7385_v17 = vand.u32 %v15426_v10, %v13194_v58 }
 0xc8b   : > { %7298 = vmatpush.bf16.msra.mxu1 %v7289_v54 }
 0xc8e   : > { %v15553_v11 = vpop.eup %10463  ;;  %v15578_v14 = vpop.permute.xlu0 %7523 }
 0xc8f   : > { %6927 = vadd.xlane.f32.xlu0 %v6926_v35  ;;  %v6902_v48 = vsel %vm3597_vm13, %v15553_v11, 0.0  ;;  %v15582_v35 = vpop.permute.xlu2 %7475 }
 0xc91   : > { %6753 = vmax.xlane.f32.xlu1 %v6752_v8 }
 0xc95   : > { %6900 = vadd.xlane.f32.xlu2 %v6899_v37 }
 0xc96   : > { %v15584_v8 = vpop.permute.xlu0 %7571 }
 0xc99   : > { %6903 = vadd.xlane.f32.xlu1 %v6902_v48 }
 0xc9e   : > { %v15589_v27 = vpop.xlane.xlu0 %6747 }
 0xca1   : > { %v6889_v46 = vpop.xlane.xlu1 %6888  ;;  %6765 = vmax.xlane.f32.xlu1 %v6764_v36  ;;  %v7737_v36 = vunpack.c.l.b16 %v5748_v30 }
 0xca2   : > { %10465 = vrcp.f32 %v6889_v46 }
 0xca3   : > { %7691 = vrot.lane.b32.xlu0 %v7690_v31, %s10901_s8  ;;  %10467 = vpow2.f32 %v6842_v51 }
 0xca8   : > { %v10466_v19 = vpop.eup %10465 }
 0xca9   : > { %v7005_v16 = vmul.f32 %v10466_v19, %v15437_v2  ;;  %6774 = vmax.xlane.f32.xlu1 %v6773_v7  ;;  %v6745_v55 = vpop.xlane.xlu1 %6744  ;;  %v15574_v54 = vpop.eup %10467  ;;  %v15593_v19 = vld [vmem:[#allocation1] sm:$0xff] }
 0xcaa   : > { %v6923_v41 = vsel %vm3597_vm13, %v15574_v54, 0.0  ;;  %v6797_v10 = vsub.f32 %v15055_v28, %v6745_v55  ;;  %v7738_v28 = vpack.c.b16 %v7737_v36, %v7737_v36  ;;  %v15599_v55 = vpop.permute.xlu0 %7643 }
 0xcab   : > { %v7037_v21 = vpack.c.bf16 %v7005_v16, %v7005_v16 }
 0xcac   : > { %v6850_v37 = vmul.f32 1.442695, %v6797_v10 }
 0xcad   : > { %7667 = vrot.lane.b32.xlu2 %v7666_v56, %s10901_s8  ;;  %9992 = vmatmul.msk.bf16.vlgmr.msrb.gmra.mxu1 %vm3982_vm0, %v7037_v21 }
 0xcae   : > { %7394 = vmatpush.bf16.msrb.mxu1 %v7385_v17 }
 0xcb1   : > { %6924 = vadd.xlane.f32.xlu1 %v6923_v41  ;;  %v6895_v2 = vpop.xlane.xlu1 %6894 }
 0xcb9   : > { %v6751_v42 = vpop.xlane.xlu1 %6750 }
 0xcba   : > { %v6799_v33 = vsub.f32 %v15069_v32, %v6751_v42  ;;  %v7337_v32 = vand.u32 %v15428_v63, %v13194_v58 }
 0xcbc   : > { %v6854_v51 = vmul.f32 1.442695, %v6799_v33 }
 0xcbf   : > { %v6883_v48 = vpop.xlane.xlu2 %6882 }
 0xcc0   : > { %10469 = vrcp.f32 %v6883_v48 }
 0xcc1   : > { %10471 = vpow2.f32 %v6850_v37 }
 0xcc6   : > { %v10470_v31 = vpop.eup %10469 }
 0xcc7   : > { %v7003_v46 = vmul.f32 %v10470_v31, %v15472_v6  ;;  %v6892_v44 = vpop.xlane.xlu2 %6891  ;;  %v7084_v26 = vpop.f32.mrf.mxu0  ;;  %v6789_v6 = vsub.f32 %v14918_v43, %v15506_v62  ;;  %v7409_v43 = vand.u32 %v15447_v4, %v13194_v58  ;;  %v7433_v4 = vand.u32 %v15517_v61, %v13194_v58 }
 0xcc8   : > { %10473 = vrcp.f32 %v6892_v44  ;;  %v7864_v7 = vrot.slane %v7084_v26, 1  ;;  %v7865_v38 = vrot.slane %v7084_v26, 2  ;;  %v7866_v16 = vrot.slane %v7084_v26, 3  ;;  %7992 = vst [vmem:[#allocation1] ss:$9 sm:$0xff] %v7084_v26  ;;  %v15595_v21 = vpop.eup %10471 }
 0xcc9   : > { %v7035_v56 = vpack.c.bf16 %v7003_v46, %v7003_v46  ;;  %v7867_v17 = vrot.slane %v7084_v26, 4  ;;  %10475 = vpow2.f32 %v6854_v51  ;;  %v6935_v41 = vsel %vm3597_vm13, %v15595_v21, 0.0 }
 0xcca   : > { %7739 = vrot.lane.b32.xlu1 %v7738_v28, %s10901_s8  ;;  %7994 = vst [vmem:[#allocation1 + $0x1] ss:$9 sm:$0xff] %v7864_v7  ;;  %10477 = vrcp.f32 %v6895_v2  ;;  %v6834_v30 = vmul.f32 1.442695, %v6789_v6  ;;  %v6790_v28 = vsub.f32 %v14965_v57, %v15433_v34  ;;  %v6767_v57 = vsel %vm3597_vm13, %v15187_v39, -inf }
 0xccb   : > { %9990 = vmatmul.msk.bf16.vlgmr.msra.gmra.mxu3 %vm3982_vm0, %v7035_v56  ;;  %7996 = vst [vmem:[#allocation1 + $0x2] ss:$9 sm:$0xff] %v7865_v38  ;;  %v6795_v56 = vsub.f32 %v15048_v40, %v15481_v0  ;;  %v7529_v40 = vand.u32 %v15578_v14, %v13194_v58 }
 0xccc   : > { %7346 = vmatpush.bf16.msra.mxu3 %v7337_v32  ;;  %7998 = vst [vmem:[#allocation1 + $0x3] ss:$9 sm:$0xff] %v7866_v16  ;;  %10479 = vpow2.f32 %v6834_v30  ;;  %v6836_v38 = vmul.f32 1.442695, %v6790_v28 }
 0xccd   : > { %6936 = vadd.xlane.f32.xlu0 %v6935_v41  ;;  %8000 = vst [vmem:[#allocation1 + $0x4] ss:$9 sm:$0xff] %v7867_v17  ;;  %v6791_v17 = vsub.f32 %v14975_v50, %v15454_v25  ;;  %v6846_v34 = vmul.f32 1.442695, %v6795_v56 }
 0xcce   : > { %v10474_v63 = vpop.eup %10473  ;;  %v15607_v10 = vpop.f32.mrf.mxu2 }
 0xccf   : > { %v7006_v37 = vmul.f32 %v10474_v63, %v15483_v18  ;;  %v7086_v48 = vpop.f32.mrf.mxu0  ;;  %v15610_v42 = vpop.eup %10475  ;;  %v6758_v18 = vsel %vm3597_vm13, %v15109_v23, -inf  ;;  %v6838_v41 = vmul.f32 1.442695, %v6791_v17 }
 0xcd0   : > { %v10478_v36 = vpop.eup %10477  ;;  %v6941_v2 = vsel %vm3597_vm13, %v15610_v42, 0.0 }
 0xcd1   : > { %v7038_v33 = vpack.c.bf16 %v7006_v37, %v7006_v37  ;;  %v7007_v31 = vmul.f32 %v10478_v36, %v15456_v47  ;;  %v15652_v14 = vpop.permute.xlu1 %7619 }
 0xcd2   : > { %v6757_v62 = vpop.xlane.xlu0 %6756  ;;  %v15620_v44 = vpop.eup %10479 }
 0xcd3   : > { %9993 = vmatmul.msk.bf16.vlgmr.msrb.gmra.mxu2 %vm3982_vm0, %v7038_v33  ;;  %v7039_v51 = vpack.c.bf16 %v7007_v31, %v7007_v31  ;;  %v6911_v47 = vsel %vm3597_vm13, %v15620_v44, 0.0  ;;  %v6801_v0 = vsub.f32 %v15117_v52, %v6757_v62  ;;  %v15662_v62 = vpop.permute.xlu2 %7595 }
 0xcd4   : > { %7418 = vmatpush.bf16.msrb.mxu2 %v7409_v43 }
 0xcd5   : > { %6942 = vadd.xlane.f32.xlu0 %v6941_v2  ;;  %v6858_v25 = vmul.f32 1.442695, %v6801_v0 }
 0xcd6   : > { %6759 = vmax.xlane.f32.xlu2 %v6758_v18  ;;  %v7134_v46 = vpop.f32.mrf.mxu2 }
 0xcda   : > { %v6907_v26 = vpop.xlane.xlu0 %6906 }
 0xcdb   : > { %9994 = vmatmul.msk.bf16.vlgmr.msrb.gmra.mxu3 %vm3982_vm0, %v7039_v51  ;;  %10481 = vrcp.f32 %v6907_v26  ;;  %v5747_v51 = vpack.c.bf16 %v15340_v3, %v15340_v3  ;;  %v7457_v26 = vand.u32 %v15452_v59, %v13194_v58 }
 0xcdc   : > { %7442 = vmatpush.bf16.msrb.mxu3 %v7433_v4  ;;  %10483 = vpow2.f32 %v6836_v38 }
 0xcdd   : > { %10485 = vpow2.f32 %v6846_v34  ;;  %v7713_v56 = vunpack.c.l.b16 %v5747_v51 }
 0xcde   : > { %6912 = vadd.xlane.f32.xlu2 %v6911_v47  ;;  %10487 = vpow2.f32 %v6838_v41 }
 0xcdf   : > { %v15629_v7 = vpop.f32.mrf.mxu0  ;;  %10489 = vpow2.f32 %v6858_v25  ;;  %v7714_v59 = vpack.c.b16 %v7713_v56, %v7713_v56 }
 0xce1   : > { %v10482_v16 = vpop.eup %10481 }
 0xce2   : > { %v7011_v61 = vmul.f32 %v10482_v16, %v15500_v22  ;;  %v15638_v63 = vpop.eup %10483  ;;  %v15658_v33 = vpop.xlane.xlu0 %6762 }
 0xce3   : > { %v6914_v50 = vsel %vm3597_vm13, %v15638_v63, 0.0  ;;  %v15646_v22 = vpop.eup %10485 }
 0xce4   : > { %v7043_v32 = vpack.c.bf16 %v7011_v61, %v7011_v61  ;;  %v15648_v37 = vpop.eup %10487  ;;  %v6929_v48 = vsel %vm3597_vm13, %v15646_v22, 0.0 }
 0xce5   : > { %v6917_v52 = vsel %vm3597_vm13, %v15648_v37, 0.0  ;;  %v15656_v30 = vpop.eup %10489 }
 0xce6   : > { %6768 = vmax.xlane.f32.xlu2 %v6767_v57  ;;  %v6947_v36 = vsel %vm3597_vm13, %v15656_v30, 0.0 }
 0xce7   : > { %v7182_v6 = vpop.f32.mrf.mxu0 }
 0xcea   : > { %v6910_v2 = vpop.xlane.xlu0 %6909 }
 0xceb   : > { %9998 = vmatmul.msk.bf16.vlgmr.msra.gmra.mxu3 %vm3982_vm0, %v7043_v32 }
 0xcec   : > { %7538 = vmatpush.bf16.msra.mxu3 %v7529_v40  ;;  %v7481_v40 = vand.u32 %v15582_v35, %v13194_v58  ;;  %v17831_v35 = vld [vmem:[#allocation21_spill] sm:$0xff] }
 0xcee   : > { %6915 = vadd.xlane.f32.xlu2 %v6914_v50 }
 0xcf2   : > { %v15675_v3 = vpop.xlane.xlu0 %6771 }
 0xcf4   : > { %6930 = vadd.xlane.f32.xlu1 %v6929_v48 }
 0xcf6   : > { %6918 = vadd.xlane.f32.xlu2 %v6917_v52  ;;  %v7505_v52 = vand.u32 %v15567_v5, %v13194_v58  ;;  %v7649_v5 = vand.u32 %v15599_v55, %v13194_v58 }
 0xcfa   : > { %v6922_v25 = vpop.xlane.xlu0 %6921 }
 0xcfc   : > { %v6898_v43 = vpop.xlane.xlu1 %6897  ;;  %6948 = vadd.xlane.f32.xlu1 %v6947_v36  ;;  %v6796_v36 = vsub.f32 %v17831_v35, %v15549_v60 }
 0xcfd   : > { %10491 = vrcp.f32 %v6898_v43 }
 0xcfe   : > { %10493 = vrcp.f32 %v6910_v2 }
 0xd02   : > { %v6928_v35 = vpop.xlane.xlu0 %6927 }
 0xd03   : > { %v10492_v31 = vpop.eup %10491 }
 0xd04   : > { %v7008_v18 = vmul.f32 %v10492_v31, %v15529_v20  ;;  %v6754_v46 = vpop.xlane.xlu1 %6753  ;;  %v10494_v61 = vpop.eup %10493  ;;  %v17832_v31 = vld [vmem:[#allocation22_spill] sm:$0xff] }
 0xd05   : > { %v7012_v32 = vmul.f32 %v10494_v61, %v15511_v24  ;;  %v6800_v60 = vsub.f32 %v15101_v13, %v6754_v46 }
 0xd06   : > { %v7040_v4 = vpack.c.bf16 %v7008_v18, %v7008_v18  ;;  %v6798_v18 = vsub.f32 %v17832_v31, %v15589_v27 }
 0xd07   : > { %v15669_v28 = vpop.f32.mrf.mxu1  ;;  %v7044_v50 = vpack.c.bf16 %v7012_v32, %v7012_v32 }
 0xd08   : > { %v7868_v47 = vrot.slane %v15669_v28, 1  ;;  %v7869_v38 = vrot.slane %v15669_v28, 2  ;;  %v6901_v16 = vpop.xlane.xlu2 %6900  ;;  %9995 = vmatmul.msk.bf16.vlgmr.msrb.gmra.mxu0 %vm3982_vm0, %v7040_v4  ;;  %8002 = vst [vmem:[#allocation1 + $0x5] ss:$9 sm:$0xff] %v15669_v28  ;;  %v6852_v51 = vmul.f32 1.442695, %v6798_v18 }
 0xd09   : > { %10495 = vrcp.f32 %v6901_v16  ;;  %7466 = vmatpush.bf16.msrb.mxu0 %v7457_v26  ;;  %v6856_v26 = vmul.f32 1.442695, %v6800_v60 }
 0xd0a   : > { %8004 = vst [vmem:[#allocation1 + $0x6] ss:$9 sm:$0xff] %v7868_v47 }
 0xd0b   : > { %8006 = vst [vmem:[#allocation1 + $0x7] ss:$9 sm:$0xff] %v7869_v38 }
 0xd0c   : > { %v6904_v20 = vpop.xlane.xlu1 %6903 }
 0xd0d   : > { %10497 = vrcp.f32 %v6904_v20  ;;  %v6803_v20 = vsub.f32 %v15162_v45, %v15658_v33 }
 0xd0e   : > { %7715 = vrot.lane.b32.xlu2 %v7714_v59, %s10901_s8  ;;  %10499 = vrcp.f32 %v6922_v25 }
 0xd0f   : > { %v10496_v17 = vpop.eup %10495  ;;  %v7110_v57 = vpop.f32.mrf.mxu1 }
 0xd10   : > { %v7009_v34 = vmul.f32 %v10496_v17, %v15547_v1  ;;  %v7553_v1 = vand.u32 %v15557_v9, %v13194_v58  ;;  %v6848_v9 = vmul.f32 1.442695, %v6796_v36  ;;  %v15709_v27 = vpop.permute.xlu2 %7667  ;;  %v6862_v57 = vmul.f32 1.442695, %v6803_v20 }
 0xd12   : > { %v7041_v6 = vpack.c.bf16 %v7009_v34, %v7009_v34  ;;  %10501 = vpow2.f32 %v6848_v9 }
 0xd13   : > { %v10498_v41 = vpop.eup %10497  ;;  %10503 = vpow2.f32 %v6852_v51 }
 0xd14   : > { %9996 = vmatmul.msk.bf16.vlgmr.msra.gmra.mxu1 %vm3982_vm0, %v7041_v6  ;;  %v7010_v0 = vmul.f32 %v10498_v41, %v15553_v11  ;;  %v10500_v24 = vpop.eup %10499  ;;  %10505 = vpow2.f32 %v6856_v26  ;;  %v6766_v56 = vpop.xlane.xlu1 %6765 }
 0xd15   : > { %7490 = vmatpush.bf16.msra.mxu1 %v7481_v40  ;;  %v7016_v11 = vmul.f32 %v10500_v24, %v15525_v53  ;;  %v6804_v41 = vsub.f32 %v15137_v12, %v6766_v56  ;;  %v17833_v40 = vld [vmem:[#allocation23_spill] sm:$0xff] }
 0xd16   : > { %v7042_v48 = vpack.c.bf16 %v7010_v0, %v7010_v0  ;;  %v5749_v45 = vpack.c.bf16 %v17833_v40, %v17833_v40  ;;  %v7870_v40 = vrot.slane %v15669_v28, 3 }
 0xd17   : > { %v7048_v43 = vpack.c.bf16 %v7016_v11, %v7016_v11  ;;  %v6864_v25 = vmul.f32 1.442695, %v6804_v41  ;;  %v7601_v41 = vand.u32 %v15662_v62, %v13194_v58  ;;  %v7871_v62 = vrot.slane %v15669_v28, 4 }
 0xd18   : > { %9997 = vmatmul.msk.bf16.vlgmr.msra.gmra.mxu2 %vm3982_vm0, %v7042_v48  ;;  %9999 = vmatmul.msk.bf16.vlgmr.msra.gmra.mxu0 %vm3982_vm0, %v7044_v50  ;;  %v15700_v53 = vpop.eup %10501  ;;  %v6806_v28 = vsub.f32 %v15214_v29, %v15675_v3 }
 0xd19   : > { %7514 = vmatpush.bf16.msra.mxu2 %v7505_v52  ;;  %7562 = vmatpush.bf16.msra.mxu0 %v7553_v1  ;;  %v6932_v55 = vsel %vm3597_vm13, %v15700_v53, 0.0  ;;  %v15705_v47 = vpop.eup %10503  ;;  %v7761_v1 = vunpack.c.l.b16 %v5749_v45  ;;  %v5751_v45 = vpack.c.bf16 %v15593_v19, %v15593_v19 }
 0xd1a   : > { %v6938_v38 = vsel %vm3597_vm13, %v15705_v47, 0.0  ;;  %v15711_v16 = vpop.eup %10505  ;;  %v6868_v29 = vmul.f32 1.442695, %v6806_v28 }
 0xd1b   : > { %v6944_v13 = vsel %vm3597_vm13, %v15711_v16, 0.0  ;;  %v7762_v9 = vpack.c.b16 %v7761_v1, %v7761_v1  ;;  %v7809_v19 = vunpack.c.l.b16 %v5751_v45 }
 0xd1c   : > { %v15720_v34 = vpop.xlane.xlu1 %6774 }
 0xd24   : > { %v6925_v11 = vpop.xlane.xlu1 %6924 }
 0xd28   : > { %10003 = vmatmul.msk.bf16.vlgmr.msrb.gmra.mxu0 %vm3982_vm0, %v7048_v43  ;;  %v7577_v43 = vand.u32 %v15584_v8, %v13194_v58 }
 0xd29   : > { %7658 = vmatpush.bf16.msrb.mxu0 %v7649_v5 }
 0xd2a   : > { %v15696_v2 = vpop.f32.mrf.mxu1 }
 0xd32   : > { %v7206_v4 = vpop.f32.mrf.mxu1 }
 0xd33   : > { %v15745_v4 = vpop.permute.xlu0 %7691 }
 0xd37   : > { %6933 = vadd.xlane.f32.xlu2 %v6932_v55 }
 0xd3f   : > { %6939 = vadd.xlane.f32.xlu2 %v6938_v38 }
 0xd47   : > { %6945 = vadd.xlane.f32.xlu2 %v6944_v13 }
 0xd49   : > { %v6760_v46 = vpop.xlane.xlu2 %6759 }
 0xd4a   : > { %v6802_v59 = vsub.f32 %v15109_v23, %v6760_v46  ;;  %v15754_v46 = vpop.permute.xlu1 %7739 }
 0xd4b   : > { %v7745_v28 = vand.u32 %v15754_v46, %v13194_v58 }
 0xd4c   : > { %v6860_v61 = vmul.f32 1.442695, %v6802_v59 }
 0xd4e   : > { %10507 = vpow2.f32 %v6860_v61  ;;  %v15718_v17 = vpop.f32.mrf.mxu3 }
 0xd51   : > { %v6913_v32 = vpop.xlane.xlu2 %6912 }
 0xd52   : > { %10509 = vrcp.f32 %v6913_v32 }
 0xd53   : > { %10511 = vpow2.f32 %v6862_v57  ;;  %v6937_v57 = vpop.xlane.xlu0 %6936 }
 0xd54   : > { %v15722_v6 = vpop.eup %10507  ;;  %10513 = vpow2.f32 %v6864_v25 }
 0xd55   : > { %v6950_v23 = vsel %vm3597_vm13, %v15722_v6, 0.0  ;;  %10515 = vrcp.f32 %v6925_v11  ;;  %v7873_v11 = vrot.slane %v15607_v10, 2 }
 0xd56   : > { %v15729_v33 = vpop.f32.mrf.mxu2  ;;  %6951 = vadd.xlane.f32.xlu1 %v6950_v23  ;;  %v7158_v0 = vpop.f32.mrf.mxu3  ;;  %v7673_v23 = vand.u32 %v15709_v27, %v13194_v58 }
 0xd58   : > { %v10510_v50 = vpop.eup %10509 }
 0xd59   : > { %v7013_v48 = vmul.f32 %v10510_v50, %v15620_v44  ;;  %v6769_v52 = vpop.xlane.xlu2 %6768  ;;  %v15732_v24 = vpop.eup %10511  ;;  %v15770_v50 = vld [vmem:[#allocation1] sm:$0xff] }
 0xd5a   : > { %v6805_v12 = vsub.f32 %v15187_v39, %v6769_v52  ;;  %v6953_v44 = vsel %vm3597_vm13, %v15732_v24, 0.0  ;;  %v15743_v51 = vpop.eup %10513  ;;  %8008 = vst [vmem:[#allocation1] ss:$9 sm:$0xff] %v7870_v40 }
 0xd5b   : > { %v7045_v36 = vpack.c.bf16 %v7013_v48, %v7013_v48  ;;  %v10516_v8 = vpop.eup %10515  ;;  %v6956_v26 = vsel %vm3597_vm13, %v15743_v51, 0.0  ;;  %v7872_v48 = vrot.slane %v15607_v10, 1  ;;  %8009 = vst [vmem:[#allocation1 + $0x1] ss:$9 sm:$0xff] %v7871_v62 }
 0xd5c   : > { %v6866_v5 = vmul.f32 1.442695, %v6805_v12  ;;  %v7017_v56 = vmul.f32 %v10516_v8, %v15574_v54  ;;  %v7625_v12 = vand.u32 %v15652_v14, %v13194_v58  ;;  %8010 = vst [vmem:[#allocation1 + $0x2] ss:$9 sm:$0xff] %v15607_v10 }
 0xd5d   : > { %10000 = vmatmul.msk.bf16.vlgmr.msrb.gmra.mxu1 %vm3982_vm0, %v7045_v36  ;;  %8011 = vst [vmem:[#allocation1 + $0x3] ss:$9 sm:$0xff] %v7872_v48 }
 0xd5e   : > { %10517 = vpow2.f32 %v6866_v5  ;;  %7586 = vmatpush.bf16.msrb.mxu1 %v7577_v43  ;;  %v7230_v31 = vpop.f32.mrf.mxu2  ;;  %6954 = vadd.xlane.f32.xlu1 %v6953_v44  ;;  %v15740_v18 = vpop.f32.mrf.mxu3  ;;  %v7049_v61 = vpack.c.bf16 %v7017_v56, %v7017_v56  ;;  %v7875_v43 = vrot.slane %v15607_v10, 4  ;;  %8012 = vst [vmem:[#allocation1 + $0x4] ss:$9 sm:$0xff] %v7873_v11 }
 0xd5f   : > { %7763 = vrot.lane.b32.xlu2 %v7762_v9, %s10901_s8  ;;  %v7810_v9 = vpack.c.b16 %v7809_v19, %v7809_v19  ;;  %8015 = vst [vmem:[#allocation1 + $0x7] ss:$9 sm:$0xff] %v15718_v17  ;;  %v6943_v56 = vpop.xlane.xlu0 %6942 }
 0xd60   : > { %8014 = vst [vmem:[#allocation1 + $0x6] ss:$9 sm:$0xff] %v7875_v43 }
 0xd61   : > { %v6916_v39 = vpop.xlane.xlu2 %6915 }
 0xd62   : > { %10519 = vrcp.f32 %v6916_v39 }
 0xd64   : > { %v15747_v60 = vpop.eup %10517 }
 0xd65   : > { %v6959_v55 = vsel %vm3597_vm13, %v15747_v60, 0.0 }
 0xd66   : > { %6960 = vadd.xlane.f32.xlu0 %v6959_v55  ;;  %6957 = vadd.xlane.f32.xlu1 %v6956_v26  ;;  %v7254_v38 = vpop.f32.mrf.mxu3  ;;  %v7697_v55 = vand.u32 %v15745_v4, %v13194_v58 }
 0xd67   : > { %v6931_v0 = vpop.xlane.xlu1 %6930 }
 0xd68   : > { %v10520_v13 = vpop.eup %10519 }
 0xd69   : > { %v7014_v59 = vmul.f32 %v10520_v13, %v15638_v63  ;;  %v6919_v20 = vpop.xlane.xlu2 %6918 }
 0xd6a   : > { %10521 = vrcp.f32 %v6919_v20 }
 0xd6b   : > { %v7046_v32 = vpack.c.bf16 %v7014_v59, %v7014_v59  ;;  %10523 = vrcp.f32 %v6928_v35  ;;  %v17834_v35 = vld [vmem:[#allocation24_spill] sm:$0xff] }
 0xd6c   : > { %10525 = vrcp.f32 %v6937_v57  ;;  %v5750_v36 = vpack.c.bf16 %v17834_v35, %v17834_v35  ;;  %v7876_v35 = vrot.slane %v15718_v17, 1 }
 0xd6d   : > { %10001 = vmatmul.msk.bf16.vlgmr.msrb.gmra.mxu2 %vm3982_vm0, %v7046_v32  ;;  %10004 = vmatmul.msk.bf16.vlgmr.msra.gmra.mxu1 %vm3982_vm0, %v7049_v61  ;;  %10527 = vrcp.f32 %v6931_v0 }
 0xd6e   : > { %7610 = vmatpush.bf16.msrb.mxu2 %v7601_v41  ;;  %7682 = vmatpush.bf16.msra.mxu1 %v7673_v23  ;;  %v15763_v54 = vpop.f32.mrf.mxu3  ;;  %v7785_v3 = vunpack.c.l.b16 %v5750_v36  ;;  %10529 = vpow2.f32 %v6868_v29  ;;  %v7877_v36 = vrot.slane %v15718_v17, 2  ;;  %v7881_v29 = vrot.slane %v15629_v7, 2 }
 0xd70   : > { %v10522_v63 = vpop.eup %10521 }
 0xd71   : > { %v7015_v27 = vmul.f32 %v10522_v63, %v15648_v37  ;;  %v10524_v25 = vpop.eup %10523  ;;  %v7874_v37 = vrot.slane %v15607_v10, 3  ;;  %v6949_v10 = vpop.xlane.xlu1 %6948 }
 0xd72   : > { %v10526_v1 = vpop.eup %10525  ;;  %v7018_v14 = vmul.f32 %v10524_v25, %v15541_v49  ;;  %v7786_v49 = vpack.c.b16 %v7785_v3, %v7785_v3  ;;  %10531 = vrcp.f32 %v6949_v10  ;;  %v7716_v26 = vpop.permute.xlu2 %7715  ;;  %v7882_v3 = vrot.slane %v15629_v7, 3 }
 0xd73   : > { %v7047_v52 = vpack.c.bf16 %v7015_v27, %v7015_v27  ;;  %v7021_v44 = vmul.f32 %v10526_v1, %v15595_v21  ;;  %8013 = vst [vmem:[#allocation1 + $0x5] ss:$9 sm:$0xff] %v7874_v37  ;;  %v10528_v8 = vpop.eup %10527  ;;  %v7721_v4 = vand.u32 %v7716_v26, %v13194_v58  ;;  %10533 = vrcp.f32 %v6943_v56 }
 0xd74   : > { %v7050_v31 = vpack.c.bf16 %v7018_v14, %v7018_v14  ;;  %v7019_v21 = vmul.f32 %v10528_v8, %v15646_v22  ;;  %v15794_v38 = vpop.eup %10529  ;;  %v7883_v8 = vrot.slane %v15629_v7, 4  ;;  %v7885_v26 = vrot.slane %v15696_v2, 2 }
 0xd75   : > { %10002 = vmatmul.msk.bf16.vlgmr.msrb.gmra.mxu3 %vm3982_vm0, %v7047_v52  ;;  %v7053_v39 = vpack.c.bf16 %v7021_v44, %v7021_v44  ;;  %v6962_v22 = vsel %vm3597_vm13, %v15794_v38, 0.0  ;;  %v7880_v44 = vrot.slane %v15629_v7, 1 }
 0xd76   : > { %7634 = vmatpush.bf16.msrb.mxu3 %v7625_v12  ;;  %v7350_v5 = vpop.f32.mrf.mxu3  ;;  %v7051_v13 = vpack.c.bf16 %v7019_v21, %v7019_v21  ;;  %v7884_v21 = vrot.slane %v15696_v2, 1 }
 0xd77   : > { %v7878_v5 = vrot.slane %v15718_v17, 3 }
 0xd78   : > { %v10532_v59 = vpop.eup %10531 }
 0xd79   : > { %v7025_v61 = vmul.f32 %v10532_v59, %v15656_v30  ;;  %v10534_v32 = vpop.eup %10533  ;;  %v6807_v30 = vsub.f32 %v15195_v15, %v15720_v34 }
 0xd7a   : > { %7811 = vrot.lane.b32.xlu0 %v7810_v9, %s10901_s8  ;;  %v7023_v23 = vmul.f32 %v10534_v32, %v15610_v42  ;;  %v15826_v43 = vld [vmem:[#allocation1] sm:$0xff]  ;;  %v7889_v32 = vrot.slane %v15729_v33, 2 }
 0xd7b   : > { %v7057_v57 = vpack.c.bf16 %v7025_v61, %v7025_v61  ;;  %v6870_v27 = vmul.f32 1.442695, %v6807_v30  ;;  %8017 = vst [vmem:[#allocation1] ss:$9 sm:$0xff] %v7876_v35 }
 0xd7c   : > { %v7055_v40 = vpack.c.bf16 %v7023_v23, %v7023_v23  ;;  %8018 = vst [vmem:[#allocation1 + $0x1] ss:$9 sm:$0xff] %v7877_v36 }
 0xd7d   : > { %10005 = vmatmul.msk.bf16.vlgmr.msra.gmra.mxu2 %vm3982_vm0, %v7050_v31  ;;  %10008 = vmatmul.msk.bf16.vlgmr.msrb.gmra.mxu1 %vm3982_vm0, %v7053_v39  ;;  %10535 = vpow2.f32 %v6870_v27  ;;  %8019 = vst [vmem:[#allocation1 + $0x2] ss:$9 sm:$0xff] %v7878_v5  ;;  %v7894_v27 = vrot.slane %v15740_v18, 3 }
 0xd7e   : > { %7706 = vmatpush.bf16.msra.mxu2 %v7697_v55  ;;  %8021 = vst [vmem:[#allocation1 + $0x4] ss:$9 sm:$0xff] %v15629_v7  ;;  %v7887_v7 = vrot.slane %v15696_v2, 4 }
 0xd7f   : > { %7787 = vrot.lane.b32.xlu1 %v7786_v49, %s10901_s8  ;;  %8022 = vst [vmem:[#allocation1 + $0x5] ss:$9 sm:$0xff] %v7880_v44 }
 0xd80   : > { %8023 = vst [vmem:[#allocation1 + $0x6] ss:$9 sm:$0xff] %v7881_v29 }
 0xd81   : > { %8024 = vst [vmem:[#allocation1 + $0x7] ss:$9 sm:$0xff] %v7882_v3 }
 0xd83   : > { %v15814_v52 = vpop.eup %10535 }
 0xd84   : > { %v6965_v1 = vsel %vm3597_vm13, %v15814_v52, 0.0 }
 0xd85   : > { %10006 = vmatmul.msk.bf16.vlgmr.msra.gmra.mxu3 %vm3982_vm0, %v7051_v13  ;;  %v15798_v20 = vpop.f32.mrf.mxu0  ;;  %v7888_v13 = vrot.slane %v15729_v33, 1 }
 0xd86   : > { %7730 = vmatpush.bf16.msra.mxu3 %v7721_v4  ;;  %v7898_v35 = vrot.slane %v15798_v20, 3 }
 0xd88   : > { %6963 = vadd.xlane.f32.xlu2 %v6962_v22  ;;  %v10147_v22 = vld [vmem:[%s11102_s25 + $0x8] sm:$0xff] }
 0xd8d   : > { %10012 = vmatmul.msk.bf16.vlgmr.msra.gmra.mxu1 %vm3982_vm0, %v7057_v57  ;;  %v7278_v41 = vpop.f32.mrf.mxu0  ;;  %v10146_v57 = vld [vmem:[%s11102_s25] sm:$0xff] }
 0xd8e   : > { %v7890_v41 = vrot.slane %v15729_v33, 3 }
 0xd91   : > { %v15805_v63 = vpop.f32.mrf.mxu1 }
 0xd92   : > { %v7902_v29 = vrot.slane %v15805_v63, 3 }
 0xd95   : > { %10010 = vmatmul.msk.bf16.vlgmr.msrb.gmra.mxu3 %vm3982_vm0, %v7055_v40  ;;  %v15808_v45 = vpop.f32.mrf.mxu0  ;;  %v7891_v40 = vrot.slane %v15729_v33, 4 }
 0xd99   : > { %v7302_v62 = vpop.f32.mrf.mxu1 }
 0xd9a   : > { %v7893_v62 = vrot.slane %v15740_v18, 2 }
 0xd9b   : > { %v15812_v0 = vpop.f32.mrf.mxu2 }
 0xd9d   : > { %v7374_v25 = vpop.f32.mrf.mxu0 }
 0xda3   : > { %v7326_v48 = vpop.f32.mrf.mxu2 }
 0xda5   : > { %v15816_v42 = vpop.f32.mrf.mxu0 }
 0xda9   : > { %6966 = vadd.xlane.f32.xlu1 %v6965_v1 }
 0xdaa   : > { %v6934_v11 = vpop.xlane.xlu2 %6933 }
 0xdab   : > { %10537 = vrcp.f32 %v6934_v11 }
 0xdad   : > { %v7470_v12 = vpop.f32.mrf.mxu0 }
 0xdb1   : > { %v10538_v19 = vpop.eup %10537 }
 0xdb2   : > { %v7020_v15 = vmul.f32 %v10538_v19, %v15700_v53  ;;  %v6940_v34 = vpop.xlane.xlu2 %6939  ;;  %v7879_v53 = vrot.slane %v15718_v17, 4 }
 0xdb3   : > { %10539 = vrcp.f32 %v6940_v34  ;;  %v7896_v34 = vrot.slane %v15798_v20, 1 }
 0xdb4   : > { %v7052_v37 = vpack.c.bf16 %v7020_v15, %v7020_v15  ;;  %8020 = vst [vmem:[#allocation1 + $0x3] ss:$9 sm:$0xff] %v7879_v53  ;;  %v7899_v53 = vrot.slane %v15798_v20, 4 }
 0xdb6   : > { %10007 = vmatmul.msk.bf16.vlgmr.msra.gmra.mxu0 %vm3982_vm0, %v7052_v37  ;;  %v7897_v37 = vrot.slane %v15798_v20, 2 }
 0xdb7   : > { %7754 = vmatpush.bf16.msra.mxu0 %v7745_v28 }
 0xdb9   : > { %v10540_v14 = vpop.eup %10539 }
 0xdba   : > { %v7022_v46 = vmul.f32 %v10540_v14, %v15705_v47  ;;  %v6946_v9 = vpop.xlane.xlu2 %6945 }
 0xdbb   : > { %10541 = vrcp.f32 %v6946_v9  ;;  %v15839_v49 = vld [vmem:[#allocation1] sm:$0xff] }
 0xdbc   : > { %v7054_v31 = vpack.c.bf16 %v7022_v46, %v7022_v46  ;;  %8026 = vst [vmem:[#allocation1] ss:$9 sm:$0xff] %v7883_v8  ;;  %v7905_v8 = vrot.slane %v15812_v0, 2 }
 0xdbd   : > { %8027 = vst [vmem:[#allocation1 + $0x1] ss:$9 sm:$0xff] %v15696_v2 }
 0xdbe   : > { %10009 = vmatmul.msk.bf16.vlgmr.msrb.gmra.mxu2 %vm3982_vm0, %v7054_v31  ;;  %8028 = vst [vmem:[#allocation1 + $0x2] ss:$9 sm:$0xff] %v7884_v21  ;;  %v7903_v31 = vrot.slane %v15805_v63, 4  ;;  %v17836_v21 = vld [vmem:[#allocation73_spill] sm:$0xff] }
 0xdbf   : > { %8029 = vst [vmem:[#allocation1 + $0x3] ss:$9 sm:$0xff] %v7885_v26 }
 0xdc0   : > { %8031 = vst [vmem:[#allocation1 + $0x5] ss:$9 sm:$0xff] %v7887_v7  ;;  %v8199_v7 = vpack.c.bf16 %v15826_v43, %v15770_v50 }
 0xdc1   : > { %v10542_v17 = vpop.eup %10541  ;;  %8032 = vst [vmem:[#allocation1 + $0x6] ss:$9 sm:$0xff] %v15729_v33  ;;  %v7895_v33 = vrot.slane %v15740_v18, 4 }
 0xdc2   : > { %v7024_v39 = vmul.f32 %v10542_v17, %v15711_v16  ;;  %v7764_v10 = vpop.permute.xlu2 %7763  ;;  %v7886_v16 = vrot.slane %v15696_v2, 3  ;;  %8033 = vst [vmem:[#allocation1 + $0x7] ss:$9 sm:$0xff] %v7888_v13  ;;  %v7904_v17 = vrot.slane %v15812_v0, 1 }
 0xdc3   : > { %v7769_v47 = vand.u32 %v7764_v10, %v13194_v58 }
 0xdc4   : > { %v7056_v55 = vpack.c.bf16 %v7024_v39, %v7024_v39  ;;  %8030 = vst [vmem:[#allocation1 + $0x4] ss:$9 sm:$0xff] %v7886_v16  ;;  %v7906_v16 = vrot.slane %v15812_v0, 3 }
 0xdc5   : > { %7778 = vmatpush.bf16.msrb.mxu1 %v7769_v47 }
 0xdc6   : > { %10011 = vmatmul.msk.bf16.vlgmr.msrb.gmra.mxu0 %vm3982_vm0, %v7056_v55  ;;  %v17835_v55 = vld [vmem:[#allocation72_spill] sm:$0xff] }
 0xdc7   : > { %8252 = vmatpush.bf16.msrb.mxu0 %v10147_v22  ;;  %v4962_v26 = vpack.c.bf16 %v17836_v21, %v17835_v55  ;;  %v17837_v22 = vld [vmem:[#allocation74_spill] sm:$0xff] }
 0xdc9   : > { %v6952_v56 = vpop.xlane.xlu1 %6951  ;;  %8347 = vmatpush.bf16.msra.mxu1 %v10146_v57  ;;  %v17838_v57 = vld [vmem:[#allocation75_spill] sm:$0xff] }
 0xdca   : > { %10543 = vrcp.f32 %v6952_v56 }
 0xdcb   : > { %v15854_v23 = vld [vmem:[#allocation1] sm:$0xff] }
 0xdcc   : > { %8035 = vst [vmem:[#allocation1] ss:$9 sm:$0xff] %v7889_v32  ;;  %v4963_v32 = vpack.c.bf16 %v17838_v57, %v17837_v22 }
 0xdcd   : > { %8036 = vst [vmem:[#allocation1 + $0x1] ss:$9 sm:$0xff] %v7890_v41  ;;  %v7908_v41 = vrot.slane %v15763_v54, 1 }
 0xdce   : > { %8037 = vst [vmem:[#allocation1 + $0x2] ss:$9 sm:$0xff] %v7891_v40 }
 0xdcf   : > { %8038 = vst [vmem:[#allocation1 + $0x3] ss:$9 sm:$0xff] %v15740_v18 }
 0xdd0   : > { %v10544_v59 = vpop.eup %10543  ;;  %8040 = vst [vmem:[#allocation1 + $0x5] ss:$9 sm:$0xff] %v7893_v62  ;;  %v7910_v62 = vrot.slane %v15763_v54, 3 }
 0xdd1   : > { %v7026_v4 = vmul.f32 %v10544_v59, %v15722_v6  ;;  %v6955_v61 = vpop.xlane.xlu1 %6954  ;;  %v7892_v6 = vrot.slane %v15740_v18, 1  ;;  %8041 = vst [vmem:[#allocation1 + $0x6] ss:$9 sm:$0xff] %v7894_v27 }
 0xdd2   : > { %10545 = vrcp.f32 %v6955_v61  ;;  %8042 = vst [vmem:[#allocation1 + $0x7] ss:$9 sm:$0xff] %v7895_v33 }
 0xdd3   : > { %v7058_v2 = vpack.c.bf16 %v7026_v4, %v7026_v4  ;;  %8039 = vst [vmem:[#allocation1 + $0x4] ss:$9 sm:$0xff] %v7892_v6  ;;  %v7909_v6 = vrot.slane %v15763_v54, 2 }
 0xdd5   : > { %10013 = vmatmul.msk.bf16.vlgmr.msra.gmra.mxu2 %vm3982_vm0, %v7058_v2  ;;  %v8200_v2 = vpack.c.bf16 %v15854_v23, %v15839_v49  ;;  %v7912_v49 = vrot.slane %v15808_v45, 1 }
 0xdd8   : > { %v10546_v30 = vpop.eup %10545 }
 0xdd9   : > { %v7027_v25 = vmul.f32 %v10546_v30, %v15732_v24  ;;  %v6961_v48 = vpop.xlane.xlu0 %6960  ;;  %v6958_v1 = vpop.xlane.xlu1 %6957 }
 0xdda   : > { %10547 = vrcp.f32 %v6961_v48  ;;  %v15864_v11 = vpop.f32.mrf.mxu1  ;;  %v15872_v5 = vld [vmem:[#allocation1] sm:$0xff]  ;;  %v7913_v48 = vrot.slane %v15808_v45, 2 }
 0xddb   : > { %v7059_v12 = vpack.c.bf16 %v7027_v25, %v7027_v25  ;;  %10549 = vrcp.f32 %v6958_v1  ;;  %8044 = vst [vmem:[#allocation1] ss:$9 sm:$0xff] %v15798_v20  ;;  %v7914_v1 = vrot.slane %v15808_v45, 3 }
 0xddc   : > { %8045 = vst [vmem:[#allocation1 + $0x1] ss:$9 sm:$0xff] %v7896_v34  ;;  %v7915_v34 = vrot.slane %v15808_v45, 4 }
 0xddd   : > { %10014 = vmatmul.msk.bf16.vlgmr.msra.gmra.mxu3 %vm3982_vm0, %v7059_v12  ;;  %8046 = vst [vmem:[#allocation1 + $0x2] ss:$9 sm:$0xff] %v7897_v37  ;;  %v17839_v12 = vld [vmem:[#allocation76_spill] sm:$0xff] }
 0xdde   : > { %8047 = vst [vmem:[#allocation1 + $0x3] ss:$9 sm:$0xff] %v7898_v35  ;;  %v7918_v35 = vrot.slane %v15864_v11, 3 }
 0xddf   : > { %8048 = vst [vmem:[#allocation1 + $0x4] ss:$9 sm:$0xff] %v7899_v53 }
 0xde0   : > { %v10548_v19 = vpop.eup %10547  ;;  %8049 = vst [vmem:[#allocation1 + $0x5] ss:$9 sm:$0xff] %v15805_v63 }
 0xde1   : > { %v10550_v15 = vpop.eup %10549  ;;  %v7029_v24 = vmul.f32 %v10548_v19, %v15747_v60  ;;  %v7900_v60 = vrot.slane %v15805_v63, 1  ;;  %v17840_v19 = vld [vmem:[#allocation77_spill] sm:$0xff] }
 0xde2   : > { %v7028_v18 = vmul.f32 %v10550_v15, %v15743_v51  ;;  %v7398_v28 = vpop.f32.mrf.mxu1  ;;  %v7901_v51 = vrot.slane %v15805_v63, 2  ;;  %v7907_v63 = vrot.slane %v15812_v0, 4  ;;  %v4964_v15 = vpack.c.bf16 %v17840_v19, %v17839_v12 }
 0xde3   : > { %v7061_v36 = vpack.c.bf16 %v7029_v24, %v7029_v24  ;;  %8050 = vst [vmem:[#allocation1 + $0x6] ss:$9 sm:$0xff] %v7900_v60  ;;  %v7916_v24 = vrot.slane %v15864_v11, 1 }
 0xde4   : > { %v7060_v14 = vpack.c.bf16 %v7028_v18, %v7028_v18  ;;  %8051 = vst [vmem:[#allocation1 + $0x7] ss:$9 sm:$0xff] %v7901_v51  ;;  %v7917_v18 = vrot.slane %v15864_v11, 2 }
 0xde5   : > { %10016 = vmatmul.msk.bf16.vlgmr.msrb.gmra.mxu1 %vm3982_vm0, %v7061_v36  ;;  %v7919_v36 = vrot.slane %v15864_v11, 4 }
 0xde6   : > { %10015 = vmatmul.msk.bf16.vlgmr.msra.gmra.mxu0 %vm3982_vm0, %v7060_v14 }
 0xdea   : > { %v15881_v44 = vpop.f32.mrf.mxu1 }
 0xdeb   : > { %v15890_v47 = vld [vmem:[#allocation1] sm:$0xff]  ;;  %v7934_v22 = vrot.slane %v15881_v44, 3 }
 0xdec   : > { %v7812_v46 = vpop.permute.xlu0 %7811  ;;  %8053 = vst [vmem:[#allocation1] ss:$9 sm:$0xff] %v7902_v29  ;;  %v8201_v37 = vpack.c.bf16 %v15890_v47, %v15872_v5 }
 0xded   : > { %v7817_v20 = vand.u32 %v7812_v46, %v13194_v58  ;;  %8054 = vst [vmem:[#allocation1 + $0x1] ss:$9 sm:$0xff] %v7903_v31  ;;  %v17841_v46 = vld [vmem:[#allocation78_spill] sm:$0xff] }
 0xdee   : > { %8055 = vst [vmem:[#allocation1 + $0x2] ss:$9 sm:$0xff] %v15812_v0 }
 0xdef   : > { %7826 = vmatpush.bf16.msrb.mxu3 %v7817_v20  ;;  %8056 = vst [vmem:[#allocation1 + $0x3] ss:$9 sm:$0xff] %v7904_v17  ;;  %v17842_v20 = vld [vmem:[#allocation79_spill] sm:$0xff] }
 0xdf0   : > { %v15884_v9 = vpop.f32.mrf.mxu2  ;;  %8057 = vst [vmem:[#allocation1 + $0x4] ss:$9 sm:$0xff] %v7905_v8 }
 0xdf1   : > { %v7788_v3 = vpop.permute.xlu1 %7787  ;;  %8058 = vst [vmem:[#allocation1 + $0x5] ss:$9 sm:$0xff] %v7906_v16  ;;  %v7920_v53 = vrot.slane %v15884_v9, 1  ;;  %v7921_v51 = vrot.slane %v15884_v9, 2  ;;  %v7922_v29 = vrot.slane %v15884_v9, 3  ;;  %v17843_v16 = vld [vmem:[#allocation80_spill] sm:$0xff] }
 0xdf2   : > { %v7793_v39 = vand.u32 %v7788_v3, %v13194_v58  ;;  %v7494_v10 = vpop.f32.mrf.mxu1  ;;  %8059 = vst [vmem:[#allocation1 + $0x6] ss:$9 sm:$0xff] %v7907_v63 }
 0xdf3   : > { %8060 = vst [vmem:[#allocation1 + $0x7] ss:$9 sm:$0xff] %v15763_v54 }
 0xdf4   : > { %7802 = vmatpush.bf16.msrb.mxu2 %v7793_v39  ;;  %v7923_v39 = vrot.slane %v15884_v9, 4 }
 0xdf5   : > { %10037 = vmatmul.msk.bf16.vlgmr.msra.gmra.mxu1 %vm2988_vm12, %v4962_v26 }
 0xdf6   : > { %10023 = vmatmul.msk.bf16.vlgmr.msrb.gmra.mxu0 %vm2988_vm12, %v8199_v7  ;;  %v17844_v7 = vld [vmem:[#allocation81_spill] sm:$0xff] }
 0xdf7   : > { %v4966_v63 = vpack.c.bf16 %v17844_v7, %v17843_v16  ;;  %v17852_v16 = vld [vmem:[#allocation89_spill] sm:$0xff] }
 0xdf8   : > { %v7422_v58 = vpop.f32.mrf.mxu2  ;;  %v15902_v56 = vpop.f32.mrf.mxu3 }
 0xdf9   : > { %v7924_v10 = vrot.slane %v15902_v56, 1  ;;  %v7925_v47 = vrot.slane %v15902_v56, 2  ;;  %v7926_v55 = vrot.slane %v15902_v56, 3  ;;  %v7929_v58 = vrot.slane %v15816_v42, 2 }
 0xdfa   : > { %v15904_v13 = vpop.f32.mrf.mxu1  ;;  %v8061_v30 = vld [vmem:[#allocation1] sm:$0xff] }
 0xdfb   : > { %v6964_v50 = vpop.xlane.xlu2 %6963  ;;  %8062 = vst [vmem:[#allocation1] ss:$9 sm:$0xff] %v7908_v41  ;;  %v17845_v41 = vld [vmem:[#allocation82_spill] sm:$0xff] }
 0xdfc   : > { %10551 = vrcp.f32 %v6964_v50  ;;  %8063 = vst [vmem:[#allocation1 + $0x1] ss:$9 sm:$0xff] %v7909_v6  ;;  %v7930_v50 = vrot.slane %v15816_v42, 3 }
 0xdfd   : > { %8064 = vst [vmem:[#allocation1 + $0x2] ss:$9 sm:$0xff] %v7910_v62 }
 0xdfe   : > { %8066 = vst [vmem:[#allocation1 + $0x4] ss:$9 sm:$0xff] %v15808_v45 }
 0xdff   : > { %8067 = vst [vmem:[#allocation1 + $0x5] ss:$9 sm:$0xff] %v7912_v49 }
 0xe00   : > { %v7446_v43 = vpop.f32.mrf.mxu3  ;;  %v15907_v59 = vpop.f32.mrf.mxu2  ;;  %8068 = vst [vmem:[#allocation1 + $0x6] ss:$9 sm:$0xff] %v7913_v48 }
 0xe01   : > { %8069 = vst [vmem:[#allocation1 + $0x7] ss:$9 sm:$0xff] %v7914_v1  ;;  %v7937_v62 = vrot.slane %v15907_v59, 2 }
 0xe02   : > { %v10552_v4 = vpop.eup %10551  ;;  %v7590_v0 = vpop.f32.mrf.mxu1 }
 0xe03   : > { %v7030_v61 = vmul.f32 %v10552_v4, %v15794_v38  ;;  %v7911_v38 = vrot.slane %v15763_v54, 4  ;;  %v7932_v4 = vrot.slane %v15881_v44, 1  ;;  %v7933_v0 = vrot.slane %v15881_v44, 2 }
 0xe05   : > { %v7062_v40 = vpack.c.bf16 %v7030_v61, %v7030_v61  ;;  %10038 = vmatmul.msk.bf16.gmra.mxu1 %vm2988_vm12, %v4963_v32  ;;  %8065 = vst [vmem:[#allocation1 + $0x3] ss:$9 sm:$0xff] %v7911_v38  ;;  %v7938_v38 = vrot.slane %v15907_v59, 3 }
 0xe06   : > { %10024 = vmatmul.msk.bf16.gmra.mxu0 %vm2988_vm12, %v8200_v2 }
 0xe07   : > { %10017 = vmatmul.msk.bf16.vlgmr.msrb.gmra.mxu2 %vm3982_vm0, %v7062_v40  ;;  %v17846_v40 = vld [vmem:[#allocation83_spill] sm:$0xff] }
 0xe08   : > { %v7518_v27 = vpop.f32.mrf.mxu2  ;;  %v15921_v25 = vpop.f32.mrf.mxu3  ;;  %v4967_v6 = vpack.c.bf16 %v17846_v40, %v17845_v41 }
 0xe09   : > { %v7940_v48 = vrot.slane %v15921_v25, 1  ;;  %v7941_v1 = vrot.slane %v15921_v25, 2  ;;  %v7943_v19 = vrot.slane %v15921_v25, 4 }
 0xe0a   : > { %v15924_v23 = vpop.f32.mrf.mxu1 }
 0xe0b   : > { %v7964_v40 = vrot.slane %v15924_v23, 1 }
 0xe0c   : > { %v8070_v28 = vld [vmem:[#allocation1] sm:$0xff] }
 0xe0d   : > { %8071 = vst [vmem:[#allocation1] ss:$9 sm:$0xff] %v7915_v34  ;;  %v8202_v31 = vpack.c.bf16 %v8070_v28, %v8061_v30  ;;  %v7936_v30 = vrot.slane %v15907_v59, 1  ;;  %v17848_v34 = vld [vmem:[#allocation85_spill] sm:$0xff] }
 0xe0e   : > { %8072 = vst [vmem:[#allocation1 + $0x1] ss:$9 sm:$0xff] %v15864_v11  ;;  %v4965_v11 = vpack.c.bf16 %v17842_v20, %v17841_v46  ;;  %v17849_v20 = vld [vmem:[#allocation86_spill] sm:$0xff] }
 0xe0f   : > { %8073 = vst [vmem:[#allocation1 + $0x2] ss:$9 sm:$0xff] %v7916_v24 }
 0xe10   : > { %v7542_v54 = vpop.f32.mrf.mxu3  ;;  %8074 = vst [vmem:[#allocation1 + $0x3] ss:$9 sm:$0xff] %v7917_v18 }
 0xe11   : > { %8075 = vst [vmem:[#allocation1 + $0x4] ss:$9 sm:$0xff] %v7918_v35 }
 0xe12   : > { %v7686_v33 = vpop.f32.mrf.mxu1  ;;  %8076 = vst [vmem:[#allocation1 + $0x5] ss:$9 sm:$0xff] %v7919_v36 }
 0xe13   : > { %8077 = vst [vmem:[#allocation1 + $0x6] ss:$9 sm:$0xff] %v15884_v9  ;;  %v7928_v9 = vrot.slane %v15816_v42, 1  ;;  %v7942_v33 = vrot.slane %v15921_v25, 3 }
 0xe14   : > { %8078 = vst [vmem:[#allocation1 + $0x7] ss:$9 sm:$0xff] %v7920_v53 }
 0xe15   : > { %10039 = vmatmul.msk.bf16.gmra.mxu1 %vm2988_vm12, %v4964_v15  ;;  %v17847_v15 = vld [vmem:[#allocation84_spill] sm:$0xff] }
 0xe16   : > { %10025 = vmatmul.msk.bf16.gmra.mxu0 %vm2988_vm12, %v8201_v37  ;;  %v4968_v24 = vpack.c.bf16 %v17848_v34, %v17847_v15  ;;  %v10636_v34 = vld [vmem:[#allocation2 + $0x38] sm:$0xff] }
 0xe18   : > { %v15941_v45 = vpop.f32.mrf.mxu3 }
 0xe1b   : > { %v8079_v17 = vld [vmem:[#allocation1] sm:$0xff] }
 0xe1c   : > { %v6967_v5 = vpop.xlane.xlu1 %6966  ;;  %8080 = vst [vmem:[#allocation1] ss:$9 sm:$0xff] %v7921_v51  ;;  %v7950_v51 = vrot.slane %v15904_v13, 3 }
 0xe1d   : > { %10553 = vrcp.f32 %v6967_v5  ;;  %8081 = vst [vmem:[#allocation1 + $0x1] ss:$9 sm:$0xff] %v7922_v29  ;;  %v7948_v5 = vrot.slane %v15904_v13, 1 }
 0xe1e   : > { %8082 = vst [vmem:[#allocation1 + $0x2] ss:$9 sm:$0xff] %v7923_v39 }
 0xe1f   : > { %8083 = vst [vmem:[#allocation1 + $0x3] ss:$9 sm:$0xff] %v15902_v56 }
 0xe20   : > { %v7638_v14 = vpop.f32.mrf.mxu3  ;;  %8084 = vst [vmem:[#allocation1 + $0x4] ss:$9 sm:$0xff] %v7924_v10 }
 0xe21   : > { %8085 = vst [vmem:[#allocation1 + $0x5] ss:$9 sm:$0xff] %v7925_v47  ;;  %v7949_v14 = vrot.slane %v15904_v13, 2 }
 0xe22   : > { %8086 = vst [vmem:[#allocation1 + $0x6] ss:$9 sm:$0xff] %v7926_v55 }
 0xe23   : > { %v10554_v60 = vpop.eup %10553 }
 0xe24   : > { %v7031_v3 = vmul.f32 %v10554_v60, %v15814_v52  ;;  %v7927_v52 = vrot.slane %v15902_v56, 4  ;;  %v7931_v56 = vrot.slane %v15816_v42, 4 }
 0xe25   : > { %10040 = vmatmul.msk.bf16.gmra.mxu1 %vm2988_vm12, %v4965_v11  ;;  %v17850_v11 = vld [vmem:[#allocation87_spill] sm:$0xff] }
 0xe26   : > { %v7063_v8 = vpack.c.bf16 %v7031_v3, %v7031_v3  ;;  %10026 = vmatmul.msk.bf16.gmra.mxu0 %vm2988_vm12, %v8202_v31  ;;  %8087 = vst [vmem:[#allocation1 + $0x7] ss:$9 sm:$0xff] %v7927_v52  ;;  %v4969_v29 = vpack.c.bf16 %v17850_v11, %v17849_v20  ;;  %v7951_v3 = vrot.slane %v15904_v13, 4  ;;  %v10637_v20 = vld [vmem:[#allocation2 + $0x50] sm:$0xff] }
 0xe28   : > { %10018 = vmatmul.msk.bf16.vlgmr.msrb.gmra.mxu3 %vm3982_vm0, %v7063_v8 }
 0xe2d   : > { %v8088_v26 = vld [vmem:[#allocation1] sm:$0xff] }
 0xe2e   : > { %8089 = vst [vmem:[#allocation1] ss:$9 sm:$0xff] %v15816_v42  ;;  %v8203_v43 = vpack.c.bf16 %v8088_v26, %v8079_v17  ;;  %v7935_v42 = vrot.slane %v15881_v44, 4  ;;  %v17851_v26 = vld [vmem:[#allocation88_spill] sm:$0xff] }
 0xe2f   : > { %8090 = vst [vmem:[#allocation1 + $0x1] ss:$9 sm:$0xff] %v7928_v9  ;;  %v7956_v9 = vrot.slane %v15941_v45, 1  ;;  %v4970_v7 = vpack.c.bf16 %v17852_v16, %v17851_v26 }
 0xe30   : > { %8091 = vst [vmem:[#allocation1 + $0x2] ss:$9 sm:$0xff] %v7929_v58  ;;  %v7959_v58 = vrot.slane %v15941_v45, 4 }
 0xe31   : > { %8092 = vst [vmem:[#allocation1 + $0x3] ss:$9 sm:$0xff] %v7930_v50 }
 0xe32   : > { %8093 = vst [vmem:[#allocation1 + $0x4] ss:$9 sm:$0xff] %v7931_v56 }
 0xe33   : > { %v15960_v21 = vpop.f32.mrf.mxu0  ;;  %8094 = vst [vmem:[#allocation1 + $0x5] ss:$9 sm:$0xff] %v15881_v44  ;;  %v7939_v44 = vrot.slane %v15907_v59, 4 }
 0xe34   : > { %8095 = vst [vmem:[#allocation1 + $0x6] ss:$9 sm:$0xff] %v7932_v4  ;;  %v7945_v37 = vrot.slane %v15960_v21, 2  ;;  %v7946_v18 = vrot.slane %v15960_v21, 3  ;;  %v7947_v28 = vrot.slane %v15960_v21, 4 }
 0xe35   : > { %10041 = vmatmul.msk.bf16.gmra.mxu1 %vm2988_vm12, %v4966_v63  ;;  %8096 = vst [vmem:[#allocation1 + $0x7] ss:$9 sm:$0xff] %v7933_v0  ;;  %v7958_v63 = vrot.slane %v15941_v45, 3  ;;  %v16036_v4 = vld [vmem:[%s17853_s21] ss:$0 sm:$0xff]  ;;  %v10635_v0 = vld [vmem:[#allocation2] sm:$0xff] }
 0xe36   : > { %10027 = vmatmul.msk.bf16.gmra.mxu0 %vm2988_vm12, %v8203_v43 }
 0xe3b   : > { %v7566_v61 = vpop.f32.mrf.mxu0 }
 0xe3c   : > { %v8097_v32 = vld [vmem:[#allocation1] sm:$0xff] }
 0xe3d   : > { %8098 = vst [vmem:[#allocation1] ss:$9 sm:$0xff] %v7934_v22 }
 0xe3e   : > { %8099 = vst [vmem:[#allocation1 + $0x1] ss:$9 sm:$0xff] %v7935_v42 }
 0xe3f   : > { %8100 = vst [vmem:[#allocation1 + $0x2] ss:$9 sm:$0xff] %v15907_v59  ;;  %v7944_v59 = vrot.slane %v15960_v21, 1 }
 0xe40   : > { %8101 = vst [vmem:[#allocation1 + $0x3] ss:$9 sm:$0xff] %v7936_v30  ;;  %v17855_v30 = vld [vmem:[#allocation91_spill] sm:$0xff] }
 0xe41   : > { %v15974_v57 = vpop.f32.mrf.mxu2  ;;  %8102 = vst [vmem:[#allocation1 + $0x4] ss:$9 sm:$0xff] %v7937_v62 }
 0xe42   : > { %8103 = vst [vmem:[#allocation1 + $0x5] ss:$9 sm:$0xff] %v7938_v38  ;;  %v7952_v31 = vrot.slane %v15974_v57, 1  ;;  %v7953_v47 = vrot.slane %v15974_v57, 2  ;;  %v7954_v8 = vrot.slane %v15974_v57, 3  ;;  %v7965_v38 = vrot.slane %v15924_v23, 2 }
 0xe43   : > { %v15977_v2 = vpop.f32.mrf.mxu0  ;;  %8104 = vst [vmem:[#allocation1 + $0x6] ss:$9 sm:$0xff] %v7939_v44  ;;  %v7966_v44 = vrot.slane %v15924_v23, 3 }
 0xe44   : > { %8105 = vst [vmem:[#allocation1 + $0x7] ss:$9 sm:$0xff] %v15921_v25  ;;  %v7961_v42 = vrot.slane %v15977_v2, 2  ;;  %v7963_v41 = vrot.slane %v15977_v2, 4 }
 0xe45   : > { %10042 = vmatmul.msk.bf16.gmra.mxu1 %vm2988_vm12, %v4967_v6  ;;  %v17854_v6 = vld [vmem:[#allocation90_spill] sm:$0xff] }
 0xe46   : > { %v4971_v62 = vpack.c.bf16 %v17855_v30, %v17854_v6 }
 0xe49   : > { %v7614_v27 = vpop.f32.mrf.mxu2 }
 0xe4b   : > { %v7662_v49 = vpop.f32.mrf.mxu0  ;;  %v8106_v54 = vld [vmem:[#allocation1] sm:$0xff] }
 0xe4c   : > { %v8204_v12 = vpack.c.bf16 %v8106_v54, %v8097_v32  ;;  %8107 = vst [vmem:[#allocation1] ss:$9 sm:$0xff] %v7940_v48  ;;  %v7962_v32 = vrot.slane %v15977_v2, 3 }
 0xe4d   : > { %8108 = vst [vmem:[#allocation1 + $0x1] ss:$9 sm:$0xff] %v7941_v1 }
 0xe4e   : > { %10028 = vmatmul.msk.bf16.gmra.mxu0 %vm2988_vm12, %v8204_v12  ;;  %8109 = vst [vmem:[#allocation1 + $0x2] ss:$9 sm:$0xff] %v7942_v33 }
 0xe4f   : > { %8110 = vst [vmem:[#allocation1 + $0x3] ss:$9 sm:$0xff] %v7943_v19 }
 0xe50   : > { %8111 = vst [vmem:[#allocation1 + $0x4] ss:$9 sm:$0xff] %v15960_v21  ;;  %v7957_v21 = vrot.slane %v15941_v45, 2 }
 0xe51   : > { %8112 = vst [vmem:[#allocation1 + $0x5] ss:$9 sm:$0xff] %v7944_v59 }
 0xe52   : > { %8113 = vst [vmem:[#allocation1 + $0x6] ss:$9 sm:$0xff] %v7945_v37 }
 0xe53   : > { %8114 = vst [vmem:[#allocation1 + $0x7] ss:$9 sm:$0xff] %v7946_v18 }
 0xe55   : > { %10043 = vmatmul.msk.bf16.gmra.mxu1 %vm2988_vm12, %v4968_v24 }
 0xe58   : > { %v16000_v25 = vpop.f32.mrf.mxu2 }
 0xe59   : > { %v7968_v27 = vrot.slane %v16000_v25, 1  ;;  %v7969_v48 = vrot.slane %v16000_v25, 2  ;;  %v7970_v54 = vrot.slane %v16000_v25, 3  ;;  %v7971_v33 = vrot.slane %v16000_v25, 4 }
 0xe5a   : > { %v8115_v35 = vld [vmem:[#allocation1] sm:$0xff] }
 0xe5b   : > { %8116 = vst [vmem:[#allocation1] ss:$9 sm:$0xff] %v7947_v28 }
 0xe5c   : > { %8117 = vst [vmem:[#allocation1 + $0x1] ss:$9 sm:$0xff] %v15904_v13  ;;  %v7955_v13 = vrot.slane %v15974_v57, 4 }
 0xe5d   : > { %8118 = vst [vmem:[#allocation1 + $0x2] ss:$9 sm:$0xff] %v7948_v5 }
 0xe5e   : > { %8119 = vst [vmem:[#allocation1 + $0x3] ss:$9 sm:$0xff] %v7949_v14 }
 0xe5f   : > { %8120 = vst [vmem:[#allocation1 + $0x4] ss:$9 sm:$0xff] %v7950_v51 }
 0xe60   : > { %v7710_v36 = vpop.f32.mrf.mxu2  ;;  %v16003_v53 = vpop.f32.mrf.mxu3  ;;  %8121 = vst [vmem:[#allocation1 + $0x5] ss:$9 sm:$0xff] %v7951_v3 }
 0xe61   : > { %8122 = vst [vmem:[#allocation1 + $0x6] ss:$9 sm:$0xff] %v15974_v57  ;;  %v7972_v5 = vrot.slane %v16003_v53, 1  ;;  %v7973_v14 = vrot.slane %v16003_v53, 2  ;;  %v7975_v3 = vrot.slane %v16003_v53, 4 }
 0xe62   : > { %v16008_v60 = vpop.f32.mrf.mxu1  ;;  %8123 = vst [vmem:[#allocation1 + $0x7] ss:$9 sm:$0xff] %v7952_v31 }
 0xe63   : > { %v16011_v46 = vpop.f32.mrf.mxu0 }
 0xe64   : > { %v7979_v16 = vrot.slane %v16011_v46, 4 }
 0xe65   : > { %10044 = vmatmul.msk.bf16.gmra.mxu1 %vm2988_vm12, %v4969_v29  ;;  %v7974_v29 = vrot.slane %v16003_v53, 3 }
 0xe68   : > { %v7734_v17 = vpop.f32.mrf.mxu3 }
 0xe69   : > { %v8124_v55 = vld [vmem:[#allocation1] sm:$0xff]  ;;  %v7976_v17 = vrot.slane %v16011_v46, 1 }
 0xe6a   : > { %v7782_v39 = vpop.f32.mrf.mxu1  ;;  %v8205_v52 = vpack.c.bf16 %v8124_v55, %v8115_v35  ;;  %8125 = vst [vmem:[#allocation1] ss:$9 sm:$0xff] %v7953_v47  ;;  %v10638_v55 = vld [vmem:[#allocation2 + $0x18] sm:$0xff] }
 0xe6b   : > { %v7758_v10 = vpop.f32.mrf.mxu0  ;;  %8126 = vst [vmem:[#allocation1 + $0x1] ss:$9 sm:$0xff] %v7954_v8  ;;  %v7977_v39 = vrot.slane %v16011_v46, 2  ;;  %v7978_v8 = vrot.slane %v16011_v46, 3 }
 0xe6c   : > { %10029 = vmatmul.msk.bf16.gmra.mxu0 %vm2988_vm12, %v8205_v52  ;;  %8127 = vst [vmem:[#allocation1 + $0x2] ss:$9 sm:$0xff] %v7955_v13 }
 0xe6d   : > { %8128 = vst [vmem:[#allocation1 + $0x3] ss:$9 sm:$0xff] %v15941_v45  ;;  %v7960_v45 = vrot.slane %v15977_v2, 1 }
 0xe6e   : > { %8129 = vst [vmem:[#allocation1 + $0x4] ss:$9 sm:$0xff] %v7956_v9 }
 0xe6f   : > { %8130 = vst [vmem:[#allocation1 + $0x5] ss:$9 sm:$0xff] %v7957_v21 }
 0xe70   : > { %8131 = vst [vmem:[#allocation1 + $0x6] ss:$9 sm:$0xff] %v7958_v63 }
 0xe71   : > { %8132 = vst [vmem:[#allocation1 + $0x7] ss:$9 sm:$0xff] %v7959_v58 }
 0xe72   : > { %v8349_v43 = vpop.f32.mrf.mxu1 }
 0xe73   : > { %v8254_v50 = vpop.f32.mrf.mxu0 }
 0xe74   : > { %v8350_v56 = vadd.f32 %v8349_v43, %v8254_v50  ;;  %v7980_v50 = vrot.slane %v16008_v60, 1 }
 0xe75   : > { %10045 = vmatmul.msk.bf16.gmra.mxu1 %vm2988_vm12, %v4970_v7 }
 0xe76   : > { %v8399_v61 = vadd.f32 %v10635_v0, %v8350_v56  ;;  %v10639_v56 = vld [vmem:[#allocation2 + $0x30] sm:$0xff] }
 0xe78   : > { %v16039_v22 = vadd.f32 %v16036_v4, %v8399_v61  ;;  %v8133_v57 = vld [vmem:[#allocation1] sm:$0xff]  ;;  %v7981_v61 = vrot.slane %v16008_v60, 2 }
 0xe79   : > { %8134 = vst [vmem:[#allocation1] ss:$9 sm:$0xff] %v15977_v2  ;;  %v7967_v2 = vrot.slane %v15924_v23, 4 }
 0xe7a   : > { %8445 = vadd.xlane.f32.xlu2 %v16039_v22  ;;  %8135 = vst [vmem:[#allocation1 + $0x1] ss:$9 sm:$0xff] %v7960_v45  ;;  %v8351_v19 = vpop.f32.mrf.mxu1  ;;  %v7982_v45 = vrot.slane %v16008_v60, 3 }
 0xe7b   : > { %8136 = vst [vmem:[#allocation1 + $0x2] ss:$9 sm:$0xff] %v7961_v42  ;;  %v8256_v12 = vpop.f32.mrf.mxu0  ;;  %v7983_v42 = vrot.slane %v16008_v60, 4 }
 0xe7c   : > { %8137 = vst [vmem:[#allocation1 + $0x3] ss:$9 sm:$0xff] %v7962_v32  ;;  %v8352_v59 = vadd.f32 %v8351_v19, %v8256_v12 }
 0xe7d   : > { %8138 = vst [vmem:[#allocation1 + $0x4] ss:$9 sm:$0xff] %v7963_v41 }
 0xe7e   : > { %8139 = vst [vmem:[#allocation1 + $0x5] ss:$9 sm:$0xff] %v15924_v23  ;;  %v8485_v23 = vmul.f32 %v16039_v22, %v16039_v22  ;;  %v8400_v24 = vadd.f32 %v10636_v34, %v8352_v59 }
 0xe7f   : > { %8140 = vst [vmem:[#allocation1 + $0x6] ss:$9 sm:$0xff] %v7964_v40 }
 0xe80   : > { %8141 = vst [vmem:[#allocation1 + $0x7] ss:$9 sm:$0xff] %v7965_v38  ;;  %v16067_v37 = vadd.f32 %v16036_v4, %v8400_v24 }
 0xe82   : > { %8505 = vadd.xlane.f32.xlu2 %v8485_v23  ;;  %8447 = vadd.xlane.f32.xlu0 %v16067_v37  ;;  %v8486_v28 = vmul.f32 %v16067_v37, %v16067_v37  ;;  %v10641_v23 = vld [vmem:[#allocation2 + $0x78] sm:$0xff] }
 0xe83   : > { %v8259_v18 = vpop.f32.mrf.mxu0 }
 0xe85   : > { %10046 = vmatmul.msk.bf16.gmra.mxu1 %vm2988_vm12, %v4971_v62  ;;  %v10640_v62 = vld [vmem:[#allocation2 + $0x68] sm:$0xff] }
 0xe87   : > { %v8142_v49 = vld [vmem:[#allocation1] sm:$0xff] }
 0xe88   : > { %v8206_v1 = vpack.c.bf16 %v8142_v49, %v8133_v57  ;;  %8143 = vst [vmem:[#allocation1] ss:$9 sm:$0xff] %v7966_v44 }
 0xe89   : > { %8144 = vst [vmem:[#allocation1 + $0x1] ss:$9 sm:$0xff] %v7967_v2 }
 0xe8a   : > { %10030 = vmatmul.msk.bf16.gmra.mxu0 %vm2988_vm12, %v8206_v1  ;;  %8145 = vst [vmem:[#allocation1 + $0x2] ss:$9 sm:$0xff] %v16000_v25  ;;  %v16063_v15 = vpop.f32.mrf.mxu2  ;;  %v8354_v25 = vpop.f32.mrf.mxu1  ;;  %8507 = vadd.xlane.f32.xlu2 %v8486_v28 }
 0xe8b   : > { %8146 = vst [vmem:[#allocation1 + $0x3] ss:$9 sm:$0xff] %v7968_v27  ;;  %v8355_v35 = vadd.f32 %v8354_v25, %v8259_v18  ;;  %v8261_v10 = vpop.f32.mrf.mxu0  ;;  %v7984_v32 = vrot.slane %v16063_v15, 1  ;;  %v7985_v27 = vrot.slane %v16063_v15, 2  ;;  %v7986_v1 = vrot.slane %v16063_v15, 3 }
 0xe8c   : > { %8147 = vst [vmem:[#allocation1 + $0x4] ss:$9 sm:$0xff] %v7969_v48  ;;  %v7987_v12 = vrot.slane %v16063_v15, 4 }
 0xe8d   : > { %8148 = vst [vmem:[#allocation1 + $0x5] ss:$9 sm:$0xff] %v7970_v54  ;;  %v8401_v11 = vadd.f32 %v10637_v20, %v8355_v35 }
 0xe8e   : > { %8149 = vst [vmem:[#allocation1 + $0x6] ss:$9 sm:$0xff] %v7971_v33 }
 0xe8f   : > { %8150 = vst [vmem:[#allocation1 + $0x7] ss:$9 sm:$0xff] %v16003_v53  ;;  %v16077_v31 = vadd.f32 %v16036_v4, %v8401_v11 }
 0xe91   : > { %8449 = vadd.xlane.f32.xlu1 %v16077_v31  ;;  %v8487_v9 = vmul.f32 %v16077_v31, %v16077_v31 }
 0xe92   : > { %v7806_v36 = vpop.f32.mrf.mxu2  ;;  %v8356_v47 = vpop.f32.mrf.mxu1 }
 0xe93   : > { %v8357_v53 = vadd.f32 %v8356_v47, %v8261_v10  ;;  %v8264_v21 = vpop.f32.mrf.mxu0  ;;  %v10643_v10 = vld [vmem:[#allocation2 + $0x8] sm:$0xff] }
 0xe95   : > { %v8402_v13 = vadd.f32 %v10638_v55, %v8357_v53 }
 0xe96   : > { %v8151_v51 = vld [vmem:[#allocation1] sm:$0xff] }
 0xe97   : > { %8152 = vst [vmem:[#allocation1] ss:$9 sm:$0xff] %v7972_v5  ;;  %v16085_v52 = vadd.f32 %v16036_v4, %v8402_v13  ;;  %v10642_v5 = vld [vmem:[#allocation2 + $0x80] sm:$0xff] }
 0xe98   : > { %8153 = vst [vmem:[#allocation1 + $0x1] ss:$9 sm:$0xff] %v7973_v14 }
 0xe99   : > { %8154 = vst [vmem:[#allocation1 + $0x2] ss:$9 sm:$0xff] %v7974_v29  ;;  %8509 = vadd.xlane.f32.xlu1 %v8487_v9  ;;  %8451 = vadd.xlane.f32.xlu2 %v16085_v52  ;;  %v8488_v57 = vmul.f32 %v16085_v52, %v16085_v52 }
 0xe9a   : > { %8155 = vst [vmem:[#allocation1 + $0x3] ss:$9 sm:$0xff] %v7975_v3  ;;  %v8359_v26 = vpop.f32.mrf.mxu1 }
 0xe9b   : > { %8156 = vst [vmem:[#allocation1 + $0x4] ss:$9 sm:$0xff] %v16011_v46  ;;  %v8360_v7 = vadd.f32 %v8359_v26, %v8264_v21  ;;  %v8266_v41 = vpop.f32.mrf.mxu0  ;;  %v10644_v21 = vld [vmem:[#allocation2 + $0x88] sm:$0xff] }
 0xe9c   : > { %8157 = vst [vmem:[#allocation1 + $0x5] ss:$9 sm:$0xff] %v7976_v17 }
 0xe9d   : > { %8158 = vst [vmem:[#allocation1 + $0x6] ss:$9 sm:$0xff] %v7977_v39  ;;  %v8403_v0 = vadd.f32 %v10639_v56, %v8360_v7 }
 0xe9e   : > { %8159 = vst [vmem:[#allocation1 + $0x7] ss:$9 sm:$0xff] %v7978_v8 }
 0xe9f   : > { %v16097_v46 = vadd.f32 %v16036_v4, %v8403_v0 }
 0xea1   : > { %8511 = vadd.xlane.f32.xlu2 %v8488_v57  ;;  %8453 = vadd.xlane.f32.xlu1 %v16097_v46 }
 0xea2   : > { %v8361_v40 = vpop.f32.mrf.mxu1 }
 0xea3   : > { %v8362_v6 = vadd.f32 %v8361_v40, %v8266_v41  ;;  %v8269_v49 = vpop.f32.mrf.mxu0 }
 0xea5   : > { %v8160_v63 = vld [vmem:[#allocation1] sm:$0xff]  ;;  %v8404_v38 = vadd.f32 %v10640_v62, %v8362_v6 }
 0xea6   : > { %v8207_v43 = vpack.c.bf16 %v8160_v63, %v8151_v51  ;;  %8161 = vst [vmem:[#allocation1] ss:$9 sm:$0xff] %v7979_v16 }
 0xea7   : > { %8162 = vst [vmem:[#allocation1 + $0x1] ss:$9 sm:$0xff] %v16008_v60  ;;  %v16106_v44 = vadd.f32 %v16036_v4, %v8404_v38  ;;  %v8489_v60 = vmul.f32 %v16097_v46, %v16097_v46 }
 0xea8   : > { %10031 = vmatmul.msk.bf16.gmra.mxu0 %vm2988_vm12, %v8207_v43  ;;  %8163 = vst [vmem:[#allocation1 + $0x2] ss:$9 sm:$0xff] %v7980_v50  ;;  %v10645_v43 = vld [vmem:[#allocation2 + $0x28] sm:$0xff] }
 0xea9   : > { %8164 = vst [vmem:[#allocation1 + $0x3] ss:$9 sm:$0xff] %v7981_v61  ;;  %8513 = vadd.xlane.f32.xlu1 %v8489_v60  ;;  %8455 = vadd.xlane.f32.xlu2 %v16106_v44  ;;  %v8490_v2 = vmul.f32 %v16106_v44, %v16106_v44  ;;  %v10647_v60 = vld [vmem:[#allocation2 + $0x58] sm:$0xff] }
 0xeaa   : > { %8165 = vst [vmem:[#allocation1 + $0x4] ss:$9 sm:$0xff] %v7982_v45  ;;  %v8364_v48 = vpop.f32.mrf.mxu1 }
 0xeab   : > { %v7828_v58 = vpop.f32.mrf.mxu3  ;;  %8166 = vst [vmem:[#allocation1 + $0x5] ss:$9 sm:$0xff] %v7983_v42  ;;  %v8365_v54 = vadd.f32 %v8364_v48, %v8269_v49  ;;  %8515 = vadd.xlane.f32.xlu0 %v8490_v2 }
 0xeac   : > { %8167 = vst [vmem:[#allocation1 + $0x6] ss:$9 sm:$0xff] %v16063_v15  ;;  %v7988_v19 = vrot.slane %v7828_v58, 1  ;;  %v7989_v34 = vrot.slane %v7828_v58, 2  ;;  %v7990_v24 = vrot.slane %v7828_v58, 3  ;;  %v7991_v25 = vrot.slane %v7828_v58, 4  ;;  %v8271_v15 = vpop.f32.mrf.mxu0 }
 0xead   : > { %8168 = vst [vmem:[#allocation1 + $0x7] ss:$9 sm:$0xff] %v7984_v32  ;;  %v8405_v59 = vadd.f32 %v10641_v23, %v8365_v54  ;;  %v10646_v32 = vld [vmem:[#allocation2 + $0x40] sm:$0xff] }
 0xeaf   : > { %v16117_v18 = vadd.f32 %v16036_v4, %v8405_v59 }
 0xeb1   : > { %8457 = vadd.xlane.f32.xlu2 %v16117_v18  ;;  %v8491_v28 = vmul.f32 %v16117_v18, %v16117_v18 }
 0xeb2   : > { %v8366_v35 = vpop.f32.mrf.mxu1 }
 0xeb3   : > { %v7830_v30 = vpop.f32.mrf.mxu3  ;;  %v8367_v36 = vadd.f32 %v8366_v35, %v8271_v15  ;;  %8517 = vadd.xlane.f32.xlu0 %v8491_v28  ;;  %v10649_v15 = vld [vmem:[#allocation2 + $0x98] sm:$0xff] }
 0xeb4   : > { %v8169_v33 = vld [vmem:[#allocation1] sm:$0xff]  ;;  %v8274_v11 = vpop.f32.mrf.mxu0 }
 0xeb5   : > { %8170 = vst [vmem:[#allocation1] ss:$9 sm:$0xff] %v7985_v27  ;;  %v8406_v14 = vadd.f32 %v10642_v5, %v8367_v36 }
 0xeb6   : > { %8171 = vst [vmem:[#allocation1 + $0x1] ss:$9 sm:$0xff] %v7986_v1 }
 0xeb7   : > { %8172 = vst [vmem:[#allocation1 + $0x2] ss:$9 sm:$0xff] %v7987_v12  ;;  %v16123_v51 = vadd.f32 %v16036_v4, %v8406_v14 }
 0xeb8   : > { %8173 = vst [vmem:[#allocation1 + $0x3] ss:$9 sm:$0xff] %v7828_v58 }
 0xeb9   : > { %8174 = vst [vmem:[#allocation1 + $0x4] ss:$9 sm:$0xff] %v7988_v19  ;;  %8459 = vadd.xlane.f32.xlu1 %v16123_v51  ;;  %v8492_v20 = vmul.f32 %v16123_v51, %v16123_v51 }
 0xeba   : > { %8175 = vst [vmem:[#allocation1 + $0x5] ss:$9 sm:$0xff] %v7989_v34  ;;  %v8369_v29 = vpop.f32.mrf.mxu1 }
 0xebb   : > { %8176 = vst [vmem:[#allocation1 + $0x6] ss:$9 sm:$0xff] %v7990_v24  ;;  %v8370_v17 = vadd.f32 %v8369_v29, %v8274_v11  ;;  %8519 = vadd.xlane.f32.xlu2 %v8492_v20 }
 0xebc   : > { %8177 = vst [vmem:[#allocation1 + $0x7] ss:$9 sm:$0xff] %v7991_v25  ;;  %v8276_v55 = vpop.f32.mrf.mxu0 }
 0xebd   : > { %v8407_v47 = vadd.f32 %v10643_v10, %v8370_v17 }
 0xebf   : > { %v16130_v8 = vadd.f32 %v16036_v4, %v8407_v47 }
 0xec1   : > { %8461 = vadd.xlane.f32.xlu1 %v16130_v8  ;;  %v8493_v53 = vmul.f32 %v16130_v8, %v16130_v8 }
 0xec2   : > { %v8371_v13 = vpop.f32.mrf.mxu1 }
 0xec3   : > { %v8178_v3 = vld [vmem:[#allocation1] sm:$0xff]  ;;  %v8372_v9 = vadd.f32 %v8371_v13, %v8276_v55  ;;  %8521 = vadd.xlane.f32.xlu2 %v8493_v53  ;;  %v10650_v55 = vld [vmem:[#allocation2 + $0x60] sm:$0xff] }
 0xec4   : > { %v8208_v39 = vpack.c.bf16 %v8178_v3, %v8169_v33  ;;  %v10648_v33 = vld [vmem:[#allocation2 + $0x10] sm:$0xff] }
 0xec5   : > { %v8408_v26 = vadd.f32 %v10644_v21, %v8372_v9 }
 0xec6   : > { %10032 = vmatmul.msk.bf16.gmra.mxu0 %vm2988_vm12, %v8208_v39 }
 0xec7   : > { %v16136_v16 = vadd.f32 %v16036_v4, %v8408_v26  ;;  %v10155_v26 = vld [vmem:[%s11142_s15 + $0x38] sm:$0xff] }
 0xec8   : > { %9009 = vmatpush.bf16.msra.mxu2 %v10155_v26  ;;  %v10651_v26 = vld [vmem:[#allocation2 + $0x20] sm:$0xff] }
 0xec9   : > { %8463 = vadd.xlane.f32.xlu0 %v16136_v16  ;;  %v8494_v7 = vmul.f32 %v16136_v16, %v16136_v16 }
 0xeca   : > { %v8374_v58 = vpop.f32.mrf.mxu1 }
 0xecb   : > { %v8279_v63 = vpop.f32.mrf.mxu0  ;;  %8523 = vadd.xlane.f32.xlu1 %v8494_v7 }
 0xecc   : > { %v8375_v50 = vadd.f32 %v8374_v58, %v8279_v63 }
 0xece   : > { %v8409_v56 = vadd.f32 %v10645_v43, %v8375_v50  ;;  %v10154_v50 = vld [vmem:[%s11142_s15 + $0x30] sm:$0xff] }
 0xecf   : > { %9010 = vmatpush.bf16.msra.mxu2 %v10154_v50 }
 0xed0   : > { %v16142_v0 = vadd.f32 %v16036_v4, %v8409_v56 }
 0xed2   : > { %8465 = vadd.xlane.f32.xlu0 %v16142_v0  ;;  %v8495_v61 = vmul.f32 %v16142_v0, %v16142_v0  ;;  %v8376_v57 = vpop.f32.mrf.mxu1 }
 0xed3   : > { %v8281_v45 = vpop.f32.mrf.mxu0 }
 0xed4   : > { %v8377_v42 = vadd.f32 %v8376_v57, %v8281_v45  ;;  %8525 = vadd.xlane.f32.xlu1 %v8495_v61 }
 0xed6   : > { %v8410_v41 = vadd.f32 %v10646_v32, %v8377_v42  ;;  %v10153_v32 = vld [vmem:[%s11142_s15 + $0x28] sm:$0xff] }
 0xed7   : > { %9011 = vmatpush.bf16.msra.mxu2 %v10153_v32 }
 0xed8   : > { %v16148_v40 = vadd.f32 %v16036_v4, %v8410_v41 }
 0xeda   : > { %8467 = vadd.xlane.f32.xlu2 %v16148_v40  ;;  %v8496_v6 = vmul.f32 %v16148_v40, %v16148_v40  ;;  %v8379_v30 = vpop.f32.mrf.mxu1 }
 0xedc   : > { %8527 = vadd.xlane.f32.xlu0 %v8496_v6 }
 0xee2   : > { %v8381_v49 = vpop.f32.mrf.mxu1 }
 0xee9   : > { %v8284_v62 = vpop.f32.mrf.mxu0 }
 0xeea   : > { %v8380_v38 = vadd.f32 %v8379_v30, %v8284_v62  ;;  %v8384_v34 = vpop.f32.mrf.mxu1 }
 0xeec   : > { %v8411_v2 = vadd.f32 %v10647_v60, %v8380_v38 }
 0xeed   : > { %v8446_v59 = vpop.xlane.xlu2 %8445 }
 0xeee   : > { %v16154_v27 = vadd.f32 %v16036_v4, %v8411_v2  ;;  %v16165_v25 = vmul.f32 0.03125, %v8446_v59  ;;  %v10152_v2 = vld [vmem:[%s11142_s15 + $0x20] sm:$0xff]  ;;  %v10151_v59 = vld [vmem:[%s11142_s15 + $0x18] sm:$0xff] }
 0xeef   : > { %9012 = vmatpush.bf16.msra.mxu2 %v10152_v2 }
 0xef0   : > { %8469 = vadd.xlane.f32.xlu2 %v16154_v27  ;;  %v8497_v48 = vmul.f32 %v16154_v27, %v16154_v27  ;;  %v8585_v5 = vmul.f32 %v16165_v25, %v16165_v25 }
 0xef1   : > { %v8286_v1 = vpop.f32.mrf.mxu0 }
 0xef2   : > { %v8382_v54 = vadd.f32 %v8381_v49, %v8286_v1  ;;  %8529 = vadd.xlane.f32.xlu0 %v8497_v48  ;;  %v8386_v29 = vpop.f32.mrf.mxu1 }
 0xef3   : > { %9013 = vmatpush.bf16.msra.mxu2 %v10151_v59 }
 0xef4   : > { %v8412_v12 = vadd.f32 %v10648_v33, %v8382_v54 }
 0xef5   : > { %v8506_v36 = vpop.xlane.xlu2 %8505  ;;  %v8448_v11 = vpop.xlane.xlu0 %8447 }
 0xef6   : > { %v16160_v19 = vadd.f32 %v16036_v4, %v8412_v12  ;;  %v8565_v14 = vmul.f32 0.03125, %v8506_v36  ;;  %v16175_v47 = vmul.f32 0.03125, %v8448_v11  ;;  %v8625_v36 = vsub.f32 %v16039_v22, %v16165_v25 }
 0xef8   : > { %8471 = vadd.xlane.f32.xlu1 %v16160_v19  ;;  %v8498_v23 = vmul.f32 %v16160_v19, %v16160_v19  ;;  %v8605_v3 = vsub.f32 %v8565_v14, %v8585_v5  ;;  %v8586_v7 = vmul.f32 %v16175_v47, %v16175_v47 }
 0xefa   : > { %8531 = vadd.xlane.f32.xlu2 %v8498_v23  ;;  %v8645_v10 = vadd.f32 1e-05, %v8605_v3 }
 0xefc   : > { %10555 = vrsqrt.f32 %v8645_v10  ;;  %vm8671_vm2 = vweird.f32 %v8645_v10 }
 0xefd   : > { %v8508_v9 = vpop.xlane.xlu2 %8507 }
 0xefe   : > { %v8566_v63 = vmul.f32 0.03125, %v8508_v9 }
 0xf00   : > { %v8606_v43 = vsub.f32 %v8566_v63, %v8586_v7 }
 0xf02   : > { %v10556_v61 = vpop.eup %10555  ;;  %v8646_v45 = vadd.f32 1e-05, %v8606_v43  ;;  %v10149_v43 = vld [vmem:[%s11142_s15 + $0x8] sm:$0xff] }
 0xf03   : > { %v8666_v42 = vmul.f32 %v10556_v61, %v8645_v10  ;;  %vm8672_vm1 = vweird.f32 %v10556_v61 }
 0xf04   : > { %v8450_v21 = vpop.xlane.xlu1 %8449  ;;  %10557 = vrsqrt.f32 %v8646_v45  ;;  %vm8673_vm3 = vmor %vm8671_vm2, %vm8672_vm1  ;;  %vm8681_vm5 = vweird.f32 %v8646_v45 }
 0xf05   : > { %v16187_v57 = vmul.f32 0.03125, %v8450_v21  ;;  %v8667_v41 = vmul.f32 %v10556_v61, %v8666_v42 }
 0xf07   : > { %v8289_v24 = vpop.f32.mrf.mxu0  ;;  %v8587_v62 = vmul.f32 %v16187_v57, %v16187_v57  ;;  %v8668_v60 = vmul.f32 0.5, %v8667_v41 }
 0xf08   : > { %v8385_v28 = vadd.f32 %v8384_v34, %v8289_v24  ;;  %v8389_v34 = vpop.f32.mrf.mxu1 }
 0xf09   : > { %v8669_v48 = vsub.f32 1.5, %v8668_v60 }
 0xf0a   : > { %v8413_v35 = vadd.f32 %v10649_v15, %v8385_v28  ;;  %v10558_v1 = vpop.eup %10557 }
 0xf0b   : > { %v8670_v12 = vmul.f32 %v10556_v61, %v8669_v48  ;;  %v8676_v23 = vmul.f32 %v10558_v1, %v8646_v45  ;;  %vm8682_vm4 = vweird.f32 %v10558_v1 }
 0xf0c   : > { %v16170_v20 = vadd.f32 %v16036_v4, %v8413_v35  ;;  %v8510_v6 = vpop.xlane.xlu1 %8509  ;;  %v8452_v30 = vpop.xlane.xlu2 %8451  ;;  %vm8683_vm6 = vmor %vm8681_vm5, %vm8682_vm4 }
 0xf0d   : > { %v8567_v38 = vmul.f32 0.03125, %v8510_v6  ;;  %v16195_v33 = vmul.f32 0.03125, %v8452_v30  ;;  %v8674_v24 = vsel %vm8673_vm3, %v10556_v61, %v8670_v12  ;;  %v8677_v28 = vmul.f32 %v10558_v1, %v8676_v23  ;;  %v10148_v12 = vld [vmem:[%s11142_s15] sm:$0xff] }
 0xf0e   : > { %8473 = vadd.xlane.f32.xlu1 %v16170_v20  ;;  %v8499_v17 = vmul.f32 %v16170_v20, %v16170_v20  ;;  %v8626_v61 = vsub.f32 %v16067_v37, %v16175_v47 }
 0xf0f   : > { %v8291_v39 = vpop.f32.mrf.mxu0  ;;  %v8607_v49 = vsub.f32 %v8567_v38, %v8587_v62  ;;  %v8588_v5 = vmul.f32 %v16195_v33, %v16195_v33  ;;  %v8678_v11 = vmul.f32 0.5, %v8677_v28 }
 0xf10   : > { %v8387_v53 = vadd.f32 %v8386_v29, %v8291_v39  ;;  %8533 = vadd.xlane.f32.xlu2 %v8499_v17  ;;  %v10150_v29 = vld [vmem:[%s11142_s15 + $0x10] sm:$0xff]  ;;  %v16205_v17 = vld [vmem:[%s11137_s2] ss:$0 sm:$0xff]  ;;  %v8865_v39 = vmul.f32 %v8674_v24, %v8625_v36  ;;  %v8391_v62 = vpop.f32.mrf.mxu1 }
 0xf11   : > { %v16193_v54 = vadd.f32 1e-05, %v8607_v49  ;;  %9014 = vmatpush.bf16.msra.mxu2 %v10150_v29  ;;  %v16230_v49 = vld [vmem:[%s17856_s10] ss:$0 sm:$0xff]  ;;  %v10652_v29 = vld [vmem:[#allocation2 + $0x48] sm:$0xff] }
 0xf12   : > { %v8414_v13 = vadd.f32 %v10650_v55, %v8387_v53  ;;  %v8679_v55 = vsub.f32 1.5, %v8678_v11 }
 0xf13   : > { %10559 = vrsqrt.f32 %v16193_v54  ;;  %vm8691_vm8 = vweird.f32 %v16193_v54 }
 0xf14   : > { %v16181_v58 = vadd.f32 %v16036_v4, %v8414_v13  ;;  %v8512_v15 = vpop.xlane.xlu2 %8511  ;;  %v8454_v35 = vpop.xlane.xlu1 %8453  ;;  %v8680_v63 = vmul.f32 %v10558_v1, %v8679_v55 }
 0xf15   : > { %v8568_v14 = vmul.f32 0.03125, %v8512_v15  ;;  %v16207_v13 = vmul.f32 0.03125, %v8454_v35  ;;  %9015 = vmatpush.bf16.msra.mxu2 %v10149_v43 }
 0xf16   : > { %8475 = vadd.xlane.f32.xlu0 %v16181_v58  ;;  %v8500_v56 = vmul.f32 %v16181_v58, %v16181_v58  ;;  %v8684_v32 = vsel %vm8683_vm6, %v10558_v1, %v8680_v63 }
 0xf17   : > { %v8608_v10 = vsub.f32 %v8568_v14, %v8588_v5  ;;  %v8589_v41 = vmul.f32 %v16207_v13, %v16207_v13  ;;  %v8866_v38 = vmul.f32 %v8684_v32, %v8626_v61 }
 0xf18   : > { %8535 = vadd.xlane.f32.xlu1 %v8500_v56  ;;  %v8888_v56 = vmul.f32 %v16205_v17, %v8865_v39 }
 0xf19   : > { %v16209_v9 = vpop.eup %10559  ;;  %v16211_v25 = vadd.f32 1e-05, %v8608_v10  ;;  %v8889_v59 = vmul.f32 %v16205_v17, %v8866_v38  ;;  %9016 = vmatpush.bf16.msra.mxu2 %v10148_v12 }
 0xf1a   : > { %v8686_v50 = vmul.f32 %v16209_v9, %v16193_v54  ;;  %v8911_v14 = vadd.f32 %v16230_v49, %v8888_v56  ;;  %vm8692_vm7 = vweird.f32 %v16209_v9 }
 0xf1b   : > { %10561 = vrsqrt.f32 %v16211_v25  ;;  %v8912_v11 = vadd.f32 %v16230_v49, %v8889_v59  ;;  %vm16253_vm9 = vmor %vm8691_vm8, %vm8692_vm7  ;;  %vm8701_vm11 = vweird.f32 %v16211_v25 }
 0xf1c   : > { %v8687_v45 = vmul.f32 %v16209_v9, %v8686_v50  ;;  %v8514_v6 = vpop.xlane.xlu1 %8513  ;;  %v8456_v30 = vpop.xlane.xlu2 %8455 }
 0xf1d   : > { %v8569_v60 = vmul.f32 0.03125, %v8514_v6  ;;  %v16226_v2 = vmul.f32 0.03125, %v8456_v30 }
 0xf1e   : > { %v8516_v21 = vpop.xlane.xlu0 %8515  ;;  %v8688_v1 = vmul.f32 0.5, %v8687_v45  ;;  %v8627_v45 = vsub.f32 %v16077_v31, %v16187_v57 }
 0xf1f   : > { %v8570_v47 = vmul.f32 0.03125, %v8516_v21  ;;  %v8590_v24 = vmul.f32 %v16226_v2, %v16226_v2  ;;  %v8931_v21 = vpack.c.bf16 %v8912_v11, %v8911_v14 }
 0xf20   : > { %v8689_v15 = vsub.f32 1.5, %v8688_v1  ;;  %v8628_v1 = vsub.f32 %v16085_v52, %v16195_v33 }
 0xf21   : > { %v10562_v35 = vpop.eup %10561  ;;  %v8610_v5 = vsub.f32 %v8570_v47, %v8590_v24  ;;  %9017 = vmatmul.bf16.vlgmr.msra.gmra.mxu2 %v8931_v21 }
 0xf22   : > { %v8690_v39 = vmul.f32 %v16209_v9, %v8689_v15  ;;  %v8696_v10 = vmul.f32 %v10562_v35, %v16211_v25  ;;  %vm8702_vm10 = vweird.f32 %v10562_v35 }
 0xf23   : > { %v16247_v55 = vadd.f32 1e-05, %v8610_v5  ;;  %vm8703_vm12 = vmor %vm8701_vm11, %vm8702_vm10 }
 0xf24   : > { %v8458_v63 = vpop.xlane.xlu2 %8457  ;;  %v8694_v54 = vsel %vm16253_vm9, %v16209_v9, %v8690_v39 }
 0xf25   : > { %v8294_v3 = vpop.f32.mrf.mxu0  ;;  %v16258_v43 = vmul.f32 0.03125, %v8458_v63  ;;  %v8867_v47 = vmul.f32 %v8694_v54, %v8627_v45  ;;  %vm8721_vm1 = vweird.f32 %v16247_v55 }
 0xf26   : > { %v8390_v53 = vadd.f32 %v8389_v34, %v8294_v3  ;;  %v8609_v34 = vsub.f32 %v8569_v60, %v8589_v41 }
 0xf27   : > { %v8591_v41 = vmul.f32 %v16258_v43, %v16258_v43  ;;  %v8890_v5 = vmul.f32 %v16205_v17, %v8867_v47 }
 0xf28   : > { %v8415_v7 = vadd.f32 %v10651_v26, %v8390_v53  ;;  %v16239_v36 = vadd.f32 1e-05, %v8609_v34  ;;  %v8518_v53 = vpop.xlane.xlu0 %8517 }
 0xf29   : > { %v8571_v56 = vmul.f32 0.03125, %v8518_v53  ;;  %v8913_v21 = vadd.f32 %v16230_v49, %v8890_v5 }
 0xf2a   : > { %v16221_v42 = vadd.f32 %v16036_v4, %v8415_v7  ;;  %10563 = vrsqrt.f32 %v16239_v36  ;;  %v8697_v7 = vmul.f32 %v10562_v35, %v8696_v10  ;;  %vm8711_vm15 = vweird.f32 %v16239_v36 }
 0xf2b   : > { %10565 = vrsqrt.f32 %v16247_v55  ;;  %v8611_v60 = vsub.f32 %v8571_v56, %v8591_v41 }
 0xf2c   : > { %8477 = vadd.xlane.f32.xlu0 %v16221_v42  ;;  %v8501_v48 = vmul.f32 %v16221_v42, %v16221_v42  ;;  %v8698_v32 = vmul.f32 0.5, %v8697_v7  ;;  %v8460_v6 = vpop.xlane.xlu1 %8459 }
 0xf2d   : > { %v8296_v23 = vpop.f32.mrf.mxu0  ;;  %v16279_v12 = vadd.f32 1e-05, %v8611_v60 }
 0xf2e   : > { %v8392_v28 = vadd.f32 %v8391_v62, %v8296_v23  ;;  %8537 = vadd.xlane.f32.xlu1 %v8501_v48  ;;  %v8699_v30 = vsub.f32 1.5, %v8698_v32  ;;  %v16270_v62 = vmul.f32 0.03125, %v8460_v6 }
 0xf2f   : > { %10567 = vrsqrt.f32 %v16279_v12  ;;  %vm8731_vm7 = vweird.f32 %v16279_v12 }
 0xf30   : > { %v8416_v3 = vadd.f32 %v10652_v29, %v8392_v28  ;;  %v16272_v38 = vpop.eup %10563  ;;  %v8700_v48 = vmul.f32 %v10562_v35, %v8699_v30  ;;  %v8592_v23 = vmul.f32 %v16270_v62, %v16270_v62  ;;  %v8520_v28 = vpop.xlane.xlu2 %8519 }
 0xf31   : > { %v8706_v9 = vmul.f32 %v16272_v38, %v16239_v36  ;;  %v10566_v57 = vpop.eup %10565  ;;  %v8572_v25 = vmul.f32 0.03125, %v8520_v28  ;;  %vm8712_vm13 = vweird.f32 %v16272_v38  ;;  %v8630_v36 = vsub.f32 %v16106_v44, %v16226_v2  ;;  %v10653_v2 = vld [vmem:[#allocation2 + $0x70] sm:$0xff] }
 0xf32   : > { %v16250_v26 = vadd.f32 %v16036_v4, %v8416_v3  ;;  %v8704_v59 = vsel %vm8703_vm12, %v10562_v35, %v8700_v48  ;;  %v8716_v24 = vmul.f32 %v10566_v57, %v16247_v55  ;;  %vm8722_vm14 = vweird.f32 %v10566_v57  ;;  %vm16302_vm0 = vmor %vm8711_vm15, %vm8712_vm13 }
 0xf33   : > { %v8707_v34 = vmul.f32 %v16272_v38, %v8706_v9  ;;  %v8868_v15 = vmul.f32 %v8704_v59, %v8628_v1  ;;  %v8612_v11 = vsub.f32 %v8572_v25, %v8592_v23  ;;  %vm8723_vm2 = vmor %vm8721_vm1, %vm8722_vm14  ;;  %v8629_v55 = vsub.f32 %v16097_v46, %v16207_v13 }
 0xf34   : > { %8479 = vadd.xlane.f32.xlu2 %v16250_v26  ;;  %v8502_v61 = vmul.f32 %v16250_v26, %v16250_v26  ;;  %v8717_v33 = vmul.f32 %v10566_v57, %v8716_v24  ;;  %v8462_v29 = vpop.xlane.xlu1 %8461 }
 0xf35   : > { %v8708_v14 = vmul.f32 0.5, %v8707_v34  ;;  %v8891_v3 = vmul.f32 %v16205_v17, %v8868_v15  ;;  %v16288_v35 = vmul.f32 0.03125, %v8462_v29  ;;  %v16291_v53 = vadd.f32 1e-05, %v8612_v11  ;;  %v16296_v56 = vpop.eup %10567 }
 0xf36   : > { %8539 = vadd.xlane.f32.xlu0 %v8502_v61  ;;  %v8718_v10 = vmul.f32 0.5, %v8717_v33  ;;  %v8394_v61 = vpop.f32.mrf.mxu1  ;;  %v8726_v6 = vmul.f32 %v16296_v56, %v16279_v12  ;;  %vm8732_vm4 = vweird.f32 %v16296_v56 }
 0xf37   : > { %v8709_v39 = vsub.f32 1.5, %v8708_v14  ;;  %v8914_v7 = vadd.f32 %v16230_v49, %v8891_v3  ;;  %10569 = vrsqrt.f32 %v16291_v53  ;;  %v8593_v54 = vmul.f32 %v16288_v35, %v16288_v35  ;;  %vm16354_vm8 = vmor %vm8731_vm7, %vm8732_vm4 }
 0xf38   : > { %v8719_v50 = vsub.f32 1.5, %v8718_v10  ;;  %v8522_v30 = vpop.xlane.xlu2 %8521  ;;  %v8727_v1 = vmul.f32 %v16296_v56, %v8726_v6  ;;  %vm8741_vm5 = vweird.f32 %v16291_v53 }
 0xf39   : > { %v8710_v63 = vmul.f32 %v16272_v38, %v8709_v39  ;;  %v8932_v32 = vpack.c.bf16 %v8914_v7, %v8913_v21  ;;  %v8573_v60 = vmul.f32 0.03125, %v8522_v30  ;;  %v10654_v30 = vld [vmem:[#allocation2 + $0x90] sm:$0xff] }
 0xf3a   : > { %v8720_v41 = vmul.f32 %v10566_v57, %v8719_v50 }
 0xf3b   : > { %9022 = vmatmul.bf16.gmra.mxu2 %v8932_v32  ;;  %v8714_v48 = vsel %vm16302_vm0, %v16272_v38, %v8710_v63  ;;  %v8613_v59 = vsub.f32 %v8573_v60, %v8593_v54  ;;  %v8728_v38 = vmul.f32 0.5, %v8727_v1 }
 0xf3c   : > { %v8724_v9 = vsel %vm8723_vm2, %v10566_v57, %v8720_v41  ;;  %v8464_v34 = vpop.xlane.xlu0 %8463  ;;  %v8869_v33 = vmul.f32 %v8714_v48, %v8629_v55 }
 0xf3d   : > { %v8870_v24 = vmul.f32 %v8724_v9, %v8630_v36  ;;  %v16317_v28 = vmul.f32 0.03125, %v8464_v34  ;;  %v10570_v15 = vpop.eup %10569  ;;  %v16319_v5 = vadd.f32 1e-05, %v8613_v59  ;;  %v8729_v50 = vsub.f32 1.5, %v8728_v38 }
 0xf3e   : > { %v8524_v14 = vpop.xlane.xlu1 %8523  ;;  %v8736_v57 = vmul.f32 %v10570_v15, %v16291_v53  ;;  %v8396_v10 = vpop.f32.mrf.mxu1  ;;  %v8892_v7 = vmul.f32 %v16205_v17, %v8869_v33  ;;  %vm8742_vm3 = vweird.f32 %v10570_v15  ;;  %v8631_v33 = vsub.f32 %v16117_v18, %v16258_v43 }
 0xf3f   : > { %v8594_v11 = vmul.f32 %v16317_v28, %v16317_v28  ;;  %10571 = vrsqrt.f32 %v16319_v5  ;;  %v8893_v29 = vmul.f32 %v16205_v17, %v8870_v24  ;;  %v8574_v39 = vmul.f32 0.03125, %v8524_v14  ;;  %vm16342_vm6 = vmor %vm8741_vm5, %vm8742_vm3 }
 0xf40   : > { %v8737_v3 = vmul.f32 %v10570_v15, %v8736_v57  ;;  %v8915_v48 = vadd.f32 %v16230_v49, %v8892_v7  ;;  %v8730_v9 = vmul.f32 %v16296_v56, %v8729_v50  ;;  %vm8751_vm13 = vweird.f32 %v16319_v5 }
 0xf41   : > { %v8614_v54 = vsub.f32 %v8574_v39, %v8594_v11  ;;  %v8916_v45 = vadd.f32 %v16230_v49, %v8893_v29 }
 0xf42   : > { %v8734_v12 = vsel %vm16354_vm8, %v16296_v56, %v8730_v9 }
 0xf43   : > { %v8299_v47 = vpop.f32.mrf.mxu0  ;;  %v8654_v6 = vadd.f32 1e-05, %v8614_v54  ;;  %v8933_v34 = vpack.c.bf16 %v8916_v45, %v8915_v48 }
 0xf44   : > { %v8395_v23 = vadd.f32 %v8394_v61, %v8299_v47  ;;  %v8738_v61 = vmul.f32 0.5, %v8737_v3 }
 0xf45   : > { %v16334_v60 = vpop.eup %10571  ;;  %v8466_v47 = vpop.xlane.xlu0 %8465  ;;  %10573 = vrsqrt.f32 %v8654_v6  ;;  %vm8761_vm11 = vweird.f32 %v8654_v6 }
 0xf46   : > { %v8417_v25 = vadd.f32 %v10653_v2, %v8395_v23  ;;  %v8739_v41 = vsub.f32 1.5, %v8738_v61  ;;  %v8746_v23 = vmul.f32 %v16334_v60, %v16319_v5  ;;  %v16352_v24 = vmul.f32 0.03125, %v8466_v47 }
 0xf47   : > { %v8526_v14 = vpop.xlane.xlu1 %8525  ;;  %vm8752_vm10 = vweird.f32 %v16334_v60 }
 0xf48   : > { %v16326_v13 = vadd.f32 %v16036_v4, %v8417_v25  ;;  %v8740_v1 = vmul.f32 %v10570_v15, %v8739_v41  ;;  %v8632_v25 = vsub.f32 %v16123_v51, %v16270_v62  ;;  %v8595_v11 = vmul.f32 %v16352_v24, %v16352_v24  ;;  %vm8753_vm14 = vmor %vm8751_vm13, %vm8752_vm10 }
 0xf49   : > { %v8575_v29 = vmul.f32 0.03125, %v8526_v14 }
 0xf4a   : > { %8481 = vadd.xlane.f32.xlu2 %v16326_v13  ;;  %v8503_v63 = vmul.f32 %v16326_v13, %v16326_v13  ;;  %v8744_v53 = vsel %vm16342_vm6, %v10570_v15, %v8740_v1  ;;  %v8747_v15 = vmul.f32 %v16334_v60, %v8746_v23 }
 0xf4b   : > { %v8301_v21 = vpop.f32.mrf.mxu0  ;;  %9027 = vmatmul.bf16.gmra.mxu2 %v8933_v34  ;;  %v8872_v57 = vmul.f32 %v8744_v53, %v8632_v25  ;;  %v10574_v62 = vpop.eup %10573  ;;  %v8615_v61 = vsub.f32 %v8575_v29, %v8595_v11  ;;  %v8634_v53 = vsub.f32 %v16136_v16, %v16317_v28  ;;  %v8633_v25 = vsub.f32 %v16130_v8, %v16288_v35 }
 0xf4c   : > { %v8397_v32 = vadd.f32 %v8396_v10, %v8301_v21  ;;  %8541 = vadd.xlane.f32.xlu0 %v8503_v63  ;;  %v8756_v39 = vmul.f32 %v10574_v62, %v8654_v6  ;;  %v8871_v21 = vmul.f32 %v8734_v12, %v8631_v33  ;;  %v8748_v7 = vmul.f32 0.5, %v8747_v15 }
 0xf4d   : > { %v8468_v38 = vpop.xlane.xlu2 %8467  ;;  %v8895_v43 = vmul.f32 %v16205_v17, %v8872_v57  ;;  %vm8762_vm9 = vweird.f32 %v10574_v62  ;;  %v8655_v47 = vadd.f32 1e-05, %v8615_v61 }
 0xf4e   : > { %v8418_v36 = vadd.f32 %v10654_v30, %v8397_v32  ;;  %v16371_v3 = vmul.f32 0.03125, %v8468_v38  ;;  %v8757_v63 = vmul.f32 %v10574_v62, %v8756_v39  ;;  %v8894_v45 = vmul.f32 %v16205_v17, %v8871_v21  ;;  %vm8763_vm12 = vmor %vm8761_vm11, %vm8762_vm9 }
 0xf4f   : > { %v8528_v10 = vpop.xlane.xlu0 %8527  ;;  %v8749_v41 = vsub.f32 1.5, %v8748_v7  ;;  %10575 = vrsqrt.f32 %v8655_v47  ;;  %vm8771_vm1 = vweird.f32 %v8655_v47 }
 0xf50   : > { %v16347_v59 = vadd.f32 %v16036_v4, %v8418_v36  ;;  %v8596_v56 = vmul.f32 %v16371_v3, %v16371_v3  ;;  %v8576_v50 = vmul.f32 0.03125, %v8528_v10  ;;  %v8758_v54 = vmul.f32 0.5, %v8757_v63 }
 0xf51   : > { %v8918_v36 = vadd.f32 %v16230_v49, %v8895_v43  ;;  %v8917_v1 = vadd.f32 %v16230_v49, %v8894_v45  ;;  %v8750_v23 = vmul.f32 %v16334_v60, %v8749_v41 }
 0xf52   : > { %8483 = vadd.xlane.f32.xlu1 %v16347_v59  ;;  %v8504_v4 = vmul.f32 %v16347_v59, %v16347_v59  ;;  %v8616_v32 = vsub.f32 %v8576_v50, %v8596_v56  ;;  %v8759_v30 = vsub.f32 1.5, %v8758_v54 }
 0xf53   : > { %v8934_v55 = vpack.c.bf16 %v8918_v36, %v8917_v1  ;;  %v8754_v2 = vsel %vm8753_vm14, %v16334_v60, %v8750_v23 }
 0xf54   : > { %8543 = vadd.xlane.f32.xlu2 %v8504_v4  ;;  %v8760_v48 = vmul.f32 %v10574_v62, %v8759_v30  ;;  %v8656_v9 = vadd.f32 1e-05, %v8616_v32  ;;  %v8873_v4 = vmul.f32 %v8754_v2, %v8633_v25  ;;  %v8636_v2 = vsub.f32 %v16148_v40, %v16371_v3 }
 0xf55   : > { %v10576_v6 = vpop.eup %10575 }
 0xf56   : > { %v8764_v34 = vsel %vm8763_vm12, %v10574_v62, %v8760_v48  ;;  %10577 = vrsqrt.f32 %v8656_v9  ;;  %v8896_v33 = vmul.f32 %v16205_v17, %v8873_v4  ;;  %v8766_v38 = vmul.f32 %v10576_v6, %v8655_v47 }
 0xf57   : > { %v8874_v14 = vmul.f32 %v8764_v34, %v8634_v53  ;;  %vm8772_vm15 = vweird.f32 %v10576_v6  ;;  %vm8781_vm3 = vweird.f32 %v8656_v9  ;;  %v8635_v53 = vsub.f32 %v16142_v0, %v16352_v24 }
 0xf58   : > { %v8919_v11 = vadd.f32 %v16230_v49, %v8896_v33  ;;  %v8767_v60 = vmul.f32 %v10576_v6, %v8766_v38  ;;  %vm8773_vm2 = vmor %vm8771_vm1, %vm8772_vm15 }
 0xf59   : > { %v8897_v15 = vmul.f32 %v16205_v17, %v8874_v14 }
 0xf5a   : > { %v8768_v56 = vmul.f32 0.5, %v8767_v60 }
 0xf5b   : > { %9032 = vmatmul.bf16.gmra.mxu2 %v8934_v55  ;;  %v8920_v28 = vadd.f32 %v16230_v49, %v8897_v15 }
 0xf5c   : > { %v10578_v12 = vpop.eup %10577  ;;  %v8769_v32 = vsub.f32 1.5, %v8768_v56 }
 0xf5d   : > { %v8776_v57 = vmul.f32 %v10578_v12, %v8656_v9  ;;  %v8935_v21 = vpack.c.bf16 %v8920_v28, %v8919_v11  ;;  %vm8782_vm0 = vweird.f32 %v10578_v12 }
 0xf5e   : > { %v8770_v36 = vmul.f32 %v10576_v6, %v8769_v32  ;;  %vm8783_vm4 = vmor %vm8781_vm3, %vm8782_vm0 }
 0xf5f   : > { %v8777_v29 = vmul.f32 %v10578_v12, %v8776_v57 }
 0xf60   : > { %v8774_v55 = vsel %vm8773_vm2, %v10576_v6, %v8770_v36 }
 0xf61   : > { %v8778_v63 = vmul.f32 0.5, %v8777_v29  ;;  %v8875_v15 = vmul.f32 %v8774_v55, %v8635_v53 }
 0xf63   : > { %v8470_v5 = vpop.xlane.xlu2 %8469  ;;  %v8779_v45 = vsub.f32 1.5, %v8778_v63  ;;  %v8898_v6 = vmul.f32 %v16205_v17, %v8875_v15 }
 0xf64   : > { %v16391_v39 = vmul.f32 0.03125, %v8470_v5 }
 0xf65   : > { %v8530_v35 = vpop.xlane.xlu0 %8529  ;;  %v8780_v48 = vmul.f32 %v10578_v12, %v8779_v45  ;;  %v8921_v3 = vadd.f32 %v16230_v49, %v8898_v6 }
 0xf66   : > { %v8597_v50 = vmul.f32 %v16391_v39, %v16391_v39  ;;  %v8577_v43 = vmul.f32 0.03125, %v8530_v35 }
 0xf67   : > { %v8784_v34 = vsel %vm8783_vm4, %v10578_v12, %v8780_v48 }
 0xf68   : > { %v8617_v41 = vsub.f32 %v8577_v43, %v8597_v50  ;;  %v8876_v47 = vmul.f32 %v8784_v34, %v8636_v2 }
 0xf6a   : > { %v8657_v1 = vadd.f32 1e-05, %v8617_v41  ;;  %v8899_v12 = vmul.f32 %v16205_v17, %v8876_v47 }
 0xf6b   : > { %v8472_v62 = vpop.xlane.xlu1 %8471  ;;  %9037 = vmatmul.bf16.gmra.mxu2 %v8935_v21 }
 0xf6c   : > { %v16393_v10 = vmul.f32 0.03125, %v8472_v62  ;;  %10579 = vrsqrt.f32 %v8657_v1  ;;  %v8922_v57 = vadd.f32 %v16230_v49, %v8899_v12  ;;  %vm8791_vm7 = vweird.f32 %v8657_v1 }
 0xf6d   : > { %v8532_v7 = vpop.xlane.xlu2 %8531 }
 0xf6e   : > { %v8598_v61 = vmul.f32 %v16393_v10, %v16393_v10  ;;  %v8578_v54 = vmul.f32 0.03125, %v8532_v7  ;;  %v8936_v11 = vpack.c.bf16 %v8922_v57, %v8921_v3  ;;  %v8638_v6 = vsub.f32 %v16160_v19, %v16393_v10 }
 0xf70   : > { %v8618_v30 = vsub.f32 %v8578_v54, %v8598_v61 }
 0xf72   : > { %v8658_v23 = vadd.f32 1e-05, %v8618_v30  ;;  %v10580_v33 = vpop.eup %10579 }
 0xf73   : > { %v8786_v60 = vmul.f32 %v10580_v33, %v8657_v1  ;;  %vm8792_vm5 = vweird.f32 %v10580_v33 }
 0xf74   : > { %10581 = vrsqrt.f32 %v8658_v23  ;;  %vm8793_vm8 = vmor %vm8791_vm7, %vm8792_vm5  ;;  %vm8801_vm9 = vweird.f32 %v8658_v23 }
 0xf75   : > { %v8787_v63 = vmul.f32 %v10580_v33, %v8786_v60 }
 0xf77   : > { %v8788_v32 = vmul.f32 0.5, %v8787_v63 }
 0xf79   : > { %v8789_v30 = vsub.f32 1.5, %v8788_v32 }
 0xf7a   : > { %v10582_v38 = vpop.eup %10581 }
 0xf7b   : > { %v8796_v29 = vmul.f32 %v10582_v38, %v8658_v23  ;;  %9042 = vmatmul.bf16.gmra.mxu2 %v8936_v11  ;;  %v8790_v53 = vmul.f32 %v10580_v33, %v8789_v30  ;;  %vm8802_vm6 = vweird.f32 %v10582_v38 }
 0xf7c   : > { %vm8803_vm10 = vmor %vm8801_vm9, %vm8802_vm6 }
 0xf7d   : > { %v8797_v50 = vmul.f32 %v10582_v38, %v8796_v29  ;;  %v8794_v47 = vsel %vm8793_vm8, %v10580_v33, %v8790_v53 }
 0xf7f   : > { %v8798_v45 = vmul.f32 0.5, %v8797_v50 }
 0xf81   : > { %v8474_v25 = vpop.xlane.xlu1 %8473  ;;  %v8799_v36 = vsub.f32 1.5, %v8798_v45 }
 0xf82   : > { %v16403_v14 = vmul.f32 0.03125, %v8474_v25 }
 0xf83   : > { %v8534_v4 = vpop.xlane.xlu2 %8533  ;;  %v8800_v2 = vmul.f32 %v10582_v38, %v8799_v36 }
 0xf84   : > { %v8599_v9 = vmul.f32 %v16403_v14, %v16403_v14  ;;  %v8579_v5 = vmul.f32 0.03125, %v8534_v4 }
 0xf86   : > { %v8619_v24 = vsub.f32 %v8579_v5, %v8599_v9  ;;  %v8804_v9 = vsel %vm8803_vm10, %v10582_v38, %v8800_v2  ;;  %v8637_v5 = vsub.f32 %v16154_v27, %v16391_v39 }
 0xf87   : > { %v8878_v11 = vmul.f32 %v8804_v9, %v8638_v6  ;;  %v16460_v6 = vld [vmem:[%s655_s5] ss:$0 sm:$0xff] }
 0xf88   : > { %v16411_v28 = vadd.f32 1e-05, %v8619_v24 }
 0xf89   : > { %v8476_v62 = vpop.xlane.xlu0 %8475  ;;  %v8901_v39 = vmul.f32 %v16205_v17, %v8878_v11 }
 0xf8a   : > { %v16413_v35 = vmul.f32 0.03125, %v8476_v62  ;;  %10583 = vrsqrt.f32 %v16411_v28  ;;  %v8877_v62 = vmul.f32 %v8794_v47, %v8637_v5  ;;  %vm8811_vm15 = vweird.f32 %v16411_v28 }
 0xf8b   : > { %v8536_v21 = vpop.xlane.xlu1 %8535 }
 0xf8c   : > { %v8600_v7 = vmul.f32 %v16413_v35, %v16413_v35  ;;  %v8580_v56 = vmul.f32 0.03125, %v8536_v21  ;;  %v8900_v38 = vmul.f32 %v16205_v17, %v8877_v62 }
 0xf8e   : > { %v8620_v43 = vsub.f32 %v8580_v56, %v8600_v7  ;;  %v8923_v21 = vadd.f32 %v16230_v49, %v8900_v38  ;;  %v8924_v7 = vadd.f32 %v16230_v49, %v8901_v39 }
 0xf90   : > { %v8660_v61 = vadd.f32 1e-05, %v8620_v43  ;;  %v16418_v54 = vpop.eup %10583  ;;  %v8937_v32 = vpack.c.bf16 %v8924_v7, %v8923_v21 }
 0xf91   : > { %v8806_v41 = vmul.f32 %v16418_v54, %v16411_v28  ;;  %vm8812_vm12 = vweird.f32 %v16418_v54  ;;  %v8639_v28 = vsub.f32 %v16170_v20, %v16403_v14 }
 0xf92   : > { %10585 = vrsqrt.f32 %v8660_v61  ;;  %vm8821_vm13 = vweird.f32 %v8660_v61  ;;  %vm8813_vm0 = vmor %vm8811_vm15, %vm8812_vm12  ;;  %9047 = vmatmul.bf16.gmra.mxu2 %v8937_v32 }
 0xf93   : > { %v8807_v55 = vmul.f32 %v16418_v54, %v8806_v41 }
 0xf95   : > { %v8808_v4 = vmul.f32 0.5, %v8807_v55 }
 0xf97   : > { %v8809_v57 = vsub.f32 1.5, %v8808_v4 }
 0xf98   : > { %v10586_v48 = vpop.eup %10585 }
 0xf99   : > { %v8816_v34 = vmul.f32 %v10586_v48, %v8660_v61  ;;  %vm8822_vm11 = vweird.f32 %v10586_v48  ;;  %v8810_v29 = vmul.f32 %v16418_v54, %v8809_v57  ;;  %v8640_v61 = vsub.f32 %v16181_v58, %v16413_v35  ;;  %v10163_v35 = vld [vmem:[%s11147_s18 + $0x38] sm:$0xff] }
 0xf9a   : > { %vm16437_vm14 = vmor %vm8821_vm13, %vm8822_vm11  ;;  %9326 = vmatpush.bf16.msra.mxu3 %v10163_v35 }
 0xf9b   : > { %v8817_v25 = vmul.f32 %v10586_v48, %v8816_v34  ;;  %v8814_v41 = vsel %vm8813_vm0, %v16418_v54, %v8810_v29  ;;  %v10162_v54 = vld [vmem:[%s11147_s18 + $0x30] sm:$0xff]  ;;  %v10159_v29 = vld [vmem:[%s11147_s18 + $0x18] sm:$0xff] }
 0xf9c   : > { %v8879_v53 = vmul.f32 %v8814_v41, %v8639_v28 }
 0xf9d   : > { %v8818_v15 = vmul.f32 0.5, %v8817_v25 }
 0xf9e   : > { %v8902_v14 = vmul.f32 %v16205_v17, %v8879_v53  ;;  %9327 = vmatpush.bf16.msra.mxu3 %v10162_v54 }
 0xf9f   : > { %v8819_v12 = vsub.f32 1.5, %v8818_v15  ;;  %v8478_v24 = vpop.xlane.xlu0 %8477 }
 0xfa0   : > { %v16427_v3 = vmul.f32 0.03125, %v8478_v24  ;;  %v10161_v24 = vld [vmem:[%s11147_s18 + $0x28] sm:$0xff] }
 0xfa1   : > { %v8538_v1 = vpop.xlane.xlu1 %8537  ;;  %v8820_v33 = vmul.f32 %v10586_v48, %v8819_v12  ;;  %v8925_v12 = vadd.f32 %v16230_v49, %v8902_v14 }
 0xfa2   : > { %v8601_v23 = vmul.f32 %v16427_v3, %v16427_v3  ;;  %v8581_v60 = vmul.f32 0.03125, %v8538_v1  ;;  %9328 = vmatpush.bf16.msra.mxu3 %v10161_v24 }
 0xfa3   : > { %v8824_v50 = vsel %vm16437_vm14, %v10586_v48, %v8820_v33 }
 0xfa4   : > { %v8621_v10 = vsub.f32 %v8581_v60, %v8601_v23  ;;  %v8880_v55 = vmul.f32 %v8824_v50, %v8640_v61  ;;  %v9018_v11 = vpop.f32.mrf.mxu2  ;;  %v10160_v23 = vld [vmem:[%s11147_s18 + $0x20] sm:$0xff]  ;;  %v8641_v50 = vsub.f32 %v16221_v42, %v16427_v3 }
 0xfa5   : > { %v16466_v38 = vadd.f32 %v16460_v6, %v9018_v11  ;;  %v10156_v11 = vld [vmem:[%s11147_s18] sm:$0xff] }
 0xfa6   : > { %v8661_v63 = vadd.f32 1e-05, %v8621_v10  ;;  %v8903_v4 = vmul.f32 %v16205_v17, %v8880_v55  ;;  %9329 = vmatpush.bf16.msra.mxu3 %v10160_v23 }
 0xfa7   : > { %v8480_v43 = vpop.xlane.xlu2 %8479  ;;  %v9088_v10 = vmul.f32 %v16466_v38, %v16466_v38 }
 0xfa8   : > { %10587 = vrsqrt.f32 %v8661_v63  ;;  %v16446_v45 = vmul.f32 0.03125, %v8480_v43  ;;  %v8926_v9 = vadd.f32 %v16230_v49, %v8903_v4  ;;  %vm8831_vm2 = vweird.f32 %v8661_v63 }
 0xfa9   : > { %v8540_v30 = vpop.xlane.xlu0 %8539  ;;  %v9108_v56 = vmul.f32 %v9088_v10, %v16466_v38 }
 0xfaa   : > { %v8602_v36 = vmul.f32 %v16446_v45, %v16446_v45  ;;  %v8582_v48 = vmul.f32 0.03125, %v8540_v30  ;;  %v8938_v62 = vpack.c.bf16 %v8926_v9, %v8925_v12  ;;  %9330 = vmatpush.bf16.msra.mxu3 %v10159_v29  ;;  %v10158_v30 = vld [vmem:[%s11147_s18 + $0x10] sm:$0xff]  ;;  %v8642_v3 = vsub.f32 %v16250_v26, %v16446_v45 }
 0xfab   : > { %v9128_v32 = vmul.f32 0.044715, %v9108_v56 }
 0xfac   : > { %v8622_v34 = vsub.f32 %v8582_v48, %v8602_v36  ;;  %9052 = vmatmul.bf16.gmra.mxu2 %v8938_v62  ;;  %v9020_v61 = vpop.f32.mrf.mxu2 }
 0xfad   : > { %v9148_v36 = vadd.f32 %v9128_v32, %v16466_v38  ;;  %v9021_v48 = vadd.f32 %v16460_v6, %v9020_v61 }
 0xfae   : > { %v10588_v2 = vpop.eup %10587  ;;  %v8662_v25 = vadd.f32 1e-05, %v8622_v34  ;;  %9331 = vmatpush.bf16.msra.mxu3 %v10158_v30 }
 0xfaf   : > { %v8826_v15 = vmul.f32 %v10588_v2, %v8661_v63  ;;  %vm8832_vm1 = vweird.f32 %v10588_v2  ;;  %v9089_v35 = vmul.f32 %v9021_v48, %v9021_v48  ;;  %v9168_v14 = vmul.f32 0.7978846, %v9148_v36 }
 0xfb0   : > { %10589 = vrsqrt.f32 %v8662_v25  ;;  %vm8833_vm3 = vmor %vm8831_vm2, %vm8832_vm1  ;;  %vm8841_vm5 = vweird.f32 %v8662_v25 }
 0xfb1   : > { %v8827_v47 = vmul.f32 %v10588_v2, %v8826_v15  ;;  %v10157_v15 = vld [vmem:[%s11147_s18 + $0x8] sm:$0xff]  ;;  %10591 = vtanh.f32 %v9168_v14 }
 0xfb2   : > { %9332 = vmatpush.bf16.msra.mxu3 %v10157_v15 }
 0xfb3   : > { %v8828_v5 = vmul.f32 0.5, %v8827_v47  ;;  %v9109_v47 = vmul.f32 %v9089_v35, %v9021_v48 }
 0xfb5   : > { %v8829_v57 = vsub.f32 1.5, %v8828_v5  ;;  %v9129_v45 = vmul.f32 0.044715, %v9109_v47 }
 0xfb6   : > { %v10590_v1 = vpop.eup %10589  ;;  %9333 = vmatpush.bf16.msra.mxu3 %v10156_v11 }
 0xfb7   : > { %v8830_v60 = vmul.f32 %v10588_v2, %v8829_v57  ;;  %v8836_v33 = vmul.f32 %v10590_v1, %v8662_v25  ;;  %vm8842_vm4 = vweird.f32 %v10590_v1  ;;  %v9149_v23 = vadd.f32 %v9129_v45, %v9021_v48 }
 0xfb8   : > { %vm8843_vm6 = vmor %vm8841_vm5, %vm8842_vm4 }
 0xfb9   : > { %v8837_v39 = vmul.f32 %v10590_v1, %v8836_v33  ;;  %v8834_v21 = vsel %vm8833_vm3, %v10588_v2, %v8830_v60  ;;  %v9169_v10 = vmul.f32 0.7978846, %v9149_v23 }
 0xfba   : > { %v8881_v63 = vmul.f32 %v8834_v21, %v8641_v50 }
 0xfbb   : > { %v8838_v7 = vmul.f32 0.5, %v8837_v39 }
 0xfbc   : > { %v8904_v25 = vmul.f32 %v16205_v17, %v8881_v63 }
 0xfbd   : > { %v8839_v43 = vsub.f32 1.5, %v8838_v7  ;;  %v8482_v41 = vpop.xlane.xlu2 %8481 }
 0xfbe   : > { %v16477_v55 = vmul.f32 0.03125, %v8482_v41  ;;  %v8927_v12 = vadd.f32 %v16230_v49, %v8904_v25  ;;  %v9023_v57 = vpop.f32.mrf.mxu2  ;;  %v9069_v25 = vmul.f32 0.5, %v9021_v48 }
 0xfbf   : > { %v8840_v28 = vmul.f32 %v10590_v1, %v8839_v43  ;;  %v8542_v34 = vpop.xlane.xlu0 %8541  ;;  %v16490_v60 = vadd.f32 %v16460_v6, %v9023_v57  ;;  %v10592_v43 = vpop.eup %10591 }
 0xfc0   : > { %v8603_v4 = vmul.f32 %v16477_v55, %v16477_v55  ;;  %v8583_v54 = vmul.f32 0.03125, %v8542_v34 }
 0xfc1   : > { %v8844_v53 = vsel %vm8843_vm6, %v10590_v1, %v8840_v28  ;;  %v9090_v29 = vmul.f32 %v16490_v60, %v16490_v60 }
 0xfc2   : > { %v8882_v2 = vmul.f32 %v8844_v53, %v8642_v3  ;;  %v8623_v5 = vsub.f32 %v8583_v54, %v8603_v4  ;;  %v9208_v3 = vadd.f32 1.0, %v10592_v43 }
 0xfc3   : > { %v9110_v56 = vmul.f32 %v9090_v29, %v16490_v60 }
 0xfc4   : > { %v8905_v9 = vmul.f32 %v16205_v17, %v8882_v2  ;;  %v8663_v1 = vadd.f32 1e-05, %v8623_v5  ;;  %v9068_v2 = vmul.f32 0.5, %v16466_v38 }
 0xfc5   : > { %v8484_v62 = vpop.xlane.xlu1 %8483  ;;  %v9130_v32 = vmul.f32 0.044715, %v9110_v56 }
 0xfc6   : > { %v8928_v24 = vadd.f32 %v16230_v49, %v8905_v9  ;;  %v16492_v33 = vmul.f32 0.03125, %v8484_v62  ;;  %10593 = vrsqrt.f32 %v8663_v1  ;;  %v9025_v61 = vpop.f32.mrf.mxu2  ;;  %v9228_v47 = vmul.f32 %v9208_v3, %v9068_v2 }
 0xfc7   : > { %v8544_v17 = vpop.xlane.xlu2 %8543  ;;  %10595 = vtanh.f32 %v9169_v10  ;;  %v9150_v30 = vadd.f32 %v9130_v32, %v16490_v60  ;;  %v9026_v36 = vadd.f32 %v16460_v6, %v9025_v61  ;;  %vm8851_vm8 = vweird.f32 %v8663_v1 }
 0xfc8   : > { %v8939_v39 = vpack.c.bf16 %v8928_v24, %v8927_v12  ;;  %v8604_v21 = vmul.f32 %v16492_v33, %v16492_v33  ;;  %v8584_v7 = vmul.f32 0.03125, %v8544_v17 }
 0xfc9   : > { %v9091_v35 = vmul.f32 %v9026_v36, %v9026_v36  ;;  %v9170_v54 = vmul.f32 0.7978846, %v9150_v30  ;;  %v9071_v2 = vmul.f32 0.5, %v9026_v36 }
 0xfca   : > { %9057 = vmatmul.bf16.gmra.mxu2 %v8939_v39  ;;  %v8624_v50 = vsub.f32 %v8584_v7, %v8604_v21  ;;  %v8643_v21 = vsub.f32 %v16326_v13, %v16477_v55 }
 0xfcb   : > { %v9111_v14 = vmul.f32 %v9091_v35, %v9026_v36  ;;  %v9070_v35 = vmul.f32 0.5, %v16490_v60 }
 0xfcc   : > { %v10594_v63 = vpop.eup %10593  ;;  %v8664_v41 = vadd.f32 1e-05, %v8624_v50 }
 0xfcd   : > { %v8846_v28 = vmul.f32 %v10594_v63, %v8663_v1  ;;  %v10596_v34 = vpop.eup %10595  ;;  %v9131_v45 = vmul.f32 0.044715, %v9111_v14  ;;  %vm8852_vm7 = vweird.f32 %v10594_v63 }
 0xfce   : > { %10597 = vrsqrt.f32 %v8664_v41  ;;  %v9209_v4 = vadd.f32 1.0, %v10596_v34  ;;  %v9028_v24 = vpop.f32.mrf.mxu2  ;;  %vm8853_vm9 = vmor %vm8851_vm8, %vm8852_vm7  ;;  %vm8861_vm11 = vweird.f32 %v8664_v41 }
 0xfcf   : > { %v8847_v53 = vmul.f32 %v10594_v63, %v8846_v28  ;;  %10599 = vtanh.f32 %v9170_v54  ;;  %v9151_v11 = vadd.f32 %v9131_v45, %v9026_v36  ;;  %v9029_v39 = vadd.f32 %v16460_v6, %v9028_v24  ;;  %v10655_v54 = vld [vmem:[%s11137_s2] ss:$0 sm:$0xff] }
 0xfd0   : > { %v9229_v9 = vmul.f32 %v9209_v4, %v9069_v25 }
 0xfd1   : > { %v8848_v15 = vmul.f32 0.5, %v8847_v53  ;;  %v9171_v38 = vmul.f32 0.7978846, %v9151_v11  ;;  %v9092_v17 = vmul.f32 %v9029_v39, %v9029_v39 }
 0xfd2   : > { %v9248_v57 = vpack.c.bf16 %v9229_v9, %v9228_v47 }
 0xfd3   : > { %v8849_v5 = vsub.f32 1.5, %v8848_v15  ;;  %10601 = vtanh.f32 %v9171_v38  ;;  %v9112_v7 = vmul.f32 %v9092_v17, %v9029_v39 }
 0xfd4   : > { %v10598_v12 = vpop.eup %10597  ;;  %9334 = vmatmul.bf16.vlgmr.msra.gmra.mxu3 %v9248_v57 }
 0xfd5   : > { %v8850_v62 = vmul.f32 %v10594_v63, %v8849_v5  ;;  %v8856_v23 = vmul.f32 %v10598_v12, %v8664_v41  ;;  %v10600_v56 = vpop.eup %10599  ;;  %vm8862_vm10 = vweird.f32 %v10598_v12  ;;  %v9132_v43 = vmul.f32 0.044715, %v9112_v7 }
 0xfd6   : > { %v9030_v32 = vpop.f32.mrf.mxu2  ;;  %vm8863_vm12 = vmor %vm8861_vm11, %vm8862_vm10  ;;  %v9210_v3 = vadd.f32 1.0, %v10600_v56 }
 0xfd7   : > { %v8857_v48 = vmul.f32 %v10598_v12, %v8856_v23  ;;  %v8854_v10 = vsel %vm8853_vm9, %v10594_v63, %v8850_v62  ;;  %v9031_v1 = vadd.f32 %v16460_v6, %v9030_v32  ;;  %v8644_v63 = vsub.f32 %v16347_v59, %v16492_v33 }
 0xfd8   : > { %v8883_v61 = vmul.f32 %v8854_v10, %v8643_v21  ;;  %v9152_v28 = vadd.f32 %v9132_v43, %v9029_v39  ;;  %v9230_v47 = vmul.f32 %v9210_v3, %v9070_v35 }
 0xfd9   : > { %v8858_v29 = vmul.f32 0.5, %v8857_v48  ;;  %v10602_v34 = vpop.eup %10601  ;;  %v9093_v53 = vmul.f32 %v9031_v1, %v9031_v1  ;;  %v9073_v43 = vmul.f32 0.5, %v9031_v1 }
 0xfda   : > { %v9211_v25 = vadd.f32 1.0, %v10602_v34  ;;  %v8906_v15 = vmul.f32 %v10655_v54, %v8883_v61  ;;  %v9172_v14 = vmul.f32 0.7978846, %v9152_v28 }
 0xfdb   : > { %v8859_v50 = vsub.f32 1.5, %v8858_v29  ;;  %v9113_v41 = vmul.f32 %v9093_v53, %v9031_v1 }
 0xfdc   : > { %v9231_v9 = vmul.f32 %v9211_v25, %v9071_v2  ;;  %v8929_v57 = vadd.f32 %v16230_v49, %v8906_v15  ;;  %10603 = vtanh.f32 %v9172_v14 }
 0xfdd   : > { %v8860_v30 = vmul.f32 %v10598_v12, %v8859_v50  ;;  %v9133_v45 = vmul.f32 0.044715, %v9113_v41  ;;  %v9072_v50 = vmul.f32 0.5, %v9029_v39 }
 0xfde   : > { %v9033_v33 = vpop.f32.mrf.mxu2  ;;  %v9249_v24 = vpack.c.bf16 %v9231_v9, %v9230_v47 }
 0xfdf   : > { %v8864_v55 = vsel %vm8863_vm12, %v10598_v12, %v8860_v30  ;;  %v9153_v62 = vadd.f32 %v9133_v45, %v9031_v1  ;;  %v9034_v60 = vadd.f32 %v16460_v6, %v9033_v33 }
 0xfe0   : > { %v8884_v4 = vmul.f32 %v8864_v55, %v8644_v63 }
 0xfe1   : > { %v9173_v11 = vmul.f32 0.7978846, %v9153_v62  ;;  %v9094_v23 = vmul.f32 %v9034_v60, %v9034_v60  ;;  %v9074_v47 = vmul.f32 0.5, %v9034_v60 }
 0xfe2   : > { %v8907_v5 = vmul.f32 %v10655_v54, %v8884_v4  ;;  %v10604_v48 = vpop.eup %10603 }
 0xfe3   : > { %10605 = vtanh.f32 %v9173_v11  ;;  %v9114_v38 = vmul.f32 %v9094_v23, %v9034_v60  ;;  %v9212_v7 = vadd.f32 1.0, %v10604_v48 }
 0xfe4   : > { %v8930_v12 = vadd.f32 %v16230_v49, %v8907_v5  ;;  %9339 = vmatmul.bf16.gmra.mxu3 %v9249_v24 }
 0xfe5   : > { %v9134_v17 = vmul.f32 0.044715, %v9114_v38  ;;  %v9232_v63 = vmul.f32 %v9212_v7, %v9072_v50 }
 0xfe6   : > { %v8940_v36 = vpack.c.bf16 %v8930_v12, %v8929_v57  ;;  %v9035_v10 = vpop.f32.mrf.mxu2 }
 0xfe7   : > { %v9154_v29 = vadd.f32 %v9134_v17, %v9034_v60  ;;  %v9036_v21 = vadd.f32 %v16460_v6, %v9035_v10 }
 0xfe8   : > { %9062 = vmatmul.bf16.gmra.mxu2 %v8940_v36 }
 0xfe9   : > { %v10606_v56 = vpop.eup %10605  ;;  %v9095_v49 = vmul.f32 %v9036_v21, %v9036_v21  ;;  %v9174_v61 = vmul.f32 0.7978846, %v9154_v29  ;;  %v9075_v9 = vmul.f32 0.5, %v9036_v21 }
 0xfea   : > { %v9213_v32 = vadd.f32 1.0, %v10606_v56 }
 0xfeb   : > { %v9115_v30 = vmul.f32 %v9095_v49, %v9036_v21  ;;  %10607 = vtanh.f32 %v9174_v61 }
 0xfec   : > { %v9233_v28 = vmul.f32 %v9213_v32, %v9073_v43 }
 0xfed   : > { %v9135_v3 = vmul.f32 0.044715, %v9115_v30 }
 0xfee   : > { %v9038_v34 = vpop.f32.mrf.mxu2  ;;  %v9250_v55 = vpack.c.bf16 %v9233_v28, %v9232_v63 }
 0xfef   : > { %v9155_v53 = vadd.f32 %v9135_v3, %v9036_v21  ;;  %v9039_v35 = vadd.f32 %v16460_v6, %v9038_v34 }
 0xff1   : > { %v9175_v2 = vmul.f32 0.7978846, %v9155_v53  ;;  %v9096_v25 = vmul.f32 %v9039_v35, %v9039_v35  ;;  %v10608_v4 = vpop.eup %10607  ;;  %v9076_v32 = vmul.f32 0.5, %v9039_v35 }
 0xff2   : > { %v9214_v15 = vadd.f32 1.0, %v10608_v4 }
 0xff3   : > { %10609 = vtanh.f32 %v9175_v2  ;;  %v9116_v1 = vmul.f32 %v9096_v25, %v9039_v35 }
 0xff4   : > { %9344 = vmatmul.bf16.gmra.mxu3 %v9250_v55  ;;  %v9234_v24 = vmul.f32 %v9214_v15, %v9074_v47 }
 0xff5   : > { %v9136_v33 = vmul.f32 0.044715, %v9116_v1 }
 0xff6   : > { %v9040_v54 = vpop.f32.mrf.mxu2 }
 0xff7   : > { %v9041_v39 = vadd.f32 %v16460_v6, %v9040_v54  ;;  %v9156_v36 = vadd.f32 %v9136_v33, %v9039_v35 }
 0xff9   : > { %v10610_v14 = vpop.eup %10609  ;;  %v9097_v41 = vmul.f32 %v9041_v39, %v9041_v39  ;;  %v9176_v23 = vmul.f32 0.7978846, %v9156_v36  ;;  %v9077_v61 = vmul.f32 0.5, %v9041_v39 }
 0xffa   : > { %v9215_v5 = vadd.f32 1.0, %v10610_v14 }
 0xffb   : > { %v9117_v45 = vmul.f32 %v9097_v41, %v9041_v39  ;;  %10611 = vtanh.f32 %v9176_v23 }
 0xffc   : > { %v9235_v57 = vmul.f32 %v9215_v5, %v9075_v9 }
 0xffd   : > { %v9137_v12 = vmul.f32 0.044715, %v9117_v45 }
 0xffe   : > { %v9251_v62 = vpack.c.bf16 %v9235_v57, %v9234_v24  ;;  %v9043_v48 = vpop.f32.mrf.mxu2 }
 0xfff   : > { %v9157_v11 = vadd.f32 %v9137_v12, %v9041_v39  ;;  %v9044_v17 = vadd.f32 %v16460_v6, %v9043_v48 }
0x1001   : > { %v9177_v38 = vmul.f32 0.7978846, %v9157_v11  ;;  %v9098_v10 = vmul.f32 %v9044_v17, %v9044_v17  ;;  %v10612_v21 = vpop.eup %10611  ;;  %v9078_v14 = vmul.f32 0.5, %v9044_v17 }
0x1002   : > { %v9216_v30 = vadd.f32 1.0, %v10612_v21 }
0x1003   : > { %10613 = vtanh.f32 %v9177_v38  ;;  %v9118_v60 = vmul.f32 %v9098_v10, %v9044_v17 }
0x1004   : > { %9349 = vmatmul.bf16.gmra.mxu3 %v9251_v62  ;;  %v9236_v34 = vmul.f32 %v9216_v30, %v9076_v32 }
0x1005   : > { %v9138_v29 = vmul.f32 0.044715, %v9118_v60 }
0x1006   : > { %v9045_v7 = vpop.f32.mrf.mxu2 }
0x1007   : > { %v9046_v49 = vadd.f32 %v16460_v6, %v9045_v7  ;;  %v9158_v50 = vadd.f32 %v9138_v29, %v9044_v17 }
0x1009   : > { %v10614_v56 = vpop.eup %10613  ;;  %v9099_v43 = vmul.f32 %v9046_v49, %v9046_v49  ;;  %v9178_v3 = vmul.f32 0.7978846, %v9158_v50  ;;  %v9079_v41 = vmul.f32 0.5, %v9046_v49 }
0x100a   : > { %v9217_v63 = vadd.f32 1.0, %v10614_v56 }
0x100b   : > { %v9119_v28 = vmul.f32 %v9099_v43, %v9046_v49  ;;  %10615 = vtanh.f32 %v9178_v3 }
0x100c   : > { %v9237_v55 = vmul.f32 %v9217_v63, %v9077_v61 }
0x100d   : > { %v9139_v53 = vmul.f32 0.044715, %v9119_v28 }
0x100e   : > { %v9252_v2 = vpack.c.bf16 %v9237_v55, %v9236_v34 }
0x100f   : > { %v9159_v25 = vadd.f32 %v9139_v53, %v9046_v49 }
0x1011   : > { %v9179_v4 = vmul.f32 0.7978846, %v9159_v25  ;;  %v10616_v54 = vpop.eup %10615 }
0x1012   : > { %v9218_v15 = vadd.f32 1.0, %v10616_v54 }
0x1013   : > { %10617 = vtanh.f32 %v9179_v4 }
0x1014   : > { %9354 = vmatmul.bf16.gmra.mxu3 %v9252_v2  ;;  %v9238_v47 = vmul.f32 %v9218_v15, %v9078_v14 }
0x1015   : > { %v9048_v39 = vpop.f32.mrf.mxu2 }
0x1016   : > { %v9049_v5 = vadd.f32 %v16460_v6, %v9048_v39 }
0x1018   : > { %v9100_v33 = vmul.f32 %v9049_v5, %v9049_v5  ;;  %v9080_v28 = vmul.f32 0.5, %v9049_v5 }
0x1019   : > { %v10618_v1 = vpop.eup %10617 }
0x101a   : > { %v9219_v35 = vadd.f32 1.0, %v10618_v1  ;;  %v9120_v24 = vmul.f32 %v9100_v33, %v9049_v5 }
0x101c   : > { %v9239_v9 = vmul.f32 %v9219_v35, %v9079_v41  ;;  %v9140_v57 = vmul.f32 0.044715, %v9120_v24 }
0x101d   : > { %v9050_v12 = vpop.f32.mrf.mxu2 }
0x101e   : > { %v9253_v45 = vpack.c.bf16 %v9239_v9, %v9238_v47  ;;  %v9160_v62 = vadd.f32 %v9140_v57, %v9049_v5  ;;  %v9051_v36 = vadd.f32 %v16460_v6, %v9050_v12 }
0x1020   : > { %v9101_v11 = vmul.f32 %v9051_v36, %v9051_v36  ;;  %v9180_v23 = vmul.f32 0.7978846, %v9160_v62  ;;  %v9081_v3 = vmul.f32 0.5, %v9051_v36 }
0x1022   : > { %v9121_v38 = vmul.f32 %v9101_v11, %v9051_v36  ;;  %10619 = vtanh.f32 %v9180_v23  ;;  %v16529_v23 = vld [vmem:[%s790_s1] ss:$0 sm:$0xff] }
0x1024   : > { %9359 = vmatmul.bf16.gmra.mxu3 %v9253_v45  ;;  %v9141_v48 = vmul.f32 0.044715, %v9121_v38 }
0x1026   : > { %v9161_v10 = vadd.f32 %v9141_v48, %v9051_v36 }
0x1028   : > { %v9181_v29 = vmul.f32 0.7978846, %v9161_v10  ;;  %v10620_v56 = vpop.eup %10619 }
0x1029   : > { %v9220_v61 = vadd.f32 1.0, %v10620_v56 }
0x102a   : > { %10621 = vtanh.f32 %v9181_v29 }
0x102b   : > { %v9240_v2 = vmul.f32 %v9220_v61, %v9080_v28 }
0x102f   : > { %v9053_v17 = vpop.f32.mrf.mxu2 }
0x1030   : > { %v9054_v60 = vadd.f32 %v16460_v6, %v9053_v17  ;;  %v10622_v30 = vpop.eup %10621 }
0x1031   : > { %v9221_v34 = vadd.f32 1.0, %v10622_v30 }
0x1032   : > { %v9102_v21 = vmul.f32 %v9054_v60, %v9054_v60  ;;  %v9082_v62 = vmul.f32 0.5, %v9054_v60 }
0x1033   : > { %v9241_v25 = vmul.f32 %v9221_v34, %v9081_v3 }
0x1034   : > { %v9122_v7 = vmul.f32 %v9102_v21, %v9054_v60 }
0x1035   : > { %v9254_v54 = vpack.c.bf16 %v9241_v25, %v9240_v2 }
0x1036   : > { %v9142_v49 = vmul.f32 0.044715, %v9122_v7 }
0x1037   : > { %v9055_v50 = vpop.f32.mrf.mxu2  ;;  %9364 = vmatmul.bf16.gmra.mxu3 %v9254_v54 }
0x1038   : > { %v9162_v43 = vadd.f32 %v9142_v49, %v9054_v60  ;;  %v9056_v32 = vadd.f32 %v16460_v6, %v9055_v50 }
0x103a   : > { %v9103_v63 = vmul.f32 %v9056_v32, %v9056_v32  ;;  %v9182_v55 = vmul.f32 0.7978846, %v9162_v43  ;;  %v9083_v36 = vmul.f32 0.5, %v9056_v32 }
0x103c   : > { %v9123_v53 = vmul.f32 %v9103_v63, %v9056_v32  ;;  %10623 = vtanh.f32 %v9182_v55 }
0x103e   : > { %v9143_v4 = vmul.f32 0.044715, %v9123_v53 }
0x1040   : > { %v9163_v1 = vadd.f32 %v9143_v4, %v9056_v32 }
0x1042   : > { %v9183_v41 = vmul.f32 0.7978846, %v9163_v1  ;;  %v10624_v47 = vpop.eup %10623 }
0x1043   : > { %v9222_v24 = vadd.f32 1.0, %v10624_v47 }
0x1044   : > { %10625 = vtanh.f32 %v9183_v41 }
0x1045   : > { %v9242_v17 = vmul.f32 %v9222_v24, %v9082_v62 }
0x104a   : > { %v10626_v57 = vpop.eup %10625 }
0x104b   : > { %v9223_v11 = vadd.f32 1.0, %v10626_v57 }
0x104d   : > { %v9058_v15 = vpop.f32.mrf.mxu2  ;;  %v9243_v10 = vmul.f32 %v9223_v11, %v9083_v36 }
0x104e   : > { %v9059_v14 = vadd.f32 %v16460_v6, %v9058_v15 }
0x104f   : > { %v9255_v7 = vpack.c.bf16 %v9243_v10, %v9242_v17 }
0x1050   : > { %v9104_v35 = vmul.f32 %v9059_v14, %v9059_v14  ;;  %v9084_v3 = vmul.f32 0.5, %v9059_v14 }
0x1051   : > { %9369 = vmatmul.bf16.gmra.mxu3 %v9255_v7 }
0x1052   : > { %v9124_v39 = vmul.f32 %v9104_v35, %v9059_v14 }
0x1054   : > { %v9144_v9 = vmul.f32 0.044715, %v9124_v39 }
0x1055   : > { %v9060_v5 = vpop.f32.mrf.mxu2 }
0x1056   : > { %v9164_v45 = vadd.f32 %v9144_v9, %v9059_v14  ;;  %v9061_v33 = vadd.f32 %v16460_v6, %v9060_v5 }
0x1057   : > { %v9335_v29 = vpop.f32.mrf.mxu3 }
0x1058   : > { %v9105_v12 = vmul.f32 %v9061_v33, %v9061_v33  ;;  %v9184_v38 = vmul.f32 0.7978846, %v9164_v45  ;;  %v9336_v56 = vadd.f32 %v16529_v23, %v9335_v29  ;;  %v9085_v34 = vmul.f32 0.5, %v9061_v33 }
0x105a   : > { %v9125_v48 = vmul.f32 %v9105_v12, %v9061_v33  ;;  %10627 = vtanh.f32 %v9184_v38  ;;  %v16533_v60 = vadd.f32 %v9336_v56, %v16039_v22 }
0x105c   : > { %v9145_v21 = vmul.f32 0.044715, %v9125_v48  ;;  %9405 = vst [vmem:[#allocation2] sm:$0xff] %v16533_v60 }
0x105e   : > { %v9165_v49 = vadd.f32 %v9145_v21, %v9061_v33 }
0x105f   : > { %v9337_v43 = vpop.f32.mrf.mxu3 }
0x1060   : > { %v9185_v50 = vmul.f32 0.7978846, %v9165_v49  ;;  %v10628_v32 = vpop.eup %10627  ;;  %v9338_v61 = vadd.f32 %v16529_v23, %v9337_v43 }
0x1061   : > { %v9224_v63 = vadd.f32 1.0, %v10628_v32 }
0x1062   : > { %10629 = vtanh.f32 %v9185_v50  ;;  %v16538_v30 = vadd.f32 %v9338_v61, %v16067_v37 }
0x1063   : > { %v9244_v22 = vmul.f32 %v9224_v63, %v9084_v3 }
0x1064   : > { %9406 = vst [vmem:[#allocation2 + $0x38] sm:$0xff] %v16538_v30 }
0x1067   : > { %v9340_v2 = vpop.f32.mrf.mxu3 }
0x1068   : > { %v10630_v28 = vpop.eup %10629  ;;  %v9341_v25 = vadd.f32 %v16529_v23, %v9340_v2 }
0x1069   : > { %v9225_v55 = vadd.f32 1.0, %v10630_v28 }
0x106a   : > { %v16543_v1 = vadd.f32 %v9341_v25, %v16077_v31 }
0x106b   : > { %v9245_v53 = vmul.f32 %v9225_v55, %v9085_v34  ;;  %v9063_v54 = vpop.f32.mrf.mxu2 }
0x106c   : > { %v9064_v37 = vadd.f32 %v16460_v6, %v9063_v54  ;;  %9407 = vst [vmem:[#allocation2 + $0x50] sm:$0xff] %v16543_v1 }
0x106d   : > { %v9256_v4 = vpack.c.bf16 %v9245_v53, %v9244_v22 }
0x106e   : > { %v9106_v15 = vmul.f32 %v9064_v37, %v9064_v37  ;;  %v9086_v21 = vmul.f32 0.5, %v9064_v37 }
0x106f   : > { %9374 = vmatmul.bf16.gmra.mxu3 %v9256_v4  ;;  %v9342_v14 = vpop.f32.mrf.mxu3 }
0x1070   : > { %v9126_v41 = vmul.f32 %v9106_v15, %v9064_v37  ;;  %v9343_v39 = vadd.f32 %v16529_v23, %v9342_v14 }
0x1072   : > { %v9146_v35 = vmul.f32 0.044715, %v9126_v41  ;;  %v16549_v5 = vadd.f32 %v9343_v39, %v16085_v52 }
0x1073   : > { %v9065_v47 = vpop.f32.mrf.mxu2 }
0x1074   : > { %v9166_v9 = vadd.f32 %v9146_v35, %v9064_v37  ;;  %v9066_v45 = vadd.f32 %v16460_v6, %v9065_v47  ;;  %9408 = vst [vmem:[#allocation2 + $0x18] sm:$0xff] %v16549_v5 }
0x1076   : > { %v9107_v31 = vmul.f32 %v9066_v45, %v9066_v45  ;;  %v9186_v33 = vmul.f32 0.7978846, %v9166_v9  ;;  %v9087_v7 = vmul.f32 0.5, %v9066_v45 }
0x1077   : > { %v9345_v57 = vpop.f32.mrf.mxu3 }
0x1078   : > { %v9127_v24 = vmul.f32 %v9107_v31, %v9066_v45  ;;  %v9346_v62 = vadd.f32 %v16529_v23, %v9345_v57  ;;  %10631 = vtanh.f32 %v9186_v33 }
0x107a   : > { %v9147_v12 = vmul.f32 0.044715, %v9127_v24  ;;  %v16555_v11 = vadd.f32 %v9346_v62, %v16097_v46 }
0x107c   : > { %v9167_v36 = vadd.f32 %v9147_v12, %v9066_v45  ;;  %9409 = vst [vmem:[#allocation2 + $0x30] sm:$0xff] %v16555_v11 }
0x107e   : > { %v9187_v38 = vmul.f32 0.7978846, %v9167_v36  ;;  %v10632_v6 = vpop.eup %10631 }
0x107f   : > { %v9347_v52 = vpop.f32.mrf.mxu3  ;;  %v9226_v10 = vadd.f32 1.0, %v10632_v6 }
0x1080   : > { %10633 = vtanh.f32 %v9187_v38  ;;  %v9348_v48 = vadd.f32 %v16529_v23, %v9347_v52 }
0x1081   : > { %v9246_v49 = vmul.f32 %v9226_v10, %v9086_v21 }
0x1082   : > { %v16560_v17 = vadd.f32 %v9348_v48, %v16106_v44 }
0x1084   : > { %9410 = vst [vmem:[#allocation2 + $0x68] sm:$0xff] %v16560_v17 }
0x1086   : > { %v10634_v29 = vpop.eup %10633 }
0x1087   : > { %v9227_v56 = vadd.f32 1.0, %v10634_v29  ;;  %v9350_v46 = vpop.f32.mrf.mxu3 }
0x1088   : > { %v9351_v43 = vadd.f32 %v16529_v23, %v9350_v46 }
0x1089   : > { %v9247_v50 = vmul.f32 %v9227_v56, %v9087_v7 }
0x108a   : > { %v16565_v61 = vadd.f32 %v9351_v43, %v16117_v18 }
0x108b   : > { %v9257_v32 = vpack.c.bf16 %v9247_v50, %v9246_v49 }
0x108c   : > { %9411 = vst [vmem:[#allocation2 + $0x78] sm:$0xff] %v16565_v61 }
0x108d   : > { %9379 = vmatmul.bf16.gmra.mxu3 %v9257_v32 }
0x108f   : > { %v9352_v44 = vpop.f32.mrf.mxu3 }
0x1090   : > { %v9353_v63 = vadd.f32 %v16529_v23, %v9352_v44 }
0x1092   : > { %v16570_v28 = vadd.f32 %v9353_v63, %v16123_v51 }
0x1094   : > { %9412 = vst [vmem:[#allocation2 + $0x80] sm:$0xff] %v16570_v28 }
0x1097   : > { %v9355_v3 = vpop.f32.mrf.mxu3 }
0x1098   : > { %v9356_v34 = vadd.f32 %v16529_v23, %v9355_v3 }
0x109a   : > { %v16575_v55 = vadd.f32 %v9356_v34, %v16130_v8 }
0x109c   : > { %9413 = vst [vmem:[#allocation2 + $0x8] sm:$0xff] %v16575_v55 }
0x109f   : > { %v9357_v18 = vpop.f32.mrf.mxu3 }
0x10a0   : > { %v9358_v22 = vadd.f32 %v16529_v23, %v9357_v18 }
0x10a2   : > { %v16580_v53 = vadd.f32 %v9358_v22, %v16136_v16 }
0x10a4   : > { %9414 = vst [vmem:[#allocation2 + $0x88] sm:$0xff] %v16580_v53 }
0x10a7   : > { %v9360_v51 = vpop.f32.mrf.mxu3 }
0x10a8   : > { %v9361_v2 = vadd.f32 %v16529_v23, %v9360_v51 }
0x10aa   : > { %v16585_v25 = vadd.f32 %v9361_v2, %v16142_v0 }
0x10ac   : > { %9415 = vst [vmem:[#allocation2 + $0x28] sm:$0xff] %v16585_v25 }
0x10af   : > { %v9362_v8 = vpop.f32.mrf.mxu3 }
0x10b0   : > { %v9363_v4 = vadd.f32 %v16529_v23, %v9362_v8 }
0x10b2   : > { %v16590_v54 = vadd.f32 %v9363_v4, %v16148_v40 }
0x10b4   : > { %9416 = vst [vmem:[#allocation2 + $0x40] sm:$0xff] %v16590_v54 }
0x10ba   : > { %v9365_v16 = vpop.f32.mrf.mxu3 }
0x10bb   : > { %v9366_v37 = vadd.f32 %v16529_v23, %v9365_v16 }
0x10bd   : > { %v16595_v15 = vadd.f32 %v9366_v37, %v16154_v27 }
0x10bf   : > { %9417 = vst [vmem:[#allocation2 + $0x58] sm:$0xff] %v16595_v15 }
0x10c2   : > { %v9367_v0 = vpop.f32.mrf.mxu3 }
0x10c3   : > { %v9368_v41 = vadd.f32 %v16529_v23, %v9367_v0 }
0x10c5   : > { %v16600_v14 = vadd.f32 %v9368_v41, %v16160_v19 }
0x10c7   : > { %9418 = vst [vmem:[#allocation2 + $0x10] sm:$0xff] %v16600_v14 }
0x10d4   : > { %v9370_v40 = vpop.f32.mrf.mxu3 }
0x10d5   : > { %v9371_v35 = vadd.f32 %v16529_v23, %v9370_v40 }
0x10d7   : > { %v16605_v39 = vadd.f32 %v9371_v35, %v16170_v20 }
0x10d9   : > { %9419 = vst [vmem:[#allocation2 + $0x98] sm:$0xff] %v16605_v39 }
0x10dc   : > { %v9372_v27 = vpop.f32.mrf.mxu3 }
0x10dd   : > { %v9373_v47 = vadd.f32 %v16529_v23, %v9372_v27 }
0x10df   : > { %v16610_v9 = vadd.f32 %v9373_v47, %v16181_v58 }
0x10e1   : > { %9420 = vst [vmem:[#allocation2 + $0x60] sm:$0xff] %v16610_v9 }
0x10f2   : > { %v9375_v19 = vpop.f32.mrf.mxu3 }
0x10f3   : > { %v9376_v45 = vadd.f32 %v16529_v23, %v9375_v19 }
0x10f5   : > { %v16615_v31 = vadd.f32 %v9376_v45, %v16221_v42 }
0x10f7   : > { %9421 = vst [vmem:[#allocation2 + $0x20] sm:$0xff] %v16615_v31 }
0x10fa   : > { %v9377_v20 = vpop.f32.mrf.mxu3 }
0x10fb   : > { %v9378_v33 = vadd.f32 %v16529_v23, %v9377_v20 }
0x10fd   : > { %v16620_v24 = vadd.f32 %v9378_v33, %v16250_v26 }
0x10ff   : > { %9422 = vst [vmem:[#allocation2 + $0x48] sm:$0xff] %v16620_v24 }
0x1110   : > { %v9380_v58 = vpop.f32.mrf.mxu3 }
0x1111   : > { %v9381_v57 = vadd.f32 %v16529_v23, %v9380_v58 }
0x1113   : > { %v16625_v12 = vadd.f32 %v9381_v57, %v16326_v13 }
0x1115   : > { %9423 = vst [vmem:[#allocation2 + $0x70] sm:$0xff] %v16625_v12 }
0x1118   : > { %v9382_v42 = vpop.f32.mrf.mxu3 }
0x1119   : > { %v9383_v62 = vadd.f32 %v16529_v23, %v9382_v42  ;;  %9428 = sbr.rel (%p10111_p1) target bundleno = 4447 (0x115f), region = 104 }
0x111b   : > { %v16630_v36 = vadd.f32 %v9383_v62, %v16347_v59 }
0x111d   : > { %9424 = vst [vmem:[#allocation2 + $0x90] sm:$0xff] %v16630_v36 }
0x111e   : > { %9477 = vst [vmem:[#allocation1] ss:$9 sm:$0xff] %v16533_v60  ;;  %v9449_v26 = vrot.slane %v16533_v60, 5  ;;  %v9450_v13 = vrot.slane %v16538_v30, 2  ;;  %v9451_v38 = vrot.slane %v16538_v30, 7  ;;  %v9452_v52 = vrot.slane %v16543_v1, 4 }
0x111f   : > { %v9453_v23 = vrot.slane %v16549_v5, 1  ;;  %v9454_v59 = vrot.slane %v16549_v5, 6  ;;  %v9455_v6 = vrot.slane %v16555_v11, 3  ;;  %v9456_v60 = vrot.slane %v16560_v17, 5 }
0x1120   : > { %9479 = vst [vmem:[#allocation1 + $0x1] ss:$9 sm:$0xff] %v9449_v26  ;;  %v9457_v30 = vrot.slane %v16565_v61, 2  ;;  %v9458_v1 = vrot.slane %v16565_v61, 7  ;;  %v9459_v10 = vrot.slane %v16570_v28, 4  ;;  %v9460_v5 = vrot.slane %v16575_v55, 1 }
0x1121   : > { %9481 = vst [vmem:[#allocation1 + $0x2] ss:$9 sm:$0xff] %v9450_v13  ;;  %v9461_v11 = vrot.slane %v16575_v55, 6  ;;  %v9462_v29 = vrot.slane %v16580_v53, 3  ;;  %v9464_v7 = vrot.slane %v16590_v54, 2  ;;  %v9465_v56 = vrot.slane %v16590_v54, 7 }
0x1122   : > { %9483 = vst [vmem:[#allocation1 + $0x3] ss:$9 sm:$0xff] %v9451_v38  ;;  %v9466_v46 = vrot.slane %v16595_v15, 4  ;;  %v9467_v49 = vrot.slane %v16600_v14, 1  ;;  %v9468_v50 = vrot.slane %v16600_v14, 6  ;;  %v9469_v43 = vrot.slane %v16605_v39, 3 }
0x1123   : > { %9485 = vst [vmem:[#allocation1 + $0x4] ss:$9 sm:$0xff] %v9452_v52  ;;  %v9470_v32 = vrot.slane %v16610_v9, 5  ;;  %v9471_v44 = vrot.slane %v16615_v31, 2  ;;  %v9472_v63 = vrot.slane %v16615_v31, 7  ;;  %v9473_v28 = vrot.slane %v16620_v24, 4 }
0x1124   : > { %9487 = vst [vmem:[#allocation1 + $0x5] ss:$9 sm:$0xff] %v9453_v23  ;;  %v9474_v3 = vrot.slane %v16625_v12, 1  ;;  %v9475_v34 = vrot.slane %v16625_v12, 6  ;;  %v9476_v55 = vrot.slane %v16630_v36, 3 }
0x1125   : > { %9489 = vst [vmem:[#allocation1 + $0x6] ss:$9 sm:$0xff] %v9454_v59 }
0x1126   : > { %9491 = vst [vmem:[#allocation1 + $0x7] ss:$9 sm:$0xff] %v9455_v6 }
0x112d   : > { %v9492_v48 = vld [vmem:[#allocation1] sm:$0xff] }
0x112e   : > { %9493 = vst [vmem:[#allocation1] ss:$9 sm:$0xff] %v16560_v17  ;;  %v9463_v17 = vrot.slane %v16585_v25, 5 }
0x112f   : > { %9524 = vst [vmem:[#allocation12] sm:$0xff] %v9492_v48 }
0x1130   : > { %9494 = vst [vmem:[#allocation1 + $0x1] ss:$9 sm:$0xff] %v9456_v60 }
0x1131   : > { %9495 = vst [vmem:[#allocation1 + $0x2] ss:$9 sm:$0xff] %v9457_v30 }
0x1132   : > { %9496 = vst [vmem:[#allocation1 + $0x3] ss:$9 sm:$0xff] %v9458_v1 }
0x1133   : > { %9497 = vst [vmem:[#allocation1 + $0x4] ss:$9 sm:$0xff] %v9459_v10 }
0x1134   : > { %9498 = vst [vmem:[#allocation1 + $0x5] ss:$9 sm:$0xff] %v9460_v5 }
0x1135   : > { %9499 = vst [vmem:[#allocation1 + $0x6] ss:$9 sm:$0xff] %v9461_v11 }
0x1136   : > { %9500 = vst [vmem:[#allocation1 + $0x7] ss:$9 sm:$0xff] %v9462_v29 }
0x113d   : > { %v9501_v21 = vld [vmem:[#allocation1] sm:$0xff] }
0x113e   : > { %9502 = vst [vmem:[#allocation1] ss:$9 sm:$0xff] %v16585_v25 }
0x113f   : > { %9525 = vst [vmem:[#allocation12 + $0x8] sm:$0xff] %v9501_v21 }
0x1140   : > { %9503 = vst [vmem:[#allocation1 + $0x1] ss:$9 sm:$0xff] %v9463_v17 }
0x1141   : > { %9504 = vst [vmem:[#allocation1 + $0x2] ss:$9 sm:$0xff] %v9464_v7 }
0x1142   : > { %9505 = vst [vmem:[#allocation1 + $0x3] ss:$9 sm:$0xff] %v9465_v56 }
0x1143   : > { %9506 = vst [vmem:[#allocation1 + $0x4] ss:$9 sm:$0xff] %v9466_v46 }
0x1144   : > { %9507 = vst [vmem:[#allocation1 + $0x5] ss:$9 sm:$0xff] %v9467_v49 }
0x1145   : > { %9508 = vst [vmem:[#allocation1 + $0x6] ss:$9 sm:$0xff] %v9468_v50 }
0x1146   : > { %9509 = vst [vmem:[#allocation1 + $0x7] ss:$9 sm:$0xff] %v9469_v43 }
0x114d   : > { %v9510_v61 = vld [vmem:[#allocation1] sm:$0xff] }
0x114e   : > { %9511 = vst [vmem:[#allocation1] ss:$9 sm:$0xff] %v16610_v9 }
0x114f   : > { %9526 = vst [vmem:[#allocation12 + $0x10] sm:$0xff] %v9510_v61 }
0x1150   : > { %9512 = vst [vmem:[#allocation1 + $0x1] ss:$9 sm:$0xff] %v9470_v32 }
0x1151   : > { %9513 = vst [vmem:[#allocation1 + $0x2] ss:$9 sm:$0xff] %v9471_v44 }
0x1152   : > { %9514 = vst [vmem:[#allocation1 + $0x3] ss:$9 sm:$0xff] %v9472_v63 }
0x1153   : > { %9515 = vst [vmem:[#allocation1 + $0x4] ss:$9 sm:$0xff] %v9473_v28 }
0x1154   : > { %9516 = vst [vmem:[#allocation1 + $0x5] ss:$9 sm:$0xff] %v9474_v3 }
0x1155   : > { %9517 = vst [vmem:[#allocation1 + $0x6] ss:$9 sm:$0xff] %v9475_v34 }
0x1156   : > { %9518 = vst [vmem:[#allocation1 + $0x7] ss:$9 sm:$0xff] %v9476_v55 }
0x115d   : > { %v9519_v18 = vld [vmem:[#allocation1] sm:$0xff] }
0x115e   : > { %9527 = vst [vmem:[#allocation12 + $0x18] sm:$0xff] %v9519_v18 }
0x115f PF: > { %p10195_p2 = scmp.eq.s32.totalorder %s11009_s19, 1  ;;  %s17868_s18 = sld [smem:[#allocation103_spill]] }
0x1160   : > { %s10902_s5 = smov [#allocation12]   ;;  %s10903_s4 = smov 128  }
0x1161   : > { %s9536_s3 = sshll.u32 %s10902_s5, 4  ;;  %s10904_s27 = smov 8   ;;  %s9537_s3 = int_to_ptr.vmem [resolvable:$true] %s9536_s3 }
0x1165   : > { %s9538_s1 = sshll.u32 %s17868_s18, 4  ;;  %s9539_s1 = int_to_ptr.hbm [resolvable:$true] %s9538_s1 }
0x1166   : > { %10175 = dma.vmem_to_hbm [thread:$0]  (%p10195_p2), %s9537_s3, 512, %s9539_s1, [#allocation5], %s10903_s4, %s10903_s4, %s10904_s27  }
0x1167   : > { %10871 = dma.done.wait (%p10195_p2), [#allocation5], 512  }
0x1168   : > { %10873 = vsyncadd (%p10195_p2), [#allocation5], 4294966784 }
0x1169 PF: > { %s17869_s9 = sld [smem:[#allocation18_spill]]  ;;  %s17873_s29 = smov %s10880_s30 }
0x116a   : > { %s17870_s28 = sld [smem:[#allocation17_spill]]  ;;  %s17875_s16 = smov %s10892_s17 }
0x116b   : > { %s17871_s15 = sld [smem:[#allocation20_spill]] }
0x116c   : > { %s17872_s19 = sld [smem:[#allocation19_spill]] }
0x116f   : > { %s34_s18 = sadd.s32 1, %s17869_s9  }
0x1170   : > { %p31_p3 = scmp.ge.s32.totalorder %s34_s18, 4   ;;  %s17874_s30 = smov %s17870_s28 }
0x1172   : > { %s17876_s17 = smov %s17872_s19  ;;  %33 = sbr.rel (!%p31_p3) target bundleno = 22 (0x16), region = 242 }
0x1177   :  { %9555 = vsyncpa [#allocation4], 1 }
0x1178   :  { %9557 = vsyncpa [#allocation4 + $0x1], 1 }
0x1179   :  { %9558 = vsyncpa [#allocation7], 1 }
0x117a   :  { %9560 = vsyncpa [#allocation7 + $0x1], 1 }
0x117b   :  { %9561 = vsyncpa [#allocation10], 1 }
0x117c   :  { %9563 = vsyncpa [#allocation10 + $0x1], 1 }
0x117d   :  { %9564 = vsyncpa [#allocation5], 1 }
0x117e   :  { %9566 = vsyncpa [#allocation5 + $0x1], 1 }

</bundles_post_ra>
